<compile_context>
chip_gen: v7x
topology: tpu7x:2x2x1
jax: 0.10.0
libtpu: 0.0.40
codegen_flags: <defaults>
</compile_context>

<pallas_src>
import math

import jax
import jax.numpy as jnp
from jax import lax
from jax.experimental import pallas as pl
from jax.experimental.pallas import tpu as pltpu


_ROWS_PER_TILE = 2048          # target output rows (flattened H*W) per block
_VMEM_LIMIT = 48 * 1024 * 1024  # raised scoped-VMEM cap (safe on v5e/v6e/v7x)


def _row_tile(h, w, divisor=1):
    """Largest row tile TH dividing h with TH*w rows per block ~<= target.

    Guarantees TPU layout constraints: the flattened (TH*w) block dim is
    either the full dim (TH == h) or a multiple of 8; when `divisor`==2 the
    coarse-skip block ((TH//2)*w) obeys the same rule.
    """
    target = max(1, _ROWS_PER_TILE // max(w, 1))
    if target >= h:
        return h
    for t in range(target, 0, -1):
        if h % t or t % divisor:
            continue
        if (t * w) % 8:
            continue
        if divisor > 1 and ((t // divisor) * w) % 8:
            continue
        return t
    return h


# ----------------------------- Pallas kernels ------------------------------

def _conv1x1_kernel(x_ref, w_ref, b_ref, o_ref):
    # x: (1, M, Cin) bf16 ; w: (Cin, F) bf16 ; b: (1, F) f32 ; o: (1, M, F) f32
    y = jnp.dot(x_ref[0], w_ref[...], preferred_element_type=jnp.float32)
    o_ref[0] = y + b_ref[...]


def _make_conv1x1_up_kernel(cin):
    """1x1 conv + bias + fused nearest-2x upsample of the coarse skip."""
    def kernel(x_ref, s_ref, w_ref, b_ref, o_ref):
        # x: (1, TH*Wc, 2*Cin) bf16   (fine width folded into channels)
        # s: (1, TH//2, Wc, F) f32    (coarse lateral, NOT pre-upsampled)
        # w: (Cin, F) bf16 ; b: (1, F) f32 ; o: (1, TH*Wc, 2*F) f32
        x = x_ref[0]
        w = w_ref[...]
        # even fine columns (t=0) and odd fine columns (t=1)
        y0 = jnp.dot(x[:, :cin], w, preferred_element_type=jnp.float32)
        y1 = jnp.dot(x[:, cin:], w, preferred_element_type=jnp.float32)
        # nearest-2x upsample of the skip: row repeat (cheap leading-dim op);
        # the column repeat is implicit (same skip added to both halves).
        s = jnp.repeat(s_ref[0], 2, axis=0)          # (TH, Wc, F)
        s = s.reshape(y0.shape)                      # (TH*Wc, F)
        bias = b_ref[...]
        o_ref[0] = jnp.concatenate([y0 + bias + s, y1 + bias + s], axis=-1)
    return kernel


def _make_conv3x3_kernel(n_w_taps, w_out, relu_input):
    """K-folded 3x3 conv: `n_w_taps` matmuls accumulated in VMEM scratch."""
    def kernel(x_ref, w_ref, b_ref, o_ref, acc_ref):
        # x: (1, TH, W_in, Kc) bf16 ; w: (n_w_taps, Kc, F) bf16
        # b: (1, F) f32 ; o: (1, TH*Wo, F) f32 ; acc: (TH*Wo, F) f32 scratch
        x = x_ref[0]
        if relu_input:                      # ReLU once on 1x data (P7 input)
            x = jnp.maximum(x, 0.0)
        th = x.shape[0]
        kc = x.shape[-1]
        for dx in range(n_w_taps):          # static unroll over width taps
            tap = x[:, dx:dx + w_out, :].reshape(th * w_out, kc)
            contrib = jnp.dot(tap, w_ref[dx],
                              preferred_element_type=jnp.float32)
            if dx == 0:
                acc_ref[...] = contrib
            else:
                acc_ref[...] += contrib
        o_ref[0] = acc_ref[...] + b_ref[...]
    return kernel


# ------------------------------ conv wrappers ------------------------------

def _compiler_params():
    return pltpu.CompilerParams(
        dimension_semantics=("parallel", "parallel"),
        vmem_limit_bytes=_VMEM_LIMIT)


def conv1x1(x, w, b):
    """Plain 1x1 conv.  x: (N,H,W,Cin); w: (1,1,Cin,F); b: (F,)."""
    n, h, wd, cin = x.shape
    cout = w.shape[-1]
    m = h * wd
    xf = x.astype(jnp.bfloat16).reshape(n, m, cin)
    wf = w.reshape(cin, cout).astype(jnp.bfloat16)
    bf = b.reshape(1, cout).astype(jnp.float32)

    th = _row_tile(h, wd)
    tm = th * wd
    y = pl.pallas_call(
        _conv1x1_kernel,
        out_shape=jax.ShapeDtypeStruct((n, m, cout), jnp.float32),
        grid=(n, h // th),
        in_specs=[pl.BlockSpec((1, tm, cin), lambda i, j: (i, j, 0)),
                  pl.BlockSpec((cin, cout), lambda i, j: (0, 0)),
                  pl.BlockSpec((1, cout), lambda i, j: (0, 0))],
        out_specs=pl.BlockSpec((1, tm, cout), lambda i, j: (i, j, 0)),
        compiler_params=_compiler_params(),
    )(xf, wf, bf)
    return y.reshape(n, h, wd, cout)


def conv1x1_up(x, w, b, skip):
    """1x1 conv + bias + nearest-2x-upsample(skip), fused in one kernel.

    x: (N,H,W,Cin); w: (1,1,Cin,F); b: (F,); skip: (N,H//2,W//2,F) (coarse).
    """
    n, h, wd, cin = x.shape
    cout = w.shape[-1]
    assert h % 2 == 0 and wd % 2 == 0
    hc, wc = h // 2, wd // 2
    assert skip.shape == (n, hc, wc, cout), (skip.shape, (n, hc, wc, cout))

    # Free wrapper reshape: fold the even/odd fine columns into channels.
    xm = x.astype(jnp.bfloat16).reshape(n, h * wc, 2 * cin)
    wf = w.reshape(cin, cout).astype(jnp.bfloat16)
    bf = b.reshape(1, cout).astype(jnp.float32)
    sf = skip.astype(jnp.float32)

    th = _row_tile(h, wc, divisor=2)
    thc = th // 2
    y = pl.pallas_call(
        _make_conv1x1_up_kernel(cin),
        out_shape=jax.ShapeDtypeStruct((n, h * wc, 2 * cout), jnp.float32),
        grid=(n, h // th),
        in_specs=[pl.BlockSpec((1, th * wc, 2 * cin), lambda i, j: (i, j, 0)),
                  pl.BlockSpec((1, thc, wc, cout), lambda i, j: (i, j, 0, 0)),
                  pl.BlockSpec((cin, cout), lambda i, j: (0, 0)),
                  pl.BlockSpec((1, cout), lambda i, j: (0, 0))],
        out_specs=pl.BlockSpec((1, th * wc, 2 * cout), lambda i, j: (i, j, 0)),
        compiler_params=_compiler_params(),
    )(xm, sf, wf, bf)
    # (N, H*Wc, 2F) row-major is exactly (N, H, W, F) row-major.
    return y.reshape(n, h, wd, cout)


def conv3x3(x, w, b, stride=1, relu_input=False):
    """3x3 conv, padding=1, stride 1 or 2.  x: (N,H,W,Cin); w: (3,3,Cin,F)."""
    n, h, wd, cin = x.shape
    cout = w.shape[-1]
    ho = (h - 1) // stride + 1
    wo = (wd - 1) // stride + 1

    xb = x.astype(jnp.bfloat16)
    xp = jnp.pad(xb, ((0, 0), (1, 1), (1, 1), (0, 0)))

    if stride == 1:
        # Fold the 3 vertical taps into the contraction dim (K = 3*Cin);
        # horizontal taps are sliced in-kernel -> no 9x im2col in HBM.
        xcat = jnp.concatenate(
            [xp[:, dy:dy + ho, :, :] for dy in range(3)], axis=-1)
        wf = jnp.transpose(w, (1, 0, 2, 3)).reshape(3, 3 * cin, cout)
        n_w_taps, w_in = 3, wo + 2
    else:
        # Stride-2 convs (P6/P7) act on the tiny C5-level maps: full 9-tap
        # K-folding (K = 9*Cin) is cheap there and yields one big matmul.
        taps = [xp[:, dy:dy + stride * (ho - 1) + 1:stride,
                    dx:dx + stride * (wo - 1) + 1:stride, :]
                for dy in range(3) for dx in range(3)]
        xcat = jnp.concatenate(taps, axis=-1)
        wf = w.reshape(1, 9 * cin, cout)
        n_w_taps, w_in = 1, wo

    wf = wf.astype(jnp.bfloat16)
    bf = b.reshape(1, cout).astype(jnp.float32)
    kc = xcat.shape[-1]

    th = _row_tile(ho, wo)
    y = pl.pallas_call(
        _make_conv3x3_kernel(n_w_taps, wo, relu_input),
        out_shape=jax.ShapeDtypeStruct((n, ho * wo, cout), jnp.float32),
        grid=(n, ho // th),
        in_specs=[pl.BlockSpec((1, th, w_in, kc), lambda i, j: (i, j, 0, 0)),
                  pl.BlockSpec((n_w_taps, kc, cout), lambda i, j: (0, 0, 0)),
                  pl.BlockSpec((1, cout), lambda i, j: (0, 0))],
        out_specs=pl.BlockSpec((1, th * wo, cout), lambda i, j: (i, j, 0)),
        scratch_shapes=[pltpu.VMEM((th * wo, cout), jnp.float32)],
        compiler_params=_compiler_params(),
    )(xcat, wf, bf)
    return y.reshape(n, ho, wo, cout)


# --------------------------- PyramidFeatures fwd ---------------------------

def pyramid_features(params, C3, C4, C5):
    p = params
    # P5 branch
    p5_lat = conv1x1(C5, p["P5_1_w"], p["P5_1_b"])
    p5 = conv3x3(p5_lat, p["P5_2_w"], p["P5_2_b"], stride=1)
    # P4 branch (upsample of p5_lat fused into the 1x1 kernel)
    p4_lat = conv1x1_up(C4, p["P4_1_w"], p["P4_1_b"], skip=p5_lat)
    p4 = conv3x3(p4_lat, p["P4_2_w"], p["P4_2_b"], stride=1)
    # P3 branch (upsample of p4_lat fused into the 1x1 kernel)
    p3_lat = conv1x1_up(C3, p["P3_1_w"], p["P3_1_b"], skip=p4_lat)
    p3 = conv3x3(p3_lat, p["P3_2_w"], p["P3_2_b"], stride=1)
    # P6 / P7 branches (P7's input ReLU fused into the conv kernel)
    p6 = conv3x3(C5, p["P6_w"], p["P6_b"], stride=2)
    p7 = conv3x3(p6, p["P7_2_w"], p["P7_2_b"], stride=2, relu_input=True)
    return [p3, p4, p5, p6, p7]


# --------------------------- plain-JAX reference ---------------------------
# Same dtype policy as the kernels: bf16 matmul operands, f32 accumulation,
# f32 carried activations.

def upsample2_nearest(x):
    return jnp.repeat(jnp.repeat(x, 2, axis=1), 2, axis=2)


def _conv_ref(x, w, b, stride, pad):
    y = lax.conv_general_dilated(
        x.astype(jnp.bfloat16), w.astype(jnp.bfloat16),
        (stride, stride), [(pad, pad), (pad, pad)],
        dimension_numbers=("NHWC", "HWIO", "NHWC"),
        preferred_element_type=jnp.float32)
    return y + b.astype(jnp.float32)


def pyramid_features_ref(params, C3, C4, C5):
    p = params
    p5_lat = _conv_ref(C5, p["P5_1_w"], p["P5_1_b"], 1, 0)
    p5 = _conv_ref(p5_lat, p["P5_2_w"], p["P5_2_b"], 1, 1)
    p4_lat = _conv_ref(C4, p["P4_1_w"], p["P4_1_b"], 1, 0) + upsample2_nearest(p5_lat)
    p4 = _conv_ref(p4_lat, p["P4_2_w"], p["P4_2_b"], 1, 1)
    p3_lat = _conv_ref(C3, p["P3_1_w"], p["P3_1_b"], 1, 0) + upsample2_nearest(p4_lat)
    p3 = _conv_ref(p3_lat, p["P3_2_w"], p["P3_2_b"], 1, 1)
    p6 = _conv_ref(C5, p["P6_w"], p["P6_b"], 2, 1)
    p7 = _conv_ref(jnp.maximum(p6, 0.0), p["P7_2_w"], p["P7_2_b"], 2, 1)
    return [p3, p4, p5, p6, p7]


# ----------------------------------- main -----------------------------------

if __name__ == "__main__":
    key = jax.random.PRNGKey(0)
    keys = jax.random.split(key, 16)

    N = 2
    # feature_size kept a multiple of 128 so output stores are lane-dense.
    C3_size, C4_size, C5_size, F = 32, 64, 128, 128
    H3 = W3 = 16  # C4 is 8x8, C5 is 4x4 (standard /2 pyramid)

    # inputs (NHWC)
    C3 = jax.random.normal(keys[0], (N, H3, W3, C3_size), jnp.float32)
    C4 = jax.random.normal(keys[1], (N, H3 // 2, W3 // 2, C4_size), jnp.float32)
    C5 = jax.random.normal(keys[2], (N, H3 // 4, W3 // 4, C5_size), jnp.float32)

    # deterministic parameter init (PyTorch Conv2d-style uniform bounds)
    def make_conv_params(k, ksize, cin, cout):
        k1, k2 = jax.random.split(k)
        bound = 1.0 / math.sqrt(ksize * ksize * cin)
        w = jax.random.uniform(k1, (ksize, ksize, cin, cout), jnp.float32,
                               -bound, bound)
        b = jax.random.uniform(k2, (cout,), jnp.float32, -bound, bound)
        return w, b

    layer_specs = [
        ("P5_1", 1, C5_size), ("P5_2", 3, F),
        ("P4_1", 1, C4_size), ("P4_2", 3, F),
        ("P3_1", 1, C3_size), ("P3_2", 3, F),
        ("P6",   3, C5_size), ("P7_2", 3, F),
    ]
    params = {}
    for i, (name, ks, cin) in enumerate(layer_specs):
        w, b = make_conv_params(keys[3 + i], ks, cin, F)
        params[name + "_w"] = w
        params[name + "_b"] = b

    outs = jax.jit(pyramid_features)(params, C3, C4, C5)
    outs = [jax.block_until_ready(o) for o in outs]

    # sanity check against a pure-JAX reference with the same bf16 policy
    refs = pyramid_features_ref(params, C3, C4, C5)
    names = ["P3", "P4", "P5", "P6", "P7"]
    for name, o, r in zip(names, outs, refs):
        assert o.shape == r.shape, (name, o.shape, r.shape)
        max_err = float(jnp.max(jnp.abs(o - r)))
        assert max_err < 2e-2, (name, max_err)

    print("KERNEL_OK")
</pallas_src>

<mosaic_0001>
module attributes {stable_mosaic.version = 11 : i64} {
  func.func @kernel(%arg0: i32, %arg1: i32, %arg2: memref<1x2x2x1152xbf16, #tpu.memory_space<vmem>>, %arg3: memref<1x1152x128xbf16, #tpu.memory_space<vmem>>, %arg4: memref<1x128xf32, #tpu.memory_space<vmem>>, %arg5: memref<1x4x128xf32, #tpu.memory_space<vmem>>, %arg6: memref<4x128xf32, #tpu.memory_space<vmem>>) attributes {dimension_semantics = [#tpu.dimension_semantics<parallel>, #tpu.dimension_semantics<parallel>], iteration_bounds = array<i64: 2, 1>, scalar_prefetch = 0 : i64, scratch_operands = 1 : i64, tpu.core_type = #tpu.core_type<tc>, window_params = [{transform_indices = @transform_0, window_bounds = array<i64: 1, 2, 2, 1152>}, {pipeline_mode = #tpu.pipeline_mode<synchronous>, transform_indices = @transform_1, window_bounds = array<i64: 1, 1152, 128>}, {pipeline_mode = #tpu.pipeline_mode<synchronous>, transform_indices = @transform_2, window_bounds = array<i64: 1, 128>}, {transform_indices = @transform_3, window_bounds = array<i64: 1, 4, 128>}]} {
    %c0 = arith.constant 0 : index
    %c0_0 = arith.constant 0 : index
    %c0_1 = arith.constant 0 : index
    %c0_2 = arith.constant 0 : index
    %0 = vector.load %arg2[%c0, %c0_0, %c0_1, %c0_2] : memref<1x2x2x1152xbf16, #tpu.memory_space<vmem>>, vector<1x2x2x1152xbf16>
    %1 = vector.shape_cast %0 : vector<1x2x2x1152xbf16> to vector<2x2x1152xbf16>
    %2 = vector.shape_cast %1 : vector<2x2x1152xbf16> to vector<4x1152xbf16>
    %c0_3 = arith.constant 0 : index
    %c0_4 = arith.constant 0 : index
    %c0_5 = arith.constant 0 : index
    %3 = vector.load %arg3[%c0_3, %c0_4, %c0_5] : memref<1x1152x128xbf16, #tpu.memory_space<vmem>>, vector<1x1152x128xbf16>
    %4 = vector.shape_cast %3 : vector<1x1152x128xbf16> to vector<1152x128xbf16>
    %cst = arith.constant dense<0.000000e+00> : vector<4x128xf32>
    %5 = tpu.matmul %2, %4, %cst {dimension_numbers = #tpu.dot_dimension_numbers<[1], [0], [0], [1], [0, 0, 1, 1], [], []>} : vector<4x1152xbf16>, vector<1152x128xbf16>, vector<4x128xf32> -> vector<4x128xf32>
    %c0_6 = arith.constant 0 : index
    %c0_7 = arith.constant 0 : index
    %6 = vector.load %arg6[%c0_6, %c0_7] : memref<4x128xf32, #tpu.memory_space<vmem>>, vector<4x128xf32>
    tpu.vector_store %arg6[%c0_6, %c0_7], %5 {strides = array<i32>} : memref<4x128xf32, #tpu.memory_space<vmem>>, vector<4x128xf32>,
    %c0_8 = arith.constant 0 : index
    %c0_9 = arith.constant 0 : index
    %7 = vector.load %arg6[%c0_8, %c0_9] : memref<4x128xf32, #tpu.memory_space<vmem>>, vector<4x128xf32>
    %c0_10 = arith.constant 0 : index
    %c0_11 = arith.constant 0 : index
    %8 = vector.load %arg4[%c0_10, %c0_11] : memref<1x128xf32, #tpu.memory_space<vmem>>, vector<1x128xf32>
    %9 = vector.broadcast %8 : vector<1x128xf32> to vector<4x128xf32>
    %10 = arith.addf %7, %9 : vector<4x128xf32>
    %c0_12 = arith.constant 0 : index
    %c0_13 = arith.constant 0 : index
    %c0_14 = arith.constant 0 : index
    %11 = vector.load %arg5[%c0_12, %c0_13, %c0_14] : memref<1x4x128xf32, #tpu.memory_space<vmem>>, vector<1x4x128xf32>
    %12 = vector.shape_cast %11 : vector<1x4x128xf32> to vector<4x128xf32>
    %13 = vector.shape_cast %10 : vector<4x128xf32> to vector<1x4x128xf32>
    tpu.vector_store %arg5[%c0_12, %c0_13, %c0_14], %13 {strides = array<i32>} : memref<1x4x128xf32, #tpu.memory_space<vmem>>, vector<1x4x128xf32>,
    return
  }
  func.func @transform_0(%arg0: i32, %arg1: i32) -> (i32, i32, i32, i32) {
    %c0_i32 = arith.constant 0 : i32
    %c0_i32_0 = arith.constant 0 : i32
    %c0_i32_1 = arith.constant 0 : i32
    return %arg0, %arg1, %c0_i32, %c0_i32_0 : i32, i32, i32, i32
  }
  func.func @transform_1(%arg0: i32, %arg1: i32) -> (i32, i32, i32) {
    %c0_i32 = arith.constant 0 : i32
    %c0_i32_0 = arith.constant 0 : i32
    %c0_i32_1 = arith.constant 0 : i32
    %c0_i32_2 = arith.constant 0 : i32
    return %c0_i32, %c0_i32_0, %c0_i32_1 : i32, i32, i32
  }
  func.func @transform_2(%arg0: i32, %arg1: i32) -> (i32, i32) {
    %c0_i32 = arith.constant 0 : i32
    %c0_i32_0 = arith.constant 0 : i32
    %c0_i32_1 = arith.constant 0 : i32
    return %c0_i32, %c0_i32_0 : i32, i32
  }
  func.func @transform_3(%arg0: i32, %arg1: i32) -> (i32, i32, i32) {
    %c0_i32 = arith.constant 0 : i32
    %c0_i32_0 = arith.constant 0 : i32
    return %arg0, %arg1, %c0_i32 : i32, i32, i32
  }
}

module attributes {stable_mosaic.version = 11 : i64} {
  func.func @kernel(%arg0: i32, %arg1: i32, %arg2: memref<1x1x1x1152xbf16, #tpu.memory_space<vmem>>, %arg3: memref<1x1152x128xbf16, #tpu.memory_space<vmem>>, %arg4: memref<1x128xf32, #tpu.memory_space<vmem>>, %arg5: memref<1x1x128xf32, #tpu.memory_space<vmem>>, %arg6: memref<1x128xf32, #tpu.memory_space<vmem>>) attributes {dimension_semantics = [#tpu.dimension_semantics<parallel>, #tpu.dimension_semantics<parallel>], iteration_bounds = array<i64: 2, 1>, scalar_prefetch = 0 : i64, scratch_operands = 1 : i64, tpu.core_type = #tpu.core_type<tc>, window_params = [{transform_indices = @transform_0, window_bounds = array<i64: 1, 1, 1, 1152>}, {pipeline_mode = #tpu.pipeline_mode<synchronous>, transform_indices = @transform_1, window_bounds = array<i64: 1, 1152, 128>}, {pipeline_mode = #tpu.pipeline_mode<synchronous>, transform_indices = @transform_2, window_bounds = array<i64: 1, 128>}, {transform_indices = @transform_3, window_bounds = array<i64: 1, 1, 128>}]} {
    %c0 = arith.constant 0 : index
    %c0_0 = arith.constant 0 : index
    %c0_1 = arith.constant 0 : index
    %c0_2 = arith.constant 0 : index
    %0 = vector.load %arg2[%c0, %c0_0, %c0_1, %c0_2] : memref<1x1x1x1152xbf16, #tpu.memory_space<vmem>>, vector<1x1x1x1152xbf16>
    %1 = vector.shape_cast %0 : vector<1x1x1x1152xbf16> to vector<1x1x1152xbf16>
    %cst = arith.constant 0.000000e+00 : bf16
    %2 = vector.broadcast %cst : bf16 to vector<1x1x1152xbf16>
    %3 = arith.maximumf %1, %2 : vector<1x1x1152xbf16>
    %4 = vector.shape_cast %3 : vector<1x1x1152xbf16> to vector<1x1152xbf16>
    %c0_3 = arith.constant 0 : index
    %c0_4 = arith.constant 0 : index
    %c0_5 = arith.constant 0 : index
    %5 = vector.load %arg3[%c0_3, %c0_4, %c0_5] : memref<1x1152x128xbf16, #tpu.memory_space<vmem>>, vector<1x1152x128xbf16>
    %6 = vector.shape_cast %5 : vector<1x1152x128xbf16> to vector<1152x128xbf16>
    %cst_6 = arith.constant dense<0.000000e+00> : vector<1x128xf32>
    %7 = tpu.matmul %4, %6, %cst_6 {dimension_numbers = #tpu.dot_dimension_numbers<[1], [0], [0], [1], [0, 0, 1, 1], [], []>} : vector<1x1152xbf16>, vector<1152x128xbf16>, vector<1x128xf32> -> vector<1x128xf32>
    %c0_7 = arith.constant 0 : index
    %c0_8 = arith.constant 0 : index
    %8 = vector.load %arg6[%c0_7, %c0_8] : memref<1x128xf32, #tpu.memory_space<vmem>>, vector<1x128xf32>
    tpu.vector_store %arg6[%c0_7, %c0_8], %7 {strides = array<i32>} : memref<1x128xf32, #tpu.memory_space<vmem>>, vector<1x128xf32>,
    %c0_9 = arith.constant 0 : index
    %c0_10 = arith.constant 0 : index
    %9 = vector.load %arg6[%c0_9, %c0_10] : memref<1x128xf32, #tpu.memory_space<vmem>>, vector<1x128xf32>
    %c0_11 = arith.constant 0 : index
    %c0_12 = arith.constant 0 : index
    %10 = vector.load %arg4[%c0_11, %c0_12] : memref<1x128xf32, #tpu.memory_space<vmem>>, vector<1x128xf32>
    %11 = arith.addf %9, %10 : vector<1x128xf32>
    %c0_13 = arith.constant 0 : index
    %c0_14 = arith.constant 0 : index
    %c0_15 = arith.constant 0 : index
    %12 = vector.load %arg5[%c0_13, %c0_14, %c0_15] : memref<1x1x128xf32, #tpu.memory_space<vmem>>, vector<1x1x128xf32>
    %13 = vector.shape_cast %12 : vector<1x1x128xf32> to vector<1x128xf32>
    %14 = vector.shape_cast %11 : vector<1x128xf32> to vector<1x1x128xf32>
    tpu.vector_store %arg5[%c0_13, %c0_14, %c0_15], %14 {strides = array<i32>} : memref<1x1x128xf32, #tpu.memory_space<vmem>>, vector<1x1x128xf32>,
    return
  }
  func.func @transform_0(%arg0: i32, %arg1: i32) -> (i32, i32, i32, i32) {
    %c0_i32 = arith.constant 0 : i32
    %c0_i32_0 = arith.constant 0 : i32
    %c0_i32_1 = arith.constant 0 : i32
    return %arg0, %arg1, %c0_i32, %c0_i32_0 : i32, i32, i32, i32
  }
  func.func @transform_1(%arg0: i32, %arg1: i32) -> (i32, i32, i32) {
    %c0_i32 = arith.constant 0 : i32
    %c0_i32_0 = arith.constant 0 : i32
    %c0_i32_1 = arith.constant 0 : i32
    %c0_i32_2 = arith.constant 0 : i32
    return %c0_i32, %c0_i32_0, %c0_i32_1 : i32, i32, i32
  }
  func.func @transform_2(%arg0: i32, %arg1: i32) -> (i32, i32) {
    %c0_i32 = arith.constant 0 : i32
    %c0_i32_0 = arith.constant 0 : i32
    %c0_i32_1 = arith.constant 0 : i32
    return %c0_i32, %c0_i32_0 : i32, i32
  }
  func.func @transform_3(%arg0: i32, %arg1: i32) -> (i32, i32, i32) {
    %c0_i32 = arith.constant 0 : i32
    %c0_i32_0 = arith.constant 0 : i32
    return %arg0, %arg1, %c0_i32 : i32, i32, i32
  }
}

module attributes {stable_mosaic.version = 11 : i64} {
  func.func @_conv1x1_kernel(%arg0: i32, %arg1: i32, %arg2: memref<1x16x128xbf16, #tpu.memory_space<vmem>>, %arg3: memref<128x128xbf16, #tpu.memory_space<vmem>>, %arg4: memref<1x128xf32, #tpu.memory_space<vmem>>, %arg5: memref<1x16x128xf32, #tpu.memory_space<vmem>>) attributes {dimension_semantics = [#tpu.dimension_semantics<parallel>, #tpu.dimension_semantics<parallel>], iteration_bounds = array<i64: 2, 1>, scalar_prefetch = 0 : i64, scratch_operands = 0 : i64, tpu.core_type = #tpu.core_type<tc>, window_params = [{transform_indices = @transform_0, window_bounds = array<i64: 1, 16, 128>}, {pipeline_mode = #tpu.pipeline_mode<synchronous>, transform_indices = @transform_1, window_bounds = array<i64: 128, 128>}, {pipeline_mode = #tpu.pipeline_mode<synchronous>, transform_indices = @transform_2, window_bounds = array<i64: 1, 128>}, {transform_indices = @transform_3, window_bounds = array<i64: 1, 16, 128>}]} {
    %c0 = arith.constant 0 : index
    %c0_0 = arith.constant 0 : index
    %c0_1 = arith.constant 0 : index
    %0 = vector.load %arg2[%c0, %c0_0, %c0_1] : memref<1x16x128xbf16, #tpu.memory_space<vmem>>, vector<1x16x128xbf16>
    %1 = vector.shape_cast %0 : vector<1x16x128xbf16> to vector<16x128xbf16>
    %c0_2 = arith.constant 0 : index
    %c0_3 = arith.constant 0 : index
    %2 = vector.load %arg3[%c0_2, %c0_3] : memref<128x128xbf16, #tpu.memory_space<vmem>>, vector<128x128xbf16>
    %cst = arith.constant dense<0.000000e+00> : vector<16x128xf32>
    %3 = tpu.matmul %1, %2, %cst {dimension_numbers = #tpu.dot_dimension_numbers<[1], [0], [0], [1], [0, 0, 1, 1], [], []>} : vector<16x128xbf16>, vector<128x128xbf16>, vector<16x128xf32> -> vector<16x128xf32>
    %c0_4 = arith.constant 0 : index
    %c0_5 = arith.constant 0 : index
    %4 = vector.load %arg4[%c0_4, %c0_5] : memref<1x128xf32, #tpu.memory_space<vmem>>, vector<1x128xf32>
    %5 = vector.broadcast %4 : vector<1x128xf32> to vector<16x128xf32>
    %6 = arith.addf %3, %5 : vector<16x128xf32>
    %c0_6 = arith.constant 0 : index
    %c0_7 = arith.constant 0 : index
    %c0_8 = arith.constant 0 : index
    %7 = vector.load %arg5[%c0_6, %c0_7, %c0_8] : memref<1x16x128xf32, #tpu.memory_space<vmem>>, vector<1x16x128xf32>
    %8 = vector.shape_cast %7 : vector<1x16x128xf32> to vector<16x128xf32>
    %9 = vector.shape_cast %6 : vector<16x128xf32> to vector<1x16x128xf32>
    tpu.vector_store %arg5[%c0_6, %c0_7, %c0_8], %9 {strides = array<i32>} : memref<1x16x128xf32, #tpu.memory_space<vmem>>, vector<1x16x128xf32>,
    return
  }
  func.func @transform_0(%arg0: i32, %arg1: i32) -> (i32, i32, i32) {
    %c0_i32 = arith.constant 0 : i32
    %c0_i32_0 = arith.constant 0 : i32
    return %arg0, %arg1, %c0_i32 : i32, i32, i32
  }
  func.func @transform_1(%arg0: i32, %arg1: i32) -> (i32, i32) {
    %c0_i32 = arith.constant 0 : i32
    %c0_i32_0 = arith.constant 0 : i32
    %c0_i32_1 = arith.constant 0 : i32
    return %c0_i32, %c0_i32_0 : i32, i32
  }
  func.func @transform_2(%arg0: i32, %arg1: i32) -> (i32, i32) {
    %c0_i32 = arith.constant 0 : i32
    %c0_i32_0 = arith.constant 0 : i32
    %c0_i32_1 = arith.constant 0 : i32
    return %c0_i32, %c0_i32_0 : i32, i32
  }
  func.func @transform_3(%arg0: i32, %arg1: i32) -> (i32, i32, i32) {
    %c0_i32 = arith.constant 0 : i32
    %c0_i32_0 = arith.constant 0 : i32
    return %arg0, %arg1, %c0_i32 : i32, i32, i32
  }
}

module attributes {stable_mosaic.version = 11 : i64} {
  func.func @kernel(%arg0: i32, %arg1: i32, %arg2: memref<1x32x128xbf16, #tpu.memory_space<vmem>>, %arg3: memref<1x4x4x128xf32, #tpu.memory_space<vmem>>, %arg4: memref<64x128xbf16, #tpu.memory_space<vmem>>, %arg5: memref<1x128xf32, #tpu.memory_space<vmem>>, %arg6: memref<1x32x256xf32, #tpu.memory_space<vmem>>) attributes {dimension_semantics = [#tpu.dimension_semantics<parallel>, #tpu.dimension_semantics<parallel>], iteration_bounds = array<i64: 2, 1>, scalar_prefetch = 0 : i64, scratch_operands = 0 : i64, tpu.core_type = #tpu.core_type<tc>, window_params = [{transform_indices = @transform_0, window_bounds = array<i64: 1, 32, 128>}, {transform_indices = @transform_1, window_bounds = array<i64: 1, 4, 4, 128>}, {pipeline_mode = #tpu.pipeline_mode<synchronous>, transform_indices = @transform_2, window_bounds = array<i64: 64, 128>}, {pipeline_mode = #tpu.pipeline_mode<synchronous>, transform_indices = @transform_3, window_bounds = array<i64: 1, 128>}, {transform_indices = @transform_4, window_bounds = array<i64: 1, 32, 256>}]} {
    %c0 = arith.constant 0 : index
    %c0_0 = arith.constant 0 : index
    %c0_1 = arith.constant 0 : index
    %0 = vector.load %arg2[%c0, %c0_0, %c0_1] : memref<1x32x128xbf16, #tpu.memory_space<vmem>>, vector<1x32x128xbf16>
    %1 = vector.shape_cast %0 : vector<1x32x128xbf16> to vector<32x128xbf16>
    %c0_2 = arith.constant 0 : index
    %c0_3 = arith.constant 0 : index
    %2 = vector.load %arg4[%c0_2, %c0_3] : memref<64x128xbf16, #tpu.memory_space<vmem>>, vector<64x128xbf16>
    %3 = vector.extract_strided_slice %1 {offsets = [0, 0], sizes = [32, 64], strides = [1, 1]} : vector<32x128xbf16> to vector<32x64xbf16>
    %cst = arith.constant dense<0.000000e+00> : vector<32x128xf32>
    %4 = tpu.matmul %3, %2, %cst {dimension_numbers = #tpu.dot_dimension_numbers<[1], [0], [0], [1], [0, 0, 1, 1], [], []>} : vector<32x64xbf16>, vector<64x128xbf16>, vector<32x128xf32> -> vector<32x128xf32>
    %5 = vector.extract_strided_slice %1 {offsets = [0, 64], sizes = [32, 64], strides = [1, 1]} : vector<32x128xbf16> to vector<32x64xbf16>
    %cst_4 = arith.constant dense<0.000000e+00> : vector<32x128xf32>
    %6 = tpu.matmul %5, %2, %cst_4 {dimension_numbers = #tpu.dot_dimension_numbers<[1], [0], [0], [1], [0, 0, 1, 1], [], []>} : vector<32x64xbf16>, vector<64x128xbf16>, vector<32x128xf32> -> vector<32x128xf32>
    %c0_5 = arith.constant 0 : index
    %c0_6 = arith.constant 0 : index
    %c0_7 = arith.constant 0 : index
    %c0_8 = arith.constant 0 : index
    %7 = vector.load %arg3[%c0_5, %c0_6, %c0_7, %c0_8] : memref<1x4x4x128xf32, #tpu.memory_space<vmem>>, vector<1x4x4x128xf32>
    %8 = vector.shape_cast %7 : vector<1x4x4x128xf32> to vector<4x4x128xf32>
    %9 = vector.shape_cast %8 : vector<4x4x128xf32> to vector<4x1x4x128xf32>
    %10 = vector.broadcast %9 : vector<4x1x4x128xf32> to vector<4x2x4x128xf32>
    %11 = vector.shape_cast %10 : vector<4x2x4x128xf32> to vector<8x4x128xf32>
    %12 = vector.shape_cast %11 : vector<8x4x128xf32> to vector<32x128xf32>
    %c0_9 = arith.constant 0 : index
    %c0_10 = arith.constant 0 : index
    %13 = vector.load %arg5[%c0_9, %c0_10] : memref<1x128xf32, #tpu.memory_space<vmem>>, vector<1x128xf32>
    %14 = vector.broadcast %13 : vector<1x128xf32> to vector<32x128xf32>
    %15 = arith.addf %4, %14 : vector<32x128xf32>
    %16 = arith.addf %15, %12 : vector<32x128xf32>
    %17 = vector.broadcast %13 : vector<1x128xf32> to vector<32x128xf32>
    %18 = arith.addf %6, %17 : vector<32x128xf32>
    %19 = arith.addf %18, %12 : vector<32x128xf32>
    %20 = tpu.concatenate %16, %19 in 1 : vector<32x128xf32>, vector<32x128xf32> -> vector<32x256xf32>
    %c0_11 = arith.constant 0 : index
    %c0_12 = arith.constant 0 : index
    %c0_13 = arith.constant 0 : index
    %21 = vector.load %arg6[%c0_11, %c0_12, %c0_13] : memref<1x32x256xf32, #tpu.memory_space<vmem>>, vector<1x32x256xf32>
    %22 = vector.shape_cast %21 : vector<1x32x256xf32> to vector<32x256xf32>
    %23 = vector.shape_cast %20 : vector<32x256xf32> to vector<1x32x256xf32>
    tpu.vector_store %arg6[%c0_11, %c0_12, %c0_13], %23 {strides = array<i32>} : memref<1x32x256xf32, #tpu.memory_space<vmem>>, vector<1x32x256xf32>,
    return
  }
  func.func @transform_0(%arg0: i32, %arg1: i32) -> (i32, i32, i32) {
    %c0_i32 = arith.constant 0 : i32
    %c0_i32_0 = arith.constant 0 : i32
    return %arg0, %arg1, %c0_i32 : i32, i32, i32
  }
  func.func @transform_1(%arg0: i32, %arg1: i32) -> (i32, i32, i32, i32) {
    %c0_i32 = arith.constant 0 : i32
    %c0_i32_0 = arith.constant 0 : i32
    %c0_i32_1 = arith.constant 0 : i32
    return %arg0, %arg1, %c0_i32, %c0_i32_0 : i32, i32, i32, i32
  }
  func.func @transform_2(%arg0: i32, %arg1: i32) -> (i32, i32) {
    %c0_i32 = arith.constant 0 : i32
    %c0_i32_0 = arith.constant 0 : i32
    %c0_i32_1 = arith.constant 0 : i32
    return %c0_i32, %c0_i32_0 : i32, i32
  }
  func.func @transform_3(%arg0: i32, %arg1: i32) -> (i32, i32) {
    %c0_i32 = arith.constant 0 : i32
    %c0_i32_0 = arith.constant 0 : i32
    %c0_i32_1 = arith.constant 0 : i32
    return %c0_i32, %c0_i32_0 : i32, i32
  }
  func.func @transform_4(%arg0: i32, %arg1: i32) -> (i32, i32, i32) {
    %c0_i32 = arith.constant 0 : i32
    %c0_i32_0 = arith.constant 0 : i32
    return %arg0, %arg1, %c0_i32 : i32, i32, i32
  }
}

module attributes {stable_mosaic.version = 11 : i64} {
  func.func @kernel(%arg0: i32, %arg1: i32, %arg2: memref<1x128x64xbf16, #tpu.memory_space<vmem>>, %arg3: memref<1x8x8x128xf32, #tpu.memory_space<vmem>>, %arg4: memref<32x128xbf16, #tpu.memory_space<vmem>>, %arg5: memref<1x128xf32, #tpu.memory_space<vmem>>, %arg6: memref<1x128x256xf32, #tpu.memory_space<vmem>>) attributes {dimension_semantics = [#tpu.dimension_semantics<parallel>, #tpu.dimension_semantics<parallel>], iteration_bounds = array<i64: 2, 1>, scalar_prefetch = 0 : i64, scratch_operands = 0 : i64, tpu.core_type = #tpu.core_type<tc>, window_params = [{transform_indices = @transform_0, window_bounds = array<i64: 1, 128, 64>}, {transform_indices = @transform_1, window_bounds = array<i64: 1, 8, 8, 128>}, {pipeline_mode = #tpu.pipeline_mode<synchronous>, transform_indices = @transform_2, window_bounds = array<i64: 32, 128>}, {pipeline_mode = #tpu.pipeline_mode<synchronous>, transform_indices = @transform_3, window_bounds = array<i64: 1, 128>}, {transform_indices = @transform_4, window_bounds = array<i64: 1, 128, 256>}]} {
    %c0 = arith.constant 0 : index
    %c0_0 = arith.constant 0 : index
    %c0_1 = arith.constant 0 : index
    %0 = vector.load %arg2[%c0, %c0_0, %c0_1] : memref<1x128x64xbf16, #tpu.memory_space<vmem>>, vector<1x128x64xbf16>
    %1 = vector.shape_cast %0 : vector<1x128x64xbf16> to vector<128x64xbf16>
    %c0_2 = arith.constant 0 : index
    %c0_3 = arith.constant 0 : index
    %2 = vector.load %arg4[%c0_2, %c0_3] : memref<32x128xbf16, #tpu.memory_space<vmem>>, vector<32x128xbf16>
    %3 = vector.extract_strided_slice %1 {offsets = [0, 0], sizes = [128, 32], strides = [1, 1]} : vector<128x64xbf16> to vector<128x32xbf16>
    %cst = arith.constant dense<0.000000e+00> : vector<128x128xf32>
    %4 = tpu.matmul %3, %2, %cst {dimension_numbers = #tpu.dot_dimension_numbers<[1], [0], [0], [1], [0, 0, 1, 1], [], []>} : vector<128x32xbf16>, vector<32x128xbf16>, vector<128x128xf32> -> vector<128x128xf32>
    %5 = vector.extract_strided_slice %1 {offsets = [0, 32], sizes = [128, 32], strides = [1, 1]} : vector<128x64xbf16> to vector<128x32xbf16>
    %cst_4 = arith.constant dense<0.000000e+00> : vector<128x128xf32>
    %6 = tpu.matmul %5, %2, %cst_4 {dimension_numbers = #tpu.dot_dimension_numbers<[1], [0], [0], [1], [0, 0, 1, 1], [], []>} : vector<128x32xbf16>, vector<32x128xbf16>, vector<128x128xf32> -> vector<128x128xf32>
    %c0_5 = arith.constant 0 : index
    %c0_6 = arith.constant 0 : index
    %c0_7 = arith.constant 0 : index
    %c0_8 = arith.constant 0 : index
    %7 = vector.load %arg3[%c0_5, %c0_6, %c0_7, %c0_8] : memref<1x8x8x128xf32, #tpu.memory_space<vmem>>, vector<1x8x8x128xf32>
    %8 = vector.shape_cast %7 : vector<1x8x8x128xf32> to vector<8x8x128xf32>
    %9 = vector.shape_cast %8 : vector<8x8x128xf32> to vector<8x1x8x128xf32>
    %10 = vector.broadcast %9 : vector<8x1x8x128xf32> to vector<8x2x8x128xf32>
    %11 = vector.shape_cast %10 : vector<8x2x8x128xf32> to vector<16x8x128xf32>
    %12 = vector.shape_cast %11 : vector<16x8x128xf32> to vector<128x128xf32>
    %c0_9 = arith.constant 0 : index
    %c0_10 = arith.constant 0 : index
    %13 = vector.load %arg5[%c0_9, %c0_10] : memref<1x128xf32, #tpu.memory_space<vmem>>, vector<1x128xf32>
    %14 = vector.broadcast %13 : vector<1x128xf32> to vector<128x128xf32>
    %15 = arith.addf %4, %14 : vector<128x128xf32>
    %16 = arith.addf %15, %12 : vector<128x128xf32>
    %17 = vector.broadcast %13 : vector<1x128xf32> to vector<128x128xf32>
    %18 = arith.addf %6, %17 : vector<128x128xf32>
    %19 = arith.addf %18, %12 : vector<128x128xf32>
    %20 = tpu.concatenate %16, %19 in 1 : vector<128x128xf32>, vector<128x128xf32> -> vector<128x256xf32>
    %c0_11 = arith.constant 0 : index
    %c0_12 = arith.constant 0 : index
    %c0_13 = arith.constant 0 : index
    %21 = vector.load %arg6[%c0_11, %c0_12, %c0_13] : memref<1x128x256xf32, #tpu.memory_space<vmem>>, vector<1x128x256xf32>
    %22 = vector.shape_cast %21 : vector<1x128x256xf32> to vector<128x256xf32>
    %23 = vector.shape_cast %20 : vector<128x256xf32> to vector<1x128x256xf32>
    tpu.vector_store %arg6[%c0_11, %c0_12, %c0_13], %23 {strides = array<i32>} : memref<1x128x256xf32, #tpu.memory_space<vmem>>, vector<1x128x256xf32>,
    return
  }
  func.func @transform_0(%arg0: i32, %arg1: i32) -> (i32, i32, i32) {
    %c0_i32 = arith.constant 0 : i32
    %c0_i32_0 = arith.constant 0 : i32
    return %arg0, %arg1, %c0_i32 : i32, i32, i32
  }
  func.func @transform_1(%arg0: i32, %arg1: i32) -> (i32, i32, i32, i32) {
    %c0_i32 = arith.constant 0 : i32
    %c0_i32_0 = arith.constant 0 : i32
    %c0_i32_1 = arith.constant 0 : i32
    return %arg0, %arg1, %c0_i32, %c0_i32_0 : i32, i32, i32, i32
  }
  func.func @transform_2(%arg0: i32, %arg1: i32) -> (i32, i32) {
    %c0_i32 = arith.constant 0 : i32
    %c0_i32_0 = arith.constant 0 : i32
    %c0_i32_1 = arith.constant 0 : i32
    return %c0_i32, %c0_i32_0 : i32, i32
  }
  func.func @transform_3(%arg0: i32, %arg1: i32) -> (i32, i32) {
    %c0_i32 = arith.constant 0 : i32
    %c0_i32_0 = arith.constant 0 : i32
    %c0_i32_1 = arith.constant 0 : i32
    return %c0_i32, %c0_i32_0 : i32, i32
  }
  func.func @transform_4(%arg0: i32, %arg1: i32) -> (i32, i32, i32) {
    %c0_i32 = arith.constant 0 : i32
    %c0_i32_0 = arith.constant 0 : i32
    return %arg0, %arg1, %c0_i32 : i32, i32, i32
  }
}

module attributes {stable_mosaic.version = 11 : i64} {
  func.func @kernel(%arg0: i32, %arg1: i32, %arg2: memref<1x16x18x384xbf16, #tpu.memory_space<vmem>>, %arg3: memref<3x384x128xbf16, #tpu.memory_space<vmem>>, %arg4: memref<1x128xf32, #tpu.memory_space<vmem>>, %arg5: memref<1x256x128xf32, #tpu.memory_space<vmem>>, %arg6: memref<256x128xf32, #tpu.memory_space<vmem>>) attributes {dimension_semantics = [#tpu.dimension_semantics<parallel>, #tpu.dimension_semantics<parallel>], iteration_bounds = array<i64: 2, 1>, scalar_prefetch = 0 : i64, scratch_operands = 1 : i64, tpu.core_type = #tpu.core_type<tc>, window_params = [{transform_indices = @transform_0, window_bounds = array<i64: 1, 16, 18, 384>}, {pipeline_mode = #tpu.pipeline_mode<synchronous>, transform_indices = @transform_1, window_bounds = array<i64: 3, 384, 128>}, {pipeline_mode = #tpu.pipeline_mode<synchronous>, transform_indices = @transform_2, window_bounds = array<i64: 1, 128>}, {transform_indices = @transform_3, window_bounds = array<i64: 1, 256, 128>}]} {
    %c0 = arith.constant 0 : index
    %c0_0 = arith.constant 0 : index
    %c0_1 = arith.constant 0 : index
    %c0_2 = arith.constant 0 : index
    %0 = vector.load %arg2[%c0, %c0_0, %c0_1, %c0_2] : memref<1x16x18x384xbf16, #tpu.memory_space<vmem>>, vector<1x16x18x384xbf16>
    %1 = vector.shape_cast %0 : vector<1x16x18x384xbf16> to vector<16x18x384xbf16>
    %2 = vector.extract_strided_slice %1 {offsets = [0, 0, 0], sizes = [16, 16, 384], strides = [1, 1, 1]} : vector<16x18x384xbf16> to vector<16x16x384xbf16>
    %3 = vector.shape_cast %2 : vector<16x16x384xbf16> to vector<256x384xbf16>
    %c0_3 = arith.constant 0 : index
    %c0_4 = arith.constant 0 : index
    %c0_5 = arith.constant 0 : index
    %4 = vector.load %arg3[%c0_3, %c0_4, %c0_5] : memref<3x384x128xbf16, #tpu.memory_space<vmem>>, vector<1x384x128xbf16>
    %5 = vector.shape_cast %4 : vector<1x384x128xbf16> to vector<384x128xbf16>
    %cst = arith.constant dense<0.000000e+00> : vector<256x128xf32>
    %6 = tpu.matmul %3, %5, %cst {dimension_numbers = #tpu.dot_dimension_numbers<[1], [0], [0], [1], [0, 0, 1, 1], [], []>} : vector<256x384xbf16>, vector<384x128xbf16>, vector<256x128xf32> -> vector<256x128xf32>
    %c0_6 = arith.constant 0 : index
    %c0_7 = arith.constant 0 : index
    %7 = vector.load %arg6[%c0_6, %c0_7] : memref<256x128xf32, #tpu.memory_space<vmem>>, vector<256x128xf32>
    tpu.vector_store %arg6[%c0_6, %c0_7], %6 {strides = array<i32>} : memref<256x128xf32, #tpu.memory_space<vmem>>, vector<256x128xf32>,
    %8 = vector.extract_strided_slice %1 {offsets = [0, 1, 0], sizes = [16, 16, 384], strides = [1, 1, 1]} : vector<16x18x384xbf16> to vector<16x16x384xbf16>
    %9 = vector.shape_cast %8 : vector<16x16x384xbf16> to vector<256x384xbf16>
    %c1 = arith.constant 1 : index
    %c0_8 = arith.constant 0 : index
    %c0_9 = arith.constant 0 : index
    %10 = vector.load %arg3[%c1, %c0_8, %c0_9] : memref<3x384x128xbf16, #tpu.memory_space<vmem>>, vector<1x384x128xbf16>
    %11 = vector.shape_cast %10 : vector<1x384x128xbf16> to vector<384x128xbf16>
    %cst_10 = arith.constant dense<0.000000e+00> : vector<256x128xf32>
    %12 = tpu.matmul %9, %11, %cst_10 {dimension_numbers = #tpu.dot_dimension_numbers<[1], [0], [0], [1], [0, 0, 1, 1], [], []>} : vector<256x384xbf16>, vector<384x128xbf16>, vector<256x128xf32> -> vector<256x128xf32>
    %c0_11 = arith.constant 0 : index
    %c0_12 = arith.constant 0 : index
    %13 = vector.load %arg6[%c0_11, %c0_12] : memref<256x128xf32, #tpu.memory_space<vmem>>, vector<256x128xf32>
    %14 = arith.addf %13, %12 : vector<256x128xf32>
    %c0_13 = arith.constant 0 : index
    %c0_14 = arith.constant 0 : index
    %15 = vector.load %arg6[%c0_13, %c0_14] : memref<256x128xf32, #tpu.memory_space<vmem>>, vector<256x128xf32>
    tpu.vector_store %arg6[%c0_13, %c0_14], %14 {strides = array<i32>} : memref<256x128xf32, #tpu.memory_space<vmem>>, vector<256x128xf32>,
    %16 = vector.extract_strided_slice %1 {offsets = [0, 2, 0], sizes = [16, 16, 384], strides = [1, 1, 1]} : vector<16x18x384xbf16> to vector<16x16x384xbf16>
    %17 = vector.shape_cast %16 : vector<16x16x384xbf16> to vector<256x384xbf16>
    %c2 = arith.constant 2 : index
    %c0_15 = arith.constant 0 : index
    %c0_16 = arith.constant 0 : index
    %18 = vector.load %arg3[%c2, %c0_15, %c0_16] : memref<3x384x128xbf16, #tpu.memory_space<vmem>>, vector<1x384x128xbf16>
    %19 = vector.shape_cast %18 : vector<1x384x128xbf16> to vector<384x128xbf16>
    %cst_17 = arith.constant dense<0.000000e+00> : vector<256x128xf32>
    %20 = tpu.matmul %17, %19, %cst_17 {dimension_numbers = #tpu.dot_dimension_numbers<[1], [0], [0], [1], [0, 0, 1, 1], [], []>} : vector<256x384xbf16>, vector<384x128xbf16>, vector<256x128xf32> -> vector<256x128xf32>
    %c0_18 = arith.constant 0 : index
    %c0_19 = arith.constant 0 : index
    %21 = vector.load %arg6[%c0_18, %c0_19] : memref<256x128xf32, #tpu.memory_space<vmem>>, vector<256x128xf32>
    %22 = arith.addf %21, %20 : vector<256x128xf32>
    %c0_20 = arith.constant 0 : index
    %c0_21 = arith.constant 0 : index
    %23 = vector.load %arg6[%c0_20, %c0_21] : memref<256x128xf32, #tpu.memory_space<vmem>>, vector<256x128xf32>
    tpu.vector_store %arg6[%c0_20, %c0_21], %22 {strides = array<i32>} : memref<256x128xf32, #tpu.memory_space<vmem>>, vector<256x128xf32>,
    %c0_22 = arith.constant 0 : index
    %c0_23 = arith.constant 0 : index
    %24 = vector.load %arg6[%c0_22, %c0_23] : memref<256x128xf32, #tpu.memory_space<vmem>>, vector<256x128xf32>
    %c0_24 = arith.constant 0 : index
    %c0_25 = arith.constant 0 : index
    %25 = vector.load %arg4[%c0_24, %c0_25] : memref<1x128xf32, #tpu.memory_space<vmem>>, vector<1x128xf32>
    %26 = vector.broadcast %25 : vector<1x128xf32> to vector<256x128xf32>
    %27 = arith.addf %24, %26 : vector<256x128xf32>
    %c0_26 = arith.constant 0 : index
    %c0_27 = arith.constant 0 : index
    %c0_28 = arith.constant 0 : index
    %28 = vector.load %arg5[%c0_26, %c0_27, %c0_28] : memref<1x256x128xf32, #tpu.memory_space<vmem>>, vector<1x256x128xf32>
    %29 = vector.shape_cast %28 : vector<1x256x128xf32> to vector<256x128xf32>
    %30 = vector.shape_cast %27 : vector<256x128xf32> to vector<1x256x128xf32>
    tpu.vector_store %arg5[%c0_26, %c0_27, %c0_28], %30 {strides = array<i32>} : memref<1x256x128xf32, #tpu.memory_space<vmem>>, vector<1x256x128xf32>,
    return
  }
  func.func @transform_0(%arg0: i32, %arg1: i32) -> (i32, i32, i32, i32) {
    %c0_i32 = arith.constant 0 : i32
    %c0_i32_0 = arith.constant 0 : i32
    %c0_i32_1 = arith.constant 0 : i32
    return %arg0, %arg1, %c0_i32, %c0_i32_0 : i32, i32, i32, i32
  }
  func.func @transform_1(%arg0: i32, %arg1: i32) -> (i32, i32, i32) {
    %c0_i32 = arith.constant 0 : i32
    %c0_i32_0 = arith.constant 0 : i32
    %c0_i32_1 = arith.constant 0 : i32
    %c0_i32_2 = arith.constant 0 : i32
    return %c0_i32, %c0_i32_0, %c0_i32_1 : i32, i32, i32
  }
  func.func @transform_2(%arg0: i32, %arg1: i32) -> (i32, i32) {
    %c0_i32 = arith.constant 0 : i32
    %c0_i32_0 = arith.constant 0 : i32
    %c0_i32_1 = arith.constant 0 : i32
    return %c0_i32, %c0_i32_0 : i32, i32
  }
  func.func @transform_3(%arg0: i32, %arg1: i32) -> (i32, i32, i32) {
    %c0_i32 = arith.constant 0 : i32
    %c0_i32_0 = arith.constant 0 : i32
    return %arg0, %arg1, %c0_i32 : i32, i32, i32
  }
}

module attributes {stable_mosaic.version = 11 : i64} {
  func.func @kernel(%arg0: i32, %arg1: i32, %arg2: memref<1x8x10x384xbf16, #tpu.memory_space<vmem>>, %arg3: memref<3x384x128xbf16, #tpu.memory_space<vmem>>, %arg4: memref<1x128xf32, #tpu.memory_space<vmem>>, %arg5: memref<1x64x128xf32, #tpu.memory_space<vmem>>, %arg6: memref<64x128xf32, #tpu.memory_space<vmem>>) attributes {dimension_semantics = [#tpu.dimension_semantics<parallel>, #tpu.dimension_semantics<parallel>], iteration_bounds = array<i64: 2, 1>, scalar_prefetch = 0 : i64, scratch_operands = 1 : i64, tpu.core_type = #tpu.core_type<tc>, window_params = [{transform_indices = @transform_0, window_bounds = array<i64: 1, 8, 10, 384>}, {pipeline_mode = #tpu.pipeline_mode<synchronous>, transform_indices = @transform_1, window_bounds = array<i64: 3, 384, 128>}, {pipeline_mode = #tpu.pipeline_mode<synchronous>, transform_indices = @transform_2, window_bounds = array<i64: 1, 128>}, {transform_indices = @transform_3, window_bounds = array<i64: 1, 64, 128>}]} {
    %c0 = arith.constant 0 : index
    %c0_0 = arith.constant 0 : index
    %c0_1 = arith.constant 0 : index
    %c0_2 = arith.constant 0 : index
    %0 = vector.load %arg2[%c0, %c0_0, %c0_1, %c0_2] : memref<1x8x10x384xbf16, #tpu.memory_space<vmem>>, vector<1x8x10x384xbf16>
    %1 = vector.shape_cast %0 : vector<1x8x10x384xbf16> to vector<8x10x384xbf16>
    %2 = vector.extract_strided_slice %1 {offsets = [0, 0, 0], sizes = [8, 8, 384], strides = [1, 1, 1]} : vector<8x10x384xbf16> to vector<8x8x384xbf16>
    %3 = vector.shape_cast %2 : vector<8x8x384xbf16> to vector<64x384xbf16>
    %c0_3 = arith.constant 0 : index
    %c0_4 = arith.constant 0 : index
    %c0_5 = arith.constant 0 : index
    %4 = vector.load %arg3[%c0_3, %c0_4, %c0_5] : memref<3x384x128xbf16, #tpu.memory_space<vmem>>, vector<1x384x128xbf16>
    %5 = vector.shape_cast %4 : vector<1x384x128xbf16> to vector<384x128xbf16>
    %cst = arith.constant dense<0.000000e+00> : vector<64x128xf32>
    %6 = tpu.matmul %3, %5, %cst {dimension_numbers = #tpu.dot_dimension_numbers<[1], [0], [0], [1], [0, 0, 1, 1], [], []>} : vector<64x384xbf16>, vector<384x128xbf16>, vector<64x128xf32> -> vector<64x128xf32>
    %c0_6 = arith.constant 0 : index
    %c0_7 = arith.constant 0 : index
    %7 = vector.load %arg6[%c0_6, %c0_7] : memref<64x128xf32, #tpu.memory_space<vmem>>, vector<64x128xf32>
    tpu.vector_store %arg6[%c0_6, %c0_7], %6 {strides = array<i32>} : memref<64x128xf32, #tpu.memory_space<vmem>>, vector<64x128xf32>,
    %8 = vector.extract_strided_slice %1 {offsets = [0, 1, 0], sizes = [8, 8, 384], strides = [1, 1, 1]} : vector<8x10x384xbf16> to vector<8x8x384xbf16>
    %9 = vector.shape_cast %8 : vector<8x8x384xbf16> to vector<64x384xbf16>
    %c1 = arith.constant 1 : index
    %c0_8 = arith.constant 0 : index
    %c0_9 = arith.constant 0 : index
    %10 = vector.load %arg3[%c1, %c0_8, %c0_9] : memref<3x384x128xbf16, #tpu.memory_space<vmem>>, vector<1x384x128xbf16>
    %11 = vector.shape_cast %10 : vector<1x384x128xbf16> to vector<384x128xbf16>
    %cst_10 = arith.constant dense<0.000000e+00> : vector<64x128xf32>
    %12 = tpu.matmul %9, %11, %cst_10 {dimension_numbers = #tpu.dot_dimension_numbers<[1], [0], [0], [1], [0, 0, 1, 1], [], []>} : vector<64x384xbf16>, vector<384x128xbf16>, vector<64x128xf32> -> vector<64x128xf32>
    %c0_11 = arith.constant 0 : index
    %c0_12 = arith.constant 0 : index
    %13 = vector.load %arg6[%c0_11, %c0_12] : memref<64x128xf32, #tpu.memory_space<vmem>>, vector<64x128xf32>
    %14 = arith.addf %13, %12 : vector<64x128xf32>
    %c0_13 = arith.constant 0 : index
    %c0_14 = arith.constant 0 : index
    %15 = vector.load %arg6[%c0_13, %c0_14] : memref<64x128xf32, #tpu.memory_space<vmem>>, vector<64x128xf32>
    tpu.vector_store %arg6[%c0_13, %c0_14], %14 {strides = array<i32>} : memref<64x128xf32, #tpu.memory_space<vmem>>, vector<64x128xf32>,
    %16 = vector.extract_strided_slice %1 {offsets = [0, 2, 0], sizes = [8, 8, 384], strides = [1, 1, 1]} : vector<8x10x384xbf16> to vector<8x8x384xbf16>
    %17 = vector.shape_cast %16 : vector<8x8x384xbf16> to vector<64x384xbf16>
    %c2 = arith.constant 2 : index
    %c0_15 = arith.constant 0 : index
    %c0_16 = arith.constant 0 : index
    %18 = vector.load %arg3[%c2, %c0_15, %c0_16] : memref<3x384x128xbf16, #tpu.memory_space<vmem>>, vector<1x384x128xbf16>
    %19 = vector.shape_cast %18 : vector<1x384x128xbf16> to vector<384x128xbf16>
    %cst_17 = arith.constant dense<0.000000e+00> : vector<64x128xf32>
    %20 = tpu.matmul %17, %19, %cst_17 {dimension_numbers = #tpu.dot_dimension_numbers<[1], [0], [0], [1], [0, 0, 1, 1], [], []>} : vector<64x384xbf16>, vector<384x128xbf16>, vector<64x128xf32> -> vector<64x128xf32>
    %c0_18 = arith.constant 0 : index
    %c0_19 = arith.constant 0 : index
    %21 = vector.load %arg6[%c0_18, %c0_19] : memref<64x128xf32, #tpu.memory_space<vmem>>, vector<64x128xf32>
    %22 = arith.addf %21, %20 : vector<64x128xf32>
    %c0_20 = arith.constant 0 : index
    %c0_21 = arith.constant 0 : index
    %23 = vector.load %arg6[%c0_20, %c0_21] : memref<64x128xf32, #tpu.memory_space<vmem>>, vector<64x128xf32>
    tpu.vector_store %arg6[%c0_20, %c0_21], %22 {strides = array<i32>} : memref<64x128xf32, #tpu.memory_space<vmem>>, vector<64x128xf32>,
    %c0_22 = arith.constant 0 : index
    %c0_23 = arith.constant 0 : index
    %24 = vector.load %arg6[%c0_22, %c0_23] : memref<64x128xf32, #tpu.memory_space<vmem>>, vector<64x128xf32>
    %c0_24 = arith.constant 0 : index
    %c0_25 = arith.constant 0 : index
    %25 = vector.load %arg4[%c0_24, %c0_25] : memref<1x128xf32, #tpu.memory_space<vmem>>, vector<1x128xf32>
    %26 = vector.broadcast %25 : vector<1x128xf32> to vector<64x128xf32>
    %27 = arith.addf %24, %26 : vector<64x128xf32>
    %c0_26 = arith.constant 0 : index
    %c0_27 = arith.constant 0 : index
    %c0_28 = arith.constant 0 : index
    %28 = vector.load %arg5[%c0_26, %c0_27, %c0_28] : memref<1x64x128xf32, #tpu.memory_space<vmem>>, vector<1x64x128xf32>
    %29 = vector.shape_cast %28 : vector<1x64x128xf32> to vector<64x128xf32>
    %30 = vector.shape_cast %27 : vector<64x128xf32> to vector<1x64x128xf32>
    tpu.vector_store %arg5[%c0_26, %c0_27, %c0_28], %30 {strides = array<i32>} : memref<1x64x128xf32, #tpu.memory_space<vmem>>, vector<1x64x128xf32>,
    return
  }
  func.func @transform_0(%arg0: i32, %arg1: i32) -> (i32, i32, i32, i32) {
    %c0_i32 = arith.constant 0 : i32
    %c0_i32_0 = arith.constant 0 : i32
    %c0_i32_1 = arith.constant 0 : i32
    return %arg0, %arg1, %c0_i32, %c0_i32_0 : i32, i32, i32, i32
  }
  func.func @transform_1(%arg0: i32, %arg1: i32) -> (i32, i32, i32) {
    %c0_i32 = arith.constant 0 : i32
    %c0_i32_0 = arith.constant 0 : i32
    %c0_i32_1 = arith.constant 0 : i32
    %c0_i32_2 = arith.constant 0 : i32
    return %c0_i32, %c0_i32_0, %c0_i32_1 : i32, i32, i32
  }
  func.func @transform_2(%arg0: i32, %arg1: i32) -> (i32, i32) {
    %c0_i32 = arith.constant 0 : i32
    %c0_i32_0 = arith.constant 0 : i32
    %c0_i32_1 = arith.constant 0 : i32
    return %c0_i32, %c0_i32_0 : i32, i32
  }
  func.func @transform_3(%arg0: i32, %arg1: i32) -> (i32, i32, i32) {
    %c0_i32 = arith.constant 0 : i32
    %c0_i32_0 = arith.constant 0 : i32
    return %arg0, %arg1, %c0_i32 : i32, i32, i32
  }
}

module attributes {stable_mosaic.version = 11 : i64} {
  func.func @kernel(%arg0: i32, %arg1: i32, %arg2: memref<1x4x6x384xbf16, #tpu.memory_space<vmem>>, %arg3: memref<3x384x128xbf16, #tpu.memory_space<vmem>>, %arg4: memref<1x128xf32, #tpu.memory_space<vmem>>, %arg5: memref<1x16x128xf32, #tpu.memory_space<vmem>>, %arg6: memref<16x128xf32, #tpu.memory_space<vmem>>) attributes {dimension_semantics = [#tpu.dimension_semantics<parallel>, #tpu.dimension_semantics<parallel>], iteration_bounds = array<i64: 2, 1>, scalar_prefetch = 0 : i64, scratch_operands = 1 : i64, tpu.core_type = #tpu.core_type<tc>, window_params = [{transform_indices = @transform_0, window_bounds = array<i64: 1, 4, 6, 384>}, {pipeline_mode = #tpu.pipeline_mode<synchronous>, transform_indices = @transform_1, window_bounds = array<i64: 3, 384, 128>}, {pipeline_mode = #tpu.pipeline_mode<synchronous>, transform_indices = @transform_2, window_bounds = array<i64: 1, 128>}, {transform_indices = @transform_3, window_bounds = array<i64: 1, 16, 128>}]} {
    %c0 = arith.constant 0 : index
    %c0_0 = arith.constant 0 : index
    %c0_1 = arith.constant 0 : index
    %c0_2 = arith.constant 0 : index
    %0 = vector.load %arg2[%c0, %c0_0, %c0_1, %c0_2] : memref<1x4x6x384xbf16, #tpu.memory_space<vmem>>, vector<1x4x6x384xbf16>
    %1 = vector.shape_cast %0 : vector<1x4x6x384xbf16> to vector<4x6x384xbf16>
    %2 = vector.extract_strided_slice %1 {offsets = [0, 0, 0], sizes = [4, 4, 384], strides = [1, 1, 1]} : vector<4x6x384xbf16> to vector<4x4x384xbf16>
    %3 = vector.shape_cast %2 : vector<4x4x384xbf16> to vector<16x384xbf16>
    %c0_3 = arith.constant 0 : index
    %c0_4 = arith.constant 0 : index
    %c0_5 = arith.constant 0 : index
    %4 = vector.load %arg3[%c0_3, %c0_4, %c0_5] : memref<3x384x128xbf16, #tpu.memory_space<vmem>>, vector<1x384x128xbf16>
    %5 = vector.shape_cast %4 : vector<1x384x128xbf16> to vector<384x128xbf16>
    %cst = arith.constant dense<0.000000e+00> : vector<16x128xf32>
    %6 = tpu.matmul %3, %5, %cst {dimension_numbers = #tpu.dot_dimension_numbers<[1], [0], [0], [1], [0, 0, 1, 1], [], []>} : vector<16x384xbf16>, vector<384x128xbf16>, vector<16x128xf32> -> vector<16x128xf32>
    %c0_6 = arith.constant 0 : index
    %c0_7 = arith.constant 0 : index
    %7 = vector.load %arg6[%c0_6, %c0_7] : memref<16x128xf32, #tpu.memory_space<vmem>>, vector<16x128xf32>
    tpu.vector_store %arg6[%c0_6, %c0_7], %6 {strides = array<i32>} : memref<16x128xf32, #tpu.memory_space<vmem>>, vector<16x128xf32>,
    %8 = vector.extract_strided_slice %1 {offsets = [0, 1, 0], sizes = [4, 4, 384], strides = [1, 1, 1]} : vector<4x6x384xbf16> to vector<4x4x384xbf16>
    %9 = vector.shape_cast %8 : vector<4x4x384xbf16> to vector<16x384xbf16>
    %c1 = arith.constant 1 : index
    %c0_8 = arith.constant 0 : index
    %c0_9 = arith.constant 0 : index
    %10 = vector.load %arg3[%c1, %c0_8, %c0_9] : memref<3x384x128xbf16, #tpu.memory_space<vmem>>, vector<1x384x128xbf16>
    %11 = vector.shape_cast %10 : vector<1x384x128xbf16> to vector<384x128xbf16>
    %cst_10 = arith.constant dense<0.000000e+00> : vector<16x128xf32>
    %12 = tpu.matmul %9, %11, %cst_10 {dimension_numbers = #tpu.dot_dimension_numbers<[1], [0], [0], [1], [0, 0, 1, 1], [], []>} : vector<16x384xbf16>, vector<384x128xbf16>, vector<16x128xf32> -> vector<16x128xf32>
    %c0_11 = arith.constant 0 : index
    %c0_12 = arith.constant 0 : index
    %13 = vector.load %arg6[%c0_11, %c0_12] : memref<16x128xf32, #tpu.memory_space<vmem>>, vector<16x128xf32>
    %14 = arith.addf %13, %12 : vector<16x128xf32>
    %c0_13 = arith.constant 0 : index
    %c0_14 = arith.constant 0 : index
    %15 = vector.load %arg6[%c0_13, %c0_14] : memref<16x128xf32, #tpu.memory_space<vmem>>, vector<16x128xf32>
    tpu.vector_store %arg6[%c0_13, %c0_14], %14 {strides = array<i32>} : memref<16x128xf32, #tpu.memory_space<vmem>>, vector<16x128xf32>,
    %16 = vector.extract_strided_slice %1 {offsets = [0, 2, 0], sizes = [4, 4, 384], strides = [1, 1, 1]} : vector<4x6x384xbf16> to vector<4x4x384xbf16>
    %17 = vector.shape_cast %16 : vector<4x4x384xbf16> to vector<16x384xbf16>
    %c2 = arith.constant 2 : index
    %c0_15 = arith.constant 0 : index
    %c0_16 = arith.constant 0 : index
    %18 = vector.load %arg3[%c2, %c0_15, %c0_16] : memref<3x384x128xbf16, #tpu.memory_space<vmem>>, vector<1x384x128xbf16>
    %19 = vector.shape_cast %18 : vector<1x384x128xbf16> to vector<384x128xbf16>
    %cst_17 = arith.constant dense<0.000000e+00> : vector<16x128xf32>
    %20 = tpu.matmul %17, %19, %cst_17 {dimension_numbers = #tpu.dot_dimension_numbers<[1], [0], [0], [1], [0, 0, 1, 1], [], []>} : vector<16x384xbf16>, vector<384x128xbf16>, vector<16x128xf32> -> vector<16x128xf32>
    %c0_18 = arith.constant 0 : index
    %c0_19 = arith.constant 0 : index
    %21 = vector.load %arg6[%c0_18, %c0_19] : memref<16x128xf32, #tpu.memory_space<vmem>>, vector<16x128xf32>
    %22 = arith.addf %21, %20 : vector<16x128xf32>
    %c0_20 = arith.constant 0 : index
    %c0_21 = arith.constant 0 : index
    %23 = vector.load %arg6[%c0_20, %c0_21] : memref<16x128xf32, #tpu.memory_space<vmem>>, vector<16x128xf32>
    tpu.vector_store %arg6[%c0_20, %c0_21], %22 {strides = array<i32>} : memref<16x128xf32, #tpu.memory_space<vmem>>, vector<16x128xf32>,
    %c0_22 = arith.constant 0 : index
    %c0_23 = arith.constant 0 : index
    %24 = vector.load %arg6[%c0_22, %c0_23] : memref<16x128xf32, #tpu.memory_space<vmem>>, vector<16x128xf32>
    %c0_24 = arith.constant 0 : index
    %c0_25 = arith.constant 0 : index
    %25 = vector.load %arg4[%c0_24, %c0_25] : memref<1x128xf32, #tpu.memory_space<vmem>>, vector<1x128xf32>
    %26 = vector.broadcast %25 : vector<1x128xf32> to vector<16x128xf32>
    %27 = arith.addf %24, %26 : vector<16x128xf32>
    %c0_26 = arith.constant 0 : index
    %c0_27 = arith.constant 0 : index
    %c0_28 = arith.constant 0 : index
    %28 = vector.load %arg5[%c0_26, %c0_27, %c0_28] : memref<1x16x128xf32, #tpu.memory_space<vmem>>, vector<1x16x128xf32>
    %29 = vector.shape_cast %28 : vector<1x16x128xf32> to vector<16x128xf32>
    %30 = vector.shape_cast %27 : vector<16x128xf32> to vector<1x16x128xf32>
    tpu.vector_store %arg5[%c0_26, %c0_27, %c0_28], %30 {strides = array<i32>} : memref<1x16x128xf32, #tpu.memory_space<vmem>>, vector<1x16x128xf32>,
    return
  }
  func.func @transform_0(%arg0: i32, %arg1: i32) -> (i32, i32, i32, i32) {
    %c0_i32 = arith.constant 0 : i32
    %c0_i32_0 = arith.constant 0 : i32
    %c0_i32_1 = arith.constant 0 : i32
    return %arg0, %arg1, %c0_i32, %c0_i32_0 : i32, i32, i32, i32
  }
  func.func @transform_1(%arg0: i32, %arg1: i32) -> (i32, i32, i32) {
    %c0_i32 = arith.constant 0 : i32
    %c0_i32_0 = arith.constant 0 : i32
    %c0_i32_1 = arith.constant 0 : i32
    %c0_i32_2 = arith.constant 0 : i32
    return %c0_i32, %c0_i32_0, %c0_i32_1 : i32, i32, i32
  }
  func.func @transform_2(%arg0: i32, %arg1: i32) -> (i32, i32) {
    %c0_i32 = arith.constant 0 : i32
    %c0_i32_0 = arith.constant 0 : i32
    %c0_i32_1 = arith.constant 0 : i32
    return %c0_i32, %c0_i32_0 : i32, i32
  }
  func.func @transform_3(%arg0: i32, %arg1: i32) -> (i32, i32, i32) {
    %c0_i32 = arith.constant 0 : i32
    %c0_i32_0 = arith.constant 0 : i32
    return %arg0, %arg1, %c0_i32 : i32, i32, i32
  }
}

</mosaic_0001>

<bundles_post_ra>
// kernel: pyramid_features.8
= control target key start
LH: loop header
LB: loop body
LE: loop exit
PB: predicated region body
PF: predicated region fallthrough
CT: control target
= control target key end

     0   :  { %s553_s12 = smov 0   ;;  %s555_s13 = smov 0   ;;  %s613_s0 = inlined_call_operand.vmem [shape: bf16[2,16,128], index: 0, kind: input, shape index: {}]   ;;  %s614_s1 = inlined_call_operand.vmem [shape: bf16[128,128], index: 1, kind: input, shape index: {}]   ;;  %s615_s2 = inlined_call_operand.vmem [shape: f32[1,128], index: 2, kind: input, shape index: {}]   ;;  %s616_s3 = inlined_call_operand.vmem [shape: f32[2,16,128], index: 3, kind: output, shape index: {}]  }
   0x1   :  { %s557_s14 = smov 0  }
   0x2 LB: > { %s25_s15 = sadd.s32 1, %s525_s13  ;;  %p424_p0 = scmp.ge.s32.totalorder %s529_s14, 1  ;;  %s529_s14 = sphi %s557_s14, %s13_s14   ;;  %s525_s13 = sphi %s555_s13, %s618_s13   ;;  %s521_s12 = sphi %s553_s12, %s617_s12  }
   0x3   : > { %p27_p1 = scmp.ge.s32.totalorder %s25_s15, 2  ;;  %p158_p2 = scmp.lt.s32.totalorder %s529_s14, 3 }
   0x5   : > { %s620_s15 = smov (%p27_p1, %s25_s15), 0  ;;  %p159_p3 = pnand %p424_p0, %p158_p2 }
   0x6   : > { %v498_v0 = vld [vmem:[%s614_s1] sm:$0xff] (!%p159_p3)   ;;  %v531_v1 = vmov (!%p159_p3), 0.0   ;;  %v499_v2 = vld [vmem:[%s614_s1 + $0x8] sm:$0xff] (!%p159_p3)   ;;  %vm532_vm0 = vmmov (!%p159_p3), 0   ;;  %p191_p4 = scmp.lt.s32.totalorder (!%p159_p3), %s521_s12, 1  ;;  %v500_v3 = vld [vmem:[%s614_s1 + $0x10] sm:$0xff] (!%p159_p3)  }
   0x7   : > { %162 = sbr.rel (%p159_p3) target bundleno = 256 (0x100), region = 32  ;;  %452 = vmatprep.subr.bf16.mxu0 (!%p159_p3), %v531_v1  ;;  %468 = vmatprep.mubr.msk.bf16.mxu0 (!%p159_p3), %vm532_vm0, %v531_v1  ;;  %v501_v4 = vld [vmem:[%s614_s1 + $0x18] sm:$0xff] (!%p159_p3)   ;;  %v502_v5 = vld [vmem:[%s614_s1 + $0x20] sm:$0xff] (!%p159_p3)   ;;  %v503_v6 = vld [vmem:[%s614_s1 + $0x28] sm:$0xff] (!%p159_p3)  }
   0x8   : > { %453 = vmatpush3.bf16.msra.mxu0 (!%p159_p3), %v498_v0  ;;  %v504_v7 = vld [vmem:[%s614_s1 + $0x30] sm:$0xff] (!%p159_p3)   ;;  %v505_v8 = vld [vmem:[%s614_s1 + $0x38] sm:$0xff] (!%p159_p3)   ;;  %v429_v10 = vld [vmem:[%s615_s2] ss:$0 sm:$0xff] (!%p159_p3) }
   0x9   : > { %454 = vmatprep.subr.bf16.mxu0 (!%p159_p3), %v531_v1 }
   0xc   : > { %455 = vmatpush3.bf16.msra.mxu0 (!%p159_p3), %v499_v2 }
   0xd   : > { %456 = vmatprep.subr.bf16.mxu0 (!%p159_p3), %v531_v1 }
   0xe   : > { %s622_s12 = smov (!%p191_p4, %s521_s12), 1 }
   0xf   : > { %s441_s22 = sshll.u32 %s622_s12, 3  ;;  %s442_s9 = sshll.u32 %s622_s12, 4 }
  0x10   : > { %s198_s25 = scalar_lea.vmem %s613_s0, %s441_s22  ;;  %457 = vmatpush3.bf16.msra.mxu0 %v500_v3  ;;  %s208_s18 = scalar_lea.vmem %s616_s3, %s442_s9 }
  0x11   : > { %458 = vmatprep.subr.bf16.mxu0 %v531_v1  ;;  %v506_v9 = vld [vmem:[%s198_s25] sm:$0xff]  }
  0x14   : > { %459 = vmatpush3.bf16.msra.mxu0 %v501_v4 }
  0x15   : > { %460 = vmatprep.subr.bf16.mxu0 %v531_v1 }
  0x18   : > { %461 = vmatpush3.bf16.msra.mxu0 %v502_v5 }
  0x19   : > { %462 = vmatprep.subr.bf16.mxu0 %v531_v1 }
  0x1c   : > { %463 = vmatpush3.bf16.msra.mxu0 %v503_v6 }
  0x1d   : > { %464 = vmatprep.subr.bf16.mxu0 %v531_v1 }
  0x20   : > { %465 = vmatpush3.bf16.msra.mxu0 %v504_v7 }
  0x21   : > { %466 = vmatprep.subr.bf16.mxu0 %v531_v1 }
  0x24   : > { %467 = vmatpush3.bf16.msra.mxu0 %v505_v8 }
  0x27   : > { %469 = vmatmul.mubr.bf16.vlgmr.msra.gmra.mrb[0].mxu0 %v506_v9 }
  0xfa   : > { %v324_v11 = vpop.f32.mrb[0].mxu0 }
  0xfb   : > { %v325_v12 = vadd.f32 %v429_v10, %v324_v11  ;;  %v470_v13 = vpop.f32.mrb[1].mxu0 }
  0xfc   : > { %v327_v14 = vpop.f32.mrb[2].mxu0 }
  0xfd   : > { %331 = vst [vmem:[%s208_s18] sm:$0xff] %v325_v12  ;;  %v328_v15 = vadd.f32 %v429_v10, %v327_v14  ;;  %v471_v16 = vpop.f32.mrb[3].mxu0 }
  0xff   : > { %332 = vst [vmem:[%s208_s18 + $0x8] sm:$0xff] %v328_v15 }
 0x100 PF: > { %s13_s14 = sadd.s32 1, %s529_s14   ;;  %s617_s12 = smov %s525_s13 }
 0x101   : > { %p10_p5 = scmp.ge.s32.totalorder %s13_s14, 4   ;;  %s618_s13 = smov %s620_s15 }
 0x103   :  { %12 = sbr.rel (!%p10_p5) target bundleno = 2 (0x2), region = 62 }

// kernel: pyramid_features.10
= control target key start
LH: loop header
LB: loop body
LE: loop exit
PB: predicated region body
PF: predicated region fallthrough
CT: control target
= control target key end

     0   :  { %s735_s15 = smov 0   ;;  %s737_s16 = smov 0   ;;  %s800_s0 = inlined_call_operand.vmem [shape: bf16[2,32,128], index: 0, kind: input, shape index: {}]   ;;  %s801_s1 = inlined_call_operand.vmem [shape: f32[2,4,4,128], index: 1, kind: input, shape index: {}]   ;;  %s802_s2 = inlined_call_operand.vmem [shape: bf16[64,128], index: 2, kind: input, shape index: {}]   ;;  %s803_s3 = inlined_call_operand.vmem [shape: f32[1,128], index: 3, kind: input, shape index: {}]   ;;  %s804_s4 = inlined_call_operand.vmem [shape: f32[2,32,256], index: 4, kind: output, shape index: {}]  }
   0x1   :  { %s739_s17 = smov 0  }
   0x2 LB: > { %s26_s18 = sadd.s32 1, %s703_s16  ;;  %p591_p0 = scmp.ge.s32.totalorder %s707_s17, 1  ;;  %s707_s17 = sphi %s739_s17, %s14_s17   ;;  %s703_s16 = sphi %s737_s16, %s806_s16   ;;  %s699_s15 = sphi %s735_s15, %s805_s15  }
   0x3   : > { %p28_p1 = scmp.ge.s32.totalorder %s26_s18, 2  ;;  %p200_p2 = scmp.lt.s32.totalorder %s707_s17, 3 }
   0x5   : > { %s808_s18 = smov (%p28_p1, %s26_s18), 0  ;;  %p201_p3 = pnand %p591_p0, %p200_p2 }
   0x6   : > { %p245_p4 = scmp.lt.s32.totalorder (!%p201_p3), %s699_s15, 1  ;;  %v677_v0 = vld [vmem:[%s802_s2] sm:$0xff] (!%p201_p3)   ;;  %v678_v1 = vld [vmem:[%s802_s2 + $0x8] sm:$0xff] (!%p201_p3)   ;;  %v679_v2 = vld [vmem:[%s802_s2 + $0x10] sm:$0xff] (!%p201_p3)   ;;  %vm333_vm0 = vcmask (!%p201_p3), 523264   ;;  %s709_s6 = smov (!%p201_p3), 64  }
   0x7   : > { %204 = sbr.rel (%p201_p3) target bundleno = 357 (0x165), region = 36  ;;  %626 = vmatprep.subr.bf16.mxu0 (!%p201_p3), %v677_v0  ;;  %638 = vmatprep.subr.bf16.mxu1 (!%p201_p3), %v677_v0  ;;  %v680_v5 = vld [vmem:[%s802_s2 + $0x18] sm:$0xff] (!%p201_p3)   ;;  %v598_v8 = vld [vmem:[%s803_s3] ss:$0 sm:$0xff] (!%p201_p3) }
   0x8   : > { %627 = vmatpush3.bf16.msra.mxu0 (!%p201_p3), %v677_v0  ;;  %639 = vmatpush3.bf16.msra.mxu1 (!%p201_p3), %v677_v0 }
   0x9   : > { %628 = vmatprep.subr.bf16.mxu0 (!%p201_p3), %v678_v1  ;;  %640 = vmatprep.subr.bf16.mxu1 (!%p201_p3), %v678_v1 }
   0xc   : > { %629 = vmatpush3.bf16.msra.mxu0 (!%p201_p3), %v678_v1  ;;  %641 = vmatpush3.bf16.msra.mxu1 (!%p201_p3), %v678_v1 }
   0xd   : > { %630 = vmatprep.subr.bf16.mxu0 (!%p201_p3), %v679_v2  ;;  %642 = vmatprep.subr.bf16.mxu1 (!%p201_p3), %v679_v2 }
   0xe   : > { %s810_s15 = smov (!%p245_p4, %s699_s15), 1 }
   0xf   : > { %s611_s23 = sshll.u32 %s810_s15, 4  ;;  %s613_s11 = sshll.u32 %s810_s15, 6 }
  0x10   : > { %s252_s26 = scalar_lea.vmem %s800_s0, %s611_s23  ;;  %s771_s5 = scalar_lea.vmem %s801_s1, %s611_s23  ;;  %631 = vmatpush3.bf16.msra.mxu0 %v679_v2  ;;  %643 = vmatpush3.bf16.msra.mxu1 %v679_v2 }
  0x11   : > { %v675_v3 = vld [vmem:[%s252_s26] sm:$0xff]   ;;  %v676_v4 = vld [vmem:[%s252_s26 + $0x8] sm:$0xff]   ;;  %632 = vmatprep.subr.bf16.mxu0 %v680_v5  ;;  %644 = vmatprep.subr.bf16.mxu1 %v680_v5  ;;  %s273_s14 = scalar_lea.vmem %s804_s4, %s613_s11 }
  0x12   : > { %405 = vrot.lane.b32.xlu0 %v675_v3, %s709_s6  ;;  %634 = vmatprep.mubr.msk.bf16.mxu0 %vm333_vm0, %v675_v3  ;;  %v681_v9 = vld [vmem:[%s771_s5 + $0x8] ss:$0 sps:$4 sm:$0xff]   ;;  %v682_v11 = vld [vmem:[%s771_s5] ss:$0 sps:$4 sm:$0xff]   ;;  %v683_v14 = vld [vmem:[%s771_s5 + $0xc] ss:$0 sps:$4 sm:$0xff]  }
  0x13   : > { %v684_v17 = vld [vmem:[%s771_s5 + $0x4] ss:$0 sps:$4 sm:$0xff]  }
  0x14   : > { %633 = vmatpush3.bf16.msra.mxu0 %v680_v5  ;;  %645 = vmatpush3.bf16.msra.mxu1 %v680_v5 }
  0x16   : > { %407 = vrot.lane.b32.xlu0 %v676_v4, %s709_s6 }
  0x17   : > { %635 = vmatmul.mubr.msk.bf16.vlgmr.msra.gmra.mrb[0].mxu0 %vm333_vm0, %v676_v4 }
  0x84   : > { %v406_v6 = vpop.permute.xlu0 %405 }
  0x85   : > { %646 = vmatprep.mubr.msk.bf16.mxu1 %vm333_vm0, %v406_v6 }
  0x88   : > { %v408_v7 = vpop.permute.xlu0 %407 }
  0x89   : > { %647 = vmatmul.mubr.msk.bf16.vlgmr.msra.gmra.mrb[0].mxu1 %vm333_vm0, %v408_v7 }
  0xea   : > { %v636_v10 = vpop.f32.mrb[0].mxu0 }
  0xeb   : > { %v383_v12 = vadd.f32 %v636_v10, %v598_v8  ;;  %v374_v13 = vpop.f32.mrb[1].mxu0 }
  0xec   : > { %v375_v15 = vadd.f32 %v598_v8, %v374_v13  ;;  %v637_v16 = vpop.f32.mrb[2].mxu0 }
  0xed   : > { %v403_v18 = vadd.f32 %v681_v9, %v383_v12  ;;  %v386_v19 = vadd.f32 %v637_v16, %v598_v8  ;;  %v377_v20 = vpop.f32.mrb[3].mxu0 }
  0xee   : > { %v401_v21 = vadd.f32 %v682_v11, %v375_v15  ;;  %v378_v22 = vadd.f32 %v598_v8, %v377_v20 }
  0xef   : > { %472 = vst [vmem:[%s273_s14 + $0x20] sm:$0xff] %v403_v18  ;;  %v404_v23 = vadd.f32 %v683_v14, %v386_v19 }
  0xf0   : > { %468 = vst [vmem:[%s273_s14] sm:$0xff] %v401_v21  ;;  %v402_v24 = vadd.f32 %v684_v17, %v378_v22 }
  0xf1   : > { %474 = vst [vmem:[%s273_s14 + $0x30] sm:$0xff] %v404_v23 }
  0xf2   : > { %470 = vst [vmem:[%s273_s14 + $0x10] sm:$0xff] %v402_v24 }
 0x15c   : > { %v648_v25 = vpop.f32.mrb[0].mxu1 }
 0x15d   : > { %v458_v26 = vadd.f32 %v648_v25, %v598_v8  ;;  %v449_v27 = vpop.f32.mrb[1].mxu1 }
 0x15e   : > { %v450_v28 = vadd.f32 %v598_v8, %v449_v27  ;;  %v649_v29 = vpop.f32.mrb[2].mxu1 }
 0x15f   : > { %v466_v30 = vadd.f32 %v681_v9, %v458_v26  ;;  %v461_v31 = vadd.f32 %v649_v29, %v598_v8  ;;  %v452_v32 = vpop.f32.mrb[3].mxu1 }
 0x160   : > { %v464_v33 = vadd.f32 %v682_v11, %v450_v28  ;;  %v453_v34 = vadd.f32 %v598_v8, %v452_v32 }
 0x161   : > { %473 = vst [vmem:[%s273_s14 + $0x28] sm:$0xff] %v466_v30  ;;  %v467_v35 = vadd.f32 %v683_v14, %v461_v31 }
 0x162   : > { %469 = vst [vmem:[%s273_s14 + $0x8] sm:$0xff] %v464_v33  ;;  %v465_v36 = vadd.f32 %v684_v17, %v453_v34 }
 0x163   : > { %475 = vst [vmem:[%s273_s14 + $0x38] sm:$0xff] %v467_v35 }
 0x164   : > { %471 = vst [vmem:[%s273_s14 + $0x18] sm:$0xff] %v465_v36 }
 0x165 PF: > { %s14_s17 = sadd.s32 1, %s707_s17   ;;  %s805_s15 = smov %s703_s16 }
 0x166   : > { %p11_p5 = scmp.ge.s32.totalorder %s14_s17, 4   ;;  %s806_s16 = smov %s808_s18 }
 0x168   :  { %13 = sbr.rel (!%p11_p5) target bundleno = 2 (0x2), region = 69 }

// kernel: pyramid_features.15
= control target key start
LH: loop header
LB: loop body
LE: loop exit
PB: predicated region body
PF: predicated region fallthrough
CT: control target
= control target key end

     0   :  { %8 = vsyncpa [#allocation4], 0  ;;  %s1920_s0 = inlined_call_operand.vmem [shape: bf16[2,1,1,1152], index: 0, kind: input, shape index: {}]   ;;  %s1921_s1 = inlined_call_operand.vmem [shape: bf16[1,1152,128], index: 1, kind: input, shape index: {}]   ;;  %s1922_s2 = inlined_call_operand.vmem [shape: f32[1,128], index: 2, kind: input, shape index: {}]   ;;  %s1923_s3 = inlined_call_operand.hbm [shape: f32[2,1,128], index: 3, kind: output, shape index: {}]  }
   0x1   :  { %10 = vsyncpa [#allocation4 + $0x1], 0  ;;  %s1571_s12 = smov 0   ;;  %s1573_s13 = smov 0  }
   0x2   :  { %s1575_s14 = smov 0   ;;  %s1577_s15 = smov 0  }
   0x3   :  { %s1579_s16 = smov 0   ;;  %s1581_s17 = smov 0  }
   0x4 LB: > { %s1137_s18 = sadd.s32 4294967295, %s1544_s17   ;;  %s1138_s19 = sadd.s32 4294967294, %s1544_s17   ;;  %s1544_s17 = sphi %s1581_s17, %s16_s17   ;;  %s1540_s16 = sphi %s1579_s16, %s1930_s16   ;;  %s1536_s15 = sphi %s1577_s15, %s1929_s15   ;;  %s1532_s14 = sphi %s1575_s14, %s1928_s14   ;;  %s1528_s13 = sphi %s1573_s13, %s1927_s13   ;;  %s1524_s12 = sphi %s1571_s12, %s1926_s12  }
   0x5   : > { %s28_s20 = sadd.s32 1, %s1540_s16  ;;  %s107_s21 = sadd.s32 1, %s1532_s14 }
   0x6   : > { %p30_p0 = scmp.ge.s32.totalorder %s28_s20, 2  ;;  %p117_p1 = scmp.ne.s32.totalorder %s1532_s14, %s1528_s13 }
   0x7   : > { %p118_p2 = scmp.eq.s32.totalorder %s1137_s18, 1  ;;  %p123_p3 = scmp.ne.s32.totalorder %s1528_s13, %s1524_s12 }
   0x8   : > { %s1932_s20 = smov (%p30_p0, %s28_s20), 0  ;;  %p124_p5 = scmp.eq.s32.totalorder %s1138_s19, 1 }
   0x9   : > { %p1611_p4 = por %p118_p2, %p117_p1  ;;  %s102_s23 = ssub.s32 %s1540_s16, %s1932_s20 }
   0xa   : > { %p1141_p6 = scmp.ge.s32.totalorder %s1544_s17, 1  ;;  %p105_p7 = scmp.eq.s32.totalorder %s102_s23, 0 }
   0xb   : > { %p1618_p8 = por %p124_p5, %p123_p3  ;;  %p159_p9 = scmp.lt.s32.totalorder %s1544_s17, 3 }
   0xc   : > { %s1624_s25 = scalar_select %p105_p7, %s1532_s14, %s107_s21  }
   0xd   : > { %p160_p10 = pnand %p1141_p6, %p159_p9 }
   0xe   : > { %v1394_v0 = vld [vmem:[%s1921_s1 + $0x40] sm:$0xff] (!%p160_p10)   ;;  %v1398_v4 = vld [vmem:[%s1921_s1 + $0x48] sm:$0xff] (!%p160_p10)   ;;  %v1402_v8 = vld [vmem:[%s1921_s1 + $0x50] sm:$0xff] (!%p160_p10)   ;;  %p185_p11 = scmp.lt.s32.totalorder (!%p160_p10), %s1536_s15, 1  ;;  %v348_v28 = vlaneseq (!%p160_p10)  ;;  %v1546_v37 = vmov (!%p160_p10), 0   ;;  %vm1549_vm0 = vmmov (!%p160_p10), 0  }
   0xf   : > { %163 = sbr.rel (%p160_p10) target bundleno = 350 (0x15e), region = 32  ;;  %v1395_v1 = vld [vmem:[%s1921_s1 + $0xc0] sm:$0xff] (!%p160_p10)   ;;  %1217 = vmatprep.subr.bf16.mxu0 (!%p160_p10), %v1394_v0  ;;  %v1399_v5 = vld [vmem:[%s1921_s1 + $0xc8] sm:$0xff] (!%p160_p10)   ;;  %v1403_v9 = vld [vmem:[%s1921_s1 + $0xd0] sm:$0xff] (!%p160_p10)   ;;  %v1547_v40 = vmov (!%p160_p10), 1966171168  }
  0x10   : > { %v1396_v2 = vld [vmem:[%s1921_s1] sm:$0xff] (!%p160_p10)   ;;  %1239 = vmatprep.subr.bf16.mxu1 (!%p160_p10), %v1395_v1  ;;  %v1400_v6 = vld [vmem:[%s1921_s1 + $0x8] sm:$0xff] (!%p160_p10)   ;;  %v1404_v10 = vld [vmem:[%s1921_s1 + $0x10] sm:$0xff] (!%p160_p10)   ;;  %v349_v33 = vshrl.u32 (!%p160_p10), %v348_v28, 7  ;;  %v346_v41 = vunpack.c.l.s4 (!%p160_p10), %v1547_v40  ;;  %s1214_s23 = sshll.u32 (!%p160_p10), %s1536_s15, 4 }
  0x11   : > { %v1397_v3 = vld [vmem:[%s1921_s1 + $0x80] sm:$0xff] (!%p160_p10)   ;;  %1218 = vmatpush3.bf16.msra.mxu0 (!%p160_p10), %v1396_v2  ;;  %v1401_v7 = vld [vmem:[%s1921_s1 + $0x88] sm:$0xff] (!%p160_p10)   ;;  %v1405_v11 = vld [vmem:[%s1921_s1 + $0x90] sm:$0xff] (!%p160_p10)   ;;  %s1873_s30 = scalar_lea.hbm (!%p160_p10), %s1923_s3, %s1214_s23 }
  0x12   : > { %1240 = vmatpush3.bf16.msra.mxu1 (!%p160_p10), %v1397_v3  ;;  %1219 = vmatprep.subr.bf16.mxu0 (!%p160_p10), %v1398_v4  ;;  %v1406_v12 = vld [vmem:[%s1921_s1 + $0x58] sm:$0xff] (!%p160_p10)   ;;  %v1410_v16 = vld [vmem:[%s1921_s1 + $0x60] sm:$0xff] (!%p160_p10)   ;;  %v1414_v20 = vld [vmem:[%s1921_s1 + $0x68] sm:$0xff] (!%p160_p10)   ;;  %v347_v43 = vunpack.c.0.s8 (!%p160_p10), %v346_v41 }
  0x13   : > { %1241 = vmatprep.subr.bf16.mxu1 (!%p160_p10), %v1399_v5  ;;  %v1407_v13 = vld [vmem:[%s1921_s1 + $0xd8] sm:$0xff] (!%p160_p10)   ;;  %v1411_v17 = vld [vmem:[%s1921_s1 + $0xe0] sm:$0xff] (!%p160_p10)   ;;  %v1415_v21 = vld [vmem:[%s1921_s1 + $0xe8] sm:$0xff] (!%p160_p10)  }
  0x14   : > { %v1408_v14 = vld [vmem:[%s1921_s1 + $0x18] sm:$0xff] (!%p160_p10)   ;;  %v1412_v18 = vld [vmem:[%s1921_s1 + $0x20] sm:$0xff] (!%p160_p10)   ;;  %v1416_v22 = vld [vmem:[%s1921_s1 + $0x28] sm:$0xff] (!%p160_p10)   ;;  %v1733_v45 = vsub.s32 (!%p160_p10), %v347_v43, %v349_v33 }
  0x15   : > { %1220 = vmatpush3.bf16.msra.mxu0 (!%p160_p10), %v1400_v6  ;;  %v1409_v15 = vld [vmem:[%s1921_s1 + $0x98] sm:$0xff] (!%p160_p10)   ;;  %v1413_v19 = vld [vmem:[%s1921_s1 + $0xa0] sm:$0xff] (!%p160_p10)   ;;  %v1417_v23 = vld [vmem:[%s1921_s1 + $0xa8] sm:$0xff] (!%p160_p10)  }
  0x16   : > { %1242 = vmatpush3.bf16.msra.mxu1 %v1401_v7  ;;  %1221 = vmatprep.subr.bf16.mxu0 %v1402_v8  ;;  %s186_s9 = scalar_select %p185_p11, %s1536_s15, 1  ;;  %v1418_v24 = vld [vmem:[%s1921_s1 + $0x70] sm:$0xff]   ;;  %v1422_v29 = vld [vmem:[%s1921_s1 + $0x78] sm:$0xff]   ;;  %v1426_v36 = vld [vmem:[%s1921_s1 + $0x140] sm:$0xff]  }
  0x17   : > { %1243 = vmatprep.subr.bf16.mxu1 %v1403_v9  ;;  %v1419_v25 = vld [vmem:[%s1921_s1 + $0xf0] sm:$0xff]   ;;  %v1423_v30 = vld [vmem:[%s1921_s1 + $0xf8] sm:$0xff]   ;;  %v1428_v44 = vld [vmem:[%s1921_s1 + $0x1c0] sm:$0xff]   ;;  %s1550_s15 = smov [#allocation3]  }
  0x18   : > { %s1334_s28 = smul.u32 9, %s186_s9  ;;  %v1420_v26 = vld [vmem:[%s1921_s1 + $0x30] sm:$0xff]   ;;  %v1424_v31 = vld [vmem:[%s1921_s1 + $0x38] sm:$0xff]   ;;  %v1427_v54 = vld [vmem:[%s1921_s1 + $0x100] sm:$0xff]   ;;  %s1470_s6 = sshll.u32 %s1550_s15, 4  ;;  %s1471_s6 = int_to_ptr.vmem [resolvable:$false] %s1470_s6 }
  0x19   : > { %1222 = vmatpush3.bf16.msra.mxu0 %v1404_v10  ;;  %v1421_v27 = vld [vmem:[%s1921_s1 + $0xb0] sm:$0xff]   ;;  %v1425_v32 = vld [vmem:[%s1921_s1 + $0xb8] sm:$0xff]   ;;  %v1430_v57 = vld [vmem:[%s1921_s1 + $0x148] sm:$0xff]   ;;  %s1472_s7 = scalar_lea.vmem %s1471_s6, 32 }
  0x1a   : > { %1244 = vmatpush3.bf16.msra.mxu1 %v1405_v11  ;;  %1223 = vmatprep.subr.bf16.mxu0 %v1406_v12  ;;  %s192_s18 = scalar_lea.vmem %s1920_s0, %s1334_s28  ;;  %v1429_v59 = vld [vmem:[%s1921_s1 + $0x180] sm:$0xff]   ;;  %v1432_v60 = vld [vmem:[%s1921_s1 + $0x1c8] sm:$0xff]   ;;  %v1434_v63 = vld [vmem:[%s1921_s1 + $0x150] sm:$0xff]  }
  0x1b   : > { %1245 = vmatprep.subr.bf16.mxu1 %v1407_v13  ;;  %v194_v34 = vld [vmem:[%s192_s18] sm:$0xff]  ;;  %v195_v35 = vld [vmem:[%s192_s18 + $0x8] sm:$0x1]  ;;  %v1436_v1 = vld [vmem:[%s1921_s1 + $0x1d0] sm:$0xff]   ;;  %s183_s18 = sand.u32 1, %s1528_s13  }
  0x1c   : > { %v196_v38 = vmax.bf16 %v1546_v37, %v194_v34  ;;  %v197_v39 = vmax.bf16 %v1546_v37, %v195_v35  ;;  %v1431_v62 = vld [vmem:[%s1921_s1 + $0x108] sm:$0xff]   ;;  %v1435_v2 = vld [vmem:[%s1921_s1 + $0x110] sm:$0xff]   ;;  %v1438_v3 = vld [vmem:[%s1921_s1 + $0x158] sm:$0xff]   ;;  %s184_s26 = scalar_lea.vmem [#allocation3], %s183_s18  ;;  %s1054_s4 = scalar_lea.sflag [#allocation4], %s183_s18 }
  0x1d   : > { %1224 = vmatpush3.bf16.msra.mxu0 %v1408_v14  ;;  %v1433_v0 = vld [vmem:[%s1921_s1 + $0x188] sm:$0xff]   ;;  %v1437_v4 = vld [vmem:[%s1921_s1 + $0x190] sm:$0xff]   ;;  %v1440_v5 = vld [vmem:[%s1921_s1 + $0x1d8] sm:$0xff]   ;;  %s1067_s27 = sshll.u32 %s184_s26, 4  ;;  %s1875_s27 = int_to_ptr.vmem [resolvable:$true] %s1067_s27 }
  0x1e   : > { %1246 = vmatpush3.bf16.msra.mxu1 %v1409_v15  ;;  %1225 = vmatprep.subr.bf16.mxu0 %v1410_v16  ;;  %v344_v42 = vcombine.high %v196_v38, %v196_v38  ;;  %v351_v46 = vrot.slane %v196_v38, %v1733_v45  ;;  %v399_v48 = vrot.slane %v197_v39, %v1733_v45  ;;  %v1439_v6 = vld [vmem:[%s1921_s1 + $0x118] sm:$0xff]   ;;  %v1442_v7 = vld [vmem:[%s1921_s1 + $0x160] sm:$0xff]   ;;  %v1446_v11 = vld [vmem:[%s1921_s1 + $0x168] sm:$0xff]   ;;  %s1466_s5 = scalar_lea.vmem %s1875_s27, 16  ;;  %p1473_p1 = scmp.lt.s32.totalorder %s1875_s27, %s1471_s6 }
  0x1f   : > { %1247 = vmatprep.subr.bf16.mxu1 %v1411_v17  ;;  %v1441_v8 = vld [vmem:[%s1921_s1 + $0x198] sm:$0xff]   ;;  %v1444_v9 = vld [vmem:[%s1921_s1 + $0x1e0] sm:$0xff]   ;;  %v1448_v13 = vld [vmem:[%s1921_s1 + $0x1e8] sm:$0xff]   ;;  %p1467_p12 = scmp.ne.s32.totalorder %s1875_s27, %s1466_s5  ;;  %p1474_p2 = scmp.lt.s32.totalorder %s1472_s7, %s1466_s5 }
  0x20   : > { %v1737_v47 = vrot.slane %v344_v42, %v1733_v45  ;;  %v359_v49 = vcombine.high %v351_v46, %v351_v46  ;;  %v367_v50 = vrot.slane %v351_v46, %v1733_v45  ;;  %v1744_v52 = vrot.slane %v399_v48, %v1733_v45  ;;  %v1443_v10 = vld [vmem:[%s1921_s1 + $0x120] sm:$0xff]   ;;  %v1447_v14 = vld [vmem:[%s1921_s1 + $0x128] sm:$0xff]   ;;  %v1450_v15 = vld [vmem:[%s1921_s1 + $0x170] sm:$0xff]  }
  0x21   : > { %1226 = vmatpush3.bf16.msra.mxu0 %v1412_v18  ;;  %v1445_v12 = vld [vmem:[%s1921_s1 + $0x1a0] sm:$0xff]   ;;  %v1449_v16 = vld [vmem:[%s1921_s1 + $0x1a8] sm:$0xff]   ;;  %v1452_v17 = vld [vmem:[%s1921_s1 + $0x1f0] sm:$0xff]   ;;  %p1468_p13 = pnand %p1467_p12, %p1611_p4  ;;  %p1475_p3 = por %p1474_p2, %p1473_p1 }
  0x22   : > { %1248 = vmatpush3.bf16.msra.mxu1 %v1413_v19  ;;  %1227 = vmatprep.subr.bf16.mxu0 %v1414_v20  ;;  %v360_v51 = vcombine.high %v1737_v47, %v1737_v47  ;;  %v381_v53 = vrot.slane %v359_v49, %v1733_v45  ;;  %v389_v56 = vcombine.high %v367_v50, %v367_v50  ;;  %v1451_v18 = vld [vmem:[%s1921_s1 + $0x130] sm:$0xff]   ;;  %v1454_v19 = vld [vmem:[%s1921_s1 + $0x178] sm:$0xff]   ;;  %v1459_v28 = vld [vmem:[%s1921_s1 + $0x208] sm:$0xff]  }
  0x23   : > { %1249 = vmatprep.subr.bf16.mxu1 %v1415_v21  ;;  %v1453_v20 = vld [vmem:[%s1921_s1 + $0x1b0] sm:$0xff]   ;;  %v1456_v21 = vld [vmem:[%s1921_s1 + $0x1f8] sm:$0xff]   ;;  %p1469_p0 = pneg %p1468_p13 }
  0x24   : > { %v388_v55 = vrot.slane %v360_v51, %v1733_v45  ;;  %880 = vmatprep.mubr.bf16.mxu0 %v381_v53  ;;  %v391_v58 = vcombine.high %v381_v53, %v381_v53  ;;  %v1464_v33 = vld [vmem:[%s1921_s1 + $0x230] sm:$0xff]   ;;  %v1465_v34 = vld [vmem:[%s1921_s1 + $0x238] sm:$0xff]  }
  0x25   : > { %1228 = vmatpush3.bf16.msra.mxu0 %v1416_v22  ;;  %v1455_v22 = vld [vmem:[%s1921_s1 + $0x138] sm:$0xff]   ;;  %p1476_p5 = pnand %p1475_p3, %p1469_p0 }
  0x26   : > { %1250 = vmatpush3.bf16.msra.mxu1 %v1417_v23  ;;  %1229 = vmatprep.subr.bf16.mxu0 %v1418_v24  ;;  %v392_v61 = vcombine.high %v388_v55, %v388_v55  ;;  %v374_v23 = vrot.slane %v1737_v47, %v1733_v45  ;;  %v1457_v24 = vld [vmem:[%s1921_s1 + $0x1b8] sm:$0xff]  }
  0x27   : > { %1251 = vmatprep.subr.bf16.mxu1 %v1419_v25  ;;  %920 = vmatprep.mubr.bf16.mxu1 %v391_v58  ;;  %v1458_v25 = vld [vmem:[%s1921_s1 + $0x200] sm:$0xff]  }
  0x29   : > { %1230 = vmatpush3.bf16.msra.mxu0 %v1420_v26  ;;  %v1548_v26 = vmov 0.0  }
  0x2a   : > { %1252 = vmatpush3.bf16.msra.mxu1 %v1421_v27  ;;  %1231 = vmatprep.subr.bf16.mxu0 %v1422_v29  ;;  %v390_v27 = vcombine.high %v374_v23, %v374_v23  ;;  %v1460_v29 = vld [vmem:[%s1921_s1 + $0x210] sm:$0xff]  }
  0x2b   : > { %1253 = vmatprep.subr.bf16.mxu1 %v1423_v30  ;;  %v1461_v30 = vld [vmem:[%s1921_s1 + $0x218] sm:$0xff]  }
  0x2d   : > { %1232 = vmatpush3.bf16.msra.mxu0 %v1424_v31  ;;  %v1462_v31 = vld [vmem:[%s1921_s1 + $0x220] sm:$0xff]  }
  0x2e   : > { %1254 = vmatpush3.bf16.msra.mxu1 %v1425_v32  ;;  %1261 = vmatprep.subr.bf16.mxu0 %v1426_v36  ;;  %v1463_v32 = vld [vmem:[%s1921_s1 + $0x228] sm:$0xff]  }
  0x2f   : > { %1283 = vmatprep.subr.bf16.mxu1 %v1428_v44 }
  0x30   : > { %881 = vmatmul.mubr.bf16.vlgmr.msra.gmra.mrb[0].mxu0 %v367_v50 }
  0x31   : > { %1262 = vmatpush3.bf16.msra.mxu0 %v1427_v54  ;;  %921 = vmatmul.mubr.bf16.vlgmr.msra.gmra.mrb[0].mxu1 %v389_v56 }
  0x32   : > { %1263 = vmatprep.subr.bf16.mxu0 %v1430_v57  ;;  %1284 = vmatpush3.bf16.msra.mxu1 %v1429_v59 }
  0x33   : > { %960 = vmatprep.mubr.bf16.mxu0 %v388_v55  ;;  %1285 = vmatprep.subr.bf16.mxu1 %v1432_v60 }
  0x34   : > { %1000 = vmatprep.mubr.bf16.mxu1 %v392_v61 }
  0x35   : > { %1264 = vmatpush3.bf16.msra.mxu0 %v1431_v62 }
  0x36   : > { %1265 = vmatprep.subr.bf16.mxu0 %v1434_v63  ;;  %1286 = vmatpush3.bf16.msra.mxu1 %v1433_v0  ;;  %v1050_v63 = vld [vmem:[%s1922_s2] sm:$0x1] }
  0x37   : > { %1287 = vmatprep.subr.bf16.mxu1 %v1436_v1 }
  0x39   : > { %1266 = vmatpush3.bf16.msra.mxu0 %v1435_v2 }
  0x3a   : > { %1267 = vmatprep.subr.bf16.mxu0 %v1438_v3  ;;  %1288 = vmatpush3.bf16.msra.mxu1 %v1437_v4 }
  0x3b   : > { %1289 = vmatprep.subr.bf16.mxu1 %v1440_v5 }
  0x3d   : > { %1268 = vmatpush3.bf16.msra.mxu0 %v1439_v6 }
  0x3e   : > { %1269 = vmatprep.subr.bf16.mxu0 %v1442_v7  ;;  %1290 = vmatpush3.bf16.msra.mxu1 %v1441_v8 }
  0x3f   : > { %1291 = vmatprep.subr.bf16.mxu1 %v1444_v9 }
  0x41   : > { %1270 = vmatpush3.bf16.msra.mxu0 %v1443_v10 }
  0x42   : > { %1271 = vmatprep.subr.bf16.mxu0 %v1446_v11  ;;  %1292 = vmatpush3.bf16.msra.mxu1 %v1445_v12 }
  0x43   : > { %1293 = vmatprep.subr.bf16.mxu1 %v1448_v13 }
  0x45   : > { %1272 = vmatpush3.bf16.msra.mxu0 %v1447_v14 }
  0x46   : > { %1273 = vmatprep.subr.bf16.mxu0 %v1450_v15  ;;  %1294 = vmatpush3.bf16.msra.mxu1 %v1449_v16 }
  0x47   : > { %1295 = vmatprep.subr.bf16.mxu1 %v1452_v17 }
  0x49   : > { %1274 = vmatpush3.bf16.msra.mxu0 %v1451_v18 }
  0x4a   : > { %1275 = vmatprep.subr.bf16.mxu0 %v1454_v19  ;;  %1296 = vmatpush3.bf16.msra.mxu1 %v1453_v20 }
  0x4b   : > { %1297 = vmatprep.subr.bf16.mxu1 %v1456_v21 }
  0x4d   : > { %1276 = vmatpush3.bf16.msra.mxu0 %v1455_v22 }
  0x4e   : > { %1314 = vmatprep.subr.bf16.mxu0 %v1548_v26  ;;  %1298 = vmatpush3.bf16.msra.mxu1 %v1457_v24 }
  0x50   : > { %961 = vmatmul.mubr.bf16.vlgmr.msra.gmra.mrb[4].mxu0 %v374_v23 }
  0x51   : > { %1315 = vmatpush3.bf16.msra.mxu0 %v1458_v25  ;;  %1330 = vmatprep.mubr.msk.bf16.mxu0 %vm1549_vm0, %v1548_v26 }
  0x52   : > { %1001 = vmatmul.mubr.bf16.vlgmr.msra.gmra.mrb[4].mxu1 %v390_v27  ;;  %1316 = vmatprep.subr.bf16.mxu0 %v1548_v26 }
  0x55   : > { %1317 = vmatpush3.bf16.msra.mxu0 %v1459_v28 }
  0x56   : > { %1318 = vmatprep.subr.bf16.mxu0 %v1548_v26 }
  0x59   : > { %1319 = vmatpush3.bf16.msra.mxu0 %v1460_v29 }
  0x5a   : > { %1320 = vmatprep.subr.bf16.mxu0 %v1548_v26 }
  0x5d   : > { %1321 = vmatpush3.bf16.msra.mxu0 %v1461_v30 }
  0x5e   : > { %1322 = vmatprep.subr.bf16.mxu0 %v1548_v26 }
  0x61   : > { %1323 = vmatpush3.bf16.msra.mxu0 %v1462_v31 }
  0x62   : > { %1324 = vmatprep.subr.bf16.mxu0 %v1548_v26 }
  0x65   : > { %1325 = vmatpush3.bf16.msra.mxu0 %v1463_v32 }
  0x66   : > { %1326 = vmatprep.subr.bf16.mxu0 %v1548_v26 }
  0x69   : > { %1327 = vmatpush3.bf16.msra.mxu0 %v1464_v33 }
  0x6a   : > { %1328 = vmatprep.subr.bf16.mxu0 %v1548_v26 }
  0x6d   : > { %1329 = vmatpush3.bf16.msra.mxu0 %v1465_v34 }
  0x70   : > { %1331 = vmatmul.mubr.bf16.vlgmr.msra.gmra.mrb[8].mxu0 %v1744_v52 }
 0x103   : > { %v1233_v35 = vpop.f32.mrb[0].mxu0 }
 0x104   : > { %v1234_v36 = vpop.f32.mrb[1].mxu0  ;;  %v1255_v37 = vpop.f32.mrb[0].mxu1 }
 0x105   : > { %v1235_v38 = vadd.f32 %v1234_v36, %v1233_v35  ;;  %v1236_v39 = vpop.f32.mrb[2].mxu0  ;;  %v1256_v40 = vpop.f32.mrb[1].mxu1 }
 0x106   : > { %v1237_v41 = vpop.f32.mrb[3].mxu0  ;;  %v1257_v42 = vadd.f32 %v1256_v40, %v1255_v37  ;;  %v1258_v43 = vpop.f32.mrb[2].mxu1 }
 0x107   : > { %v1259_v44 = vpop.f32.mrb[3].mxu1 }
 0x108   : > { %v923_v45 = vadd.f32 %v1257_v42, %v1235_v38 }
 0x123   : > { %v1277_v46 = vpop.f32.mrb[4].mxu0 }
 0x124   : > { %v1278_v47 = vpop.f32.mrb[5].mxu0 }
 0x125   : > { %v1279_v48 = vadd.f32 %v1278_v47, %v1277_v46  ;;  %v1280_v49 = vpop.f32.mrb[6].mxu0  ;;  %v1299_v50 = vpop.f32.mrb[4].mxu1 }
 0x126   : > { %v1281_v51 = vpop.f32.mrb[7].mxu0  ;;  %v1300_v52 = vpop.f32.mrb[5].mxu1 }
 0x127   : > { %v963_v53 = vadd.f32 %v1279_v48, %v923_v45  ;;  %v1301_v54 = vadd.f32 %v1300_v52, %v1299_v50  ;;  %v1302_v55 = vpop.f32.mrb[6].mxu1 }
 0x128   : > { %v1303_v56 = vpop.f32.mrb[7].mxu1 }
 0x129   : > { %v1003_v57 = vadd.f32 %v1301_v54, %v963_v53 }
 0x143   : > { %v1042_v58 = vpop.f32.mrb[8].mxu0 }
 0x144   : > { %v1043_v59 = vadd.f32 %v1042_v58, %v1003_v57  ;;  %v1332_v60 = vpop.f32.mrb[9].mxu0 }
 0x145   : > { %v1045_v61 = vpop.f32.mrb[10].mxu0 }
 0x146   : > { %1048 = vst [vmem:[#allocation2] sm:$0x1] %v1043_v59  ;;  %v1333_v62 = vpop.f32.mrb[11].mxu0 }
 0x14d   : > { %v1049_v0 = vld [vmem:[#allocation2] sm:$0x1] }
 0x14e   : > { %v1051_v1 = vadd.f32 %v1050_v63, %v1049_v0 }
 0x150   : > { %1052 = vst [vmem:[%s184_s26] sm:$0x1] %v1051_v1 }
 0x151   : > { %1479 = shalt.err (!%p1476_p5)
}
 0x152   : > { %s1480_s8 = scalar_lea.hbm %s1873_s30, 16  ;;  %s1484_s11 = scalar_lea.hbm %s1923_s3, 32 }
 0x153   : > { %p1481_p6 = scmp.ne.s32.totalorder %s1873_s30, %s1480_s8  ;;  %p1485_p10 = scmp.lt.u32.totalorder %s1873_s30, %s1923_s3 }
 0x154   : > { %p1486_p11 = scmp.lt.u32.totalorder %s1484_s11, %s1480_s8  ;;  %p1488_p13 = scmp.lt.u32.totalorder %s1480_s8, %s1873_s30 }
 0x155   : > { %p1482_p7 = pnand %p1481_p6, %p1611_p4 }
 0x156   : > { %p1487_p12 = por %p1486_p11, %p1485_p10 }
 0x157   : > { %p1483_p9 = pneg %p1482_p7 }
 0x158   : > { %p1489_p0 = por %p1488_p13, %p1487_p12 }
 0x15a   : > { %p1490_p1 = pnand %p1489_p0, %p1483_p9 }
 0x15c   : > { %1493 = shalt.err (!%p1490_p1)
}
 0x15d   : > { %1335 = dma.vmem_to_hbm [thread:$0]  (%p1611_p4), %s1875_s27, 16, %s1873_s30, %s1054_s4  }
 0x15e PF: > { %p1341_p2 = scmp.ge.s32.totalorder %s1544_s17, 2  ;;  %s1079_s21 = sand.u32 1, %s1524_s12  }
 0x15f   : > { %s1080_s23 = scalar_lea.sflag [#allocation4], %s1079_s21 }
 0x160   : > { %p1338_p3 = pnand %p1341_p2, %p1618_p8 }
 0x162   : > { %1519 = dma.done.wait (!%p1338_p3), %s1080_s23, 16  }
 0x163   : > { %1521 = vsyncadd (!%p1338_p3), %s1080_s23, 4294967280  ;;  %s16_s17 = sadd.s32 1, %s1544_s17   ;;  %s1926_s12 = smov %s1528_s13 }
 0x164   : > { %p13_p5 = scmp.ge.s32.totalorder %s16_s17, 4   ;;  %s1927_s13 = smov %s1532_s14 }
 0x165   : > { %s1928_s14 = smov %s1624_s25  ;;  %s1929_s15 = smov %s1540_s16 }
 0x166   : > { %s1930_s16 = smov %s1932_s20  ;;  %15 = sbr.rel (!%p13_p5) target bundleno = 4 (0x4), region = 67 }
 0x16d   :  { %1084 = vsyncpa [#allocation4], 1 }
 0x16e   :  { %1086 = vsyncpa [#allocation4 + $0x1], 1 }

// kernel: pyramid_features.14
= control target key start
LH: loop header
LB: loop body
LE: loop exit
PB: predicated region body
PF: predicated region fallthrough
CT: control target
= control target key end

     0   :  { %s1501_s12 = smov 0   ;;  %s1503_s13 = smov 0   ;;  %s1781_s0 = inlined_call_operand.vmem [shape: bf16[2,2,2,1152], index: 0, kind: input, shape index: {}]   ;;  %s1782_s1 = inlined_call_operand.vmem [shape: bf16[1,1152,128], index: 1, kind: input, shape index: {}]   ;;  %s1783_s2 = inlined_call_operand.vmem [shape: f32[1,128], index: 2, kind: input, shape index: {}]   ;;  %s1784_s3 = inlined_call_operand.vmem [shape: f32[2,4,128], index: 3, kind: output, shape index: {}]  }
   0x1   :  { %s1505_s14 = smov 0  }
   0x2 LB: > { %s25_s15 = sadd.s32 1, %s1472_s13  ;;  %p1156_p0 = scmp.ge.s32.totalorder %s1476_s14, 1  ;;  %s1476_s14 = sphi %s1505_s14, %s13_s14   ;;  %s1472_s13 = sphi %s1503_s13, %s1786_s13   ;;  %s1468_s12 = sphi %s1501_s12, %s1785_s12  }
   0x3   : > { %p27_p1 = scmp.ge.s32.totalorder %s25_s15, 2  ;;  %p158_p2 = scmp.lt.s32.totalorder %s1476_s14, 3 }
   0x5   : > { %s1788_s15 = smov (%p27_p1, %s25_s15), 0  ;;  %p159_p3 = pnand %p1156_p0, %p158_p2 }
   0x6   : > { %v1378_v0 = vld [vmem:[%s1782_s1 + $0x40] sm:$0xff] (!%p159_p3)   ;;  %v1382_v4 = vld [vmem:[%s1782_s1 + $0x48] sm:$0xff] (!%p159_p3)   ;;  %v1386_v8 = vld [vmem:[%s1782_s1 + $0x50] sm:$0xff] (!%p159_p3)   ;;  %p189_p4 = scmp.lt.s32.totalorder (!%p159_p3), %s1468_s12, 1  ;;  %v363_v29 = vlaneseq (!%p159_p3)  ;;  %v1478_v35 = vmov (!%p159_p3), 1966171168  }
   0x7   : > { %162 = sbr.rel (%p159_p3) target bundleno = 329 (0x149), region = 32  ;;  %v1379_v1 = vld [vmem:[%s1782_s1 + $0xc0] sm:$0xff] (!%p159_p3)   ;;  %1233 = vmatprep.subr.bf16.mxu0 (!%p159_p3), %v1378_v0  ;;  %v1383_v5 = vld [vmem:[%s1782_s1 + $0xc8] sm:$0xff] (!%p159_p3)   ;;  %v1387_v9 = vld [vmem:[%s1782_s1 + $0xd0] sm:$0xff] (!%p159_p3)   ;;  %v361_v36 = vunpack.c.l.s4 (!%p159_p3), %v1478_v35  ;;  %vm1480_vm0 = vmmov (!%p159_p3), 0  }
   0x8   : > { %v1380_v2 = vld [vmem:[%s1782_s1] sm:$0xff] (!%p159_p3)   ;;  %1255 = vmatprep.subr.bf16.mxu1 (!%p159_p3), %v1379_v1  ;;  %v1384_v6 = vld [vmem:[%s1782_s1 + $0x8] sm:$0xff] (!%p159_p3)   ;;  %v1388_v10 = vld [vmem:[%s1782_s1 + $0x10] sm:$0xff] (!%p159_p3)   ;;  %v364_v33 = vshrl.u32 (!%p159_p3), %v363_v29, 7 }
   0x9   : > { %v1381_v3 = vld [vmem:[%s1782_s1 + $0x80] sm:$0xff] (!%p159_p3)   ;;  %1234 = vmatpush3.bf16.msra.mxu0 (!%p159_p3), %v1380_v2  ;;  %v1385_v7 = vld [vmem:[%s1782_s1 + $0x88] sm:$0xff] (!%p159_p3)   ;;  %v1389_v11 = vld [vmem:[%s1782_s1 + $0x90] sm:$0xff] (!%p159_p3)   ;;  %v362_v39 = vunpack.c.0.s8 (!%p159_p3), %v361_v36 }
   0xa   : > { %1256 = vmatpush3.bf16.msra.mxu1 (!%p159_p3), %v1381_v3  ;;  %1235 = vmatprep.subr.bf16.mxu0 (!%p159_p3), %v1382_v4  ;;  %v1390_v12 = vld [vmem:[%s1782_s1 + $0x58] sm:$0xff] (!%p159_p3)   ;;  %v1394_v16 = vld [vmem:[%s1782_s1 + $0x60] sm:$0xff] (!%p159_p3)   ;;  %v1398_v20 = vld [vmem:[%s1782_s1 + $0x68] sm:$0xff] (!%p159_p3)  }
   0xb   : > { %1257 = vmatprep.subr.bf16.mxu1 (!%p159_p3), %v1383_v5  ;;  %v1391_v13 = vld [vmem:[%s1782_s1 + $0xd8] sm:$0xff] (!%p159_p3)   ;;  %v1395_v17 = vld [vmem:[%s1782_s1 + $0xe0] sm:$0xff] (!%p159_p3)   ;;  %v1399_v21 = vld [vmem:[%s1782_s1 + $0xe8] sm:$0xff] (!%p159_p3)   ;;  %v1635_v41 = vsub.s32 (!%p159_p3), %v362_v39, %v364_v33 }
   0xc   : > { %v1392_v14 = vld [vmem:[%s1782_s1 + $0x18] sm:$0xff] (!%p159_p3)   ;;  %v1396_v18 = vld [vmem:[%s1782_s1 + $0x20] sm:$0xff] (!%p159_p3)   ;;  %v1400_v22 = vld [vmem:[%s1782_s1 + $0x28] sm:$0xff] (!%p159_p3)  }
   0xd   : > { %1236 = vmatpush3.bf16.msra.mxu0 (!%p159_p3), %v1384_v6  ;;  %v1393_v15 = vld [vmem:[%s1782_s1 + $0x98] sm:$0xff] (!%p159_p3)   ;;  %v1397_v19 = vld [vmem:[%s1782_s1 + $0xa0] sm:$0xff] (!%p159_p3)   ;;  %v1401_v23 = vld [vmem:[%s1782_s1 + $0xa8] sm:$0xff] (!%p159_p3)  }
   0xe   : > { %1258 = vmatpush3.bf16.msra.mxu1 %v1385_v7  ;;  %1237 = vmatprep.subr.bf16.mxu0 %v1386_v8  ;;  %s1790_s12 = smov (!%p189_p4, %s1468_s12), 1  ;;  %v1402_v24 = vld [vmem:[%s1782_s1 + $0x70] sm:$0xff]   ;;  %v1406_v28 = vld [vmem:[%s1782_s1 + $0x78] sm:$0xff]   ;;  %v1413_v37 = vld [vmem:[%s1782_s1 + $0x140] sm:$0xff]  }
   0xf   : > { %1259 = vmatprep.subr.bf16.mxu1 %v1387_v9  ;;  %v1403_v25 = vld [vmem:[%s1782_s1 + $0xf0] sm:$0xff]   ;;  %s1350_s24 = smul.u32 18, %s1790_s12  ;;  %v1407_v30 = vld [vmem:[%s1782_s1 + $0xf8] sm:$0xff]   ;;  %v1415_v40 = vld [vmem:[%s1782_s1 + $0x1c0] sm:$0xff]   ;;  %s1157_s28 = sshll.u32 %s1790_s12, 2 }
  0x10   : > { %v1404_v26 = vld [vmem:[%s1782_s1 + $0x30] sm:$0xff]   ;;  %v1408_v31 = vld [vmem:[%s1782_s1 + $0x38] sm:$0xff]   ;;  %v1414_v48 = vld [vmem:[%s1782_s1 + $0x100] sm:$0xff]   ;;  %s204_s6 = scalar_lea.vmem %s1784_s3, %s1157_s28 }
  0x11   : > { %1238 = vmatpush3.bf16.msra.mxu0 %v1388_v10  ;;  %v1405_v27 = vld [vmem:[%s1782_s1 + $0xb0] sm:$0xff]   ;;  %s1622_s8 = scalar_lea.vmem %s1781_s0, %s1350_s24  ;;  %v1409_v32 = vld [vmem:[%s1782_s1 + $0xb8] sm:$0xff]   ;;  %v1417_v51 = vld [vmem:[%s1782_s1 + $0x148] sm:$0xff]  }
  0x12   : > { %1260 = vmatpush3.bf16.msra.mxu1 %v1389_v11  ;;  %1239 = vmatprep.subr.bf16.mxu0 %v1390_v12  ;;  %v1410_v34 = vld [vmem:[%s1622_s8] ss:$9 sps:$4 sm:$0xff]   ;;  %v1412_v38 = vld [vmem:[%s1622_s8 + $0x4] ss:$9 sps:$4 sm:$0xff]   ;;  %v1425_v61 = vld [vmem:[%s1782_s1 + $0x158] sm:$0xff]  }
  0x13   : > { %1261 = vmatprep.subr.bf16.mxu1 %v1391_v13  ;;  %v366_v42 = vrot.slane %v1410_v34, %v1635_v41  ;;  %v1639_v43 = vrot.slane %v1412_v38, %v1635_v41  ;;  %v1416_v53 = vld [vmem:[%s1782_s1 + $0x180] sm:$0xff]   ;;  %v1419_v54 = vld [vmem:[%s1782_s1 + $0x1c8] sm:$0xff]   ;;  %v1421_v57 = vld [vmem:[%s1782_s1 + $0x150] sm:$0xff]  }
  0x14   : > { %v1418_v56 = vld [vmem:[%s1782_s1 + $0x108] sm:$0xff]   ;;  %v1423_v59 = vld [vmem:[%s1782_s1 + $0x1d0] sm:$0xff]   ;;  %v1427_v63 = vld [vmem:[%s1782_s1 + $0x1d8] sm:$0xff]  }
  0x15   : > { %1240 = vmatpush3.bf16.msra.mxu0 %v1392_v14  ;;  %v374_v44 = vcombine.high %v366_v42, %v366_v42  ;;  %v382_v45 = vrot.slane %v366_v42, %v1635_v41  ;;  %v375_v46 = vcombine.high %v1639_v43, %v1639_v43  ;;  %v1420_v58 = vld [vmem:[%s1782_s1 + $0x188] sm:$0xff]   ;;  %v1422_v60 = vld [vmem:[%s1782_s1 + $0x110] sm:$0xff]   ;;  %v1426_v0 = vld [vmem:[%s1782_s1 + $0x118] sm:$0xff]  }
  0x16   : > { %1262 = vmatpush3.bf16.msra.mxu1 %v1393_v15  ;;  %1241 = vmatprep.subr.bf16.mxu0 %v1394_v16  ;;  %v1424_v62 = vld [vmem:[%s1782_s1 + $0x190] sm:$0xff]   ;;  %v1429_v1 = vld [vmem:[%s1782_s1 + $0x160] sm:$0xff]   ;;  %v1428_v2 = vld [vmem:[%s1782_s1 + $0x198] sm:$0xff]  }
  0x17   : > { %1263 = vmatprep.subr.bf16.mxu1 %v1395_v17  ;;  %v396_v47 = vrot.slane %v374_v44, %v1635_v41  ;;  %v403_v49 = vrot.slane %v375_v46, %v1635_v41  ;;  %v404_v50 = vcombine.high %v382_v45, %v382_v45  ;;  %v1431_v3 = vld [vmem:[%s1782_s1 + $0x1e0] sm:$0xff]   ;;  %v1433_v5 = vld [vmem:[%s1782_s1 + $0x168] sm:$0xff]   ;;  %v1437_v9 = vld [vmem:[%s1782_s1 + $0x170] sm:$0xff]   ;;  %v389_v17 = vrot.slane %v1639_v43, %v1635_v41 }
  0x18   : > { %v1430_v4 = vld [vmem:[%s1782_s1 + $0x120] sm:$0xff]   ;;  %v1435_v7 = vld [vmem:[%s1782_s1 + $0x1e8] sm:$0xff]   ;;  %v1439_v11 = vld [vmem:[%s1782_s1 + $0x1f0] sm:$0xff]  }
  0x19   : > { %1242 = vmatpush3.bf16.msra.mxu0 %v1396_v18  ;;  %896 = vmatprep.mubr.bf16.mxu0 %v396_v47  ;;  %v406_v52 = vcombine.high %v396_v47, %v396_v47  ;;  %v407_v55 = vcombine.high %v403_v49, %v403_v49  ;;  %v1432_v6 = vld [vmem:[%s1782_s1 + $0x1a0] sm:$0xff]   ;;  %v1434_v8 = vld [vmem:[%s1782_s1 + $0x128] sm:$0xff]   ;;  %v1438_v12 = vld [vmem:[%s1782_s1 + $0x130] sm:$0xff]  }
  0x1a   : > { %1264 = vmatpush3.bf16.msra.mxu1 %v1397_v19  ;;  %1243 = vmatprep.subr.bf16.mxu0 %v1398_v20  ;;  %v1436_v10 = vld [vmem:[%s1782_s1 + $0x1a8] sm:$0xff]   ;;  %v1441_v13 = vld [vmem:[%s1782_s1 + $0x178] sm:$0xff]   ;;  %v1440_v14 = vld [vmem:[%s1782_s1 + $0x1b0] sm:$0xff]  }
  0x1b   : > { %1265 = vmatprep.subr.bf16.mxu1 %v1399_v21  ;;  %936 = vmatprep.mubr.bf16.mxu1 %v406_v52  ;;  %v1443_v15 = vld [vmem:[%s1782_s1 + $0x1f8] sm:$0xff]   ;;  %v1453_v19 = vld [vmem:[%s1622_s8 + $0x8] ss:$9 sps:$4 sm:$0x11]   ;;  %v1445_v20 = vld [vmem:[%s1782_s1 + $0x200] sm:$0xff]   ;;  %v1479_v21 = vmov 0.0  }
  0x1c   : > { %v1442_v16 = vld [vmem:[%s1782_s1 + $0x138] sm:$0xff]   ;;  %v1450_v29 = vld [vmem:[%s1782_s1 + $0x228] sm:$0xff]  }
  0x1d   : > { %1244 = vmatpush3.bf16.msra.mxu0 %v1400_v22  ;;  %v1444_v18 = vld [vmem:[%s1782_s1 + $0x1b8] sm:$0xff]   ;;  %v405_v22 = vcombine.high %v389_v17, %v389_v17 }
  0x1e   : > { %1266 = vmatpush3.bf16.msra.mxu1 %v1401_v23  ;;  %1245 = vmatprep.subr.bf16.mxu0 %v1402_v24  ;;  %v415_v23 = vrot.slane %v1453_v19, %v1635_v41 }
  0x1f   : > { %1267 = vmatprep.subr.bf16.mxu1 %v1403_v25  ;;  %v1446_v25 = vld [vmem:[%s1782_s1 + $0x208] sm:$0xff]  }
  0x20   : > { %v422_v24 = vrot.slane %v415_v23, %v1635_v41 }
  0x21   : > { %1246 = vmatpush3.bf16.msra.mxu0 %v1404_v26  ;;  %v1447_v26 = vld [vmem:[%s1782_s1 + $0x210] sm:$0xff]  }
  0x22   : > { %1268 = vmatpush3.bf16.msra.mxu1 %v1405_v27  ;;  %1247 = vmatprep.subr.bf16.mxu0 %v1406_v28  ;;  %v1448_v27 = vld [vmem:[%s1782_s1 + $0x218] sm:$0xff]   ;;  %v1449_v28 = vld [vmem:[%s1782_s1 + $0x220] sm:$0xff]  }
  0x23   : > { %1269 = vmatprep.subr.bf16.mxu1 %v1407_v30  ;;  %v1451_v30 = vld [vmem:[%s1782_s1 + $0x230] sm:$0xff]  }
  0x25   : > { %1248 = vmatpush3.bf16.msra.mxu0 %v1408_v31  ;;  %v1452_v31 = vld [vmem:[%s1782_s1 + $0x238] sm:$0xff]  }
  0x26   : > { %1270 = vmatpush3.bf16.msra.mxu1 %v1409_v32  ;;  %1277 = vmatprep.subr.bf16.mxu0 %v1413_v37 }
  0x27   : > { %1299 = vmatprep.subr.bf16.mxu1 %v1415_v40 }
  0x28   : > { %897 = vmatmul.mubr.bf16.vlgmr.msra.gmra.mrb[0].mxu0 %v382_v45 }
  0x29   : > { %1278 = vmatpush3.bf16.msra.mxu0 %v1414_v48  ;;  %937 = vmatmul.mubr.bf16.vlgmr.msra.gmra.mrb[0].mxu1 %v404_v50 }
  0x2a   : > { %1279 = vmatprep.subr.bf16.mxu0 %v1417_v51  ;;  %1300 = vmatpush3.bf16.msra.mxu1 %v1416_v53 }
  0x2b   : > { %976 = vmatprep.mubr.bf16.mxu0 %v403_v49  ;;  %1301 = vmatprep.subr.bf16.mxu1 %v1419_v54 }
  0x2c   : > { %1016 = vmatprep.mubr.bf16.mxu1 %v407_v55 }
  0x2d   : > { %1280 = vmatpush3.bf16.msra.mxu0 %v1418_v56 }
  0x2e   : > { %1281 = vmatprep.subr.bf16.mxu0 %v1421_v57  ;;  %1302 = vmatpush3.bf16.msra.mxu1 %v1420_v58 }
  0x2f   : > { %1303 = vmatprep.subr.bf16.mxu1 %v1423_v59 }
  0x31   : > { %1282 = vmatpush3.bf16.msra.mxu0 %v1422_v60  ;;  %v1230_v60 = vld [vmem:[%s1783_s2] ss:$0 sm:$0xff] }
  0x32   : > { %1283 = vmatprep.subr.bf16.mxu0 %v1425_v61  ;;  %1304 = vmatpush3.bf16.msra.mxu1 %v1424_v62 }
  0x33   : > { %1305 = vmatprep.subr.bf16.mxu1 %v1427_v63 }
  0x35   : > { %1284 = vmatpush3.bf16.msra.mxu0 %v1426_v0 }
  0x36   : > { %1285 = vmatprep.subr.bf16.mxu0 %v1429_v1  ;;  %1306 = vmatpush3.bf16.msra.mxu1 %v1428_v2 }
  0x37   : > { %1307 = vmatprep.subr.bf16.mxu1 %v1431_v3 }
  0x39   : > { %1286 = vmatpush3.bf16.msra.mxu0 %v1430_v4 }
  0x3a   : > { %1287 = vmatprep.subr.bf16.mxu0 %v1433_v5  ;;  %1308 = vmatpush3.bf16.msra.mxu1 %v1432_v6 }
  0x3b   : > { %1309 = vmatprep.subr.bf16.mxu1 %v1435_v7 }
  0x3d   : > { %1288 = vmatpush3.bf16.msra.mxu0 %v1434_v8 }
  0x3e   : > { %1289 = vmatprep.subr.bf16.mxu0 %v1437_v9  ;;  %1310 = vmatpush3.bf16.msra.mxu1 %v1436_v10 }
  0x3f   : > { %1311 = vmatprep.subr.bf16.mxu1 %v1439_v11 }
  0x41   : > { %1290 = vmatpush3.bf16.msra.mxu0 %v1438_v12 }
  0x42   : > { %1291 = vmatprep.subr.bf16.mxu0 %v1441_v13  ;;  %1312 = vmatpush3.bf16.msra.mxu1 %v1440_v14 }
  0x43   : > { %1313 = vmatprep.subr.bf16.mxu1 %v1443_v15 }
  0x45   : > { %1292 = vmatpush3.bf16.msra.mxu0 %v1442_v16 }
  0x46   : > { %1330 = vmatprep.subr.bf16.mxu0 %v1479_v21  ;;  %1314 = vmatpush3.bf16.msra.mxu1 %v1444_v18 }
  0x48   : > { %977 = vmatmul.mubr.bf16.vlgmr.msra.gmra.mrb[4].mxu0 %v389_v17 }
  0x49   : > { %1331 = vmatpush3.bf16.msra.mxu0 %v1445_v20  ;;  %1346 = vmatprep.mubr.msk.bf16.mxu0 %vm1480_vm0, %v1479_v21 }
  0x4a   : > { %1017 = vmatmul.mubr.bf16.vlgmr.msra.gmra.mrb[4].mxu1 %v405_v22  ;;  %1332 = vmatprep.subr.bf16.mxu0 %v1479_v21 }
  0x4d   : > { %1333 = vmatpush3.bf16.msra.mxu0 %v1446_v25 }
  0x4e   : > { %1334 = vmatprep.subr.bf16.mxu0 %v1479_v21 }
  0x51   : > { %1335 = vmatpush3.bf16.msra.mxu0 %v1447_v26 }
  0x52   : > { %1336 = vmatprep.subr.bf16.mxu0 %v1479_v21 }
  0x55   : > { %1337 = vmatpush3.bf16.msra.mxu0 %v1448_v27 }
  0x56   : > { %1338 = vmatprep.subr.bf16.mxu0 %v1479_v21 }
  0x59   : > { %1339 = vmatpush3.bf16.msra.mxu0 %v1449_v28 }
  0x5a   : > { %1340 = vmatprep.subr.bf16.mxu0 %v1479_v21 }
  0x5d   : > { %1341 = vmatpush3.bf16.msra.mxu0 %v1450_v29 }
  0x5e   : > { %1342 = vmatprep.subr.bf16.mxu0 %v1479_v21 }
  0x61   : > { %1343 = vmatpush3.bf16.msra.mxu0 %v1451_v30 }
  0x62   : > { %1344 = vmatprep.subr.bf16.mxu0 %v1479_v21 }
  0x65   : > { %1345 = vmatpush3.bf16.msra.mxu0 %v1452_v31 }
  0x68   : > { %1347 = vmatmul.mubr.bf16.vlgmr.msra.gmra.mrb[8].mxu0 %v422_v24 }
  0xfb   : > { %v1249_v32 = vpop.f32.mrb[0].mxu0 }
  0xfc   : > { %v1250_v33 = vpop.f32.mrb[1].mxu0  ;;  %v1271_v34 = vpop.f32.mrb[0].mxu1 }
  0xfd   : > { %v1251_v35 = vadd.f32 %v1250_v33, %v1249_v32  ;;  %v1252_v36 = vpop.f32.mrb[2].mxu0  ;;  %v1272_v37 = vpop.f32.mrb[1].mxu1 }
  0xfe   : > { %v1253_v38 = vpop.f32.mrb[3].mxu0  ;;  %v1273_v39 = vadd.f32 %v1272_v37, %v1271_v34  ;;  %v1274_v40 = vpop.f32.mrb[2].mxu1 }
  0xff   : > { %v1275_v41 = vpop.f32.mrb[3].mxu1 }
 0x100   : > { %v939_v42 = vadd.f32 %v1273_v39, %v1251_v35 }
 0x11b   : > { %v1293_v43 = vpop.f32.mrb[4].mxu0 }
 0x11c   : > { %v1294_v44 = vpop.f32.mrb[5].mxu0 }
 0x11d   : > { %v1295_v45 = vadd.f32 %v1294_v44, %v1293_v43  ;;  %v1296_v46 = vpop.f32.mrb[6].mxu0  ;;  %v1315_v47 = vpop.f32.mrb[4].mxu1 }
 0x11e   : > { %v1297_v48 = vpop.f32.mrb[7].mxu0  ;;  %v1316_v49 = vpop.f32.mrb[5].mxu1 }
 0x11f   : > { %v979_v50 = vadd.f32 %v1295_v45, %v939_v42  ;;  %v1317_v51 = vadd.f32 %v1316_v49, %v1315_v47  ;;  %v1318_v52 = vpop.f32.mrb[6].mxu1 }
 0x120   : > { %v1319_v53 = vpop.f32.mrb[7].mxu1 }
 0x121   : > { %v1019_v54 = vadd.f32 %v1317_v51, %v979_v50 }
 0x13b   : > { %v1058_v55 = vpop.f32.mrb[8].mxu0 }
 0x13c   : > { %v1059_v56 = vadd.f32 %v1058_v55, %v1019_v54  ;;  %v1348_v57 = vpop.f32.mrb[9].mxu0 }
 0x13d   : > { %v1061_v58 = vpop.f32.mrb[10].mxu0 }
 0x13e   : > { %1064 = vst [vmem:[#allocation2] sm:$0xf] %v1059_v56  ;;  %v1349_v59 = vpop.f32.mrb[11].mxu0 }
 0x145   : > { %v1065_v61 = vld [vmem:[#allocation2] sm:$0xf] }
 0x146   : > { %v1073_v62 = vadd.f32 %v1230_v60, %v1065_v61 }
 0x148   : > { %1074 = vst [vmem:[%s204_s6] sm:$0xf] %v1073_v62 }
 0x149 PF: > { %s13_s14 = sadd.s32 1, %s1476_s14   ;;  %s1785_s12 = smov %s1472_s13 }
 0x14a   : > { %p10_p5 = scmp.ge.s32.totalorder %s13_s14, 4   ;;  %s1786_s13 = smov %s1788_s15 }
 0x14c   :  { %12 = sbr.rel (!%p10_p5) target bundleno = 2 (0x2), region = 62 }

// kernel: pyramid_features.12
= control target key start
LH: loop header
LB: loop body
LE: loop exit
PB: predicated region body
PF: predicated region fallthrough
CT: control target
= control target key end

     0   :  { %s985_s15 = smov 0   ;;  %s987_s16 = smov 0   ;;  %s1180_s0 = inlined_call_operand.vmem [shape: bf16[2,128,64], index: 0, kind: input, shape index: {}]   ;;  %s1181_s1 = inlined_call_operand.vmem [shape: f32[2,8,8,128], index: 1, kind: input, shape index: {}]   ;;  %s1182_s2 = inlined_call_operand.vmem [shape: bf16[32,128], index: 2, kind: input, shape index: {}]   ;;  %s1183_s3 = inlined_call_operand.vmem [shape: f32[1,128], index: 3, kind: input, shape index: {}]   ;;  %s1184_s4 = inlined_call_operand.vmem [shape: f32[2,128,256], index: 4, kind: output, shape index: {}]  }
   0x1   :  { %s989_s17 = smov 0  }
   0x2 LB: > { %s26_s18 = sadd.s32 1, %s953_s16  ;;  %p801_p0 = scmp.ge.s32.totalorder %s957_s17, 1  ;;  %s957_s17 = sphi %s989_s17, %s14_s17   ;;  %s953_s16 = sphi %s987_s16, %s1186_s16   ;;  %s949_s15 = sphi %s985_s15, %s1185_s15  }
   0x3   : > { %p28_p1 = scmp.ge.s32.totalorder %s26_s18, 2  ;;  %p200_p2 = scmp.lt.s32.totalorder %s957_s17, 3 }
   0x5   : > { %s1188_s18 = smov (%p28_p1, %s26_s18), 0  ;;  %p201_p3 = pnand %p801_p0, %p200_p2 }
   0x6   : > { %p245_p4 = scmp.lt.s32.totalorder (!%p201_p3), %s949_s15, 1  ;;  %v933_v0 = vld [vmem:[%s1182_s2] sm:$0xff] (!%p201_p3)   ;;  %v934_v1 = vld [vmem:[%s1182_s2 + $0x8] sm:$0xff] (!%p201_p3)   ;;  %vm363_vm0 = vcmask (!%p201_p3), 261120   ;;  %s959_s27 = smov (!%p201_p3), 96  }
   0x7   : > { %204 = sbr.rel (%p201_p3) target bundleno = 381 (0x17d), region = 36  ;;  %860 = vmatprep.subr.bf16.mxu0 (!%p201_p3), %v933_v0  ;;  %880 = vmatprep.subr.bf16.mxu1 (!%p201_p3), %v933_v0  ;;  %v1043_v18 = vld [vmem:[%s1183_s3] ss:$0 sm:$0xff] (!%p201_p3) }
   0x8   : > { %861 = vmatpush3.bf16.msra.mxu0 (!%p201_p3), %v933_v0  ;;  %881 = vmatpush3.bf16.msra.mxu1 (!%p201_p3), %v933_v0 }
   0x9   : > { %862 = vmatprep.subr.bf16.mxu0 (!%p201_p3), %v934_v1  ;;  %882 = vmatprep.subr.bf16.mxu1 (!%p201_p3), %v934_v1 }
   0xc   : > { %863 = vmatpush3.bf16.msra.mxu0 (!%p201_p3), %v934_v1  ;;  %883 = vmatpush3.bf16.msra.mxu1 (!%p201_p3), %v934_v1 }
   0xe   : > { %s1190_s15 = smov (!%p245_p4, %s949_s15), 1 }
   0xf   : > { %s837_s23 = sshll.u32 %s1190_s15, 6  ;;  %s839_s7 = sshll.u32 %s1190_s15, 8 }
  0x10   : > { %s252_s26 = scalar_lea.vmem %s1180_s0, %s837_s23  ;;  %s1038_s30 = scalar_lea.vmem %s1181_s1, %s837_s23 }
  0x11   : > { %v925_v2 = vld [vmem:[%s252_s26] sm:$0xff]   ;;  %v926_v3 = vld [vmem:[%s252_s26 + $0x8] sm:$0xff]   ;;  %v927_v4 = vld [vmem:[%s252_s26 + $0x10] sm:$0xff]   ;;  %s1056_s10 = scalar_lea.vmem %s1184_s4, %s839_s7 }
  0x12   : > { %501 = vrot.lane.b32.xlu0 %v925_v2, %s959_s27  ;;  %864 = vmatprep.mubr.msk.bf16.mxu0 %vm363_vm0, %v925_v2  ;;  %v928_v5 = vld [vmem:[%s252_s26 + $0x18] sm:$0xff]   ;;  %v929_v6 = vld [vmem:[%s252_s26 + $0x20] sm:$0xff]   ;;  %v930_v7 = vld [vmem:[%s252_s26 + $0x28] sm:$0xff]  }
  0x13   : > { %505 = vrot.lane.b32.xlu1 %v927_v4, %s959_s27  ;;  %865 = vmatmul.mubr.msk.bf16.vlgmr.msra.gmra.mrb[0].mxu0 %vm363_vm0, %v926_v3  ;;  %v931_v8 = vld [vmem:[%s252_s26 + $0x30] sm:$0xff]   ;;  %v932_v9 = vld [vmem:[%s252_s26 + $0x38] sm:$0xff]   ;;  %v1047_v19 = vld [vmem:[%s1038_s30 + $0x8] sm:$0xff] }
  0x14   : > { %868 = vmatprep.mubr.msk.bf16.mxu0 %vm363_vm0, %v927_v4  ;;  %v1051_v22 = vld [vmem:[%s1038_s30] sm:$0xff]  ;;  %v1070_v33 = vld [vmem:[%s1038_s30 + $0x18] sm:$0xff]  ;;  %v1074_v36 = vld [vmem:[%s1038_s30 + $0x10] sm:$0xff] }
  0x15   : > { %v1088_v47 = vld [vmem:[%s1038_s30 + $0x28] sm:$0xff]  ;;  %v1092_v50 = vld [vmem:[%s1038_s30 + $0x20] sm:$0xff]  ;;  %v1106_v61 = vld [vmem:[%s1038_s30 + $0x38] sm:$0xff] }
  0x16   : > { %503 = vrot.lane.b32.xlu0 %v926_v3, %s959_s27  ;;  %v1110_v0 = vld [vmem:[%s1038_s30 + $0x30] sm:$0xff] }
  0x17   : > { %507 = vrot.lane.b32.xlu1 %v928_v5, %s959_s27 }
  0x1a   : > { %509 = vrot.lane.b32.xlu0 %v929_v6, %s959_s27 }
  0x1b   : > { %511 = vrot.lane.b32.xlu1 %v930_v7, %s959_s27  ;;  %869 = vmatmul.mubr.msk.bf16.gmra.mrb[4].mxu0 %vm363_vm0, %v928_v5 }
  0x1c   : > { %872 = vmatprep.mubr.msk.bf16.mxu0 %vm363_vm0, %v929_v6 }
  0x1e   : > { %513 = vrot.lane.b32.xlu0 %v931_v8, %s959_s27 }
  0x1f   : > { %515 = vrot.lane.b32.xlu1 %v932_v9, %s959_s27 }
  0x23   : > { %873 = vmatmul.mubr.msk.bf16.gmra.mrb[8].mxu0 %vm363_vm0, %v930_v7 }
  0x24   : > { %876 = vmatprep.mubr.msk.bf16.mxu0 %vm363_vm0, %v931_v8 }
  0x2b   : > { %877 = vmatmul.mubr.msk.bf16.gmra.mrb[12].mxu0 %vm363_vm0, %v932_v9 }
  0x84   : > { %v502_v10 = vpop.permute.xlu0 %501 }
  0x85   : > { %884 = vmatprep.mubr.msk.bf16.mxu1 %vm363_vm0, %v502_v10  ;;  %v506_v11 = vpop.permute.xlu1 %505 }
  0x88   : > { %v504_v12 = vpop.permute.xlu0 %503 }
  0x89   : > { %885 = vmatmul.mubr.msk.bf16.vlgmr.msra.gmra.mrb[0].mxu1 %vm363_vm0, %v504_v12  ;;  %v508_v13 = vpop.permute.xlu1 %507 }
  0x8a   : > { %888 = vmatprep.mubr.msk.bf16.mxu1 %vm363_vm0, %v506_v11 }
  0x8c   : > { %v510_v14 = vpop.permute.xlu0 %509 }
  0x8d   : > { %v512_v15 = vpop.permute.xlu1 %511 }
  0x90   : > { %v514_v16 = vpop.permute.xlu0 %513 }
  0x91   : > { %889 = vmatmul.mubr.msk.bf16.gmra.mrb[4].mxu1 %vm363_vm0, %v508_v13  ;;  %v516_v17 = vpop.permute.xlu1 %515 }
  0x92   : > { %892 = vmatprep.mubr.msk.bf16.mxu1 %vm363_vm0, %v510_v14 }
  0x99   : > { %893 = vmatmul.mubr.msk.bf16.gmra.mrb[8].mxu1 %vm363_vm0, %v512_v15 }
  0x9a   : > { %896 = vmatprep.mubr.msk.bf16.mxu1 %vm363_vm0, %v514_v16 }
  0xa1   : > { %897 = vmatmul.mubr.msk.bf16.gmra.mrb[12].mxu1 %vm363_vm0, %v516_v17 }
  0xe6   : > { %v866_v20 = vpop.f32.mrb[0].mxu0 }
  0xe7   : > { %v431_v21 = vadd.f32 %v866_v20, %v1043_v18  ;;  %v422_v23 = vpop.f32.mrb[1].mxu0 }
  0xe8   : > { %v423_v24 = vadd.f32 %v1043_v18, %v422_v23  ;;  %v867_v25 = vpop.f32.mrb[2].mxu0 }
  0xe9   : > { %v487_v26 = vadd.f32 %v431_v21, %v1047_v19  ;;  %v434_v27 = vadd.f32 %v867_v25, %v1043_v18  ;;  %v425_v28 = vpop.f32.mrb[3].mxu0 }
  0xea   : > { %v485_v29 = vadd.f32 %v423_v24, %v1051_v22  ;;  %v426_v30 = vadd.f32 %v1043_v18, %v425_v28 }
  0xeb   : > { %658 = vst [vmem:[%s1056_s10 + $0x20] sm:$0xff] %v487_v26  ;;  %v488_v31 = vadd.f32 %v434_v27, %v1047_v19 }
  0xec   : > { %654 = vst [vmem:[%s1056_s10] sm:$0xff] %v485_v29  ;;  %v486_v32 = vadd.f32 %v426_v30, %v1051_v22 }
  0xed   : > { %660 = vst [vmem:[%s1056_s10 + $0x30] sm:$0xff] %v488_v31 }
  0xee   : > { %656 = vst [vmem:[%s1056_s10 + $0x10] sm:$0xff] %v486_v32  ;;  %v870_v34 = vpop.f32.mrb[4].mxu0 }
  0xef   : > { %v447_v35 = vadd.f32 %v870_v34, %v1043_v18  ;;  %v438_v37 = vpop.f32.mrb[5].mxu0 }
  0xf0   : > { %v439_v38 = vadd.f32 %v1043_v18, %v438_v37  ;;  %v871_v39 = vpop.f32.mrb[6].mxu0 }
  0xf1   : > { %v491_v40 = vadd.f32 %v447_v35, %v1070_v33  ;;  %v450_v41 = vadd.f32 %v871_v39, %v1043_v18  ;;  %v441_v42 = vpop.f32.mrb[7].mxu0 }
  0xf2   : > { %v489_v43 = vadd.f32 %v439_v38, %v1074_v36  ;;  %v442_v44 = vadd.f32 %v1043_v18, %v441_v42 }
  0xf3   : > { %666 = vst [vmem:[%s1056_s10 + $0x60] sm:$0xff] %v491_v40  ;;  %v492_v45 = vadd.f32 %v450_v41, %v1070_v33 }
  0xf4   : > { %662 = vst [vmem:[%s1056_s10 + $0x40] sm:$0xff] %v489_v43  ;;  %v490_v46 = vadd.f32 %v442_v44, %v1074_v36 }
  0xf5   : > { %668 = vst [vmem:[%s1056_s10 + $0x70] sm:$0xff] %v492_v45 }
  0xf6   : > { %664 = vst [vmem:[%s1056_s10 + $0x50] sm:$0xff] %v490_v46  ;;  %v874_v48 = vpop.f32.mrb[8].mxu0 }
  0xf7   : > { %v463_v49 = vadd.f32 %v874_v48, %v1043_v18  ;;  %v454_v51 = vpop.f32.mrb[9].mxu0 }
  0xf8   : > { %v455_v52 = vadd.f32 %v1043_v18, %v454_v51  ;;  %v875_v53 = vpop.f32.mrb[10].mxu0 }
  0xf9   : > { %v495_v54 = vadd.f32 %v463_v49, %v1088_v47  ;;  %v466_v55 = vadd.f32 %v875_v53, %v1043_v18  ;;  %v457_v56 = vpop.f32.mrb[11].mxu0 }
  0xfa   : > { %v493_v57 = vadd.f32 %v455_v52, %v1092_v50  ;;  %v458_v58 = vadd.f32 %v1043_v18, %v457_v56 }
  0xfb   : > { %674 = vst [vmem:[%s1056_s10 + $0xa0] sm:$0xff] %v495_v54  ;;  %v496_v59 = vadd.f32 %v466_v55, %v1088_v47 }
  0xfc   : > { %670 = vst [vmem:[%s1056_s10 + $0x80] sm:$0xff] %v493_v57  ;;  %v494_v60 = vadd.f32 %v458_v58, %v1092_v50 }
  0xfd   : > { %676 = vst [vmem:[%s1056_s10 + $0xb0] sm:$0xff] %v496_v59 }
  0xfe   : > { %672 = vst [vmem:[%s1056_s10 + $0x90] sm:$0xff] %v494_v60  ;;  %v878_v62 = vpop.f32.mrb[12].mxu0 }
  0xff   : > { %v479_v63 = vadd.f32 %v878_v62, %v1043_v18  ;;  %v470_v1 = vpop.f32.mrb[13].mxu0 }
 0x100   : > { %v471_v2 = vadd.f32 %v1043_v18, %v470_v1  ;;  %v879_v3 = vpop.f32.mrb[14].mxu0 }
 0x101   : > { %v499_v4 = vadd.f32 %v479_v63, %v1106_v61  ;;  %v482_v5 = vadd.f32 %v879_v3, %v1043_v18  ;;  %v473_v6 = vpop.f32.mrb[15].mxu0 }
 0x102   : > { %v497_v7 = vadd.f32 %v471_v2, %v1110_v0  ;;  %v474_v8 = vadd.f32 %v1043_v18, %v473_v6 }
 0x103   : > { %682 = vst [vmem:[%s1056_s10 + $0xe0] sm:$0xff] %v499_v4  ;;  %v500_v9 = vadd.f32 %v482_v5, %v1106_v61 }
 0x104   : > { %678 = vst [vmem:[%s1056_s10 + $0xc0] sm:$0xff] %v497_v7  ;;  %v498_v10 = vadd.f32 %v474_v8, %v1110_v0 }
 0x105   : > { %684 = vst [vmem:[%s1056_s10 + $0xf0] sm:$0xff] %v500_v9 }
 0x106   : > { %680 = vst [vmem:[%s1056_s10 + $0xd0] sm:$0xff] %v498_v10 }
 0x15c   : > { %v886_v11 = vpop.f32.mrb[0].mxu1 }
 0x15d   : > { %v584_v12 = vadd.f32 %v886_v11, %v1043_v18  ;;  %v575_v13 = vpop.f32.mrb[1].mxu1 }
 0x15e   : > { %v576_v14 = vadd.f32 %v1043_v18, %v575_v13  ;;  %v887_v15 = vpop.f32.mrb[2].mxu1 }
 0x15f   : > { %v640_v16 = vadd.f32 %v584_v12, %v1047_v19  ;;  %v587_v17 = vadd.f32 %v887_v15, %v1043_v18  ;;  %v578_v20 = vpop.f32.mrb[3].mxu1 }
 0x160   : > { %v638_v21 = vadd.f32 %v576_v14, %v1051_v22  ;;  %v579_v23 = vadd.f32 %v1043_v18, %v578_v20 }
 0x161   : > { %659 = vst [vmem:[%s1056_s10 + $0x28] sm:$0xff] %v640_v16  ;;  %v641_v24 = vadd.f32 %v587_v17, %v1047_v19 }
 0x162   : > { %655 = vst [vmem:[%s1056_s10 + $0x8] sm:$0xff] %v638_v21  ;;  %v639_v25 = vadd.f32 %v579_v23, %v1051_v22 }
 0x163   : > { %661 = vst [vmem:[%s1056_s10 + $0x38] sm:$0xff] %v641_v24 }
 0x164   : > { %657 = vst [vmem:[%s1056_s10 + $0x18] sm:$0xff] %v639_v25  ;;  %v890_v26 = vpop.f32.mrb[4].mxu1 }
 0x165   : > { %v600_v27 = vadd.f32 %v890_v26, %v1043_v18  ;;  %v591_v28 = vpop.f32.mrb[5].mxu1 }
 0x166   : > { %v592_v29 = vadd.f32 %v1043_v18, %v591_v28  ;;  %v891_v30 = vpop.f32.mrb[6].mxu1 }
 0x167   : > { %v644_v31 = vadd.f32 %v600_v27, %v1070_v33  ;;  %v603_v32 = vadd.f32 %v891_v30, %v1043_v18  ;;  %v594_v19 = vpop.f32.mrb[7].mxu1 }
 0x168   : > { %v642_v34 = vadd.f32 %v592_v29, %v1074_v36  ;;  %v595_v22 = vadd.f32 %v1043_v18, %v594_v19 }
 0x169   : > { %667 = vst [vmem:[%s1056_s10 + $0x68] sm:$0xff] %v644_v31  ;;  %v645_v35 = vadd.f32 %v603_v32, %v1070_v33 }
 0x16a   : > { %663 = vst [vmem:[%s1056_s10 + $0x48] sm:$0xff] %v642_v34  ;;  %v643_v37 = vadd.f32 %v595_v22, %v1074_v36 }
 0x16b   : > { %669 = vst [vmem:[%s1056_s10 + $0x78] sm:$0xff] %v645_v35 }
 0x16c   : > { %665 = vst [vmem:[%s1056_s10 + $0x58] sm:$0xff] %v643_v37  ;;  %v894_v38 = vpop.f32.mrb[8].mxu1 }
 0x16d   : > { %v616_v39 = vadd.f32 %v894_v38, %v1043_v18  ;;  %v607_v40 = vpop.f32.mrb[9].mxu1 }
 0x16e   : > { %v608_v41 = vadd.f32 %v1043_v18, %v607_v40  ;;  %v895_v42 = vpop.f32.mrb[10].mxu1 }
 0x16f   : > { %v648_v43 = vadd.f32 %v616_v39, %v1088_v47  ;;  %v619_v44 = vadd.f32 %v895_v42, %v1043_v18  ;;  %v610_v33 = vpop.f32.mrb[11].mxu1 }
 0x170   : > { %v646_v45 = vadd.f32 %v608_v41, %v1092_v50  ;;  %v611_v36 = vadd.f32 %v1043_v18, %v610_v33 }
 0x171   : > { %675 = vst [vmem:[%s1056_s10 + $0xa8] sm:$0xff] %v648_v43  ;;  %v649_v46 = vadd.f32 %v619_v44, %v1088_v47 }
 0x172   : > { %671 = vst [vmem:[%s1056_s10 + $0x88] sm:$0xff] %v646_v45  ;;  %v647_v48 = vadd.f32 %v611_v36, %v1092_v50 }
 0x173   : > { %677 = vst [vmem:[%s1056_s10 + $0xb8] sm:$0xff] %v649_v46 }
 0x174   : > { %673 = vst [vmem:[%s1056_s10 + $0x98] sm:$0xff] %v647_v48  ;;  %v898_v49 = vpop.f32.mrb[12].mxu1 }
 0x175   : > { %v632_v51 = vadd.f32 %v898_v49, %v1043_v18  ;;  %v623_v52 = vpop.f32.mrb[13].mxu1 }
 0x176   : > { %v624_v53 = vadd.f32 %v1043_v18, %v623_v52  ;;  %v899_v54 = vpop.f32.mrb[14].mxu1 }
 0x177   : > { %v652_v55 = vadd.f32 %v632_v51, %v1106_v61  ;;  %v635_v56 = vadd.f32 %v899_v54, %v1043_v18  ;;  %v626_v47 = vpop.f32.mrb[15].mxu1 }
 0x178   : > { %v650_v57 = vadd.f32 %v624_v53, %v1110_v0  ;;  %v627_v50 = vadd.f32 %v1043_v18, %v626_v47 }
 0x179   : > { %683 = vst [vmem:[%s1056_s10 + $0xe8] sm:$0xff] %v652_v55  ;;  %v653_v58 = vadd.f32 %v635_v56, %v1106_v61 }
 0x17a   : > { %679 = vst [vmem:[%s1056_s10 + $0xc8] sm:$0xff] %v650_v57  ;;  %v651_v59 = vadd.f32 %v627_v50, %v1110_v0 }
 0x17b   : > { %685 = vst [vmem:[%s1056_s10 + $0xf8] sm:$0xff] %v653_v58 }
 0x17c   : > { %681 = vst [vmem:[%s1056_s10 + $0xd8] sm:$0xff] %v651_v59 }
 0x17d PF: > { %s14_s17 = sadd.s32 1, %s957_s17   ;;  %s1185_s15 = smov %s953_s16 }
 0x17e   : > { %p11_p5 = scmp.ge.s32.totalorder %s14_s17, 4   ;;  %s1186_s16 = smov %s1188_s18 }
 0x180   :  { %13 = sbr.rel (!%p11_p5) target bundleno = 2 (0x2), region = 69 }

// kernel: pyramid_features.9
= control target key start
LH: loop header
LB: loop body
LE: loop exit
PB: predicated region body
PF: predicated region fallthrough
CT: control target
= control target key end

     0   :  { %8 = vsyncpa [#allocation4], 0  ;;  %s2507_s0 = inlined_call_operand.vmem [shape: bf16[2,4,6,384], index: 0, kind: input, shape index: {}]   ;;  %s2508_s1 = inlined_call_operand.vmem [shape: bf16[3,384,128], index: 1, kind: input, shape index: {}]   ;;  %s2509_s2 = inlined_call_operand.vmem [shape: f32[1,128], index: 2, kind: input, shape index: {}]   ;;  %s2510_s3 = inlined_call_operand.hbm [shape: f32[2,16,128], index: 3, kind: output, shape index: {}]  }
   0x1   :  { %10 = vsyncpa [#allocation4 + $0x1], 0  ;;  %s2023_s12 = smov 0   ;;  %s2025_s13 = smov 0  }
   0x2   :  { %s2027_s14 = smov 0   ;;  %s2029_s15 = smov 0  }
   0x3   :  { %s2031_s16 = smov 0   ;;  %s2033_s17 = smov 0  }
   0x4 LB: > { %s1433_s18 = sadd.s32 4294967295, %s1995_s17   ;;  %s1434_s19 = sadd.s32 4294967294, %s1995_s17   ;;  %s1995_s17 = sphi %s2033_s17, %s16_s17   ;;  %s1991_s16 = sphi %s2031_s16, %s2521_s16   ;;  %s1987_s15 = sphi %s2029_s15, %s2520_s15   ;;  %s1983_s14 = sphi %s2027_s14, %s2519_s14   ;;  %s1979_s13 = sphi %s2025_s13, %s2518_s13   ;;  %s1975_s12 = sphi %s2023_s12, %s2517_s12  }
   0x5   : > { %s28_s20 = sadd.s32 1, %s1991_s16  ;;  %s107_s21 = sadd.s32 1, %s1983_s14 }
   0x6   : > { %p30_p0 = scmp.ge.s32.totalorder %s28_s20, 2  ;;  %p117_p1 = scmp.ne.s32.totalorder %s1983_s14, %s1979_s13 }
   0x7   : > { %p118_p2 = scmp.eq.s32.totalorder %s1433_s18, 1  ;;  %p123_p3 = scmp.ne.s32.totalorder %s1979_s13, %s1975_s12 }
   0x8   : > { %s2523_s20 = smov (%p30_p0, %s28_s20), 0  ;;  %p124_p5 = scmp.eq.s32.totalorder %s1434_s19, 1 }
   0x9   : > { %p2063_p4 = por %p118_p2, %p117_p1  ;;  %s102_s23 = ssub.s32 %s1991_s16, %s2523_s20 }
   0xa   : > { %p1437_p6 = scmp.ge.s32.totalorder %s1995_s17, 1  ;;  %p105_p7 = scmp.eq.s32.totalorder %s102_s23, 0 }
   0xb   : > { %p2070_p8 = por %p124_p5, %p123_p3  ;;  %p162_p9 = scmp.lt.s32.totalorder %s1995_s17, 3 }
   0xc   : > { %s2076_s25 = scalar_select %p105_p7, %s1983_s14, %s107_s21  }
   0xd   : > { %p163_p10 = pnand %p1437_p6, %p162_p9 }
   0xe   : > { %v1845_v0 = vld [vmem:[%s2508_s1 + $0x40] sm:$0xff] (!%p163_p10)   ;;  %v1997_v1 = vmov (!%p163_p10), 0.0   ;;  %v1848_v4 = vld [vmem:[%s2508_s1 + $0x48] sm:$0xff] (!%p163_p10)   ;;  %v1851_v7 = vld [vmem:[%s2508_s1 + $0x50] sm:$0xff] (!%p163_p10)   ;;  %vm1998_vm0 = vmmov (!%p163_p10), 0   ;;  %p192_p11 = scmp.lt.s32.totalorder (!%p163_p10), %s1987_s15, 1  ;;  %v335_v21 = vlaneseq (!%p163_p10) }
   0xf   : > { %166 = sbr.rel (%p163_p10) target bundleno = 349 (0x15d), region = 32  ;;  %1724 = vmatprep.subr.bf16.mxu1 (!%p163_p10), %v1997_v1  ;;  %v1846_v2 = vld [vmem:[%s2508_s1] sm:$0xff] (!%p163_p10)   ;;  %1631 = vmatprep.subr.bf16.mxu0 (!%p163_p10), %v1845_v0  ;;  %v1849_v5 = vld [vmem:[%s2508_s1 + $0x8] sm:$0xff] (!%p163_p10)   ;;  %v1852_v8 = vld [vmem:[%s2508_s1 + $0x10] sm:$0xff] (!%p163_p10)   ;;  %v1999_v25 = vmov (!%p163_p10), 1983009808  }
  0x10   : > { %v1847_v3 = vld [vmem:[%s2508_s1 + $0x80] sm:$0xff] (!%p163_p10)   ;;  %1632 = vmatpush3.bf16.msra.mxu0 (!%p163_p10), %v1846_v2  ;;  %v1850_v6 = vld [vmem:[%s2508_s1 + $0x88] sm:$0xff] (!%p163_p10)   ;;  %1740 = vmatprep.mubr.msk.bf16.mxu1 (!%p163_p10), %vm1998_vm0, %v1997_v1  ;;  %v1853_v9 = vld [vmem:[%s2508_s1 + $0x90] sm:$0xff] (!%p163_p10)   ;;  %v333_v26 = vunpack.c.l.s4 (!%p163_p10), %v1999_v25  ;;  %v336_v27 = vshrl.u32 (!%p163_p10), %v335_v21, 7  ;;  %vm980_vm1 = vcmask (!%p163_p10), 1040384   ;;  %vm981_vm2 = vcmask (!%p163_p10), 1042434  }
  0x11   : > { %1725 = vmatpush3.bf16.msra.mxu1 (!%p163_p10), %v1847_v3  ;;  %1633 = vmatprep.subr.bf16.mxu0 (!%p163_p10), %v1848_v4  ;;  %v1854_v10 = vld [vmem:[%s2508_s1 + $0x58] sm:$0xff] (!%p163_p10)   ;;  %v1857_v13 = vld [vmem:[%s2508_s1 + $0x60] sm:$0xff] (!%p163_p10)   ;;  %v1860_v16 = vld [vmem:[%s2508_s1 + $0x68] sm:$0xff] (!%p163_p10)   ;;  %vm983_vm3 = vcmask (!%p163_p10), 1044484   ;;  %vm985_vm4 = vcmask (!%p163_p10), 1046534   ;;  %s188_s18 = sand.u32 (!%p163_p10), 1, %s1979_s13  }
  0x12   : > { %1726 = vmatprep.subr.bf16.mxu1 (!%p163_p10), %v1997_v1  ;;  %v1855_v11 = vld [vmem:[%s2508_s1 + $0x18] sm:$0xff] (!%p163_p10)   ;;  %v1858_v14 = vld [vmem:[%s2508_s1 + $0x20] sm:$0xff] (!%p163_p10)   ;;  %v1861_v17 = vld [vmem:[%s2508_s1 + $0x28] sm:$0xff] (!%p163_p10)   ;;  %v334_v32 = vunpack.c.0.s8 (!%p163_p10), %v333_v26  ;;  %vm598_vm7 = vsmask.f32 (!%p163_p10), 1280  ;;  %s1438_s19 = sshll.u32 (!%p163_p10), %s188_s18, 4 }
  0x13   : > { %v1856_v12 = vld [vmem:[%s2508_s1 + $0x98] sm:$0xff] (!%p163_p10)   ;;  %v1859_v15 = vld [vmem:[%s2508_s1 + $0xa0] sm:$0xff] (!%p163_p10)   ;;  %v1862_v18 = vld [vmem:[%s2508_s1 + $0xa8] sm:$0xff] (!%p163_p10)   ;;  %vm599_vm8 = vsmask.f32 (!%p163_p10), 3336  ;;  %s1630_s26 = sshll.u32 (!%p163_p10), %s1987_s15, 8 }
  0x14   : > { %1634 = vmatpush3.bf16.msra.mxu0 (!%p163_p10), %v1849_v5  ;;  %v1863_v19 = vld [vmem:[%s2508_s1 + $0x70] sm:$0xff] (!%p163_p10)   ;;  %v1866_v23 = vld [vmem:[%s2508_s1 + $0x78] sm:$0xff] (!%p163_p10)   ;;  %v1869_v36 = vld [vmem:[%s2508_s1 + $0x100] sm:$0xff] (!%p163_p10)   ;;  %v2177_v38 = vsub.s32 (!%p163_p10), %v334_v32, %v336_v27  ;;  %vm601_vm11 = vsmask.f32 (!%p163_p10), 5392  ;;  %s190_s27 = scalar_lea.vmem (!%p163_p10), [#allocation3], %s1438_s19  ;;  %s2457_s4 = scalar_lea.hbm (!%p163_p10), %s2510_s3, %s1630_s26 }
  0x15   : > { %1727 = vmatpush3.bf16.msra.mxu1 (!%p163_p10), %v1850_v6  ;;  %1635 = vmatprep.subr.bf16.mxu0 (!%p163_p10), %v1851_v7  ;;  %v1864_v20 = vld [vmem:[%s2508_s1 + $0x30] sm:$0xff] (!%p163_p10)   ;;  %v1867_v29 = vld [vmem:[%s2508_s1 + $0x38] sm:$0xff] (!%p163_p10)   ;;  %v1870_v2 = vld [vmem:[%s2508_s1 + $0xc0] sm:$0xff] (!%p163_p10)   ;;  %vm603_vm12 = vsmask.f32 (!%p163_p10), 7448  ;;  %s1351_s28 = sshll.u32 (!%p163_p10), %s190_s27, 4  ;;  %s2459_s28 = int_to_ptr.vmem [resolvable:$true] %s1351_s28 }
  0x16   : > { %1728 = vmatprep.subr.bf16.mxu1 %v1997_v1  ;;  %s193_s8 = scalar_select %p192_p11, %s1987_s15, 1  ;;  %v1865_v22 = vld [vmem:[%s2508_s1 + $0xb0] sm:$0xff]   ;;  %v1868_v33 = vld [vmem:[%s2508_s1 + $0xb8] sm:$0xff]   ;;  %v1872_v7 = vld [vmem:[%s2508_s1 + $0x108] sm:$0xff]  }
  0x17   : > { %v1878_v26 = vld [vmem:[%s2508_s1 + $0x118] sm:$0xff]   ;;  %vm2256_vm5 = vmor %vm980_vm1, %vm981_vm2  ;;  %s2461_s5 = scalar_lea.sflag [#allocation4], %s188_s18  ;;  %s1917_s15 = scalar_lea.vmem %s2459_s28, 256 }
  0x18   : > { %1636 = vmatpush3.bf16.msra.mxu0 %v1852_v8  ;;  %s1784_s23 = smul.u32 48, %s193_s8  ;;  %vm2280_vm6 = vmor %vm2256_vm5, %vm983_vm3  ;;  %p1918_p12 = scmp.ne.s32.totalorder %s2459_s28, %s1917_s15 }
  0x19   : > { %1729 = vmatpush3.bf16.msra.mxu1 %v1853_v9  ;;  %1637 = vmatprep.subr.bf16.mxu0 %v1854_v10  ;;  %v1871_v9 = vld [vmem:[%s2508_s1 + $0x140] sm:$0xff]   ;;  %vm986_vm9 = vmor %vm2280_vm6, %vm985_vm4  ;;  %s2000_s6 = smov [#allocation3]  }
  0x1a   : > { %1730 = vmatprep.subr.bf16.mxu1 %v1997_v1  ;;  %s2151_s9 = scalar_lea.vmem %s2507_s0, %s1784_s23  ;;  %vm600_vm10 = vmor %vm598_vm7, %vm599_vm8  ;;  %p1919_p13 = pnand %p1918_p12, %p2063_p4 }
  0x1b   : > { %v1440_v24 = vld.sshfl [vmem:[%s2151_s9] sm:$0x5f pattern:$0x76325410]  ;;  %vm602_vm13 = vmor %vm600_vm10, %vm601_vm11  ;;  %s1921_s7 = sshll.u32 %s2000_s6, 4  ;;  %s1922_s7 = int_to_ptr.vmem [resolvable:$false] %s1921_s7 }
  0x1c   : > { %1638 = vmatpush3.bf16.msra.mxu0 %v1855_v11  ;;  %v1442_v28 = vld.sshfl [vmem:[%s2151_s9 + $0xc] sm:$0x5f pattern:$0x76325410]  ;;  %vm604_vm14 = vmor %vm602_vm13, %vm603_vm12  ;;  %p1920_p0 = pneg %p1919_p13  ;;  %s1923_s8 = scalar_lea.vmem %s1922_s7, 512 }
  0x1d   : > { %1731 = vmatpush3.bf16.msra.mxu1 %v1856_v12  ;;  %1639 = vmatprep.subr.bf16.mxu0 %v1857_v13  ;;  %v1441_v30 = vld.sshfl [vmem:[%s2151_s9 + $0x8] sm:$0x13 pattern:$0x76325410]  ;;  %v1448_v31 = vcombine.low %v1440_v24, %v1442_v28  ;;  %p1924_p1 = scmp.lt.s32.totalorder %s2459_s28, %s1922_s7  ;;  %p1925_p2 = scmp.lt.s32.totalorder %s1923_s8, %s1917_s15 }
  0x1e   : > { %1732 = vmatprep.subr.bf16.mxu1 %v1997_v1  ;;  %v1444_v34 = vld.sshfl [vmem:[%s2151_s9 + $0x18] sm:$0x5f pattern:$0x76325410]  ;;  %v2170_v35 = vcombine.low %v1440_v24, %v1441_v30  ;;  %v2182_v41 = vcombine.high %v1440_v24, %v1441_v30  ;;  %v1876_v24 = vld [vmem:[%s2508_s1 + $0xd0] sm:$0xff]  }
  0x1f   : > { %v1443_v37 = vld.sshfl [vmem:[%s2151_s9 + $0x14] sm:$0x13 pattern:$0x76325410]  ;;  %v338_v43 = vrot.slane %v1448_v31, %v2177_v38  ;;  %p1926_p3 = por %p1925_p2, %p1924_p1 }
  0x20   : > { %1640 = vmatpush3.bf16.msra.mxu0 %v1858_v14  ;;  %v1446_v39 = vld.sshfl [vmem:[%s2151_s9 + $0x24] sm:$0x5f pattern:$0x76325410]  ;;  %v2180_v40 = vcombine.low %v1442_v28, %v1443_v37  ;;  %v606_v44 = vshrl.u32 %v2170_v35, 16  ;;  %v609_v45 = vshll.u32 %v2170_v35, 16  ;;  %v2189_v48 = vcombine.high %v1442_v28, %v1443_v37 }
  0x21   : > { %1733 = vmatpush3.bf16.msra.mxu1 %v1859_v15  ;;  %1641 = vmatprep.subr.bf16.mxu0 %v1860_v16  ;;  %v1450_v42 = vcombine.low %v1444_v34, %v1446_v39  ;;  %v1445_v46 = vld.sshfl [vmem:[%s2151_s9 + $0x20] sm:$0x13 pattern:$0x76325410]  ;;  %v615_v50 = vshll.u32 %v2182_v41, 16  ;;  %v1449_v54 = vcombine.low %v1441_v30, %v1443_v37  ;;  %v1548_v56 = vrot.slane %v2170_v35, 9  ;;  %p1927_p5 = pnand %p1926_p3, %p1920_p0 }
  0x22   : > { %1734 = vmatprep.subr.bf16.mxu1 %v1997_v1  ;;  %v2192_v49 = vcombine.low %v1444_v34, %v1445_v46  ;;  %v620_v51 = vshrl.u32 %v2180_v40, 16  ;;  %v1447_v52 = vld.sshfl [vmem:[%s2151_s9 + $0x2c] sm:$0x13 pattern:$0x76325410]  ;;  %v623_v55 = vshll.u32 %v2180_v40, 16  ;;  %v2199_v57 = vcombine.high %v1444_v34, %v1445_v46 }
  0x23   : > { %v352_v47 = vrot.slane %v1450_v42, %v2177_v38  ;;  %v2201_v58 = vrot.slane %v606_v44, 6  ;;  %v2203_v59 = vrot.slane %v609_v45, 7  ;;  %v629_v60 = vshll.u32 %v2189_v48, 16  ;;  %v1873_v14 = vld [vmem:[%s2508_s1 + $0xc8] sm:$0xff]   ;;  %v1877_v31 = vld [vmem:[%s2508_s1 + $0x150] sm:$0xff]   ;;  %v1880_v45 = vld [vmem:[%s2508_s1 + $0x158] sm:$0xff]  }
  0x24   : > { %1642 = vmatpush3.bf16.msra.mxu0 %v1861_v17  ;;  %v2206_v61 = vcombine.low %v1446_v39, %v1447_v52  ;;  %v2208_v62 = vrot.slane %v615_v50, 7  ;;  %v2210_v63 = vrot.slane %v620_v51, 6  ;;  %v634_v0 = vshrl.u32 %v2192_v49, 16 }
  0x25   : > { %1735 = vmatpush3.bf16.msra.mxu1 %v1862_v18  ;;  %1643 = vmatprep.subr.bf16.mxu0 %v1863_v19  ;;  %v361_v53 = vcombine.high %v338_v43, %v352_v47  ;;  %v637_v3 = vshll.u32 %v2192_v49, 16  ;;  %v360_v4 = vcombine.low %v338_v43, %v352_v47  ;;  %v1451_v5 = vcombine.low %v1445_v46, %v1447_v52  ;;  %v1875_v18 = vld [vmem:[%s2508_s1 + $0x110] sm:$0xff]   ;;  %v1910_v43 = vld [vmem:[%s2508_s1 + $0x228] sm:$0xff]  }
  0x26   : > { %1736 = vmatprep.subr.bf16.mxu1 %v1997_v1  ;;  %v345_v6 = vrot.slane %v1449_v54, %v2177_v38  ;;  %v625_v8 = vrot.slane %v623_v55, 7  ;;  %v2224_v10 = vrot.slane %v629_v60, 7  ;;  %v643_v11 = vshll.u32 %v2199_v57, 16  ;;  %v1885_v55 = vld [vmem:[%s2508_s1 + $0xe8] sm:$0xff]  }
  0x27   : > { %542 = vmatprep.mubr.bf16.mxu0 %v361_v53  ;;  %v359_v12 = vrot.slane %v1451_v5, %v2177_v38  ;;  %v648_v13 = vshrl.u32 %v2206_v61, 16  ;;  %v2232_v15 = vcombine.high %v1446_v39, %v1447_v52  ;;  %v636_v16 = vrot.slane %v634_v0, 6  ;;  %v1883_v53 = vld [vmem:[%s2508_s1 + $0x160] sm:$0xff]   ;;  %v1888_v0 = vld [vmem:[%s2508_s1 + $0xf0] sm:$0xff]  }
  0x28   : > { %1644 = vmatpush3.bf16.msra.mxu0 %v1864_v20  ;;  %v639_v19 = vrot.slane %v637_v3, 7  ;;  %v651_v20 = vshll.u32 %v2206_v61, 16  ;;  %v2238_v21 = vrot.slane %v643_v11, 7  ;;  %v989_v28 = vrot.slane %v2182_v41, 7 }
  0x29   : > { %1737 = vmatpush3.bf16.msra.mxu1 %v1865_v22  ;;  %1645 = vmatprep.subr.bf16.mxu0 %v1866_v23  ;;  %v362_v17 = vcombine.low %v345_v6, %v359_v12  ;;  %v1874_v22 = vld [vmem:[%s2508_s1 + $0x148] sm:$0xff]   ;;  %v650_v23 = vrot.slane %v648_v13, 6  ;;  %v657_v25 = vshll.u32 %v2232_v15, 16  ;;  %v1549_v30 = vrot.slane %v2180_v40, 9  ;;  %v1891_v12 = vld [vmem:[%s2508_s1 + $0xf8] sm:$0xff]  }
  0x2a   : > { %1738 = vmatprep.subr.bf16.mxu1 %v1997_v1  ;;  %v653_v27 = vrot.slane %v651_v20, 7  ;;  %v993_v32 = vrot.slane %v2189_v48, 7  ;;  %v1550_v34 = vrot.slane %v2192_v49, 9  ;;  %v612_v37 = vor.u32 %v2203_v59, %v2201_v58  ;;  %v1882_v48 = vld [vmem:[%s2508_s1 + $0xe0] sm:$0xff]   ;;  %v1884_v49 = vld [vmem:[%s2508_s1 + $0x128] sm:$0xff]  }
  0x2b   : > { %v659_v39 = vrot.slane %v657_v25, 7  ;;  %v997_v40 = vrot.slane %v2199_v57, 7  ;;  %v626_v41 = vor.u32 %v625_v8, %v2210_v63  ;;  %v640_v42 = vor.u32 %v639_v19, %v636_v16  ;;  %v1887_v57 = vld [vmem:[%s2508_s1 + $0x130] sm:$0xff]   ;;  %v1886_v58 = vld [vmem:[%s2508_s1 + $0x168] sm:$0xff]  }
  0x2c   : > { %1646 = vmatpush3.bf16.msra.mxu0 %v1867_v29  ;;  %v1551_v44 = vrot.slane %v2206_v61, 9  ;;  %v654_v46 = vor.u32 %v653_v27, %v650_v23  ;;  %v1001_v47 = vrot.slane %v2232_v15, 7  ;;  %v613_v50 = vrot.slane %v612_v37, 2  ;;  %v1889_v8 = vld [vmem:[%s2508_s1 + $0x170] sm:$0xff]   ;;  %v1893_v15 = vld [vmem:[%s2508_s1 + $0x1c0] sm:$0xff]   ;;  %v1896_v23 = vld [vmem:[%s2508_s1 + $0x1c8] sm:$0xff]  }
  0x2d   : > { %1739 = vmatpush3.bf16.msra.mxu1 %v1868_v33  ;;  %1662 = vmatprep.subr.bf16.mxu0 %v1869_v36  ;;  %v1879_v33 = vld [vmem:[%s2508_s1 + $0xd8] sm:$0xff]   ;;  %v1881_v36 = vld [vmem:[%s2508_s1 + $0x120] sm:$0xff]   ;;  %v627_v51 = vrot.slane %v626_v41, 2  ;;  %v641_v52 = vrot.slane %v640_v42, 2  ;;  %v2314_v59 = vsel %vm986_vm9, %v1548_v56, %v989_v28  ;;  %v2316_v60 = vsel %vm986_vm9, %v1549_v30, %v993_v32  ;;  %v1897_v27 = vld [vmem:[%s2508_s1 + $0x188] sm:$0xff]  }
  0x2e   : > { %1744 = vmatprep.subr.bf16.mxu1 %v1997_v1  ;;  %v655_v54 = vrot.slane %v654_v46, 2  ;;  %v2318_v61 = vsel %vm986_vm9, %v1550_v34, %v997_v40  ;;  %v2320_v63 = vsel %vm986_vm9, %v1551_v44, %v1001_v47  ;;  %v1890_v56 = vld [vmem:[%s2508_s1 + $0x138] sm:$0xff]   ;;  %v1899_v28 = vld [vmem:[%s2508_s1 + $0x1d0] sm:$0xff]   ;;  %v1898_v29 = vld [vmem:[%s2508_s1 + $0x208] sm:$0xff]   ;;  %v1053_v46 = vcombine.high %v2314_v59, %v2316_v60 }
  0x2f   : > { %543 = vmatmul.mubr.bf16.vlgmr.msra.gmra.mrb[0].mxu0 %v360_v4  ;;  %v632_v3 = vsel %vm604_vm14, %v627_v51, %v2224_v10  ;;  %v646_v35 = vsel %vm604_vm14, %v641_v52, %v2238_v21  ;;  %v1900_v30 = vld [vmem:[%s2508_s1 + $0x190] sm:$0xff]   ;;  %v1905_v34 = vld [vmem:[%s2508_s1 + $0x1e0] sm:$0xff]   ;;  %v1909_v41 = vld [vmem:[%s2508_s1 + $0x1a8] sm:$0xff]   ;;  %v1055_v47 = vcombine.high %v2318_v61, %v2320_v63 }
  0x30   : > { %1663 = vmatpush3.bf16.msra.mxu0 %v1870_v2  ;;  %1741 = vmatmul.mubr.bf16.vlgmr.msra.gmra.mrb[0].mxu1 %v362_v17  ;;  %v618_v2 = vsel %vm604_vm14, %v613_v50, %v2208_v62  ;;  %v660_v4 = vsel %vm604_vm14, %v655_v54, %v659_v39  ;;  %v1054_v62 = vcombine.low %v2318_v61, %v2320_v63  ;;  %v1901_v32 = vld [vmem:[%s2508_s1 + $0x210] sm:$0xff]   ;;  %v1906_v37 = vld [vmem:[%s2508_s1 + $0x1a0] sm:$0xff]   ;;  %v1908_v39 = vld [vmem:[%s2508_s1 + $0x1e8] sm:$0xff]  }
  0x31   : > { %1664 = vmatprep.subr.bf16.mxu0 %v1872_v7  ;;  %1745 = vmatpush3.bf16.msra.mxu1 %v1871_v9  ;;  %v710_v5 = vcombine.low %v618_v2, %v632_v3  ;;  %v712_v6 = vcombine.low %v646_v35, %v660_v4  ;;  %v1052_v7 = vcombine.low %v2314_v59, %v2316_v60  ;;  %v1907_v40 = vld [vmem:[%s2508_s1 + $0x220] sm:$0xff]   ;;  %v1911_v42 = vld [vmem:[%s2508_s1 + $0x1f0] sm:$0xff]  }
  0x32   : > { %1746 = vmatprep.subr.bf16.mxu1 %v1997_v1  ;;  %1760 = vmatprep.mubr.msk.bf16.mxu1 %vm1998_vm0, %v1997_v1  ;;  %v711_v9 = vcombine.high %v618_v2, %v632_v3  ;;  %v713_v10 = vcombine.high %v646_v35, %v660_v4  ;;  %v2352_v17 = vrot.slane %v1054_v62, %v2177_v38  ;;  %v1912_v44 = vld [vmem:[%s2508_s1 + $0x1b0] sm:$0xff]  }
  0x33   : > { %v720_v11 = vrot.slane %v710_v5, %v2177_v38  ;;  %v734_v13 = vrot.slane %v712_v6, %v2177_v38  ;;  %v2349_v16 = vrot.slane %v1052_v7, %v2177_v38  ;;  %v1069_v51 = vrot.slane %v1053_v46, %v2177_v38 }
  0x34   : > { %1665 = vmatpush3.bf16.msra.mxu0 %v1873_v14  ;;  %v727_v20 = vrot.slane %v711_v9, %v2177_v38  ;;  %v741_v21 = vrot.slane %v713_v10, %v2177_v38  ;;  %v1083_v52 = vrot.slane %v1055_v47, %v2177_v38 }
  0x35   : > { %1666 = vmatprep.subr.bf16.mxu0 %v1875_v18  ;;  %1747 = vmatpush3.bf16.msra.mxu1 %v1874_v22  ;;  %v743_v14 = vcombine.high %v720_v11, %v734_v13  ;;  %v1892_v18 = vld [vmem:[%s2508_s1 + $0x178] sm:$0xff]   ;;  %v742_v19 = vcombine.low %v720_v11, %v734_v13  ;;  %v1894_v22 = vld [vmem:[%s2508_s1 + $0x180] sm:$0xff]   ;;  %v1084_v50 = vcombine.low %v2349_v16, %v2352_v17 }
  0x36   : > { %1748 = vmatprep.subr.bf16.mxu1 %v1997_v1  ;;  %v744_v25 = vcombine.low %v727_v20, %v741_v21  ;;  %v1086_v54 = vcombine.low %v1069_v51, %v1083_v52 }
  0x37   : > { %924 = vmatprep.mubr.bf16.mxu0 %v743_v14 }
  0x38   : > { %1667 = vmatpush3.bf16.msra.mxu0 %v1876_v24  ;;  %v1085_v24 = vcombine.high %v2349_v16, %v2352_v17 }
  0x39   : > { %1668 = vmatprep.subr.bf16.mxu0 %v1878_v26  ;;  %1749 = vmatpush3.bf16.msra.mxu1 %v1877_v31  ;;  %v1895_v26 = vld [vmem:[%s2508_s1 + $0x200] sm:$0xff]   ;;  %v1902_v31 = vld [vmem:[%s2508_s1 + $0x1d8] sm:$0xff]  }
  0x3a   : > { %1750 = vmatprep.subr.bf16.mxu1 %v1997_v1 }
  0x3c   : > { %1669 = vmatpush3.bf16.msra.mxu0 %v1879_v33  ;;  %v1903_v33 = vld [vmem:[%s2508_s1 + $0x198] sm:$0xff]  }
  0x3d   : > { %1670 = vmatprep.subr.bf16.mxu0 %v1881_v36  ;;  %1751 = vmatpush3.bf16.msra.mxu1 %v1880_v45  ;;  %v1904_v36 = vld [vmem:[%s2508_s1 + $0x218] sm:$0xff]  }
  0x3e   : > { %1752 = vmatprep.subr.bf16.mxu1 %v1997_v1  ;;  %v1914_v45 = vld [vmem:[%s2508_s1 + $0x1f8] sm:$0xff]  }
  0x40   : > { %1671 = vmatpush3.bf16.msra.mxu0 %v1882_v48  ;;  %v1913_v48 = vld [vmem:[%s2508_s1 + $0x230] sm:$0xff]  }
  0x41   : > { %1672 = vmatprep.subr.bf16.mxu0 %v1884_v49  ;;  %1753 = vmatpush3.bf16.msra.mxu1 %v1883_v53  ;;  %v1915_v49 = vld [vmem:[%s2508_s1 + $0x1b8] sm:$0xff]  }
  0x42   : > { %1754 = vmatprep.subr.bf16.mxu1 %v1997_v1  ;;  %v1916_v53 = vld [vmem:[%s2508_s1 + $0x238] sm:$0xff]  }
  0x44   : > { %1673 = vmatpush3.bf16.msra.mxu0 %v1885_v55 }
  0x45   : > { %1674 = vmatprep.subr.bf16.mxu0 %v1887_v57  ;;  %1755 = vmatpush3.bf16.msra.mxu1 %v1886_v58 }
  0x46   : > { %1756 = vmatprep.subr.bf16.mxu1 %v1997_v1 }
  0x48   : > { %1675 = vmatpush3.bf16.msra.mxu0 %v1888_v0 }
  0x49   : > { %1676 = vmatprep.subr.bf16.mxu0 %v1890_v56  ;;  %1757 = vmatpush3.bf16.msra.mxu1 %v1889_v8 }
  0x4a   : > { %1758 = vmatprep.subr.bf16.mxu1 %v1997_v1 }
  0x4c   : > { %1677 = vmatpush3.bf16.msra.mxu0 %v1891_v12 }
  0x4d   : > { %1693 = vmatprep.subr.bf16.mxu0 %v1893_v15  ;;  %1759 = vmatpush3.bf16.msra.mxu1 %v1892_v18 }
  0x4e   : > { %1764 = vmatprep.subr.bf16.mxu1 %v1997_v1 }
  0x4f   : > { %925 = vmatmul.mubr.bf16.vlgmr.msra.gmra.mrb[4].mxu0 %v742_v19 }
  0x50   : > { %1694 = vmatpush3.bf16.msra.mxu0 %v1894_v22  ;;  %1266 = vmatprep.mubr.bf16.mxu0 %v1085_v24  ;;  %v1624_v24 = vld [vmem:[%s2509_s2] ss:$0 sm:$0xff] }
  0x51   : > { %1695 = vmatprep.subr.bf16.mxu0 %v1896_v23  ;;  %1761 = vmatmul.mubr.bf16.vlgmr.msra.gmra.mrb[4].mxu1 %v744_v25 }
  0x52   : > { %1765 = vmatpush3.bf16.msra.mxu1 %v1895_v26  ;;  %1780 = vmatprep.mubr.msk.bf16.mxu1 %vm1998_vm0, %v1997_v1 }
  0x53   : > { %1766 = vmatprep.subr.bf16.mxu1 %v1997_v1 }
  0x54   : > { %1696 = vmatpush3.bf16.msra.mxu0 %v1897_v27 }
  0x55   : > { %1697 = vmatprep.subr.bf16.mxu0 %v1899_v28 }
  0x56   : > { %1767 = vmatpush3.bf16.msra.mxu1 %v1898_v29 }
  0x57   : > { %1768 = vmatprep.subr.bf16.mxu1 %v1997_v1 }
  0x58   : > { %1698 = vmatpush3.bf16.msra.mxu0 %v1900_v30 }
  0x59   : > { %1699 = vmatprep.subr.bf16.mxu0 %v1902_v31 }
  0x5a   : > { %1769 = vmatpush3.bf16.msra.mxu1 %v1901_v32 }
  0x5b   : > { %1770 = vmatprep.subr.bf16.mxu1 %v1997_v1 }
  0x5c   : > { %1700 = vmatpush3.bf16.msra.mxu0 %v1903_v33 }
  0x5d   : > { %1701 = vmatprep.subr.bf16.mxu0 %v1905_v34 }
  0x5e   : > { %1771 = vmatpush3.bf16.msra.mxu1 %v1904_v36 }
  0x5f   : > { %1772 = vmatprep.subr.bf16.mxu1 %v1997_v1 }
  0x60   : > { %1702 = vmatpush3.bf16.msra.mxu0 %v1906_v37 }
  0x61   : > { %1703 = vmatprep.subr.bf16.mxu0 %v1908_v39 }
  0x62   : > { %1773 = vmatpush3.bf16.msra.mxu1 %v1907_v40 }
  0x63   : > { %1774 = vmatprep.subr.bf16.mxu1 %v1997_v1 }
  0x64   : > { %1704 = vmatpush3.bf16.msra.mxu0 %v1909_v41 }
  0x65   : > { %1705 = vmatprep.subr.bf16.mxu0 %v1911_v42 }
  0x66   : > { %1775 = vmatpush3.bf16.msra.mxu1 %v1910_v43 }
  0x67   : > { %1776 = vmatprep.subr.bf16.mxu1 %v1997_v1 }
  0x68   : > { %1706 = vmatpush3.bf16.msra.mxu0 %v1912_v44 }
  0x69   : > { %1707 = vmatprep.subr.bf16.mxu0 %v1914_v45 }
  0x6a   : > { %1777 = vmatpush3.bf16.msra.mxu1 %v1913_v48 }
  0x6b   : > { %1778 = vmatprep.subr.bf16.mxu1 %v1997_v1 }
  0x6c   : > { %1708 = vmatpush3.bf16.msra.mxu0 %v1915_v49 }
  0x6e   : > { %1779 = vmatpush3.bf16.msra.mxu1 %v1916_v53 }
  0x6f   : > { %1267 = vmatmul.mubr.bf16.vlgmr.msra.gmra.mrb[8].mxu0 %v1084_v50 }
  0x71   : > { %1781 = vmatmul.mubr.bf16.vlgmr.msra.gmra.mrb[8].mxu1 %v1086_v54 }
 0x102   : > { %v1647_v55 = vpop.f32.mrb[0].mxu0 }
 0x103   : > { %v1648_v57 = vpop.f32.mrb[1].mxu0  ;;  %v585_v61 = vpop.f32.mrb[0].mxu1 }
 0x104   : > { %v1649_v58 = vadd.f32 %v1648_v57, %v1647_v55  ;;  %v1650_v59 = vpop.f32.mrb[2].mxu0  ;;  %v1742_v0 = vpop.f32.mrb[1].mxu1 }
 0x105   : > { %v1651_v60 = vpop.f32.mrb[3].mxu0  ;;  %v588_v2 = vpop.f32.mrb[2].mxu1 }
 0x106   : > { %v1652_v63 = vadd.f32 %v1651_v60, %v1650_v59  ;;  %v586_v38 = vadd.f32 %v1649_v58, %v585_v61  ;;  %v1743_v35 = vpop.f32.mrb[3].mxu1 }
 0x108   : > { %v589_v3 = vadd.f32 %v1652_v63, %v588_v2 }
 0x122   : > { %v1678_v56 = vpop.f32.mrb[4].mxu0 }
 0x123   : > { %v1679_v4 = vpop.f32.mrb[5].mxu0 }
 0x124   : > { %v1680_v1 = vadd.f32 %v1679_v4, %v1678_v56  ;;  %v1681_v5 = vpop.f32.mrb[6].mxu0  ;;  %v967_v7 = vpop.f32.mrb[4].mxu1 }
 0x125   : > { %v1682_v6 = vpop.f32.mrb[7].mxu0  ;;  %v1762_v9 = vpop.f32.mrb[5].mxu1 }
 0x126   : > { %v1683_v62 = vadd.f32 %v1682_v6, %v1681_v5  ;;  %v968_v8 = vadd.f32 %v1680_v1, %v967_v7  ;;  %v970_v10 = vpop.f32.mrb[6].mxu1 }
 0x127   : > { %v1763_v13 = vpop.f32.mrb[7].mxu1 }
 0x128   : > { %v976_v11 = vadd.f32 %v968_v8, %v586_v38  ;;  %v971_v12 = vadd.f32 %v1683_v62, %v970_v10 }
 0x12a   : > { %v977_v14 = vadd.f32 %v971_v12, %v589_v3 }
 0x142   : > { %v1709_v15 = vpop.f32.mrb[8].mxu0 }
 0x143   : > { %v1710_v16 = vpop.f32.mrb[9].mxu0 }
 0x144   : > { %v1711_v17 = vadd.f32 %v1710_v16, %v1709_v15  ;;  %v1712_v18 = vpop.f32.mrb[10].mxu0  ;;  %v1309_v20 = vpop.f32.mrb[8].mxu1 }
 0x145   : > { %v1713_v19 = vpop.f32.mrb[11].mxu0  ;;  %v1782_v23 = vpop.f32.mrb[9].mxu1 }
 0x146   : > { %v1714_v21 = vadd.f32 %v1713_v19, %v1712_v18  ;;  %v1310_v22 = vadd.f32 %v1711_v17, %v1309_v20  ;;  %v1312_v25 = vpop.f32.mrb[10].mxu1 }
 0x147   : > { %v1783_v28 = vpop.f32.mrb[11].mxu1 }
 0x148   : > { %v1318_v26 = vadd.f32 %v1310_v22, %v976_v11  ;;  %v1313_v27 = vadd.f32 %v1714_v21, %v1312_v25 }
 0x14a   : > { %v1331_v29 = vadd.f32 %v1624_v24, %v1318_v26  ;;  %v1319_v30 = vadd.f32 %v1313_v27, %v977_v14 }
 0x14c   : > { %1333 = vst [vmem:[%s190_s27] sm:$0xff] %v1331_v29  ;;  %v1332_v31 = vadd.f32 %v1624_v24, %v1319_v30 }
 0x14e   : > { %1334 = vst [vmem:[%s190_s27 + $0x8] sm:$0xff] %v1332_v31 }
 0x14f   : > { %1930 = shalt.err (!%p1927_p5)
}
 0x150   : > { %s1931_s9 = scalar_lea.hbm %s2457_s4, 256  ;;  %s1935_s18 = scalar_lea.hbm %s2510_s3, 512 }
 0x151   : > { %p1932_p6 = scmp.ne.s32.totalorder %s2457_s4, %s1931_s9  ;;  %p1936_p10 = scmp.lt.u32.totalorder %s2457_s4, %s2510_s3 }
 0x152   : > { %p1937_p11 = scmp.lt.u32.totalorder %s1935_s18, %s1931_s9  ;;  %p1939_p13 = scmp.lt.u32.totalorder %s1931_s9, %s2457_s4 }
 0x153   : > { %p1933_p7 = pnand %p1932_p6, %p2063_p4 }
 0x154   : > { %p1938_p12 = por %p1937_p11, %p1936_p10 }
 0x155   : > { %p1934_p9 = pneg %p1933_p7 }
 0x156   : > { %p1940_p0 = por %p1939_p13, %p1938_p12 }
 0x158   : > { %p1941_p1 = pnand %p1940_p0, %p1934_p9 }
 0x15a   : > { %1944 = shalt.err (!%p1941_p1)
}
 0x15b   : > { %s2001_s23 = smov 128   ;;  %s2002_s26 = smov 8  }
 0x15c   : > { %1785 = dma.vmem_to_hbm [thread:$0]  (%p2063_p4), %s2459_s28, 256, %s2457_s4, %s2461_s5, %s2001_s23, %s2001_s23, %s2002_s26  }
 0x15d PF: > { %p1791_p2 = scmp.ge.s32.totalorder %s1995_s17, 2  ;;  %s1366_s27 = sand.u32 1, %s1975_s12  }
 0x15e   : > { %s1367_s29 = scalar_lea.sflag [#allocation4], %s1366_s27 }
 0x15f   : > { %p1788_p3 = pnand %p1791_p2, %p2070_p8 }
 0x161   : > { %1970 = dma.done.wait (!%p1788_p3), %s1367_s29, 256  }
 0x162   : > { %1972 = vsyncadd (!%p1788_p3), %s1367_s29, 4294967040  ;;  %s16_s17 = sadd.s32 1, %s1995_s17   ;;  %s2517_s12 = smov %s1979_s13 }
 0x163   : > { %p13_p5 = scmp.ge.s32.totalorder %s16_s17, 4   ;;  %s2518_s13 = smov %s1983_s14 }
 0x164   : > { %s2519_s14 = smov %s2076_s25  ;;  %s2520_s15 = smov %s1991_s16 }
 0x165   : > { %s2521_s16 = smov %s2523_s20  ;;  %15 = sbr.rel (!%p13_p5) target bundleno = 4 (0x4), region = 69 }
 0x16c   :  { %1372 = vsyncpa [#allocation4], 1 }
 0x16d   :  { %1374 = vsyncpa [#allocation4 + $0x1], 1 }

// kernel: pyramid_features.11
= control target key start
LH: loop header
LB: loop body
LE: loop exit
PB: predicated region body
PF: predicated region fallthrough
CT: control target
= control target key end

     0   :  { %8 = vsyncpa [#allocation4], 0  ;;  %s3287_s0 = inlined_call_operand.vmem [shape: bf16[2,8,10,384], index: 0, kind: input, shape index: {}]   ;;  %s3288_s1 = inlined_call_operand.vmem [shape: bf16[3,384,128], index: 1, kind: input, shape index: {}]   ;;  %s3289_s2 = inlined_call_operand.vmem [shape: f32[1,128], index: 2, kind: input, shape index: {}]   ;;  %s3290_s3 = inlined_call_operand.hbm [shape: f32[2,64,128], index: 3, kind: output, shape index: {}]  }
   0x1   :  { %10 = vsyncpa [#allocation4 + $0x1], 0  ;;  %s2606_s12 = smov 0   ;;  %s2608_s13 = smov 0  }
   0x2   :  { %s2610_s14 = smov 0   ;;  %s2612_s15 = smov 0  }
   0x3   :  { %s2614_s16 = smov 0   ;;  %s2616_s17 = smov 0  }
   0x4 LB: > { %s1859_s18 = sadd.s32 4294967295, %s2581_s17   ;;  %s1860_s19 = sadd.s32 4294967294, %s2581_s17   ;;  %s2581_s17 = sphi %s2616_s17, %s16_s17   ;;  %s2577_s16 = sphi %s2614_s16, %s3303_s16   ;;  %s2573_s15 = sphi %s2612_s15, %s3302_s15   ;;  %s2569_s14 = sphi %s2610_s14, %s3301_s14   ;;  %s2565_s13 = sphi %s2608_s13, %s3300_s13   ;;  %s2561_s12 = sphi %s2606_s12, %s3299_s12  }
   0x5   : > { %s28_s20 = sadd.s32 1, %s2577_s16  ;;  %s107_s21 = sadd.s32 1, %s2569_s14 }
   0x6   : > { %p30_p0 = scmp.ge.s32.totalorder %s28_s20, 2  ;;  %p117_p1 = scmp.ne.s32.totalorder %s2569_s14, %s2565_s13 }
   0x7   : > { %p118_p2 = scmp.eq.s32.totalorder %s1859_s18, 1  ;;  %p123_p3 = scmp.ne.s32.totalorder %s2565_s13, %s2561_s12 }
   0x8   : > { %s3305_s20 = smov (%p30_p0, %s28_s20), 0  ;;  %p124_p5 = scmp.eq.s32.totalorder %s1860_s19, 1 }
   0x9   : > { %p2646_p4 = por %p118_p2, %p117_p1  ;;  %s102_s23 = ssub.s32 %s2577_s16, %s3305_s20 }
   0xa   : > { %p1863_p6 = scmp.ge.s32.totalorder %s2581_s17, 1  ;;  %p105_p7 = scmp.eq.s32.totalorder %s102_s23, 0 }
   0xb   : > { %p2653_p8 = por %p124_p5, %p123_p3  ;;  %p162_p9 = scmp.lt.s32.totalorder %s2581_s17, 3 }
   0xc   : > { %s2659_s25 = scalar_select %p105_p7, %s2569_s14, %s107_s21  }
   0xd   : > { %p163_p10 = pnand %p1863_p6, %p162_p9 }
   0xe   : > { %v2419_v0 = vld [vmem:[%s3288_s1 + $0x40] sm:$0xff] (!%p163_p10)   ;;  %v2422_v3 = vld [vmem:[%s3288_s1 + $0x48] sm:$0xff] (!%p163_p10)   ;;  %v2425_v6 = vld [vmem:[%s3288_s1 + $0x50] sm:$0xff] (!%p163_p10)   ;;  %p192_p11 = scmp.lt.s32.totalorder (!%p163_p10), %s2573_s15, 1  ;;  %vm630_vm0 = vsmask.f32 (!%p163_p10), 3328 }
   0xf   : > { %166 = sbr.rel (%p163_p10) target bundleno = 376 (0x178), region = 32  ;;  %v2420_v1 = vld [vmem:[%s3288_s1 + $0x80] sm:$0xff] (!%p163_p10)   ;;  %2093 = vmatprep.subr.bf16.mxu0 (!%p163_p10), %v2419_v0  ;;  %v2423_v4 = vld [vmem:[%s3288_s1 + $0x88] sm:$0xff] (!%p163_p10)   ;;  %v2426_v7 = vld [vmem:[%s3288_s1 + $0x90] sm:$0xff] (!%p163_p10)   ;;  %vm631_vm1 = vsmask.f32 (!%p163_p10), 7440 }
  0x10   : > { %v2421_v2 = vld [vmem:[%s3288_s1] sm:$0xff] (!%p163_p10)   ;;  %2249 = vmatprep.subr.bf16.mxu1 (!%p163_p10), %v2420_v1  ;;  %v2424_v5 = vld [vmem:[%s3288_s1 + $0x8] sm:$0xff] (!%p163_p10)   ;;  %v2427_v8 = vld [vmem:[%s3288_s1 + $0x10] sm:$0xff] (!%p163_p10)   ;;  %vm1268_vm3 = vcmask (!%p163_p10), 1042432   ;;  %vm1269_vm4 = vcmask (!%p163_p10), 1046532   ;;  %s2092_s5 = sshll.u32 (!%p163_p10), %s2573_s15, 10 }
  0x11   : > { %2094 = vmatpush3.bf16.msra.mxu0 (!%p163_p10), %v2421_v2  ;;  %2250 = vmatpush3.bf16.msra.mxu1 (!%p163_p10), %v2420_v1  ;;  %v2428_v9 = vld [vmem:[%s3288_s1 + $0x58] sm:$0xff] (!%p163_p10)   ;;  %v2431_v12 = vld [vmem:[%s3288_s1 + $0x60] sm:$0xff] (!%p163_p10)   ;;  %v2434_v15 = vld [vmem:[%s3288_s1 + $0x68] sm:$0xff] (!%p163_p10)   ;;  %s2583_s11 = smov (!%p163_p10), [#allocation3]  }
  0x12   : > { %2095 = vmatprep.subr.bf16.mxu0 (!%p163_p10), %v2422_v3  ;;  %2251 = vmatprep.subr.bf16.mxu1 (!%p163_p10), %v2423_v4  ;;  %v2429_v10 = vld [vmem:[%s3288_s1 + $0x98] sm:$0xff] (!%p163_p10)   ;;  %v2432_v13 = vld [vmem:[%s3288_s1 + $0xa0] sm:$0xff] (!%p163_p10)   ;;  %v2435_v16 = vld [vmem:[%s3288_s1 + $0xa8] sm:$0xff] (!%p163_p10)   ;;  %s2507_s18 = sshll.u32 (!%p163_p10), %s2583_s11, 4  ;;  %s2508_s18 = int_to_ptr.vmem [resolvable:$false] %s2507_s18 }
  0x13   : > { %v2430_v11 = vld [vmem:[%s3288_s1 + $0x18] sm:$0xff] (!%p163_p10)   ;;  %v2433_v14 = vld [vmem:[%s3288_s1 + $0x20] sm:$0xff] (!%p163_p10)   ;;  %v2436_v17 = vld [vmem:[%s3288_s1 + $0x28] sm:$0xff] (!%p163_p10)   ;;  %s2509_s19 = scalar_lea.vmem (!%p163_p10), %s2508_s18, 2048 }
  0x14   : > { %v2437_v18 = vld [vmem:[%s3288_s1 + $0x70] sm:$0xff] (!%p163_p10)   ;;  %v2440_v21 = vld [vmem:[%s3288_s1 + $0x78] sm:$0xff] (!%p163_p10)   ;;  %v2446_v37 = vld [vmem:[%s3288_s1 + $0x100] sm:$0xff] (!%p163_p10)  }
  0x15   : > { %2096 = vmatpush3.bf16.msra.mxu0 (!%p163_p10), %v2424_v5  ;;  %2252 = vmatpush3.bf16.msra.mxu1 (!%p163_p10), %v2423_v4  ;;  %v2438_v19 = vld [vmem:[%s3288_s1 + $0xb0] sm:$0xff] (!%p163_p10)   ;;  %v2441_v25 = vld [vmem:[%s3288_s1 + $0xb8] sm:$0xff] (!%p163_p10)   ;;  %v2447_v38 = vld [vmem:[%s3288_s1 + $0x140] sm:$0xff] (!%p163_p10)  }
  0x16   : > { %2097 = vmatprep.subr.bf16.mxu0 %v2425_v6  ;;  %2253 = vmatprep.subr.bf16.mxu1 %v2426_v7  ;;  %s193_s10 = scalar_select %p192_p11, %s2573_s15, 1  ;;  %v2439_v20 = vld [vmem:[%s3288_s1 + $0x30] sm:$0xff]   ;;  %v2442_v32 = vld [vmem:[%s3288_s1 + $0x38] sm:$0xff]   ;;  %v2449_v48 = vld [vmem:[%s3288_s1 + $0xc0] sm:$0xff]  }
  0x17   : > { %v2450_v50 = vld [vmem:[%s3288_s1 + $0x108] sm:$0xff]   ;;  %v2455_v61 = vld [vmem:[%s3288_s1 + $0x110] sm:$0xff]   ;;  %vm2942_vm2 = vmor %vm630_vm0, %vm631_vm1 }
  0x18   : > { %s2361_s27 = smul.u32 192, %s193_s10  ;;  %v2451_v52 = vld [vmem:[%s3288_s1 + $0x148] sm:$0xff]   ;;  %v2456_v63 = vld [vmem:[%s3288_s1 + $0x150] sm:$0xff]   ;;  %vm3130_vm5 = vmor %vm1268_vm3, %vm1269_vm4 }
  0x19   : > { %2098 = vmatpush3.bf16.msra.mxu0 %v2427_v8  ;;  %2254 = vmatpush3.bf16.msra.mxu1 %v2426_v7  ;;  %v2452_v54 = vld [vmem:[%s3288_s1 + $0xc8] sm:$0xff]   ;;  %v2457_v4 = vld [vmem:[%s3288_s1 + $0xd0] sm:$0xff]   ;;  %v2458_v7 = vld [vmem:[%s3288_s1 + $0x118] sm:$0xff]  }
  0x1a   : > { %2099 = vmatprep.subr.bf16.mxu0 %v2428_v9  ;;  %2255 = vmatprep.subr.bf16.mxu1 %v2429_v10  ;;  %s2726_s9 = scalar_lea.vmem %s3287_s0, %s2361_s27  ;;  %s188_s27 = sand.u32 1, %s2565_s13  }
  0x1b   : > { %v2735_v22 = vld [vmem:[%s2726_s9] sm:$0xff]  ;;  %v2738_v23 = vld [vmem:[%s2726_s9 + $0x18] sm:$0xff]  ;;  %v2741_v24 = vld [vmem:[%s2726_s9 + $0x8] sm:$0xf]  ;;  %s1864_s28 = sshll.u32 %s188_s27, 6  ;;  %s3241_s10 = scalar_lea.sflag [#allocation4], %s188_s27 }
  0x1c   : > { %v1867_v26 = vcombine.high %v2735_v22, %v2738_v23  ;;  %v2749_v27 = vld [vmem:[%s2726_s9 + $0x20] sm:$0xf]  ;;  %v648_v28 = vshrl.u32 %v2741_v24, 16  ;;  %v651_v30 = vshll.u32 %v2741_v24, 16  ;;  %v1987_v34 = vrot.slane %v2741_v24, 9  ;;  %v2801_v55 = vld [vmem:[%s2726_s9 + $0x30] sm:$0xff] }
  0x1d   : > { %2100 = vmatpush3.bf16.msra.mxu0 %v2430_v11  ;;  %2256 = vmatpush3.bf16.msra.mxu1 %v2429_v10  ;;  %v1868_v29 = vcombine.low %v2741_v24, %v2749_v27  ;;  %v676_v31 = vshrl.u32 %v2749_v27, 16  ;;  %v679_v33 = vshll.u32 %v2749_v27, 16  ;;  %v2762_v35 = vld [vmem:[%s2726_s9 + $0x38] sm:$0xf]  ;;  %v2773_v39 = vld [vmem:[%s2726_s9 + $0x50] sm:$0xf]  ;;  %v1866_v45 = vcombine.low %v2735_v22, %v2738_v23 }
  0x1e   : > { %2101 = vmatprep.subr.bf16.mxu0 %v2431_v12  ;;  %2257 = vmatprep.subr.bf16.mxu1 %v2432_v13  ;;  %v2764_v36 = vrot.slane %v648_v28, 4  ;;  %v704_v40 = vshrl.u32 %v2762_v35, 16  ;;  %v2776_v41 = vrot.slane %v651_v30, 5  ;;  %v1989_v43 = vrot.slane %v2749_v27, 9  ;;  %v2805_v58 = vld [vmem:[%s2726_s9 + $0x48] sm:$0xff]  ;;  %v2459_v10 = vld [vmem:[%s3288_s1 + $0x158] sm:$0xff]  }
  0x1f   : > { %524 = vmatprep.mubr.bf16.mxu0 %v1867_v26  ;;  %2265 = vmatprep.mubr.bf16.mxu1 %v1868_v29  ;;  %v2778_v42 = vrot.slane %v676_v31, 4  ;;  %v707_v44 = vshll.u32 %v2762_v35, 16  ;;  %v1871_v46 = vcombine.low %v2762_v35, %v2773_v39  ;;  %v732_v47 = vshrl.u32 %v2773_v39, 16  ;;  %v2830_v11 = vld [vmem:[%s2726_s9 + $0x60] sm:$0xff]  ;;  %v2833_v12 = vld [vmem:[%s2726_s9 + $0x78] sm:$0xff]  ;;  %s3219_s4 = scalar_lea.vmem [#allocation3], %s1864_s28 }
  0x20   : > { %v735_v49 = vshll.u32 %v2773_v39, 16  ;;  %v706_v51 = vrot.slane %v704_v40, 4  ;;  %v634_v56 = vshrl.u32 %v2735_v22, 16  ;;  %v1870_v60 = vcombine.high %v2801_v55, %v2805_v58  ;;  %v2464_v29 = vld [vmem:[%s3288_s1 + $0x160] sm:$0xff]   ;;  %s1777_s6 = sshll.u32 %s3219_s4, 4  ;;  %s3235_s6 = int_to_ptr.vmem [resolvable:$true] %s1777_s6 }
  0x21   : > { %2102 = vmatpush3.bf16.msra.mxu0 %v2433_v14  ;;  %2258 = vmatpush3.bf16.msra.mxu1 %v2432_v13  ;;  %v709_v53 = vrot.slane %v707_v44, 5  ;;  %v734_v57 = vrot.slane %v732_v47, 4  ;;  %v681_v62 = vrot.slane %v679_v33, 5  ;;  %v637_v2 = vshll.u32 %v2735_v22, 16  ;;  %v2877_v44 = vld [vmem:[%s2726_s9 + $0x68] sm:$0xf]  ;;  %p2510_p1 = scmp.lt.s32.totalorder %s3235_s6, %s2508_s18 }
  0x22   : > { %2103 = vmatprep.subr.bf16.mxu0 %v2434_v15  ;;  %2259 = vmatprep.subr.bf16.mxu1 %v2435_v16  ;;  %v737_v59 = vrot.slane %v735_v49, 5  ;;  %v636_v1 = vrot.slane %v634_v56, 4  ;;  %v1869_v3 = vcombine.low %v2801_v55, %v2805_v58  ;;  %v662_v5 = vshrl.u32 %v2738_v23, 16  ;;  %v2882_v47 = vld [vmem:[%s2726_s9 + $0x80] sm:$0xf]  ;;  %s2503_s15 = scalar_lea.vmem %s3235_s6, 1024 }
  0x23   : > { %v710_v0 = vor.u32 %v709_v53, %v706_v51  ;;  %v639_v8 = vrot.slane %v637_v2, 5  ;;  %v665_v14 = vshll.u32 %v2738_v23, 16  ;;  %v682_v28 = vor.u32 %v681_v62, %v2778_v42  ;;  %v2874_v42 = vld [vmem:[%s2726_s9 + $0xa8] sm:$0xff]  ;;  %v2897_v56 = vld [vmem:[%s2726_s9 + $0x98] sm:$0xf]  ;;  %v2472_v62 = vld [vmem:[%s3288_s1 + $0x130] sm:$0xff]   ;;  %p2504_p12 = scmp.ne.s32.totalorder %s3235_s6, %s2503_s15  ;;  %p2511_p2 = scmp.lt.s32.totalorder %s2509_s19, %s2503_s15 }
  0x24   : > { %v738_v6 = vor.u32 %v737_v59, %v734_v57  ;;  %v664_v13 = vrot.slane %v662_v5, 4  ;;  %v690_v31 = vshrl.u32 %v2801_v55, 16  ;;  %v693_v33 = vshll.u32 %v2801_v55, 16 }
  0x25   : > { %2104 = vmatpush3.bf16.msra.mxu0 %v2436_v17  ;;  %2260 = vmatpush3.bf16.msra.mxu1 %v2435_v16  ;;  %v2836_v15 = vrot.slane %v710_v0, 4  ;;  %v1873_v17 = vcombine.high %v2830_v11, %v2833_v12  ;;  %v640_v26 = vor.u32 %v639_v8, %v636_v1  ;;  %v760_v53 = vshrl.u32 %v2877_v44, 16  ;;  %v2477_v8 = vld [vmem:[%s3288_s1 + $0x178] sm:$0xff]   ;;  %p2505_p13 = pnand %p2504_p12, %p2646_p4  ;;  %p2512_p3 = por %p2511_p2, %p2510_p1 }
  0x26   : > { %2105 = vmatprep.subr.bf16.mxu0 %v2437_v18  ;;  %2261 = vmatprep.subr.bf16.mxu1 %v2438_v19  ;;  %v2460_v18 = vld [vmem:[%s3288_s1 + $0xd8] sm:$0xff]   ;;  %v2884_v49 = vrot.slane %v690_v31, 4  ;;  %v763_v57 = vshll.u32 %v2877_v44, 16  ;;  %v788_v59 = vshrl.u32 %v2882_v47, 16  ;;  %v816_v1 = vshrl.u32 %v2897_v56, 16  ;;  %v2479_v31 = vld [vmem:[%s3288_s1 + $0x1c0] sm:$0xff]  }
  0x27   : > { %p2506_p0 = pneg %p2505_p13 }
  0x29   : > { %2106 = vmatpush3.bf16.msra.mxu0 %v2439_v20  ;;  %2262 = vmatpush3.bf16.msra.mxu1 %v2438_v19  ;;  %v667_v19 = vrot.slane %v665_v14, 5  ;;  %v654_v20 = vor.u32 %v2776_v41, %v2764_v36  ;;  %v1872_v36 = vcombine.low %v2830_v11, %v2833_v12  ;;  %v2871_v41 = vld [vmem:[%s2726_s9 + $0x90] sm:$0xff]  ;;  %p2513_p5 = pnand %p2512_p3, %p2506_p0 }
  0x2a   : > { %2107 = vmatprep.subr.bf16.mxu0 %v2440_v21  ;;  %2263 = vmatprep.subr.bf16.mxu1 %v2441_v25  ;;  %v2846_v21 = vrot.slane %v738_v6, 4  ;;  %v1876_v51 = vcombine.high %v2871_v41, %v2874_v42  ;;  %v1875_v2 = vcombine.low %v2871_v41, %v2874_v42  ;;  %v2476_v6 = vld [vmem:[%s3288_s1 + $0x138] sm:$0xff]   ;;  %v2935_v14 = vld [vmem:[%s2726_s9 + $0x14] sm:$0x1] }
  0x2b   : > { %v668_v30 = vor.u32 %v667_v19, %v664_v13  ;;  %v2868_v40 = vrot.slane %v654_v20, 4  ;;  %v2948_v20 = vld [vmem:[%s2726_s9 + $0x2c] sm:$0x1] }
  0x2d   : > { %2108 = vmatpush3.bf16.msra.mxu0 %v2442_v32  ;;  %2264 = vmatpush3.bf16.msra.mxu1 %v2441_v25  ;;  %v2463_v25 = vld [vmem:[%s3288_s1 + $0x120] sm:$0xff]  }
  0x2e   : > { %2145 = vmatprep.subr.bf16.mxu0 %v2446_v37  ;;  %2273 = vmatprep.subr.bf16.mxu1 %v2447_v38  ;;  %v2465_v32 = vld [vmem:[%s3288_s1 + $0xe0] sm:$0xff]   ;;  %v2466_v37 = vld [vmem:[%s3288_s1 + $0x128] sm:$0xff]  }
  0x30   : > { %525 = vmatmul.mubr.bf16.vlgmr.msra.gmra.mrb[0].mxu0 %v1866_v45  ;;  %2266 = vmatmul.mubr.bf16.vlgmr.msra.gmra.mrb[0].mxu1 %v1871_v46  ;;  %v641_v45 = vrot.slane %v640_v26, 4  ;;  %v2879_v46 = vrot.slane %v682_v28, 4  ;;  %v685_v28 = vshll.u32 %v2948_v20, 16 }
  0x31   : > { %2146 = vmatpush3.bf16.msra.mxu0 %v2449_v48  ;;  %2274 = vmatpush3.bf16.msra.mxu1 %v2447_v38  ;;  %v2467_v38 = vld [vmem:[%s3288_s1 + $0x168] sm:$0xff]   ;;  %v669_v48 = vrot.slane %v668_v30, 4 }
  0x32   : > { %2147 = vmatprep.subr.bf16.mxu0 %v2450_v50  ;;  %2275 = vmatprep.subr.bf16.mxu1 %v2451_v52  ;;  %v2468_v50 = vld [vmem:[%s3288_s1 + $0xe8] sm:$0xff]  }
  0x33   : > { %532 = vmatprep.mubr.bf16.mxu0 %v1870_v60  ;;  %v2902_v60 = vld [vmem:[%s2726_s9 + $0xb0] sm:$0xf] }
  0x34   : > { %v1877_v0 = vcombine.low %v2897_v56, %v2902_v60  ;;  %v844_v5 = vshrl.u32 %v2902_v60, 16 }
  0x35   : > { %2148 = vmatpush3.bf16.msra.mxu0 %v2452_v54  ;;  %2276 = vmatpush3.bf16.msra.mxu1 %v2451_v52  ;;  %v1874_v52 = vcombine.low %v2877_v44, %v2882_v47  ;;  %v2894_v54 = vrot.slane %v693_v33, 5 }
  0x36   : > { %2149 = vmatprep.subr.bf16.mxu0 %v2455_v61  ;;  %2277 = vmatprep.subr.bf16.mxu1 %v2456_v63  ;;  %v791_v61 = vshll.u32 %v2882_v47, 16 }
  0x37   : > { %2269 = vmatprep.mubr.bf16.mxu1 %v1874_v52 }
  0x38   : > { %533 = vmatmul.mubr.bf16.gmra.mrb[4].mxu0 %v1869_v3  ;;  %2270 = vmatmul.mubr.bf16.gmra.mrb[4].mxu1 %v1877_v0  ;;  %v819_v3 = vshll.u32 %v2897_v56, 16 }
  0x39   : > { %2150 = vmatpush3.bf16.msra.mxu0 %v2457_v4  ;;  %2278 = vmatpush3.bf16.msra.mxu1 %v2456_v63  ;;  %v2473_v63 = vld [vmem:[%s3288_s1 + $0x170] sm:$0xff]  }
  0x3a   : > { %2151 = vmatprep.subr.bf16.mxu0 %v2458_v7  ;;  %2279 = vmatprep.subr.bf16.mxu1 %v2459_v10  ;;  %v2475_v4 = vld [vmem:[%s3288_s1 + $0xf0] sm:$0xff]  }
  0x3b   : > { %540 = vmatprep.mubr.bf16.mxu0 %v1873_v17  ;;  %v2925_v7 = vld [vmem:[%s2726_s9 + $0xc] sm:$0x11]  ;;  %v2478_v17 = vld [vmem:[%s3288_s1 + $0xf8] sm:$0xff]  }
  0x3c   : > { %v643_v13 = vshll.u32 %v2925_v7, 16 }
  0x3d   : > { %2152 = vmatpush3.bf16.msra.mxu0 %v2460_v18  ;;  %2280 = vmatpush3.bf16.msra.mxu1 %v2459_v10  ;;  %v2931_v10 = vld [vmem:[%s2726_s9 + $0x24] sm:$0x11] }
  0x3e   : > { %2153 = vmatprep.subr.bf16.mxu0 %v2463_v25  ;;  %2281 = vmatprep.subr.bf16.mxu1 %v2464_v29  ;;  %v671_v19 = vshll.u32 %v2931_v10, 16  ;;  %v657_v25 = vshll.u32 %v2935_v14, 16  ;;  %v645_v26 = vrot.slane %v643_v13, 5  ;;  %v2482_v13 = vld [vmem:[%s3288_s1 + $0x1c8] sm:$0xff]  }
  0x40   : > { %541 = vmatmul.mubr.bf16.gmra.mrb[8].mxu0 %v1872_v36  ;;  %v659_v30 = vrot.slane %v657_v25, 5  ;;  %v646_v33 = vsel %vm2942_vm2, %v641_v45, %v645_v26  ;;  %v687_v36 = vrot.slane %v685_v28, 5  ;;  %v2483_v25 = vld [vmem:[%s3288_s1 + $0x208] sm:$0xff]   ;;  %v2998_v26 = vld [vmem:[%s2726_s9 + $0x54] sm:$0x11] }
  0x41   : > { %2154 = vmatpush3.bf16.msra.mxu0 %v2465_v32  ;;  %2282 = vmatpush3.bf16.msra.mxu1 %v2464_v29  ;;  %v673_v29 = vrot.slane %v671_v19, 5  ;;  %v718_v32 = vshrl.u32 %v2805_v58, 16  ;;  %v696_v19 = vor.u32 %v2894_v54, %v2884_v49  ;;  %v2484_v28 = vld [vmem:[%s3288_s1 + $0x188] sm:$0xff]  }
  0x42   : > { %2155 = vmatprep.subr.bf16.mxu0 %v2466_v37  ;;  %2283 = vmatprep.subr.bf16.mxu1 %v2467_v38  ;;  %v2480_v37 = vld [vmem:[%s3288_s1 + $0x200] sm:$0xff]   ;;  %v660_v52 = vsel %vm2942_vm2, %v2868_v40, %v659_v30  ;;  %v727_v30 = vshll.u32 %v2998_v26, 16 }
  0x43   : > { %548 = vmatprep.mubr.bf16.mxu0 %v1876_v51  ;;  %v674_v51 = vsel %vm2942_vm2, %v669_v48, %v673_v29  ;;  %v2481_v40 = vld [vmem:[%s3288_s1 + $0x180] sm:$0xff]   ;;  %v720_v29 = vrot.slane %v718_v32, 4  ;;  %v2486_v32 = vld [vmem:[%s3288_s1 + $0x210] sm:$0xff]  }
  0x44   : > { %v1951_v0 = vcombine.high %v646_v33, %v674_v51 }
  0x45   : > { %2156 = vmatpush3.bf16.msra.mxu0 %v2468_v50  ;;  %2284 = vmatpush3.bf16.msra.mxu1 %v2467_v38  ;;  %v2962_v38 = vld [vmem:[%s2726_s9 + $0x44] sm:$0x1]  ;;  %v2965_v50 = vld [vmem:[%s2726_s9 + $0x5c] sm:$0x1] }
  0x46   : > { %2157 = vmatprep.subr.bf16.mxu0 %v2472_v62  ;;  %2285 = vmatprep.subr.bf16.mxu1 %v2473_v63  ;;  %v713_v62 = vshll.u32 %v2962_v38, 16  ;;  %v741_v45 = vshll.u32 %v2965_v50, 16 }
  0x48   : > { %549 = vmatmul.mubr.bf16.gmra.mrb[12].mxu0 %v1875_v2  ;;  %v688_v2 = vsel %vm2942_vm2, %v2879_v46, %v687_v36  ;;  %v715_v48 = vrot.slane %v713_v62, 5  ;;  %v2986_v46 = vld [vmem:[%s2726_s9 + $0x3c] sm:$0x11] }
  0x49   : > { %2158 = vmatpush3.bf16.msra.mxu0 %v2475_v4  ;;  %2286 = vmatpush3.bf16.msra.mxu1 %v2473_v63  ;;  %v1950_v63 = vcombine.low %v646_v33, %v674_v51  ;;  %v1952_v4 = vcombine.low %v660_v52, %v688_v2  ;;  %v699_v49 = vshll.u32 %v2986_v46, 16  ;;  %v2487_v51 = vld [vmem:[%s3288_s1 + $0x190] sm:$0xff]   ;;  %v746_v52 = vshrl.u32 %v2830_v11, 16 }
  0x4a   : > { %2159 = vmatprep.subr.bf16.mxu0 %v2476_v6  ;;  %2287 = vmatprep.subr.bf16.mxu1 %v2477_v8  ;;  %v743_v6 = vrot.slane %v741_v45, 5  ;;  %v729_v45 = vrot.slane %v727_v30, 5  ;;  %v1289_v27 = vrot.slane %v2986_v46, 5 }
  0x4b   : > { %1130 = vmatprep.mubr.bf16.mxu0 %v1951_v0  ;;  %2289 = vmatprep.mubr.bf16.mxu1 %v1952_v4  ;;  %v701_v33 = vrot.slane %v699_v49, 5  ;;  %v2488_v0 = vld [vmem:[%s3288_s1 + $0x1d8] sm:$0xff]   ;;  %v748_v2 = vrot.slane %v746_v52, 4 }
  0x4d   : > { %2160 = vmatpush3.bf16.msra.mxu0 %v2478_v17  ;;  %2288 = vmatpush3.bf16.msra.mxu1 %v2477_v8  ;;  %v716_v8 = vsel %vm2942_vm2, %v2836_v15, %v715_v48  ;;  %v744_v17 = vsel %vm2942_vm2, %v2846_v21, %v743_v6  ;;  %v721_v15 = vshll.u32 %v2805_v58, 16  ;;  %v697_v21 = vrot.slane %v696_v19, 4  ;;  %v3023_v48 = vld [vmem:[%s2726_s9 + $0x6c] sm:$0x11]  ;;  %v3026_v6 = vld [vmem:[%s2726_s9 + $0x84] sm:$0x11] }
  0x4e   : > { %2197 = vmatprep.subr.bf16.mxu0 %v2479_v31  ;;  %2297 = vmatprep.subr.bf16.mxu1 %v2480_v37  ;;  %v1955_v54 = vcombine.low %v716_v8, %v744_v17  ;;  %v2485_v31 = vld [vmem:[%s3288_s1 + $0x1d0] sm:$0xff]   ;;  %v755_v19 = vshll.u32 %v3023_v48, 16  ;;  %v774_v8 = vshrl.u32 %v2833_v12, 16  ;;  %v777_v17 = vshll.u32 %v2833_v12, 16 }
  0x4f   : > { %v723_v36 = vrot.slane %v721_v15, 5 }
  0x50   : > { %1131 = vmatmul.mubr.bf16.vlgmr.msra.gmra.mrb[16].mxu0 %v1950_v63  ;;  %2290 = vmatmul.mubr.bf16.vlgmr.msra.gmra.mrb[0].mxu1 %v1955_v54  ;;  %v749_v63 = vshll.u32 %v2830_v11, 16  ;;  %v2489_v54 = vld [vmem:[%s3288_s1 + $0x218] sm:$0xff]   ;;  %v757_v52 = vrot.slane %v755_v19, 5 }
  0x51   : > { %2198 = vmatpush3.bf16.msra.mxu0 %v2481_v40  ;;  %2298 = vmatpush3.bf16.msra.mxu1 %v2480_v37  ;;  %v724_v62 = vor.u32 %v723_v36, %v720_v29  ;;  %v702_v37 = vsel %vm2942_vm2, %v697_v21, %v701_v33  ;;  %v783_v29 = vshll.u32 %v3026_v6, 16  ;;  %v776_v21 = vrot.slane %v774_v8, 4  ;;  %v3058_v19 = vld [vmem:[%s2726_s9 + $0x9c] sm:$0x11]  ;;  %v3061_v8 = vld [vmem:[%s2726_s9 + $0xb4] sm:$0x11] }
  0x52   : > { %2199 = vmatprep.subr.bf16.mxu0 %v2482_v13  ;;  %2299 = vmatprep.subr.bf16.mxu1 %v2483_v25  ;;  %v751_v40 = vrot.slane %v749_v63, 5  ;;  %v847_v13 = vshll.u32 %v2902_v60, 16  ;;  %v802_v33 = vshrl.u32 %v2871_v41, 16 }
  0x53   : > { %v725_v4 = vrot.slane %v724_v62, 4  ;;  %v779_v62 = vrot.slane %v777_v17, 5  ;;  %v830_v17 = vshrl.u32 %v2874_v42, 16 }
  0x55   : > { %2200 = vmatpush3.bf16.msra.mxu0 %v2484_v28  ;;  %2300 = vmatpush3.bf16.msra.mxu1 %v2483_v25  ;;  %v730_v49 = vsel %vm2942_vm2, %v725_v4, %v729_v45  ;;  %v752_v28 = vor.u32 %v751_v40, %v748_v2  ;;  %v2490_v25 = vld [vmem:[%s3288_s1 + $0x198] sm:$0xff]   ;;  %v2492_v45 = vld [vmem:[%s3288_s1 + $0x220] sm:$0xff]   ;;  %v780_v63 = vor.u32 %v779_v62, %v776_v21  ;;  %v785_v2 = vrot.slane %v783_v29, 5  ;;  %v2495_v21 = vld [vmem:[%s3288_s1 + $0x228] sm:$0xff]  }
  0x56   : > { %2201 = vmatprep.subr.bf16.mxu0 %v2485_v31  ;;  %2301 = vmatprep.subr.bf16.mxu1 %v2486_v32  ;;  %v1954_v15 = vcombine.high %v702_v37, %v730_v49  ;;  %v1953_v30 = vcombine.low %v702_v37, %v730_v49  ;;  %v2491_v31 = vld [vmem:[%s3288_s1 + $0x1e0] sm:$0xff]   ;;  %v804_v37 = vrot.slane %v802_v33, 4  ;;  %v805_v4 = vshll.u32 %v2871_v41, 16 }
  0x57   : > { %v753_v36 = vrot.slane %v752_v28, 4  ;;  %v781_v40 = vrot.slane %v780_v63, 4  ;;  %v811_v28 = vshll.u32 %v3058_v19, 16  ;;  %v833_v29 = vshll.u32 %v2874_v42, 16  ;;  %v2496_v63 = vld [vmem:[%s3288_s1 + $0x1a8] sm:$0xff]  }
  0x58   : > { %1138 = vmatprep.mubr.bf16.mxu0 %v1954_v15  ;;  %v807_v49 = vrot.slane %v805_v4, 5  ;;  %v839_v15 = vshll.u32 %v3061_v8, 16  ;;  %v762_v33 = vrot.slane %v760_v53, 4 }
  0x59   : > { %2202 = vmatpush3.bf16.msra.mxu0 %v2487_v51  ;;  %2302 = vmatpush3.bf16.msra.mxu1 %v2486_v32  ;;  %v2493_v51 = vld [vmem:[%s3288_s1 + $0x1a0] sm:$0xff]   ;;  %v758_v32 = vsel %vm2942_vm2, %v753_v36, %v757_v52  ;;  %v765_v36 = vrot.slane %v763_v57, 5  ;;  %v813_v4 = vrot.slane %v811_v28, 5  ;;  %v835_v53 = vrot.slane %v833_v29, 5 }
  0x5a   : > { %2203 = vmatprep.subr.bf16.mxu0 %v2488_v0  ;;  %1139 = vmatmul.mubr.bf16.gmra.mrb[20].mxu0 %v1953_v30  ;;  %v2494_v0 = vld [vmem:[%s3288_s1 + $0x1e8] sm:$0xff]   ;;  %v3068_v30 = vld [vmem:[%s2726_s9 + $0x74] sm:$0x1]  ;;  %v841_v16 = vrot.slane %v839_v15, 5 }
  0x5b   : > { %2303 = vmatprep.subr.bf16.mxu1 %v2489_v54  ;;  %v766_v9 = vor.u32 %v765_v36, %v762_v33  ;;  %v769_v57 = vshll.u32 %v3068_v30, 16  ;;  %v818_v33 = vrot.slane %v816_v1, 4  ;;  %v846_v1 = vrot.slane %v844_v5, 4 }
  0x5d   : > { %2204 = vmatpush3.bf16.msra.mxu0 %v2490_v25  ;;  %2304 = vmatpush3.bf16.msra.mxu1 %v2489_v54  ;;  %v786_v25 = vsel %vm2942_vm2, %v781_v40, %v785_v2  ;;  %v3076_v54 = vld [vmem:[%s2726_s9 + $0x8c] sm:$0x1]  ;;  %v808_v2 = vor.u32 %v807_v49, %v804_v37  ;;  %v3086_v40 = vld [vmem:[%s2726_s9 + $0xa4] sm:$0x1]  ;;  %v790_v49 = vrot.slane %v788_v59, 4  ;;  %v767_v15 = vrot.slane %v766_v9, 4 }
  0x5e   : > { %2205 = vmatprep.subr.bf16.mxu0 %v2491_v31  ;;  %2305 = vmatprep.subr.bf16.mxu1 %v2492_v45  ;;  %v832_v31 = vrot.slane %v830_v17, 4  ;;  %v1957_v52 = vcombine.high %v758_v32, %v786_v25  ;;  %v1956_v62 = vcombine.low %v758_v32, %v786_v25  ;;  %v2497_v17 = vld [vmem:[%s3288_s1 + $0x1f0] sm:$0xff]   ;;  %v3093_v32 = vld [vmem:[%s2726_s9 + $0xbc] sm:$0x1]  ;;  %v797_v28 = vshll.u32 %v3076_v54, 16  ;;  %s3233_s9 = scalar_lea.hbm %s3290_s3, %s2092_s5 }
  0x5f   : > { %v809_v37 = vrot.slane %v808_v2, 4  ;;  %v771_v25 = vrot.slane %v769_v57, 5  ;;  %v2501_v57 = vld [vmem:[%s3288_s1 + $0x238] sm:$0xff]  }
  0x60   : > { %1146 = vmatprep.mubr.bf16.mxu0 %v1957_v52  ;;  %v836_v29 = vor.u32 %v835_v53, %v832_v31  ;;  %v821_v52 = vrot.slane %v819_v3, 5  ;;  %v825_v31 = vshll.u32 %v3086_v40, 16  ;;  %v849_v3 = vrot.slane %v847_v13, 5 }
  0x61   : > { %2206 = vmatpush3.bf16.msra.mxu0 %v2493_v51  ;;  %v2498_v51 = vld [vmem:[%s3288_s1 + $0x230] sm:$0xff]   ;;  %2306 = vmatpush3.bf16.msra.mxu1 %v2492_v45  ;;  %v814_v59 = vsel %vm2942_vm2, %v809_v37, %v813_v4  ;;  %v772_v9 = vsel %vm2942_vm2, %v767_v15, %v771_v25  ;;  %v853_v53 = vshll.u32 %v3093_v32, 16  ;;  %v1986_v37 = vrot.slane %v2735_v22, 9 }
  0x62   : > { %2207 = vmatprep.subr.bf16.mxu0 %v2494_v0  ;;  %v793_v0 = vrot.slane %v791_v61, 5  ;;  %1147 = vmatmul.mubr.bf16.gmra.mrb[24].mxu0 %v1956_v62  ;;  %v2499_v45 = vld [vmem:[%s3288_s1 + $0x1b0] sm:$0xff]   ;;  %v799_v61 = vrot.slane %v797_v28, 5  ;;  %v837_v62 = vrot.slane %v836_v29, 4  ;;  %v822_v4 = vor.u32 %v821_v52, %v818_v33 }
  0x63   : > { %2307 = vmatprep.subr.bf16.mxu1 %v2495_v21  ;;  %v850_v15 = vor.u32 %v849_v3, %v846_v1  ;;  %v855_v25 = vrot.slane %v853_v53, 5  ;;  %v1273_v33 = vrot.slane %v2925_v7, 5  ;;  %v1293_v7 = vrot.slane %v2962_v38, 5 }
  0x64   : > { %v794_v36 = vor.u32 %v793_v0, %v790_v49  ;;  %v842_v5 = vsel %vm2942_vm2, %v837_v62, %v841_v16  ;;  %v823_v28 = vrot.slane %v822_v4, 4  ;;  %v2502_v16 = vld [vmem:[%s3288_s1 + $0x1b8] sm:$0xff]   ;;  %v1285_v62 = vrot.slane %v2948_v20, 5 }
  0x65   : > { %2208 = vmatpush3.bf16.msra.mxu0 %v2496_v63  ;;  %v2500_v63 = vld [vmem:[%s3288_s1 + $0x1f8] sm:$0xff]   ;;  %2308 = vmatpush3.bf16.msra.mxu1 %v2495_v21  ;;  %v1960_v13 = vcombine.high %v814_v59, %v842_v5  ;;  %v1959_v0 = vcombine.low %v814_v59, %v842_v5  ;;  %v1281_v59 = vrot.slane %v2931_v10, 5  ;;  %v1274_v52 = vsel %vm3130_vm5, %v1986_v37, %v1273_v33 }
  0x66   : > { %2209 = vmatprep.subr.bf16.mxu0 %v2497_v17  ;;  %v795_v2 = vrot.slane %v794_v36, 4  ;;  %v827_v17 = vrot.slane %v825_v31, 5  ;;  %2309 = vmatprep.subr.bf16.mxu1 %v2498_v51  ;;  %v1988_v36 = vrot.slane %v2738_v23, 9  ;;  %v1301_v10 = vrot.slane %v2965_v50, 5 }
  0x67   : > { %1154 = vmatprep.mubr.bf16.mxu0 %v1960_v13  ;;  %v1286_v38 = vsel %vm3130_vm5, %v1989_v43, %v1285_v62  ;;  %v1297_v43 = vrot.slane %v2998_v26, 5  ;;  %v1995_v4 = vrot.slane %v2877_v44, 9  ;;  %v1997_v3 = vrot.slane %v2882_v47, 9 }
  0x68   : > { %v800_v49 = vsel %vm2942_vm2, %v795_v2, %v799_v61  ;;  %v828_v22 = vsel %vm2942_vm2, %v823_v28, %v827_v17  ;;  %v851_v61 = vrot.slane %v850_v15, 4  ;;  %v1992_v2 = vrot.slane %v2805_v58, 9 }
  0x69   : > { %2210 = vmatpush3.bf16.msra.mxu0 %v2499_v45  ;;  %v1958_v29 = vcombine.low %v772_v9, %v800_v49  ;;  %2310 = vmatpush3.bf16.msra.mxu1 %v2498_v51  ;;  %v1277_v45 = vrot.slane %v2935_v14, 5  ;;  %v1282_v51 = vsel %vm3130_vm5, %v1988_v36, %v1281_v59  ;;  %v1990_v14 = vrot.slane %v2801_v55, 9 }
  0x6a   : > { %2211 = vmatprep.subr.bf16.mxu0 %v2500_v63  ;;  %1155 = vmatmul.mubr.bf16.gmra.mrb[28].mxu0 %v1959_v0  ;;  %v856_v9 = vsel %vm2942_vm2, %v851_v61, %v855_v25  ;;  %v2050_v20 = vcombine.low %v1274_v52, %v1282_v51  ;;  %v2051_v31 = vcombine.high %v1274_v52, %v1282_v51  ;;  %v3297_v63 = vrot.slane %v2762_v35, 9 }
  0x6b   : > { %2293 = vmatprep.mubr.bf16.mxu1 %v1958_v29  ;;  %2311 = vmatprep.subr.bf16.mxu1 %v2501_v57  ;;  %v1278_v23 = vsel %vm3130_vm5, %v1987_v34, %v1277_v45  ;;  %v1961_v1 = vcombine.low %v828_v22, %v856_v9  ;;  %v3298_v55 = vrot.slane %v2773_v39, 9  ;;  %v1309_v35 = vrot.slane %v3068_v30, 5 }
  0x6c   : > { %v2052_v24 = vcombine.low %v1278_v23, %v1286_v38  ;;  %v1294_v34 = vsel %vm3130_vm5, %v3297_v63, %v1293_v7  ;;  %1608 = vmatprep.mubr.bf16.mxu0 %v2051_v31  ;;  %v1317_v39 = vrot.slane %v3076_v54, 5  ;;  %v1290_v53 = vsel %vm3130_vm5, %v1990_v14, %v1289_v27 }
  0x6d   : > { %2212 = vmatpush3.bf16.msra.mxu0 %v2502_v16  ;;  %2312 = vmatpush3.bf16.msra.mxu1 %v2501_v57  ;;  %v1302_v18 = vsel %vm3130_vm5, %v3298_v55, %v1301_v10  ;;  %v1298_v46 = vsel %vm3130_vm5, %v1992_v2, %v1297_v43  ;;  %v1310_v58 = vsel %vm3130_vm5, %v1995_v4, %v1309_v35  ;;  %v1999_v26 = vrot.slane %v2897_v56, 9 }
  0x6e   : > { %v2055_v50 = vcombine.low %v1294_v34, %v1302_v18  ;;  %2294 = vmatmul.mubr.bf16.gmra.mrb[4].mxu1 %v1961_v1  ;;  %v2054_v57 = vcombine.high %v1290_v53, %v1298_v46  ;;  %v1318_v44 = vsel %vm3130_vm5, %v1997_v3, %v1317_v39  ;;  %v1325_v47 = vrot.slane %v3086_v40, 5 }
  0x6f   : > { %2313 = vmatprep.mubr.bf16.mxu1 %v2052_v24  ;;  %v2001_v30 = vrot.slane %v2902_v60, 9  ;;  %v1333_v54 = vrot.slane %v3093_v32, 5  ;;  %v1994_v5 = vrot.slane %v2830_v11, 9  ;;  %v1305_v17 = vrot.slane %v3023_v48, 5 }
  0x70   : > { %v1996_v37 = vrot.slane %v2833_v12, 9  ;;  %v1313_v13 = vrot.slane %v3026_v6, 5  ;;  %v2058_v49 = vcombine.low %v1310_v58, %v1318_v44  ;;  %v2053_v40 = vcombine.low %v1290_v53, %v1298_v46 }
  0x71   : > { %v1306_v0 = vsel %vm3130_vm5, %v1994_v5, %v1305_v17  ;;  %v1326_v60 = vsel %vm3130_vm5, %v1999_v26, %v1325_v47  ;;  %v1334_v11 = vsel %vm3130_vm5, %v2001_v30, %v1333_v54  ;;  %v1998_v12 = vrot.slane %v2871_v41, 9 }
  0x72   : > { %1609 = vmatmul.mubr.bf16.vlgmr.msra.gmra.mrb[32].mxu0 %v2050_v20  ;;  %v1314_v56 = vsel %vm3130_vm5, %v1996_v37, %v1313_v13  ;;  %v1321_v6 = vrot.slane %v3058_v19, 5  ;;  %v2000_v32 = vrot.slane %v2874_v42, 9  ;;  %v1329_v28 = vrot.slane %v3061_v8, 5 }
  0x73   : > { %1616 = vmatprep.mubr.bf16.mxu0 %v2054_v57  ;;  %v2057_v48 = vcombine.high %v1306_v0, %v1314_v56  ;;  %v2061_v16 = vcombine.low %v1326_v60, %v1334_v11  ;;  %v2056_v25 = vcombine.low %v1306_v0, %v1314_v56 }
  0x74   : > { %v1322_v29 = vsel %vm3130_vm5, %v1998_v12, %v1321_v6  ;;  %v1330_v15 = vsel %vm3130_vm5, %v2000_v32, %v1329_v28 }
  0x75   : > { %v2060_v33 = vcombine.high %v1322_v29, %v1330_v15  ;;  %v2059_v41 = vcombine.low %v1322_v29, %v1330_v15 }
  0x76   : > { %2314 = vmatmul.mubr.bf16.vlgmr.msra.gmra.mrb[0].mxu1 %v2055_v50 }
  0x77   : > { %2317 = vmatprep.mubr.bf16.mxu1 %v2058_v49 }
  0x7a   : > { %1617 = vmatmul.mubr.bf16.gmra.mrb[36].mxu0 %v2053_v40 }
  0x7b   : > { %1624 = vmatprep.mubr.bf16.mxu0 %v2057_v48 }
  0x7e   : > { %2318 = vmatmul.mubr.bf16.gmra.mrb[4].mxu1 %v2061_v16 }
  0x82   : > { %1625 = vmatmul.mubr.bf16.gmra.mrb[40].mxu0 %v2056_v25 }
  0x83   : > { %1632 = vmatprep.mubr.bf16.mxu0 %v2060_v33 }
  0x8a   : > { %1633 = vmatmul.mubr.bf16.gmra.mrb[44].mxu0 %v2059_v41 }
 0x103   : > { %v2109_v19 = vpop.f32.mrb[0].mxu0 }
 0x104   : > { %v2110_v42 = vpop.f32.mrb[1].mxu0 }
 0x105   : > { %v2111_v22 = vadd.f32 %v2110_v42, %v2109_v19  ;;  %v2112_v8 = vpop.f32.mrb[2].mxu0  ;;  %v2086_v42 = vld [vmem:[%s3289_s2] ss:$0 sm:$0xff] }
 0x106   : > { %v2113_v36 = vpop.f32.mrb[3].mxu0 }
 0x107   : > { %v2114_v59 = vadd.f32 %v2113_v36, %v2112_v8 }
 0x10b   : > { %v2115_v45 = vpop.f32.mrb[4].mxu0 }
 0x10c   : > { %v2116_v61 = vpop.f32.mrb[5].mxu0 }
 0x10d   : > { %v2117_v52 = vadd.f32 %v2116_v61, %v2115_v45  ;;  %v2118_v62 = vpop.f32.mrb[6].mxu0 }
 0x10e   : > { %v2119_v7 = vpop.f32.mrb[7].mxu0 }
 0x10f   : > { %v2120_v21 = vadd.f32 %v2119_v7, %v2118_v62 }
 0x113   : > { %v2121_v51 = vpop.f32.mrb[8].mxu0 }
 0x114   : > { %v2122_v23 = vpop.f32.mrb[9].mxu0 }
 0x115   : > { %v2123_v10 = vadd.f32 %v2122_v23, %v2121_v51  ;;  %v2124_v14 = vpop.f32.mrb[10].mxu0 }
 0x116   : > { %v2125_v9 = vpop.f32.mrb[11].mxu0 }
 0x117   : > { %v2126_v20 = vadd.f32 %v2125_v9, %v2124_v14 }
 0x11b   : > { %v2127_v31 = vpop.f32.mrb[12].mxu0 }
 0x11c   : > { %v2128_v38 = vpop.f32.mrb[13].mxu0 }
 0x11d   : > { %v2129_v1 = vadd.f32 %v2128_v38, %v2127_v31  ;;  %v2130_v24 = vpop.f32.mrb[14].mxu0 }
 0x11e   : > { %v2131_v63 = vpop.f32.mrb[15].mxu0 }
 0x11f   : > { %v2132_v34 = vadd.f32 %v2131_v63, %v2130_v24 }
 0x123   : > { %v2161_v55 = vpop.f32.mrb[16].mxu0 }
 0x124   : > { %v2162_v18 = vpop.f32.mrb[17].mxu0 }
 0x125   : > { %v2163_v50 = vadd.f32 %v2162_v18, %v2161_v55  ;;  %v2164_v27 = vpop.f32.mrb[18].mxu0 }
 0x126   : > { %v2165_v2 = vpop.f32.mrb[19].mxu0 }
 0x127   : > { %v2324_v43 = vadd.f32 %v2163_v50, %v2111_v22  ;;  %v2166_v4 = vadd.f32 %v2165_v2, %v2164_v27 }
 0x129   : > { %v2330_v35 = vadd.f32 %v2166_v4, %v2114_v59 }
 0x12d   : > { %v2167_v3 = vpop.f32.mrb[20].mxu0 }
 0x12e   : > { %v2168_v39 = vpop.f32.mrb[21].mxu0 }
 0x12f   : > { %v2169_v53 = vadd.f32 %v2168_v39, %v2167_v3  ;;  %v2170_v46 = vpop.f32.mrb[22].mxu0 }
 0x130   : > { %v2171_v57 = vpop.f32.mrb[23].mxu0 }
 0x131   : > { %v2321_v58 = vadd.f32 %v2169_v53, %v2117_v52  ;;  %v2172_v44 = vadd.f32 %v2171_v57, %v2170_v46 }
 0x133   : > { %v2327_v26 = vadd.f32 %v2172_v44, %v2120_v21 }
 0x135   : > { %v2173_v47 = vpop.f32.mrb[24].mxu0 }
 0x136   : > { %v2174_v30 = vpop.f32.mrb[25].mxu0 }
 0x137   : > { %v2175_v54 = vadd.f32 %v2174_v30, %v2173_v47  ;;  %v2176_v5 = vpop.f32.mrb[26].mxu0 }
 0x138   : > { %v2177_v17 = vpop.f32.mrb[27].mxu0 }
 0x139   : > { %v2336_v37 = vadd.f32 %v2175_v54, %v2123_v10  ;;  %v2178_v13 = vadd.f32 %v2177_v17, %v2176_v5 }
 0x13b   : > { %v2342_v49 = vadd.f32 %v2178_v13, %v2126_v20 }
 0x13d   : > { %v2179_v0 = vpop.f32.mrb[28].mxu0 }
 0x13e   : > { %v2180_v56 = vpop.f32.mrb[29].mxu0 }
 0x13f   : > { %v2181_v40 = vadd.f32 %v2180_v56, %v2179_v0  ;;  %v2182_v60 = vpop.f32.mrb[30].mxu0 }
 0x140   : > { %v2183_v11 = vpop.f32.mrb[31].mxu0 }
 0x141   : > { %v2333_v48 = vadd.f32 %v2181_v40, %v2129_v1  ;;  %v2184_v12 = vadd.f32 %v2183_v11, %v2182_v60 }
 0x143   : > { %v3211_v6 = vadd.f32 %v2184_v12, %v2132_v34 }
 0x145   : > { %v2213_v32 = vpop.f32.mrb[32].mxu0 }
 0x146   : > { %v2214_v28 = vpop.f32.mrb[33].mxu0 }
 0x147   : > { %v2215_v16 = vadd.f32 %v2214_v28, %v2213_v32  ;;  %v2216_v29 = vpop.f32.mrb[34].mxu0 }
 0x148   : > { %v2217_v15 = vpop.f32.mrb[35].mxu0 }
 0x149   : > { %v2325_v25 = vadd.f32 %v2324_v43, %v2215_v16  ;;  %v2218_v33 = vadd.f32 %v2217_v15, %v2216_v29  ;;  %v2315_v41 = vpop.f32.mrb[0].mxu1 }
 0x14a   : > { %v1675_v19 = vpop.f32.mrb[1].mxu1 }
 0x14b   : > { %v2331_v22 = vadd.f32 %v2330_v35, %v2218_v33  ;;  %v2326_v8 = vadd.f32 %v2325_v25, %v1675_v19  ;;  %v2316_v36 = vpop.f32.mrb[2].mxu1 }
 0x14c   : > { %v1678_v59 = vpop.f32.mrb[3].mxu1 }
 0x14d   : > { %v2219_v45 = vpop.f32.mrb[36].mxu0  ;;  %v1745_v61 = vadd.f32 %v2326_v8, %v2086_v42  ;;  %v2332_v52 = vadd.f32 %v2331_v22, %v1678_v59 }
 0x14e   : > { %v2220_v62 = vpop.f32.mrb[37].mxu0 }
 0x14f   : > { %v2221_v7 = vadd.f32 %v2220_v62, %v2219_v45  ;;  %v2222_v21 = vpop.f32.mrb[38].mxu0  ;;  %1753 = vst [vmem:[%s3219_s4] sm:$0xff] %v1745_v61  ;;  %v1746_v51 = vadd.f32 %v2332_v52, %v2086_v42 }
 0x150   : > { %v2223_v23 = vpop.f32.mrb[39].mxu0 }
 0x151   : > { %v2322_v10 = vadd.f32 %v2321_v58, %v2221_v7  ;;  %v2224_v14 = vadd.f32 %v2223_v23, %v2222_v21  ;;  %1754 = vst [vmem:[%s3219_s4 + $0x8] sm:$0xff] %v1746_v51  ;;  %v2319_v9 = vpop.f32.mrb[4].mxu1 }
 0x152   : > { %v1691_v31 = vpop.f32.mrb[5].mxu1 }
 0x153   : > { %v2323_v20 = vadd.f32 %v2322_v10, %v2315_v41  ;;  %v2328_v38 = vadd.f32 %v2327_v26, %v2224_v14  ;;  %v2320_v1 = vpop.f32.mrb[6].mxu1 }
 0x154   : > { %v1694_v34 = vpop.f32.mrb[7].mxu1 }
 0x155   : > { %v1747_v24 = vadd.f32 %v2323_v20, %v2086_v42  ;;  %v2329_v63 = vadd.f32 %v2328_v38, %v2316_v36  ;;  %v2225_v55 = vpop.f32.mrb[40].mxu0 }
 0x156   : > { %v2226_v18 = vpop.f32.mrb[41].mxu0 }
 0x157   : > { %1755 = vst [vmem:[%s3219_s4 + $0x10] sm:$0xff] %v1747_v24  ;;  %v1748_v50 = vadd.f32 %v2329_v63, %v2086_v42  ;;  %v2227_v27 = vadd.f32 %v2226_v18, %v2225_v55  ;;  %v2228_v2 = vpop.f32.mrb[42].mxu0 }
 0x158   : > { %v2229_v43 = vpop.f32.mrb[43].mxu0 }
 0x159   : > { %1756 = vst [vmem:[%s3219_s4 + $0x18] sm:$0xff] %v1748_v50  ;;  %v2337_v4 = vadd.f32 %v2336_v37, %v2227_v27  ;;  %v2230_v35 = vadd.f32 %v2229_v43, %v2228_v2 }
 0x15b   : > { %v2338_v3 = vadd.f32 %v2337_v4, %v1691_v31  ;;  %v2343_v39 = vadd.f32 %v2342_v49, %v2230_v35 }
 0x15d   : > { %v1749_v53 = vadd.f32 %v2338_v3, %v2086_v42  ;;  %v2344_v46 = vadd.f32 %v2343_v39, %v1694_v34  ;;  %v2231_v57 = vpop.f32.mrb[44].mxu0 }
 0x15e   : > { %v2232_v58 = vpop.f32.mrb[45].mxu0 }
 0x15f   : > { %1757 = vst [vmem:[%s3219_s4 + $0x20] sm:$0xff] %v1749_v53  ;;  %v1750_v44 = vadd.f32 %v2344_v46, %v2086_v42  ;;  %v2233_v26 = vadd.f32 %v2232_v58, %v2231_v57  ;;  %v2234_v47 = vpop.f32.mrb[46].mxu0 }
 0x160   : > { %v2235_v30 = vpop.f32.mrb[47].mxu0 }
 0x161   : > { %1758 = vst [vmem:[%s3219_s4 + $0x28] sm:$0xff] %v1750_v44  ;;  %v2334_v54 = vadd.f32 %v2333_v48, %v2233_v26  ;;  %v2236_v5 = vadd.f32 %v2235_v30, %v2234_v47 }
 0x163   : > { %v2335_v17 = vadd.f32 %v2334_v54, %v2319_v9  ;;  %v2340_v37 = vadd.f32 %v3211_v6, %v2236_v5 }
 0x165   : > { %v1751_v13 = vadd.f32 %v2335_v17, %v2086_v42  ;;  %v2341_v49 = vadd.f32 %v2340_v37, %v2320_v1 }
 0x167   : > { %1759 = vst [vmem:[%s3219_s4 + $0x30] sm:$0xff] %v1751_v13  ;;  %v1752_v0 = vadd.f32 %v2341_v49, %v2086_v42 }
 0x169   : > { %1760 = vst [vmem:[%s3219_s4 + $0x38] sm:$0xff] %v1752_v0 }
 0x16a   : > { %2516 = shalt.err (!%p2513_p5)
}
 0x16b   : > { %s2517_s21 = scalar_lea.hbm %s3233_s9, 1024  ;;  %s2521_s27 = scalar_lea.hbm %s3290_s3, 2048 }
 0x16c   : > { %p2518_p6 = scmp.ne.s32.totalorder %s3233_s9, %s2517_s21  ;;  %p2522_p10 = scmp.lt.u32.totalorder %s3233_s9, %s3290_s3 }
 0x16d   : > { %p2523_p11 = scmp.lt.u32.totalorder %s2521_s27, %s2517_s21  ;;  %p2525_p13 = scmp.lt.u32.totalorder %s2517_s21, %s3233_s9 }
 0x16e   : > { %p2519_p7 = pnand %p2518_p6, %p2646_p4 }
 0x16f   : > { %p2524_p12 = por %p2523_p11, %p2522_p10 }
 0x170   : > { %p2520_p9 = pneg %p2519_p7 }
 0x171   : > { %p2526_p0 = por %p2525_p13, %p2524_p12 }
 0x173   : > { %p2527_p1 = pnand %p2526_p0, %p2520_p9 }
 0x175   : > { %2530 = shalt.err (!%p2527_p1)
}
 0x176   : > { %s2584_s30 = smov 128   ;;  %s2585_s4 = smov 8  }
 0x177   : > { %2362 = dma.vmem_to_hbm [thread:$0]  (%p2646_p4), %s3235_s6, 1024, %s3233_s9, %s3241_s10, %s2584_s30, %s2584_s30, %s2585_s4  }
 0x178 PF: > { %p2368_p2 = scmp.ge.s32.totalorder %s2581_s17, 2  ;;  %s1792_s5 = sand.u32 1, %s2561_s12  }
 0x179   : > { %s1793_s7 = scalar_lea.sflag [#allocation4], %s1792_s5 }
 0x17a   : > { %p2365_p3 = pnand %p2368_p2, %p2653_p8 }
 0x17c   : > { %2556 = dma.done.wait (!%p2365_p3), %s1793_s7, 1024  }
 0x17d   : > { %2558 = vsyncadd (!%p2365_p3), %s1793_s7, 4294966272  ;;  %s16_s17 = sadd.s32 1, %s2581_s17   ;;  %s3299_s12 = smov %s2565_s13 }
 0x17e   : > { %p13_p5 = scmp.ge.s32.totalorder %s16_s17, 4   ;;  %s3300_s13 = smov %s2569_s14 }
 0x17f   : > { %s3301_s14 = smov %s2659_s25  ;;  %s3302_s15 = smov %s2577_s16 }
 0x180   : > { %s3303_s16 = smov %s3305_s20  ;;  %15 = sbr.rel (!%p13_p5) target bundleno = 4 (0x4), region = 69 }
 0x187   :  { %1798 = vsyncpa [#allocation4], 1 }
 0x188   :  { %1800 = vsyncpa [#allocation4 + $0x1], 1 }

// kernel: pyramid_features.13
= control target key start
LH: loop header
LB: loop body
LE: loop exit
PB: predicated region body
PF: predicated region fallthrough
CT: control target
= control target key end

     0   :  { %8 = vsyncpa [#allocation4], 0  ;;  %s7425_s0 = inlined_call_operand.vmem [shape: bf16[2,16,18,384], index: 0, kind: input, shape index: {}]   ;;  %s7426_s1 = inlined_call_operand.vmem [shape: bf16[3,384,128], index: 1, kind: input, shape index: {}]   ;;  %s7427_s2 = inlined_call_operand.vmem [shape: f32[1,128], index: 2, kind: input, shape index: {}]   ;;  %s7428_s3 = inlined_call_operand.hbm [shape: f32[2,256,128], index: 3, kind: output, shape index: {}]  }
   0x1   :  { %10 = vsyncpa [#allocation4 + $0x1], 0  ;;  %s5392_s12 = smov 0   ;;  %s5394_s13 = smov 0  }
   0x2   :  { %s5396_s14 = smov 0   ;;  %s5398_s15 = smov 0  }
   0x3   :  { %s5400_s16 = smov 0   ;;  %s5402_s17 = smov 0  }
   0x4 LB: > { %s3939_s18 = sadd.s32 4294967295, %s5367_s17   ;;  %s3940_s19 = sadd.s32 4294967294, %s5367_s17   ;;  %s5367_s17 = sphi %s5402_s17, %s16_s17   ;;  %s5363_s16 = sphi %s5400_s16, %s7505_s16   ;;  %s5359_s15 = sphi %s5398_s15, %s7504_s15   ;;  %s5355_s14 = sphi %s5396_s14, %s7503_s14   ;;  %s5351_s13 = sphi %s5394_s13, %s7502_s13   ;;  %s5347_s12 = sphi %s5392_s12, %s7501_s12  }
   0x5   : > { %s28_s20 = sadd.s32 1, %s5363_s16  ;;  %s107_s21 = sadd.s32 1, %s5355_s14 }
   0x6   : > { %p30_p0 = scmp.ge.s32.totalorder %s28_s20, 2  ;;  %p117_p1 = scmp.ne.s32.totalorder %s5355_s14, %s5351_s13 }
   0x7   : > { %p118_p2 = scmp.eq.s32.totalorder %s3939_s18, 1  ;;  %p123_p3 = scmp.ne.s32.totalorder %s5351_s13, %s5347_s12 }
   0x8   : > { %s7507_s20 = smov (%p30_p0, %s28_s20), 0  ;;  %p124_p5 = scmp.eq.s32.totalorder %s3940_s19, 1 }
   0x9   : > { %p5432_p4 = por %p118_p2, %p117_p1  ;;  %s102_s23 = ssub.s32 %s5363_s16, %s7507_s20 }
   0xa   : > { %p3943_p6 = scmp.ge.s32.totalorder %s5367_s17, 1  ;;  %p105_p7 = scmp.eq.s32.totalorder %s102_s23, 0 }
   0xb   : > { %p5439_p8 = por %p124_p5, %p123_p3  ;;  %p162_p9 = scmp.lt.s32.totalorder %s5367_s17, 3 }
   0xc   : > { %s5445_s25 = scalar_select %p105_p7, %s5355_s14, %s107_s21  }
   0xd   : > { %p163_p10 = pnand %p3943_p6, %p162_p9 }
   0xf   : > { %166 = sbr.rel (%p163_p10) target bundleno = 577 (0x241), region = 32 }
  0x16   : > { %v5083_v0 = vld [vmem:[%s7426_s1 + $0x40] sm:$0xff]   ;;  %v5086_v3 = vld [vmem:[%s7426_s1 + $0x48] sm:$0xff]   ;;  %v5089_v6 = vld [vmem:[%s7426_s1 + $0x50] sm:$0xff]   ;;  %p192_p11 = scmp.lt.s32.totalorder %s5359_s15, 1  ;;  %vm1102_vm0 = vsmask.f32 3328 }
  0x17   : > { %v5453_v1 = vld [vmem:[%s7426_s1 + $0x80] sm:$0xff]   ;;  %4297 = vmatprep.subr.bf16.mxu0 %v5083_v0  ;;  %v5466_v4 = vld [vmem:[%s7426_s1 + $0x88] sm:$0xff]   ;;  %v5478_v7 = vld [vmem:[%s7426_s1 + $0x90] sm:$0xff]   ;;  %vm1103_vm1 = vsmask.f32 7440  ;;  %vm2708_vm3 = vcmask 1042432  }
  0x18   : > { %v5085_v2 = vld [vmem:[%s7426_s1] sm:$0xff]   ;;  %4849 = vmatprep.subr.bf16.mxu1 %v5453_v1  ;;  %v5088_v5 = vld [vmem:[%s7426_s1 + $0x8] sm:$0xff]   ;;  %v5091_v8 = vld [vmem:[%s7426_s1 + $0x10] sm:$0xff]   ;;  %s193_s10 = scalar_select %p192_p11, %s5359_s15, 1  ;;  %vm2709_vm4 = vcmask 1046532  }
  0x19   : > { %4298 = vmatpush3.bf16.msra.mxu0 %v5085_v2  ;;  %4857 = vmatpush3.bf16.msra.mxu1 %v5453_v1  ;;  %v5092_v9 = vld [vmem:[%s7426_s1 + $0x58] sm:$0xff]   ;;  %v5095_v12 = vld [vmem:[%s7426_s1 + $0x60] sm:$0xff]   ;;  %v5098_v15 = vld [vmem:[%s7426_s1 + $0x68] sm:$0xff]   ;;  %s4296_s5 = sshll.u32 %s5359_s15, 12  ;;  %s5369_s18 = smov [#allocation3]  }
  0x1a   : > { %4299 = vmatprep.subr.bf16.mxu0 %v5086_v3  ;;  %4850 = vmatprep.subr.bf16.mxu1 %v5466_v4  ;;  %v5492_v10 = vld [vmem:[%s7426_s1 + $0x98] sm:$0xff]   ;;  %v5505_v13 = vld [vmem:[%s7426_s1 + $0xa0] sm:$0xff]   ;;  %v5519_v16 = vld [vmem:[%s7426_s1 + $0xa8] sm:$0xff]   ;;  %s5025_s27 = smul.u32 576, %s193_s10  ;;  %s7370_s10 = scalar_lea.hbm %s7428_s3, %s4296_s5 }
  0x1b   : > { %v5094_v11 = vld [vmem:[%s7426_s1 + $0x18] sm:$0xff]   ;;  %v5097_v14 = vld [vmem:[%s7426_s1 + $0x20] sm:$0xff]   ;;  %v5100_v17 = vld [vmem:[%s7426_s1 + $0x28] sm:$0xff]   ;;  %s5293_s19 = sshll.u32 %s5369_s18, 4  ;;  %s5294_s19 = int_to_ptr.vmem [resolvable:$false] %s5293_s19 }
  0x1c   : > { %v5101_v18 = vld [vmem:[%s7426_s1 + $0x70] sm:$0xff]   ;;  %s5537_s9 = scalar_lea.vmem %s7425_s0, %s5025_s27  ;;  %v5104_v24 = vld [vmem:[%s7426_s1 + $0x78] sm:$0xff]   ;;  %v5111_v30 = vld [vmem:[%s7426_s1 + $0x100] sm:$0xff]   ;;  %s5295_s21 = scalar_lea.vmem %s5294_s19, 8192 }
  0x1d   : > { %4300 = vmatpush3.bf16.msra.mxu0 %v5088_v5  ;;  %4858 = vmatpush3.bf16.msra.mxu1 %v5466_v4  ;;  %v5532_v19 = vld [vmem:[%s7426_s1 + $0xb0] sm:$0xff]   ;;  %v5544_v21 = vld [vmem:[%s5537_s9] sm:$0xff]  ;;  %v5550_v23 = vld [vmem:[%s5537_s9 + $0x128] sm:$0xf] }
  0x1e   : > { %4301 = vmatprep.subr.bf16.mxu0 %v5089_v6  ;;  %4851 = vmatprep.subr.bf16.mxu1 %v5478_v7  ;;  %v5103_v20 = vld [vmem:[%s7426_s1 + $0x30] sm:$0xff]   ;;  %v5559_v25 = vld [vmem:[%s7426_s1 + $0xb8] sm:$0xff]   ;;  %v259_v31 = vld [vmem:[%s5537_s9 + $0x14c] sm:$0xf]  ;;  %v1106_v47 = vshrl.u32 %v5544_v21, 16  ;;  %v1109_v54 = vshll.u32 %v5544_v21, 16 }
  0x1f   : > { %v5547_v22 = vld [vmem:[%s5537_s9 + $0xc] sm:$0xff]  ;;  %v5564_v27 = vld [vmem:[%s5537_s9 + $0x134] sm:$0xf]  ;;  %v5106_v29 = vld [vmem:[%s7426_s1 + $0x38] sm:$0xff]  }
  0x20   : > { %v3947_v26 = vcombine.high %v5544_v21, %v5547_v22  ;;  %v3972_v28 = vcombine.low %v5550_v23, %v5564_v27  ;;  %v261_v32 = vld [vmem:[%s5537_s9 + $0x158] sm:$0xf]  ;;  %v5579_v33 = vld [vmem:[%s5537_s9 + $0x24] sm:$0xff]  ;;  %v3946_v34 = vcombine.low %v5544_v21, %v5547_v22  ;;  %v5584_v36 = vld [vmem:[%s5537_s9 + $0x30] sm:$0xff]  ;;  %v1108_v59 = vrot.slane %v1106_v47, 4 }
  0x21   : > { %4302 = vmatpush3.bf16.msra.mxu0 %v5091_v8  ;;  %4859 = vmatpush3.bf16.msra.mxu1 %v5478_v7  ;;  %v3975_v35 = vcombine.low %v259_v31, %v261_v32  ;;  %v5112_v37 = vld [vmem:[%s7426_s1 + $0xc0] sm:$0xff]   ;;  %v265_v38 = vld [vmem:[%s5537_s9 + $0x170] sm:$0xf]  ;;  %v267_v39 = vld [vmem:[%s5537_s9 + $0x17c] sm:$0xf]  ;;  %v3950_v41 = vcombine.high %v5579_v33, %v5584_v36  ;;  %v3949_v51 = vcombine.low %v5579_v33, %v5584_v36  ;;  %v1111_v61 = vrot.slane %v1109_v54, 5 }
  0x22   : > { %4303 = vmatprep.subr.bf16.mxu0 %v5092_v9  ;;  %4852 = vmatprep.subr.bf16.mxu1 %v5492_v10  ;;  %v5113_v40 = vld [vmem:[%s7426_s1 + $0x108] sm:$0xff]   ;;  %v3978_v43 = vcombine.low %v265_v38, %v267_v39  ;;  %v271_v44 = vld [vmem:[%s5537_s9 + $0x194] sm:$0xf]  ;;  %v273_v45 = vld [vmem:[%s5537_s9 + $0x1a0] sm:$0xf]  ;;  %v1115_v9 = vshll.u32 %v5547_v22, 16 }
  0x23   : > { %780 = vmatprep.mubr.bf16.mxu0 %v3947_v26  ;;  %4737 = vmatprep.mubr.bf16.mxu1 %v3972_v28  ;;  %v5114_v42 = vld [vmem:[%s7426_s1 + $0xc8] sm:$0xff]   ;;  %v5119_v46 = vld [vmem:[%s7426_s1 + $0x110] sm:$0xff]   ;;  %v5615_v50 = vld [vmem:[%s5537_s9 + $0x1b8] sm:$0xf]  ;;  %v3981_v52 = vcombine.low %v271_v44, %v273_v45  ;;  %v1112_v5 = vor.u32 %v1111_v61, %v1108_v59  ;;  %v1157_v38 = vshll.u32 %v5579_v33, 16 }
  0x24   : > { %v5609_v48 = vld [vmem:[%s5537_s9 + $0x48] sm:$0xff]  ;;  %v5612_v49 = vld [vmem:[%s5537_s9 + $0x54] sm:$0xff]  ;;  %v279_v53 = vld [vmem:[%s5537_s9 + $0x1c4] sm:$0xf]  ;;  %v1117_v26 = vrot.slane %v1115_v9, 5 }
  0x25   : > { %4304 = vmatpush3.bf16.msra.mxu0 %v5094_v11  ;;  %4860 = vmatpush3.bf16.msra.mxu1 %v5492_v10  ;;  %v5120_v55 = vld [vmem:[%s7426_s1 + $0xd0] sm:$0xff]   ;;  %v3953_v56 = vcombine.high %v5609_v48, %v5612_v49  ;;  %v5121_v57 = vld [vmem:[%s7426_s1 + $0x118] sm:$0xff]   ;;  %v3984_v58 = vcombine.low %v5615_v50, %v279_v53  ;;  %v5640_v63 = vld [vmem:[%s5537_s9 + $0x1e8] sm:$0xf]  ;;  %v3952_v6 = vcombine.low %v5609_v48, %v5612_v49  ;;  %v1133_v11 = vshrl.u32 %v5547_v22, 16 }
  0x26   : > { %4305 = vmatprep.subr.bf16.mxu0 %v5095_v12  ;;  %4853 = vmatprep.subr.bf16.mxu1 %v5505_v13  ;;  %v5122_v60 = vld [vmem:[%s7426_s1 + $0xd8] sm:$0xff]   ;;  %v5127_v0 = vld [vmem:[%s7426_s1 + $0x120] sm:$0xff]   ;;  %v297_v22 = vld [vmem:[%s5537_s9 + $0x230] sm:$0xf] }
  0x27   : > { %v5637_v62 = vld [vmem:[%s5537_s9 + $0x1dc] sm:$0xf]  ;;  %v289_v3 = vld [vmem:[%s5537_s9 + $0x200] sm:$0xf]  ;;  %v295_v21 = vld [vmem:[%s5537_s9 + $0x224] sm:$0xf] }
  0x28   : > { %v5649_v2 = vld [vmem:[%s5537_s9 + $0x78] sm:$0xff]  ;;  %v3987_v8 = vcombine.low %v5637_v62, %v5640_v63  ;;  %v5128_v12 = vld [vmem:[%s7426_s1 + $0xe0] sm:$0xff]   ;;  %vm5678_vm2 = vmor %vm1102_vm0, %vm1103_vm1  ;;  %v1135_v28 = vrot.slane %v1133_v11, 4  ;;  %v3993_v39 = vcombine.low %v295_v21, %v297_v22 }
  0x29   : > { %4306 = vmatpush3.bf16.msra.mxu0 %v5097_v14  ;;  %4861 = vmatpush3.bf16.msra.mxu1 %v5505_v13  ;;  %v5689_v31 = vld [vmem:[%s5537_s9 + $0x90] sm:$0xff]  ;;  %v5692_v32 = vld [vmem:[%s5537_s9 + $0x9c] sm:$0xff]  ;;  %vm6308_vm5 = vmor %vm2708_vm3, %vm2709_vm4 }
  0x2a   : > { %4307 = vmatprep.subr.bf16.mxu0 %v5098_v15  ;;  %4854 = vmatprep.subr.bf16.mxu1 %v5519_v16  ;;  %v1154_v15 = vshrl.u32 %v5579_v33, 16  ;;  %v5136_v33 = vld [vmem:[%s7426_s1 + $0xf0] sm:$0xff]   ;;  %v5141_v11 = vld [vmem:[%s7426_s1 + $0x140] sm:$0xff]   ;;  %v3958_v22 = vcombine.low %v5689_v31, %v5692_v32 }
  0x2d   : > { %4308 = vmatpush3.bf16.msra.mxu0 %v5100_v17  ;;  %4862 = vmatpush3.bf16.msra.mxu1 %v5519_v16 }
  0x2e   : > { %4309 = vmatprep.subr.bf16.mxu0 %v5101_v18  ;;  %4855 = vmatprep.subr.bf16.mxu1 %v5532_v19  ;;  %v5130_v18 = vld [vmem:[%s7426_s1 + $0xe8] sm:$0xff]  }
  0x31   : > { %4310 = vmatpush3.bf16.msra.mxu0 %v5103_v20  ;;  %4863 = vmatpush3.bf16.msra.mxu1 %v5532_v19  ;;  %v1113_v20 = vrot.slane %v1112_v5, 4 }
  0x32   : > { %4311 = vmatprep.subr.bf16.mxu0 %v5104_v24  ;;  %4856 = vmatprep.subr.bf16.mxu1 %v5559_v25 }
  0x35   : > { %4312 = vmatpush3.bf16.msra.mxu0 %v5106_v29  ;;  %4864 = vmatpush3.bf16.msra.mxu1 %v5559_v25 }
  0x36   : > { %4705 = vmatprep.subr.bf16.mxu0 %v5453_v1  ;;  %4433 = vmatprep.subr.bf16.mxu1 %v5111_v30  ;;  %v5135_v30 = vld [vmem:[%s7426_s1 + $0x130] sm:$0xff]  }
  0x38   : > { %781 = vmatmul.mubr.bf16.vlgmr.msra.gmra.mrb[0].mxu0 %v3946_v34  ;;  %4738 = vmatmul.mubr.bf16.vlgmr.msra.gmra.mrb[0].mxu1 %v3975_v35  ;;  %v1136_v34 = vor.u32 %v1135_v28, %v1117_v26 }
  0x39   : > { %4706 = vmatpush3.bf16.msra.mxu0 %v5453_v1  ;;  %4434 = vmatpush3.bf16.msra.mxu1 %v5112_v37  ;;  %v5646_v1 = vld [vmem:[%s5537_s9 + $0x6c] sm:$0xff]  ;;  %v1156_v37 = vrot.slane %v1154_v15, 4 }
  0x3a   : > { %4435 = vmatprep.subr.bf16.mxu1 %v5113_v40  ;;  %788 = vmatprep.mubr.bf16.mxu0 %v3950_v41  ;;  %v3956_v14 = vcombine.high %v5646_v1, %v5649_v2  ;;  %v3955_v29 = vcombine.low %v5646_v1, %v5649_v2  ;;  %v5697_v40 = vsel %vm5678_vm2, %v1113_v20, %v1117_v26  ;;  %v214_v41 = vld [vmem:[%s5537_s9 + $0x3c] sm:$0x11]  ;;  %v1137_v44 = vrot.slane %v1136_v34, 4 }
  0x3b   : > { %4741 = vmatprep.mubr.bf16.mxu1 %v3978_v43  ;;  %4707 = vmatprep.subr.bf16.mxu0 %v5466_v4  ;;  %v1181_v43 = vshrl.u32 %v5584_v36, 16  ;;  %v1187_v47 = vshll.u32 %v214_v41, 16  ;;  %v1253_v20 = vshll.u32 %v5646_v1, 16 }
  0x3d   : > { %4436 = vmatpush3.bf16.msra.mxu1 %v5114_v42  ;;  %4708 = vmatpush3.bf16.msra.mxu0 %v5466_v4  ;;  %v291_v4 = vld [vmem:[%s5537_s9 + $0x20c] sm:$0xf]  ;;  %v1163_v42 = vshll.u32 %v5584_v36, 16  ;;  %v1183_v53 = vrot.slane %v1181_v43, 4  ;;  %v1202_v36 = vshrl.u32 %v5609_v48, 16  ;;  %v1189_v59 = vrot.slane %v1187_v47, 5 }
  0x3e   : > { %4437 = vmatprep.subr.bf16.mxu1 %v5119_v46  ;;  %4709 = vmatprep.subr.bf16.mxu0 %v5478_v7  ;;  %v3990_v17 = vcombine.low %v289_v3, %v291_v4  ;;  %v1159_v46 = vrot.slane %v1157_v38, 5  ;;  %v5723_v3 = vld [vmem:[%s5537_s9 + $0xb4] sm:$0xff]  ;;  %v5757_v43 = vld [vmem:[%s5537_s9 + $0xe4] sm:$0xff] }
  0x3f   : > { %v1204_v61 = vrot.slane %v1202_v36, 4 }
  0x40   : > { %789 = vmatmul.mubr.bf16.gmra.mrb[4].mxu0 %v3949_v51  ;;  %4742 = vmatmul.mubr.bf16.gmra.mrb[4].mxu1 %v3981_v52  ;;  %v3959_v51 = vcombine.high %v5689_v31, %v5692_v32  ;;  %v1165_v52 = vrot.slane %v1163_v42, 5  ;;  %v5754_v42 = vld [vmem:[%s5537_s9 + $0xd8] sm:$0xff] }
  0x41   : > { %4438 = vmatpush3.bf16.msra.mxu1 %v5120_v55  ;;  %796 = vmatprep.mubr.bf16.mxu0 %v3953_v56  ;;  %v1160_v55 = vor.u32 %v1159_v46, %v1156_v37  ;;  %v1205_v56 = vshll.u32 %v5609_v48, 16  ;;  %v1229_v48 = vshrl.u32 %v5612_v49, 16  ;;  %v1301_v46 = vshll.u32 %v5689_v31, 16 }
  0x42   : > { %4439 = vmatprep.subr.bf16.mxu1 %v5121_v57  ;;  %4745 = vmatprep.mubr.bf16.mxu1 %v3984_v58  ;;  %v1184_v58 = vor.u32 %v1183_v53, %v1165_v52  ;;  %v5151_v53 = vld [vmem:[%s7426_s1 + $0x150] sm:$0xff]  }
  0x43   : > { %4710 = vmatpush3.bf16.msra.mxu0 %v5478_v7  ;;  %v5129_v7 = vld [vmem:[%s7426_s1 + $0x128] sm:$0xff]   ;;  %v1161_v4 = vrot.slane %v1160_v55, 4  ;;  %v1207_v5 = vrot.slane %v1205_v56, 5 }
  0x44   : > { %4711 = vmatprep.subr.bf16.mxu0 %v5492_v10  ;;  %v1185_v9 = vrot.slane %v1184_v58, 4  ;;  %v1303_v58 = vrot.slane %v1301_v46, 5 }
  0x45   : > { %4440 = vmatpush3.bf16.msra.mxu1 %v5122_v60  ;;  %v220_v60 = vld [vmem:[%s5537_s9 + $0x60] sm:$0x11] }
  0x46   : > { %4441 = vmatprep.subr.bf16.mxu1 %v5127_v0  ;;  %v5138_v0 = vld [vmem:[%s7426_s1 + $0xf8] sm:$0xff]   ;;  %v1235_v15 = vshll.u32 %v220_v60, 16 }
  0x47   : > { %4712 = vmatpush3.bf16.msra.mxu0 %v5492_v10  ;;  %v208_v10 = vld [vmem:[%s5537_s9 + $0x18] sm:$0x11] }
  0x48   : > { %797 = vmatmul.mubr.bf16.gmra.mrb[8].mxu0 %v3952_v6  ;;  %4746 = vmatmul.mubr.bf16.gmra.mrb[8].mxu1 %v3987_v8  ;;  %v1139_v35 = vshll.u32 %v208_v10, 16  ;;  %v1211_v6 = vshll.u32 %v5612_v49, 16  ;;  %v5728_v8 = vld [vmem:[%s5537_s9 + $0xc0] sm:$0xff]  ;;  %v1190_v49 = vsel %vm5678_vm2, %v1185_v9, %v1189_v59  ;;  %v1237_v38 = vrot.slane %v1235_v15, 5 }
  0x49   : > { %4442 = vmatpush3.bf16.msra.mxu1 %v5128_v12  ;;  %804 = vmatprep.mubr.bf16.mxu0 %v3956_v14  ;;  %v1208_v12 = vor.u32 %v1207_v5, %v1204_v61  ;;  %v1231_v14 = vrot.slane %v1229_v48, 4  ;;  %v3962_v26 = vcombine.high %v5723_v3, %v5728_v8  ;;  %v5788_v48 = vld [vmem:[%s5537_s9 + $0x108] sm:$0xff]  ;;  %v1373_v15 = vshrl.u32 %v5728_v8, 16 }
  0x4a   : > { %4443 = vmatprep.subr.bf16.mxu1 %v5129_v7  ;;  %4749 = vmatprep.mubr.bf16.mxu1 %v3990_v17  ;;  %v1141_v45 = vrot.slane %v1139_v35, 5  ;;  %v1213_v7 = vrot.slane %v1211_v6, 5  ;;  %v1166_v17 = vsel %vm5678_vm2, %v1161_v4, %v1165_v52  ;;  %v1325_v52 = vshrl.u32 %v5692_v32, 16 }
  0x4b   : > { %4713 = vmatprep.subr.bf16.mxu0 %v5505_v13  ;;  %v4070_v34 = vcombine.high %v1166_v17, %v1190_v49  ;;  %v1209_v35 = vrot.slane %v1208_v12, 4  ;;  %v4069_v36 = vcombine.low %v1166_v17, %v1190_v49  ;;  %v1346_v12 = vshrl.u32 %v5723_v3, 16  ;;  %v5171_v17 = vld [vmem:[%s7426_s1 + $0x1c0] sm:$0xff]  }
  0x4c   : > { %4714 = vmatpush3.bf16.msra.mxu0 %v5505_v13  ;;  %v5137_v13 = vld [vmem:[%s7426_s1 + $0x138] sm:$0xff]   ;;  %v1142_v54 = vsel %vm5678_vm2, %v1137_v44, %v1141_v45  ;;  %v1232_v28 = vor.u32 %v1231_v14, %v1213_v7  ;;  %v1298_v45 = vshrl.u32 %v5689_v31, 16  ;;  %v3961_v31 = vcombine.low %v5723_v3, %v5728_v8 }
  0x4d   : > { %4444 = vmatpush3.bf16.msra.mxu1 %v5130_v18  ;;  %4715 = vmatprep.subr.bf16.mxu0 %v5519_v16  ;;  %v4067_v57 = vcombine.high %v5697_v40, %v1142_v54  ;;  %v1250_v18 = vshrl.u32 %v5646_v1, 16  ;;  %v4066_v21 = vcombine.low %v5697_v40, %v1142_v54  ;;  %v1259_v1 = vshll.u32 %v5649_v2, 16  ;;  %v232_v54 = vld [vmem:[%s5537_s9 + $0xa8] sm:$0x11] }
  0x4e   : > { %4445 = vmatprep.subr.bf16.mxu1 %v5135_v30  ;;  %v1255_v30 = vrot.slane %v1253_v20, 5  ;;  %v1233_v37 = vrot.slane %v1232_v28, 4  ;;  %v1327_v61 = vrot.slane %v1325_v52, 4  ;;  %v1331_v6 = vshll.u32 %v232_v54, 16 }
  0x4f   : > { %v1252_v10 = vrot.slane %v1250_v18, 4  ;;  %v1261_v40 = vrot.slane %v1259_v1, 5  ;;  %v1355_v14 = vshll.u32 %v5728_v8, 16  ;;  %v3964_v49 = vcombine.low %v5754_v42, %v5757_v43  ;;  %v5161_v18 = vld [vmem:[%s7426_s1 + $0x160] sm:$0xff]   ;;  %v238_v1 = vld [vmem:[%s5537_s9 + $0xcc] sm:$0x11] }
  0x50   : > { %805 = vmatmul.mubr.bf16.gmra.mrb[12].mxu0 %v3955_v29  ;;  %4750 = vmatmul.mubr.bf16.gmra.mrb[12].mxu1 %v3993_v39  ;;  %v226_v29 = vld [vmem:[%s5537_s9 + $0x84] sm:$0x11]  ;;  %v1333_v8 = vrot.slane %v1331_v6, 5  ;;  %v1348_v28 = vrot.slane %v1346_v12, 4  ;;  %v1379_v46 = vshll.u32 %v238_v1, 16 }
  0x51   : > { %4446 = vmatpush3.bf16.msra.mxu1 %v5136_v33  ;;  %812 = vmatprep.mubr.bf16.mxu0 %v3959_v51  ;;  %v5146_v39 = vld [vmem:[%s7426_s1 + $0x148] sm:$0xff]   ;;  %v1283_v44 = vshll.u32 %v226_v29, 16  ;;  %v1238_v33 = vsel %vm5678_vm2, %v1233_v37, %v1237_v38  ;;  %v1307_v51 = vshll.u32 %v5692_v32, 16  ;;  %v1403_v37 = vshll.u32 %v5757_v43, 16  ;;  %v250_v12 = vld [vmem:[%s5537_s9 + $0x114] sm:$0x11] }
  0x52   : > { %4447 = vmatprep.subr.bf16.mxu1 %v5137_v13  ;;  %2290 = vmatprep.mubr.bf16.mxu1 %v4067_v57  ;;  %v3965_v13 = vcombine.high %v5754_v42, %v5757_v43  ;;  %v1300_v57 = vrot.slane %v1298_v45, 4  ;;  %v1421_v38 = vshrl.u32 %v5757_v43, 16 }
  0x53   : > { %4716 = vmatpush3.bf16.msra.mxu0 %v5519_v16  ;;  %v1277_v16 = vshrl.u32 %v5649_v2, 16  ;;  %v1256_v2 = vor.u32 %v1255_v30, %v1252_v10  ;;  %v1285_v56 = vrot.slane %v1283_v44, 5  ;;  %v1309_v60 = vrot.slane %v1307_v51, 5 }
  0x54   : > { %4717 = vmatprep.subr.bf16.mxu0 %v5532_v19  ;;  %v1304_v5 = vor.u32 %v1303_v58, %v1300_v57  ;;  %v1357_v10 = vrot.slane %v1355_v14, 5  ;;  %v1375_v30 = vrot.slane %v1373_v15, 4  ;;  %v1405_v52 = vrot.slane %v1403_v37, 5 }
  0x55   : > { %4448 = vmatpush3.bf16.msra.mxu1 %v5138_v0  ;;  %v1279_v41 = vrot.slane %v1277_v16, 4  ;;  %v1257_v55 = vrot.slane %v1256_v2, 4  ;;  %v5156_v0 = vld [vmem:[%s7426_s1 + $0x158] sm:$0xff]   ;;  %v5166_v16 = vld [vmem:[%s7426_s1 + $0x168] sm:$0xff]  }
  0x56   : > { %4753 = vmatprep.subr.bf16.mxu1 %v5141_v11  ;;  %v1376_v45 = vor.u32 %v1375_v30, %v1357_v10 }
  0x57   : > { %4718 = vmatpush3.bf16.msra.mxu0 %v5532_v19  ;;  %v1280_v47 = vor.u32 %v1279_v41, %v1261_v40  ;;  %v1214_v19 = vsel %vm5678_vm2, %v1209_v35, %v1213_v7  ;;  %v5782_v4 = vsel %vm5678_vm2, %v1257_v55, %v1261_v40  ;;  %v1349_v7 = vshll.u32 %v5723_v3, 16  ;;  %v5818_v40 = vld [vmem:[%s5537_s9 + $0x120] sm:$0xff]  ;;  %v5821_v41 = vld [vmem:[%s5537_s9 + $0x12c] sm:$0xff] }
  0x58   : > { %813 = vmatmul.mubr.bf16.gmra.mrb[16].mxu0 %v3958_v22  ;;  %2291 = vmatmul.mubr.bf16.vlgmr.msra.gmra.mrb[16].mxu1 %v4066_v21  ;;  %v4073_v32 = vcombine.high %v1214_v19, %v1238_v33  ;;  %v4072_v20 = vcombine.low %v1214_v19, %v1238_v33  ;;  %v1305_v22 = vrot.slane %v1304_v5, 4  ;;  %v1397_v35 = vshll.u32 %v5754_v42, 16  ;;  %v5173_v19 = vld [vmem:[%s7426_s1 + $0x170] sm:$0xff]  }
  0x59   : > { %4754 = vmatpush3.bf16.msra.mxu1 %v5141_v11  ;;  %820 = vmatprep.mubr.bf16.mxu0 %v3962_v26  ;;  %v1281_v59 = vrot.slane %v1280_v47, 4  ;;  %v1328_v11 = vor.u32 %v1327_v61, %v1309_v60  ;;  %v1351_v29 = vrot.slane %v1349_v7, 5  ;;  %v244_v47 = vld [vmem:[%s5537_s9 + $0xf0] sm:$0x11]  ;;  %v1377_v54 = vrot.slane %v1376_v45, 4 }
  0x5a   : > { %2298 = vmatprep.mubr.bf16.mxu1 %v4070_v34  ;;  %4755 = vmatprep.subr.bf16.mxu1 %v5146_v39  ;;  %v1394_v34 = vshrl.u32 %v5754_v42, 16  ;;  %v1399_v51 = vrot.slane %v1397_v35, 5  ;;  %v1381_v55 = vrot.slane %v1379_v46, 5  ;;  %v1469_v61 = vshrl.u32 %v5788_v48, 16 }
  0x5b   : > { %4719 = vmatprep.subr.bf16.mxu0 %v5559_v25  ;;  %v1286_v9 = vsel %vm5678_vm2, %v1281_v59, %v1285_v56  ;;  %v1329_v26 = vrot.slane %v1328_v11, 4  ;;  %v1352_v44 = vor.u32 %v1351_v29, %v1348_v28  ;;  %v1427_v56 = vshll.u32 %v244_v47, 16  ;;  %v256_v47 = vld [vmem:[%s5537_s9 + $0x138] sm:$0x11] }
  0x5c   : > { %4720 = vmatpush3.bf16.msra.mxu0 %v5559_v25  ;;  %v5785_v25 = vld [vmem:[%s5537_s9 + $0xfc] sm:$0xff]  ;;  %v4076_v21 = vcombine.high %v5782_v4, %v1286_v9  ;;  %v4075_v43 = vcombine.low %v5782_v4, %v1286_v9  ;;  %v1396_v33 = vrot.slane %v1394_v34, 4  ;;  %v5842_v4 = vld [vmem:[%s5537_s9 + $0x150] sm:$0xff]  ;;  %v1382_v6 = vsel %vm5678_vm2, %v1377_v54, %v1381_v55 }
  0x5d   : > { %4756 = vmatpush3.bf16.msra.mxu1 %v5146_v39  ;;  %v3968_v3 = vcombine.high %v5785_v25, %v5788_v48  ;;  %4569 = vmatprep.subr.bf16.mxu0 %v5171_v17  ;;  %v1310_v39 = vsel %vm5678_vm2, %v1305_v22, %v1309_v60  ;;  %v1334_v2 = vsel %vm5678_vm2, %v1329_v26, %v1333_v8  ;;  %v1445_v59 = vshll.u32 %v5785_v25, 16  ;;  %v5860_v8 = vld [vmem:[%s5537_s9 + $0x174] sm:$0xff] }
  0x5e   : > { %4757 = vmatprep.subr.bf16.mxu1 %v5151_v53  ;;  %v3967_v42 = vcombine.low %v5785_v25, %v5788_v48  ;;  %v1400_v57 = vor.u32 %v1399_v51, %v1396_v33  ;;  %v1451_v60 = vshll.u32 %v5788_v48, 16  ;;  %v3970_v9 = vcombine.low %v5818_v40, %v5821_v41 }
  0x5f   : > { %v4078_v48 = vcombine.low %v1310_v39, %v1334_v2  ;;  %v1429_v11 = vrot.slane %v1427_v56, 5  ;;  %v1447_v17 = vrot.slane %v1445_v59, 5  ;;  %v1475_v28 = vshll.u32 %v250_v12, 16 }
  0x60   : > { %821 = vmatmul.mubr.bf16.gmra.mrb[20].mxu0 %v3961_v31  ;;  %2299 = vmatmul.mubr.bf16.gmra.mrb[20].mxu1 %v4069_v36  ;;  %v3971_v31 = vcombine.high %v5818_v40, %v5821_v41  ;;  %v4079_v36 = vcombine.high %v1310_v39, %v1334_v2  ;;  %v1401_v7 = vrot.slane %v1400_v57, 4  ;;  %v1490_v30 = vshrl.u32 %v5818_v40, 16 }
  0x61   : > { %828 = vmatprep.mubr.bf16.mxu0 %v3965_v13  ;;  %2306 = vmatprep.mubr.bf16.mxu1 %v4073_v32  ;;  %v1353_v13 = vrot.slane %v1352_v44, 4  ;;  %v1442_v32 = vshrl.u32 %v5785_v25, 16  ;;  %v5186_v25 = vld [vmem:[%s7426_s1 + $0x178] sm:$0xff]   ;;  %v1493_v1 = vshll.u32 %v5818_v40, 16  ;;  %v1517_v34 = vshrl.u32 %v5821_v41, 16 }
  0x62   : > { %4758 = vmatpush3.bf16.msra.mxu1 %v5151_v53  ;;  %v1423_v53 = vrot.slane %v1421_v38, 4  ;;  %v1406_v22 = vsel %vm5678_vm2, %v1401_v7, %v1405_v52  ;;  %v1477_v2 = vrot.slane %v1475_v28, 5  ;;  %v1492_v46 = vrot.slane %v1490_v30, 4 }
  0x63   : > { %4759 = vmatprep.subr.bf16.mxu1 %v5156_v0  ;;  %v1358_v5 = vsel %vm5678_vm2, %v1353_v13, %v1357_v10  ;;  %v1444_v15 = vrot.slane %v1442_v32, 4  ;;  %v1547_v33 = vshll.u32 %v5842_v4, 16  ;;  %v1565_v51 = vshrl.u32 %v5842_v4, 16  ;;  %v262_v32 = vld [vmem:[%s5537_s9 + $0x15c] sm:$0x11] }
  0x64   : > { %v1424_v58 = vor.u32 %v1423_v53, %v1405_v52  ;;  %v4081_v37 = vcombine.low %v1358_v5, %v1382_v6  ;;  %v5882_v53 = vld [vmem:[%s5537_s9 + $0x18c] sm:$0xff]  ;;  %v1523_v55 = vshll.u32 %v256_v47, 16 }
  0x65   : > { %v1448_v26 = vor.u32 %v1447_v17, %v1444_v15  ;;  %v1595_v15 = vshll.u32 %v5860_v8, 16  ;;  %v1613_v17 = vshrl.u32 %v5860_v8, 16 }
  0x66   : > { %4760 = vmatpush3.bf16.msra.mxu1 %v5156_v0  ;;  %v5839_v0 = vld [vmem:[%s5537_s9 + $0x144] sm:$0xff]  ;;  %v1425_v14 = vrot.slane %v1424_v58, 4 }
  0x67   : > { %4761 = vmatprep.subr.bf16.mxu1 %v5161_v18  ;;  %v3973_v35 = vcombine.low %v5839_v0, %v5842_v4  ;;  %v1449_v44 = vrot.slane %v1448_v26, 4  ;;  %v5894_v58 = vld [vmem:[%s7426_s1 + $0x200] sm:$0xff]  }
  0x68   : > { %829 = vmatmul.mubr.bf16.gmra.mrb[24].mxu0 %v3964_v49  ;;  %2307 = vmatmul.mubr.bf16.gmra.mrb[24].mxu1 %v4072_v20  ;;  %v3974_v49 = vcombine.high %v5839_v0, %v5842_v4  ;;  %v1453_v20 = vrot.slane %v1451_v60, 5  ;;  %v1430_v29 = vsel %vm5678_vm2, %v1425_v14, %v1429_v11 }
  0x69   : > { %836 = vmatprep.mubr.bf16.mxu0 %v3968_v3  ;;  %2314 = vmatprep.mubr.bf16.mxu1 %v4076_v21  ;;  %v1471_v3 = vrot.slane %v1469_v61, 4  ;;  %v5857_v21 = vld [vmem:[%s5537_s9 + $0x168] sm:$0xff]  ;;  %v4085_v39 = vcombine.high %v1406_v22, %v1430_v29  ;;  %v4084_v57 = vcombine.low %v1406_v22, %v1430_v29  ;;  %v1549_v61 = vrot.slane %v1547_v33, 5 }
  0x6a   : > { %4762 = vmatpush3.bf16.msra.mxu1 %v5161_v18  ;;  %v4082_v18 = vcombine.high %v1358_v5, %v1382_v6  ;;  %v3977_v38 = vcombine.high %v5857_v21, %v5860_v8  ;;  %v1454_v52 = vsel %vm5678_vm2, %v1449_v44, %v1453_v20  ;;  %v3976_v56 = vcombine.low %v5857_v21, %v5860_v8 }
  0x6b   : > { %4763 = vmatprep.subr.bf16.mxu1 %v5166_v16  ;;  %v1472_v10 = vor.u32 %v1471_v3, %v1453_v20  ;;  %v1586_v7 = vshrl.u32 %v5857_v21, 16  ;;  %v1589_v14 = vshll.u32 %v5857_v21, 16  ;;  %v1504_v44 = vshrl.u32 %v5550_v23, 16 }
  0x6d   : > { %v1473_v45 = vrot.slane %v1472_v10, 4  ;;  %v1588_v10 = vrot.slane %v1586_v7, 4  ;;  %v1591_v8 = vrot.slane %v1589_v14, 5 }
  0x6e   : > { %4764 = vmatpush3.bf16.msra.mxu1 %v5166_v16  ;;  %v1499_v16 = vshll.u32 %v5821_v41, 16  ;;  %v1538_v41 = vshrl.u32 %v5839_v0, 16 }
  0x6f   : > { %4765 = vmatprep.subr.bf16.mxu1 %v5173_v19 }
  0x70   : > { %837 = vmatmul.mubr.bf16.gmra.mrb[28].mxu0 %v3967_v42  ;;  %2315 = vmatmul.mubr.bf16.gmra.mrb[28].mxu1 %v4075_v43  ;;  %v1495_v42 = vrot.slane %v1493_v1, 5  ;;  %v1501_v40 = vrot.slane %v1499_v16, 5  ;;  %v1519_v43 = vrot.slane %v1517_v34, 4  ;;  %v1540_v59 = vrot.slane %v1538_v41, 4 }
  0x71   : > { %844 = vmatprep.mubr.bf16.mxu0 %v3971_v31  ;;  %2322 = vmatprep.mubr.bf16.mxu1 %v4079_v36  ;;  %v5885_v31 = vld [vmem:[%s5537_s9 + $0x198] sm:$0xff]  ;;  %v1478_v36 = vsel %vm5678_vm2, %v1473_v45, %v1477_v2  ;;  %v1597_v16 = vrot.slane %v1595_v15, 5  ;;  %v1615_v34 = vrot.slane %v1613_v17, 4  ;;  %v1507_v45 = vshll.u32 %v5550_v23, 16  ;;  %v5970_v15 = vld [vmem:[%s5537_s9 + $0x14c] sm:$0xf] }
  0x72   : > { %4766 = vmatpush3.bf16.msra.mxu1 %v5173_v19  ;;  %v1541_v19 = vshll.u32 %v5839_v0, 16  ;;  %v1496_v13 = vor.u32 %v1495_v42, %v1492_v46  ;;  %v1520_v54 = vor.u32 %v1519_v43, %v1501_v40  ;;  %v1567_v0 = vrot.slane %v1565_v51, 4  ;;  %v5930_v42 = vld [vmem:[%s5537_s9 + $0x1d4] sm:$0xff] }
  0x73   : > { %4767 = vmatprep.subr.bf16.mxu1 %v5186_v25  ;;  %v3980_v4 = vcombine.high %v5882_v53, %v5885_v31  ;;  %v4088_v5 = vcombine.high %v1454_v52, %v1478_v36  ;;  %v3979_v21 = vcombine.low %v5882_v53, %v5885_v31  ;;  %v4087_v22 = vcombine.low %v1454_v52, %v1478_v36 }
  0x74   : > { %v1543_v60 = vrot.slane %v1541_v19, 5  ;;  %v1497_v6 = vrot.slane %v1496_v13, 4  ;;  %v1568_v12 = vor.u32 %v1567_v0, %v1549_v61  ;;  %v1661_v2 = vshrl.u32 %v5885_v31, 16  ;;  %v274_v13 = vld [vmem:[%s5537_s9 + $0x1a4] sm:$0x11] }
  0x75   : > { %v1592_v23 = vor.u32 %v1591_v8, %v1588_v10  ;;  %v1616_v47 = vor.u32 %v1615_v34, %v1597_v16  ;;  %v5965_v7 = vrot.slane %v1507_v45, 5  ;;  %v6007_v45 = vld [vmem:[%s5537_s9 + $0x17c] sm:$0xf] }
  0x76   : > { %4768 = vmatpush3.bf16.msra.mxu1 %v5186_v25  ;;  %v1521_v25 = vrot.slane %v1520_v54, 4  ;;  %v1544_v11 = vor.u32 %v1543_v60, %v1540_v59  ;;  %v1502_v20 = vsel %vm5678_vm2, %v1497_v6, %v1501_v40  ;;  %v1569_v29 = vrot.slane %v1568_v12, 4  ;;  %v5933_v40 = vld [vmem:[%s5537_s9 + $0x1e0] sm:$0xff]  ;;  %v5948_v54 = vld [vmem:[%s5537_s9 + $0x134] sm:$0xf] }
  0x77   : > { %4801 = vmatprep.subr.bf16.mxu1 %v5894_v58  ;;  %v1663_v52 = vrot.slane %v1661_v2, 4  ;;  %v3986_v59 = vcombine.high %v5930_v42, %v5933_v40  ;;  %v1593_v60 = vrot.slane %v1592_v23, 4  ;;  %v1617_v0 = vrot.slane %v1616_v47, 4  ;;  %v6011_v47 = vld [vmem:[%s5537_s9 + $0x194] sm:$0xf] }
  0x78   : > { %845 = vmatmul.mubr.bf16.gmra.mrb[32].mxu0 %v3970_v9  ;;  %2323 = vmatmul.mubr.bf16.gmra.mrb[32].mxu1 %v4078_v48  ;;  %v1525_v9 = vrot.slane %v1523_v55, 5  ;;  %v1571_v48 = vshll.u32 %v262_v32, 16  ;;  %v1545_v28 = vrot.slane %v1544_v11, 4  ;;  %v1527_v55 = vshrl.u32 %v5948_v54, 16 }
  0x79   : > { %852 = vmatprep.mubr.bf16.mxu0 %v3974_v49  ;;  %2330 = vmatprep.mubr.bf16.mxu1 %v4082_v18  ;;  %v5905_v49 = vld [vmem:[%s5537_s9 + $0x1b0] sm:$0xff]  ;;  %v5908_v18 = vld [vmem:[%s5537_s9 + $0x1bc] sm:$0xff]  ;;  %v1667_v6 = vshll.u32 %v274_v13, 16  ;;  %v5963_v12 = vrot.slane %v1504_v44, 4  ;;  %v280_v44 = vld [vmem:[%s5537_s9 + $0x1c8] sm:$0x11] }
  0x7a   : > { %v1526_v3 = vsel %vm5678_vm2, %v1521_v25, %v1525_v9  ;;  %v1573_v26 = vrot.slane %v1571_v48, 5  ;;  %v3983_v30 = vcombine.high %v5905_v49, %v5908_v18  ;;  %v5927_v46 = vsel %vm5678_vm2, %v1545_v28, %v1549_v61 }
  0x7b   : > { %v4091_v1 = vcombine.high %v1502_v20, %v1526_v3  ;;  %v4090_v32 = vcombine.low %v1502_v20, %v1526_v3  ;;  %v1682_v25 = vshrl.u32 %v5905_v49, 16  ;;  %v1685_v9 = vshll.u32 %v5905_v49, 16  ;;  %v5977_v3 = vld [vmem:[%s5537_s9 + $0x158] sm:$0xf] }
  0x7c   : > { %v5937_v43 = vsel %vm5678_vm2, %v1569_v29, %v1573_v26  ;;  %v1691_v48 = vshll.u32 %v5908_v18, 16  ;;  %v1709_v11 = vshrl.u32 %v5908_v18, 16  ;;  %v5973_v20 = vrot.slane %v1527_v55, 4  ;;  %v5988_v26 = vld [vmem:[%s5537_s9 + $0x204] sm:$0xff]  ;;  %v6030_v55 = vld [vmem:[%s5537_s9 + $0x21c] sm:$0xff] }
  0x7d   : > { %v1669_v8 = vrot.slane %v1667_v6, 5  ;;  %v4093_v2 = vcombine.low %v5927_v46, %v5937_v43  ;;  %v6105_v6 = vld [vmem:[%s5537_s9 + $0x50] sm:$0xf] }
  0x7e   : > { %v5994_v34 = vrot.slane %v1691_v48, 5  ;;  %v1787_v48 = vshll.u32 %v5988_v26, 16 }
  0x80   : > { %853 = vmatmul.mubr.bf16.gmra.mrb[36].mxu0 %v3973_v35  ;;  %2331 = vmatmul.mubr.bf16.gmra.mrb[36].mxu1 %v4081_v37  ;;  %v268_v35 = vld [vmem:[%s5537_s9 + $0x180] sm:$0x11]  ;;  %v1634_v37 = vshrl.u32 %v5882_v53, 16  ;;  %v6111_v23 = vrot.slane %v1787_v48, 5 }
  0x81   : > { %860 = vmatprep.mubr.bf16.mxu0 %v3977_v38  ;;  %2338 = vmatprep.mubr.bf16.mxu1 %v4085_v39  ;;  %v1637_v38 = vshll.u32 %v5882_v53, 16  ;;  %v1643_v39 = vshll.u32 %v5885_v31, 16  ;;  %v1619_v41 = vshll.u32 %v268_v35, 16  ;;  %v1513_v53 = vshll.u32 %v5564_v27, 16  ;;  %v5943_v31 = vld [vmem:[%s5537_s9 + $0x128] sm:$0xf] }
  0x82   : > { %v1636_v19 = vrot.slane %v1634_v37, 4  ;;  %7437 = vst [vmem:[#allocation6_spill] sm:$0xff] %v5943_v31  ;;  %v4094_v27 = vcombine.high %v5927_v46, %v5937_v43  ;;  %v5997_v35 = vld [vmem:[%s5537_s9 + $0x170] sm:$0xf] }
  0x83   : > { %v1639_v33 = vrot.slane %v1637_v38, 5  ;;  %v5939_v51 = vrot.slane %v1643_v39, 5  ;;  %v1621_v61 = vrot.slane %v1619_v41, 5  ;;  %v5967_v14 = vrot.slane %v1513_v53, 5  ;;  %v6020_v53 = vld [vmem:[%s5537_s9 + $0x1a0] sm:$0xf] }
  0x84   : > { %v3985_v39 = vcombine.low %v5930_v42, %v5933_v40 }
  0x85   : > { %v5992_v28 = vsel %vm5678_vm2, %v1617_v0, %v1621_v61  ;;  %v1730_v61 = vshrl.u32 %v5930_v42, 16  ;;  %v1739_v0 = vshll.u32 %v5933_v40, 16 }
  0x88   : > { %861 = vmatmul.mubr.bf16.gmra.mrb[40].mxu0 %v3976_v56  ;;  %2339 = vmatmul.mubr.bf16.gmra.mrb[40].mxu1 %v4084_v57  ;;  %v3982_v57 = vcombine.low %v5905_v49, %v5908_v18  ;;  %v286_v56 = vld [vmem:[%s5537_s9 + $0x1ec] sm:$0x11]  ;;  %v6135_v18 = vld [vmem:[%s5537_s9 + $0x98] sm:$0xf] }
  0x89   : > { %868 = vmatprep.mubr.bf16.mxu0 %v3980_v4  ;;  %2346 = vmatprep.mubr.bf16.mxu1 %v4088_v5  ;;  %v1640_v4 = vor.u32 %v1639_v33, %v1636_v19  ;;  %v1664_v5 = vor.u32 %v1663_v52, %v5939_v51  ;;  %v1763_v52 = vshll.u32 %v286_v56, 16 }
  0x8b   : > { %v1641_v29 = vrot.slane %v1640_v4, 4  ;;  %v1665_v10 = vrot.slane %v1664_v5, 4  ;;  %v1757_v4 = vshrl.u32 %v5933_v40, 16  ;;  %v6045_v5 = vld [vmem:[%s5537_s9 + $0x1b8] sm:$0xf] }
  0x8d   : > { %v6027_v13 = vsel %vm5678_vm2, %v1641_v29, %v5939_v51  ;;  %v1733_v51 = vshll.u32 %v5930_v42, 16  ;;  %v1759_v36 = vrot.slane %v1757_v4, 4 }
  0x90   : > { %869 = vmatmul.mubr.bf16.gmra.mrb[44].mxu0 %v3979_v21  ;;  %2347 = vmatmul.mubr.bf16.gmra.mrb[44].mxu1 %v4087_v22  ;;  %v5982_v21 = vsel %vm5678_vm2, %v1593_v60, %v1597_v16  ;;  %v5985_v22 = vld [vmem:[%s5537_s9 + $0x1f8] sm:$0xff]  ;;  %v1711_v16 = vrot.slane %v1709_v11, 4  ;;  %v1715_v60 = vshll.u32 %v280_v44, 16  ;;  %v6070_v44 = vld [vmem:[%s5537_s9 + $0x2c] sm:$0xf] }
  0x91   : > { %876 = vmatprep.mubr.bf16.mxu0 %v3983_v30  ;;  %2354 = vmatprep.mubr.bf16.mxu1 %v4091_v1  ;;  %v1684_v30 = vrot.slane %v1682_v25, 4  ;;  %v1687_v1 = vrot.slane %v1685_v9, 5  ;;  %v3989_v19 = vcombine.high %v5985_v22, %v5988_v26  ;;  %v4097_v33 = vcombine.high %v5982_v21, %v5992_v28  ;;  %v6049_v25 = vld [vmem:[%s5537_s9 + $0x1c4] sm:$0xf] }
  0x92   : > { %v3988_v40 = vcombine.low %v5985_v22, %v5988_v26  ;;  %v4096_v29 = vcombine.low %v5982_v21, %v5992_v28  ;;  %v1735_v21 = vrot.slane %v1733_v51, 5  ;;  %v6075_v28 = vrot.slane %v1739_v0, 5 }
  0x93   : > { %v1778_v42 = vshrl.u32 %v5985_v22, 16  ;;  %v1781_v11 = vshll.u32 %v5985_v22, 16 }
  0x94   : > { %v1760_v46 = vor.u32 %v1759_v36, %v6075_v28 }
  0x95   : > { %v1783_v41 = vrot.slane %v1781_v11, 5  ;;  %v5174_v11 = vld [vmem:[%s7426_s1 + $0x1c8] sm:$0xff]  }
  0x98   : > { %877 = vmatmul.mubr.bf16.gmra.mrb[48].mxu0 %v3982_v57  ;;  %2355 = vmatmul.mubr.bf16.gmra.mrb[48].mxu1 %v4090_v32  ;;  %v6033_v57 = vld [vmem:[%s5537_s9 + $0x228] sm:$0xff]  ;;  %v6037_v32 = vsel %vm5678_vm2, %v1665_v10, %v1669_v8 }
  0x99   : > { %884 = vmatprep.mubr.bf16.mxu0 %v3986_v59  ;;  %2362 = vmatprep.mubr.bf16.mxu1 %v4094_v27  ;;  %v1688_v59 = vor.u32 %v1687_v1, %v1684_v30  ;;  %v1712_v27 = vor.u32 %v1711_v16, %v5994_v34  ;;  %v3992_v10 = vcombine.high %v6030_v55, %v6033_v57  ;;  %v6062_v8 = vld [vmem:[%s5537_s9 + $0x8] sm:$0xf]  ;;  %v6065_v30 = vld [vmem:[%s5537_s9 + $0x14] sm:$0xf]  ;;  %v1853_v36 = vshrl.u32 %v6033_v57, 16 }
  0x9a   : > { %v4100_v1 = vcombine.high %v6027_v13, %v6037_v32  ;;  %v3948_v51 = vcombine.low %v6062_v8, %v6065_v30  ;;  %v1120_v0 = vshrl.u32 %v6062_v8, 16  ;;  %v1123_v4 = vshll.u32 %v6062_v8, 16  ;;  %v5175_v8 = vld [vmem:[%s7426_s1 + $0x188] sm:$0xff]  }
  0x9b   : > { %v1689_v16 = vrot.slane %v1688_v59, 4  ;;  %v1805_v59 = vshrl.u32 %v5988_v26, 16  ;;  %v1143_v22 = vshrl.u32 %v6065_v30, 16  ;;  %v4099_v56 = vcombine.low %v6027_v13, %v6037_v32 }
  0x9c   : > { %v1761_v13 = vrot.slane %v1760_v46, 4  ;;  %v1855_v48 = vrot.slane %v1853_v36, 4  ;;  %v298_v46 = vld [vmem:[%s5537_s9 + $0x234] sm:$0x11]  ;;  %v6163_v36 = vld [vmem:[%s5537_s9 + $0xbc] sm:$0xf] }
  0x9d   : > { %v6096_v26 = vsel %vm5678_vm2, %v1689_v16, %v5994_v34  ;;  %v6109_v34 = vld [vmem:[%s5537_s9 + $0x5c] sm:$0xf]  ;;  %v1780_v16 = vrot.slane %v1778_v42, 4 }
  0x9e   : > { %v2745_v24 = vrot.slane %v6109_v34, 5 }
  0x9f   : > { %v1784_v32 = vor.u32 %v1783_v41, %v1780_v16 }
  0xa0   : > { %885 = vmatmul.mubr.bf16.gmra.mrb[52].mxu0 %v3985_v39  ;;  %2363 = vmatmul.mubr.bf16.gmra.mrb[52].mxu1 %v4093_v2  ;;  %v1713_v39 = vrot.slane %v1712_v27, 4  ;;  %v1717_v2 = vrot.slane %v1715_v60, 5  ;;  %v6083_v27 = vld [vmem:[%s5537_s9 + $0x200] sm:$0xf] }
  0xa1   : > { %892 = vmatprep.mubr.bf16.mxu0 %v3989_v19  ;;  %2370 = vmatprep.mubr.bf16.mxu1 %v4097_v33  ;;  %v6073_v19 = vld [vmem:[%s5537_s9 + $0x38] sm:$0xf]  ;;  %v1732_v33 = vrot.slane %v1730_v61, 4  ;;  %v3991_v61 = vcombine.low %v6030_v55, %v6033_v57 }
  0xa2   : > { %v3951_v60 = vcombine.low %v6070_v44, %v6073_v19  ;;  %v6102_v9 = vsel %vm5678_vm2, %v1713_v39, %v1717_v2  ;;  %v1826_v39 = vshrl.u32 %v6030_v55, 16  ;;  %v1829_v2 = vshll.u32 %v6030_v55, 16 }
  0xa3   : > { %v1736_v43 = vor.u32 %v1735_v21, %v1732_v33  ;;  %v1835_v33 = vshll.u32 %v6033_v57, 16  ;;  %v3954_v55 = vcombine.low %v6105_v6, %v6109_v34  ;;  %v1765_v21 = vrot.slane %v1763_v52, 5  ;;  %v6131_v57 = vld [vmem:[%s5537_s9 + $0x80] sm:$0xf] }
  0xa4   : > { %v1828_v49 = vrot.slane %v1826_v39, 4  ;;  %v1831_v17 = vrot.slane %v1829_v2, 5  ;;  %v4102_v16 = vcombine.low %v6096_v26, %v6102_v9  ;;  %v6151_v2 = vld [vmem:[%s5537_s9 + $0xa4] sm:$0xf]  ;;  %v6223_v52 = vrot.slane %v1123_v4, 5 }
  0xa5   : > { %v6137_v42 = vrot.slane %v1835_v33, 5  ;;  %v6160_v33 = vsel %vm5678_vm2, %v1761_v13, %v1765_v21  ;;  %v6191_v21 = vld [vmem:[%s5537_s9 + $0x110] sm:$0xf]  ;;  %v5172_v13 = vld [vmem:[%s7426_s1 + $0x180] sm:$0xff]  }
  0xa6   : > { %v1832_v39 = vor.u32 %v1831_v17, %v1828_v49  ;;  %v6204_v49 = vld [vmem:[%s5537_s9 + $0x20] sm:$0x1] }
  0xa7   : > { %7438 = vst [vmem:[#allocation7_spill] sm:$0xff] %v6204_v49 }
  0xa8   : > { %893 = vmatmul.mubr.bf16.gmra.mrb[56].mxu0 %v3988_v40  ;;  %2371 = vmatmul.mubr.bf16.gmra.mrb[56].mxu1 %v4096_v29  ;;  %v1807_v40 = vrot.slane %v1805_v59, 4  ;;  %v292_v29 = vld [vmem:[%s5537_s9 + $0x210] sm:$0x11]  ;;  %v1833_v17 = vrot.slane %v1832_v39, 4 }
  0xa9   : > { %900 = vmatprep.mubr.bf16.mxu0 %v3992_v10  ;;  %2378 = vmatprep.mubr.bf16.mxu1 %v4100_v1  ;;  %v4103_v10 = vcombine.high %v6096_v26, %v6102_v9  ;;  %v1737_v1 = vrot.slane %v1736_v43, 4  ;;  %v6128_v59 = vld [vmem:[%s5537_s9 + $0x74] sm:$0xf]  ;;  %v1811_v37 = vshll.u32 %v292_v29, 16  ;;  %v1785_v9 = vrot.slane %v1784_v32, 4 }
  0xaa   : > { %v1808_v38 = vor.u32 %v1807_v40, %v6111_v23  ;;  %v1856_v29 = vor.u32 %v1855_v48, %v6137_v42  ;;  %v6178_v32 = vld [vmem:[%s5537_s9 + $0xec] sm:$0xf]  ;;  %v1129_v48 = vshll.u32 %v6065_v30, 16  ;;  %v6219_v40 = vrot.slane %v1120_v0, 4 }
  0xab   : > { %v1813_v26 = vrot.slane %v1811_v37, 5  ;;  %v6199_v37 = vsel %vm5678_vm2, %v1785_v9, %v6111_v23  ;;  %v1149_v0 = vshll.u32 %v6204_v49, 16 }
  0xac   : > { %v1857_v41 = vrot.slane %v1856_v29, 4  ;;  %v1126_v39 = vor.u32 %v6223_v52, %v6219_v40  ;;  %v7443_v52 = vshrl.u32 %v6073_v19, 16 }
  0xad   : > { %v6265_v29 = vrot.slane %v1149_v0, 5  ;;  %v7440_v0 = vshrl.u32 %v6070_v44, 16 }
  0xae   : > { %v1193_v4 = vrot.slane %v7443_v52, 4 }
  0xb0   : > { %901 = vmatmul.mubr.bf16.gmra.mrb[60].mxu0 %v3991_v61  ;;  %2379 = vmatmul.mubr.bf16.gmra.mrb[60].mxu1 %v4099_v56  ;;  %v6156_v61 = vsel %vm5678_vm2, %v1737_v1, %v6075_v28  ;;  %v6166_v56 = vld [vmem:[%s5537_s9 + $0xc8] sm:$0xf]  ;;  %v1859_v28 = vshll.u32 %v298_v46, 16  ;;  %v6188_v46 = vld [vmem:[%s5537_s9 + $0x104] sm:$0xf] }
  0xb1   : > { %4721 = vmatprep.mubr.bf16.mxu0 %v3948_v51  ;;  %2386 = vmatprep.mubr.bf16.mxu1 %v4103_v10  ;;  %v1809_v51 = vrot.slane %v1808_v38, 4  ;;  %v6169_v10 = vld [vmem:[%s5537_s9 + $0xe0] sm:$0xf]  ;;  %v4106_v38 = vcombine.high %v6156_v61, %v6160_v33 }
  0xb2   : > { %v1861_v23 = vrot.slane %v1859_v28, 5  ;;  %v5178_v28 = vld [vmem:[%s7426_s1 + $0x1d0] sm:$0xff]  }
  0xb3   : > { %v6212_v43 = vsel %vm5678_vm2, %v1809_v51, %v1813_v26  ;;  %v1145_v51 = vrot.slane %v1143_v22, 4  ;;  %v1177_v22 = vshll.u32 %v6073_v19, 16  ;;  %v6286_v26 = vld [vmem:[%s5537_s9 + $0x44] sm:$0x1]  ;;  %v7446_v19 = vcombine.low %v6156_v61, %v6160_v33  ;;  %v5181_v61 = vld [vmem:[%s7426_s1 + $0x198] sm:$0xff]  }
  0xb4   : > { %7442 = vst [vmem:[#allocation9_spill] sm:$0xff] %v6286_v26  ;;  %v7451_v33 = vcombine.low %v6135_v18, %v6151_v2 }
  0xb5   : > { %v6288_v9 = vrot.slane %v1177_v22, 5  ;;  %v7445_v22 = vcombine.low %v6128_v59, %v6131_v57 }
  0xb8   : > { %4722 = vmatmul.mubr.bf16.vlgmr.msra.gmra.mrb[64].mxu0 %v3951_v60  ;;  %2387 = vmatmul.mubr.bf16.gmra.mrb[64].mxu1 %v4102_v16  ;;  %v4109_v60 = vcombine.high %v6199_v37, %v6212_v43  ;;  %v6243_v16 = vrot.slane %v1129_v48, 5  ;;  %v5214_v48 = vld [vmem:[%s5537_s9 + $0xc] sm:$0xff] }
  0xb9   : > { %4570 = vmatpush3.bf16.msra.mxu0 %v5172_v13  ;;  %4725 = vmatprep.mubr.bf16.mxu0 %v3954_v55  ;;  %v6253_v55 = vsel %vm5678_vm2, %v1833_v17, %v6137_v42  ;;  %v6257_v13 = vsel %vm5678_vm2, %v1857_v41, %v1861_v23  ;;  %v2713_v30 = vrot.slane %v5214_v48, 5  ;;  %v5215_v42 = vld [vmem:[%s5537_s9] sm:$0xff]  ;;  %v1225_v41 = vshll.u32 %v6109_v34, 16  ;;  %v5179_v48 = vld [vmem:[%s7426_s1 + $0x190] sm:$0xff]  }
  0xba   : > { %4571 = vmatprep.subr.bf16.mxu0 %v5174_v11  ;;  %2394 = vmatprep.mubr.bf16.mxu1 %v4106_v38  ;;  %v4138_v17 = vrot.slane %v5215_v42, 9  ;;  %v6270_v23 = vld [vmem:[%s5537_s9 + $0x140] sm:$0x1]  ;;  %v1146_v40 = vor.u32 %v1145_v51, %v6243_v16  ;;  %v1170_v38 = vrot.slane %v7440_v0, 4  ;;  %v7441_v42 = vshll.u32 %v6070_v44, 16 }
  0xbb   : > { %7439 = vst [vmem:[#allocation8_spill] sm:$0xff] %v6270_v23  ;;  %v2719_v1 = vrot.slane %v2713_v30, 4  ;;  %v1510_v51 = vor.u32 %v5965_v7, %v5963_v12  ;;  %v5216_v0 = vld [vmem:[%s5537_s9 + $0x18] sm:$0x11]  ;;  %v7444_v44 = vshrl.u32 %v6105_v6, 16  ;;  %v1533_v31 = vshll.u32 %v6270_v23, 16 }
  0xbc   : > { %v1173_v11 = vrot.slane %v7441_v42, 5  ;;  %v2720_v49 = vrot.slane %v5216_v0, 5  ;;  %v1530_v42 = vor.u32 %v5973_v20, %v5967_v14  ;;  %v7449_v7 = vshll.u32 %v6105_v6, 16 }
  0xbd   : > { %4572 = vmatpush3.bf16.msra.mxu0 %v5175_v8  ;;  %v5180_v8 = vld [vmem:[%s7426_s1 + $0x1d8] sm:$0xff]   ;;  %v6314_v20 = vrot.slane %v1225_v41, 5  ;;  %v7450_v0 = vshrl.u32 %v6109_v34, 16  ;;  %v1511_v23 = vrot.slane %v1510_v51, 4  ;;  %v1197_v6 = vshll.u32 %v6286_v26, 16 }
  0xbe   : > { %4573 = vmatprep.subr.bf16.mxu0 %v5178_v28  ;;  %v1218_v28 = vrot.slane %v7444_v44, 4  ;;  %v1221_v52 = vrot.slane %v7449_v7, 5  ;;  %v1531_v41 = vrot.slane %v1530_v42, 4  ;;  %v1535_v7 = vrot.slane %v1533_v31, 5 }
  0xbf   : > { %v1241_v44 = vrot.slane %v7450_v0, 4  ;;  %v6333_v0 = vrot.slane %v1126_v39, 4  ;;  %v6341_v31 = vsel %vm6308_vm5, %v4138_v17, %v2713_v30  ;;  %v6355_v30 = vsel %vm6308_vm5, %v2719_v1, %v2720_v49 }
  0xc0   : > { %4726 = vmatmul.mubr.bf16.gmra.mrb[68].mxu0 %v7445_v22  ;;  %2395 = vmatmul.mubr.bf16.gmra.mrb[68].mxu1 %v7446_v19  ;;  %v1174_v22 = vor.u32 %v1173_v11, %v1170_v38  ;;  %v6326_v19 = vld [vmem:[%s5537_s9 + $0x68] sm:$0x1]  ;;  %v1516_v11 = vsel %vm5678_vm2, %v1511_v23, %v5967_v14  ;;  %v1147_v38 = vrot.slane %v1146_v40, 4  ;;  %v1536_v42 = vsel %vm5678_vm2, %v1531_v41, %v1535_v7  ;;  %v5185_v14 = vld [vmem:[%s7426_s1 + $0x1a0] sm:$0xff]  }
  0xc1   : > { %4574 = vmatpush3.bf16.msra.mxu0 %v5179_v48  ;;  %4729 = vmatprep.mubr.bf16.mxu0 %v7451_v33  ;;  %v5184_v48 = vld [vmem:[%s7426_s1 + $0x1e0] sm:$0xff]   ;;  %v1194_v33 = vor.u32 %v1193_v4, %v6288_v9  ;;  %v1222_v51 = vor.u32 %v1221_v52, %v1218_v28  ;;  %v1242_v39 = vor.u32 %v1241_v44, %v6314_v20  ;;  %v1245_v4 = vshll.u32 %v6326_v19, 16  ;;  %v5187_v28 = vld [vmem:[%s7426_s1 + $0x1e8] sm:$0xff]  }
  0xc2   : > { %4575 = vmatprep.subr.bf16.mxu0 %v5180_v8  ;;  %2402 = vmatprep.mubr.bf16.mxu1 %v4109_v60  ;;  %v5217_v60 = vld [vmem:[%s5537_s9 + $0x30] sm:$0xff]  ;;  %v6348_v26 = vcombine.low %v1516_v11, %v1536_v42  ;;  %v1175_v17 = vrot.slane %v1174_v22, 4  ;;  %v1199_v23 = vrot.slane %v1197_v6, 5  ;;  %v1273_v40 = vshll.u32 %v6131_v57, 16  ;;  %v5218_v44 = vld [vmem:[%s5537_s9 + $0x24] sm:$0xff] }
  0xc3   : > { %v2727_v8 = vrot.slane %v5217_v60, 5  ;;  %v1195_v52 = vrot.slane %v1194_v33, 4  ;;  %v7452_v41 = vshrl.u32 %v6128_v59, 16  ;;  %v7453_v11 = vshll.u32 %v6128_v59, 16 }
  0xc4   : > { %v1132_v49 = vsel %vm5678_vm2, %v6333_v0, %v6243_v16  ;;  %v1152_v22 = vsel %vm5678_vm2, %v1147_v38, %v6265_v29  ;;  %v7454_v60 = vcombine.low %v6163_v36, %v6166_v56  ;;  %v7455_v59 = vcombine.low %v6199_v37, %v6212_v43  ;;  %v5188_v29 = vld [vmem:[%s7426_s1 + $0x1a8] sm:$0xff]  }
  0xc5   : > { %4576 = vmatpush3.bf16.msra.mxu0 %v5181_v61  ;;  %v4140_v61 = vrot.slane %v5218_v44, 9  ;;  %v1266_v7 = vrot.slane %v7452_v41, 4  ;;  %v1269_v1 = vrot.slane %v7453_v11, 5  ;;  %v2733_v6 = vrot.slane %v2727_v8, 4  ;;  %v6381_v11 = vld [vmem:[%s5537_s9 + $0x8c] sm:$0x1] }
  0xc6   : > { %4577 = vmatprep.subr.bf16.mxu0 %v5184_v48  ;;  %v5219_v48 = vld [vmem:[%s5537_s9 + $0x3c] sm:$0x11]  ;;  %v1223_v42 = vrot.slane %v1222_v51, 4  ;;  %v1243_v44 = vrot.slane %v1242_v39, 4  ;;  %v1247_v41 = vrot.slane %v1245_v4, 5  ;;  %v1321_v16 = vshll.u32 %v6151_v2, 16 }
  0xc7   : > { %v2734_v33 = vrot.slane %v5219_v48, 5  ;;  %v7456_v0 = vcombine.low %v6169_v10, %v6178_v32  ;;  %v1180_v37 = vsel %vm5678_vm2, %v1175_v17, %v6288_v9  ;;  %v6395_v51 = vrot.slane %v1273_v40, 5  ;;  %v5191_v48 = vld [vmem:[%s7426_s1 + $0x1f0] sm:$0xff]  }
  0xc8   : > { %4730 = vmatmul.mubr.bf16.gmra.mrb[72].mxu0 %v7454_v60  ;;  %2403 = vmatmul.mubr.bf16.gmra.mrb[72].mxu1 %v7455_v59  ;;  %v7457_v38 = vshrl.u32 %v6131_v57, 16  ;;  %v7458_v4 = vcombine.high %v6253_v55, %v6257_v13  ;;  %v1200_v9 = vsel %vm5678_vm2, %v1195_v52, %v1199_v23  ;;  %v6410_v17 = vsel %vm6308_vm5, %v4140_v61, %v2727_v8  ;;  %v6427_v52 = vld [vmem:[%s5537_s9 + $0xb0] sm:$0x1] }
  0xc9   : > { %4578 = vmatpush3.bf16.msra.mxu0 %v5185_v14  ;;  %4733 = vmatprep.mubr.bf16.mxu0 %v7456_v0  ;;  %v1479_v14 = vshrl.u32 %v6191_v21, 16  ;;  %v1270_v40 = vor.u32 %v1269_v1, %v1266_v7  ;;  %v1293_v60 = vshll.u32 %v6381_v11, 16  ;;  %v7459_v59 = vshrl.u32 %v6135_v18, 16 }
  0xca   : > { %v1289_v39 = vrot.slane %v7457_v38, 4  ;;  %4579 = vmatprep.subr.bf16.mxu0 %v5187_v28  ;;  %2410 = vmatprep.mubr.bf16.mxu1 %v7458_v4  ;;  %v6414_v28 = vsel %vm6308_vm5, %v2733_v6, %v2734_v33  ;;  %v7460_v38 = vshll.u32 %v6135_v18, 16  ;;  %v1228_v23 = vsel %vm5678_vm2, %v1223_v42, %v6314_v20  ;;  %v5192_v18 = vld [vmem:[%s7426_s1 + $0x1b0] sm:$0xff]  }
  0xcb   : > { %v1314_v0 = vrot.slane %v7459_v59, 4  ;;  %v1248_v8 = vsel %vm5678_vm2, %v1243_v44, %v1247_v41  ;;  %v6429_v61 = vrot.slane %v1321_v16, 5  ;;  %v7461_v7 = vshrl.u32 %v6151_v2, 16  ;;  %v5193_v44 = vld [vmem:[%s7426_s1 + $0x1f8] sm:$0xff]  }
  0xcc   : > { %v1317_v4 = vrot.slane %v7460_v38, 5  ;;  %v4068_v6 = vcombine.low %v1132_v49, %v1152_v22  ;;  %v4219_v33 = vcombine.high %v6341_v31, %v6355_v30  ;;  %v1290_v20 = vor.u32 %v1289_v39, %v6395_v51 }
  0xcd   : > { %v1337_v1 = vrot.slane %v7461_v7, 4  ;;  %4580 = vmatpush3.bf16.msra.mxu0 %v5188_v29  ;;  %v1369_v42 = vshll.u32 %v6166_v56, 16  ;;  %v4071_v41 = vcombine.low %v1180_v37, %v1200_v9  ;;  %v6445_v29 = vrot.slane %v1270_v40, 4  ;;  %v5220_v40 = vld [vmem:[%s5537_s9 + $0x54] sm:$0xff] }
  0xce   : > { %4581 = vmatprep.subr.bf16.mxu0 %v5191_v48  ;;  %v1417_v49 = vshll.u32 %v6178_v32, 16  ;;  %v4074_v22 = vcombine.low %v1228_v23, %v1248_v8  ;;  %v6448_v59 = vrot.slane %v1293_v60, 5  ;;  %v1318_v39 = vor.u32 %v1317_v4, %v1314_v0  ;;  %v5194_v8 = vld [vmem:[%s7426_s1 + $0x1b8] sm:$0xff]  }
  0xcf   : > { %v1341_v38 = vshll.u32 %v6427_v52, 16  ;;  %v7462_v48 = vcombine.low %v6188_v46, %v6191_v21  ;;  %v7463_v37 = vcombine.low %v6253_v55, %v6257_v13  ;;  %v1338_v9 = vor.u32 %v1337_v1, %v6429_v61  ;;  %v5221_v13 = vld [vmem:[%s5537_s9 + $0x48] sm:$0xff] }
  0xd0   : > { %v2741_v7 = vrot.slane %v5220_v40, 5  ;;  %v7464_v23 = vshrl.u32 %v6163_v36, 16  ;;  %v7465_v0 = vshll.u32 %v6163_v36, 16  ;;  %v6466_v55 = vrot.slane %v1290_v20, 4  ;;  %v6474_v36 = vld [vmem:[%s5537_s9 + $0xd4] sm:$0x1] }
  0xd1   : > { %4734 = vmatmul.mubr.bf16.gmra.mrb[76].mxu0 %v7462_v48  ;;  %2411 = vmatmul.mubr.bf16.gmra.mrb[76].mxu1 %v7463_v37  ;;  %v4142_v1 = vrot.slane %v5221_v13, 9  ;;  %v6469_v48 = vrot.slane %v1369_v42, 5  ;;  %v7466_v37 = vshrl.u32 %v6166_v56, 16  ;;  %v6480_v20 = vrot.slane %v1417_v49, 5 }
  0xd2   : > { %v1362_v60 = vrot.slane %v7464_v23, 4  ;;  %v1365_v4 = vrot.slane %v7465_v0, 5  ;;  %4582 = vmatpush3.bf16.msra.mxu0 %v5192_v18  ;;  %4769 = vmatprep.mubr.bf16.mxu1 %v4068_v6  ;;  %v7467_v18 = vshrl.u32 %v6169_v10, 16  ;;  %v7468_v0 = vshll.u32 %v6169_v10, 16 }
  0xd3   : > { %v1385_v40 = vrot.slane %v7466_v37, 4  ;;  %4583 = vmatprep.subr.bf16.mxu0 %v5193_v44  ;;  %3352 = vmatprep.mubr.bf16.mxu0 %v4219_v33  ;;  %v7469_v16 = vshrl.u32 %v6178_v32, 16  ;;  %v1276_v56 = vsel %vm5678_vm2, %v6445_v29, %v6395_v51  ;;  %v1319_v42 = vrot.slane %v1318_v39, 4  ;;  %v5222_v33 = vld [vmem:[%s5537_s9 + $0x60] sm:$0x11]  ;;  %v5196_v39 = vld [vmem:[%s7426_s1 + $0x208] sm:$0xff]  }
  0xd4   : > { %v1410_v23 = vrot.slane %v7467_v18, 4  ;;  %v1413_v6 = vrot.slane %v7468_v0, 5  ;;  %v2748_v44 = vrot.slane %v5222_v33, 5  ;;  %v6490_v37 = vld [vmem:[%s5537_s9 + $0xf8] sm:$0x1]  ;;  %v1465_v18 = vshll.u32 %v6191_v21, 16 }
  0xd5   : > { %v1433_v13 = vrot.slane %v7469_v16, 4  ;;  %v1339_v10 = vrot.slane %v1338_v9, 4  ;;  %v1343_v0 = vrot.slane %v1341_v38, 5  ;;  %v2747_v49 = vrot.slane %v2741_v7, 4 }
  0xd6   : > { %v1366_v43 = vor.u32 %v1365_v4, %v1362_v60  ;;  %4584 = vmatpush3.bf16.msra.mxu0 %v5194_v8  ;;  %v1296_v32 = vsel %vm5678_vm2, %v6466_v55, %v6448_v59  ;;  %v6499_v51 = vsel %vm6308_vm5, %v4142_v1, %v2741_v7  ;;  %v1386_v16 = vor.u32 %v1385_v40, %v6469_v48  ;;  %v5223_v4 = vld [vmem:[%s5537_s9 + $0x78] sm:$0xff] }
  0xd7   : > { %v1389_v29 = vshll.u32 %v6474_v36, 16  ;;  %v1414_v38 = vor.u32 %v1413_v6, %v1410_v23  ;;  %v1434_v9 = vor.u32 %v1433_v13, %v6480_v20  ;;  %v1437_v60 = vshll.u32 %v6490_v37, 16 }
  0xd8   : > { %v2755_v59 = vrot.slane %v5223_v4, 5  ;;  %v7470_v8 = vshrl.u32 %v6188_v46, 16  ;;  %v7471_v55 = vshll.u32 %v6188_v46, 16  ;;  %v6513_v40 = vrot.slane %v1465_v18, 5  ;;  %v6530_v4 = vld [vmem:[%s5537_s9 + $0x11c] sm:$0x1] }
  0xd9   : > { %v1481_v33 = vrot.slane %v1479_v14, 4  ;;  %4770 = vmatmul.mubr.bf16.vlgmr.msra.gmra.mrb[80].mxu1 %v4071_v41  ;;  %v7472_v23 = vcombine.low %v6341_v31, %v6355_v30  ;;  %v1324_v6 = vsel %vm5678_vm2, %v1319_v42, %v6429_v61  ;;  %v1344_v13 = vsel %vm5678_vm2, %v1339_v10, %v1343_v0  ;;  %v5224_v30 = vld [vmem:[%s5537_s9 + $0x6c] sm:$0xff]  ;;  %v5225_v41 = vld [vmem:[%s5537_s9 + $0x84] sm:$0x11] }
  0xda   : > { %v1458_v7 = vrot.slane %v7470_v8, 4  ;;  %v1461_v1 = vrot.slane %v7471_v55, 5  ;;  %v6527_v46 = vsel %vm6308_vm5, %v2747_v49, %v2748_v44  ;;  %v1367_v18 = vrot.slane %v1366_v43, 4  ;;  %4802 = vmatpush3.bf16.msra.mxu1 %v5894_v58  ;;  %4773 = vmatprep.mubr.bf16.mxu1 %v4074_v22  ;;  %v5197_v43 = vld [vmem:[%s7426_s1 + $0x210] sm:$0xff]  }
  0xdb   : > { %3353 = vmatmul.mubr.bf16.vlgmr.msra.gmra.mrb[80].mxu0 %v7472_v23  ;;  %v1387_v21 = vrot.slane %v1386_v16, 4  ;;  %v1391_v31 = vrot.slane %v1389_v29, 5  ;;  %v4144_v14 = vrot.slane %v5224_v30, 9  ;;  %v2762_v61 = vrot.slane %v5225_v41, 5  ;;  %4803 = vmatprep.subr.bf16.mxu1 %v5196_v39  ;;  %v5226_v30 = vld [vmem:[%s5537_s9 + $0x9c] sm:$0xff] }
  0xdc   : > { %v7473_v42 = vcombine.high %v6410_v17, %v6414_v28  ;;  %v1415_v44 = vrot.slane %v1414_v38, 4  ;;  %v1435_v10 = vrot.slane %v1434_v9, 4  ;;  %v1439_v58 = vrot.slane %v1437_v60, 5 }
  0xdd   : > { %v2761_v22 = vrot.slane %v2755_v59, 4  ;;  %v1795_v0 = vshll.u32 %v6083_v27, 16  ;;  %v1462_v49 = vor.u32 %v1461_v1, %v1458_v7  ;;  %v1482_v16 = vor.u32 %v1481_v33, %v6513_v40  ;;  %v5198_v33 = vld [vmem:[%s7426_s1 + $0x218] sm:$0xff]  }
  0xde   : > { %3360 = vmatprep.mubr.bf16.mxu0 %v7473_v42  ;;  %v1485_v29 = vshll.u32 %v6530_v4, 16  ;;  %v4077_v8 = vcombine.low %v1276_v56, %v1296_v32  ;;  %v4221_v55 = vcombine.low %v6410_v17, %v6414_v28  ;;  %v4225_v23 = vcombine.high %v6499_v51, %v6527_v46  ;;  %4804 = vmatpush3.bf16.msra.mxu1 %v5196_v39  ;;  %v6578_v42 = vld [vmem:[%s5537_s9 + $0x20c] sm:$0xf] }
  0xdf   : > { %v2769_v38 = vrot.slane %v5226_v30, 5  ;;  %v4080_v9 = vcombine.low %v1324_v6, %v1344_v13  ;;  %v1372_v60 = vsel %vm5678_vm2, %v1367_v18, %v6469_v48  ;;  %v6554_v7 = vsel %vm6308_vm5, %v4144_v14, %v2755_v59  ;;  %4805 = vmatprep.subr.bf16.mxu1 %v5197_v43  ;;  %v5227_v6 = vld [vmem:[%s5537_s9 + $0x90] sm:$0xff]  ;;  %v5228_v18 = vld [vmem:[%s5537_s9 + $0xa8] sm:$0x11] }
  0xe0   : > { %v1561_v56 = vshll.u32 %v5977_v3, 16  ;;  %v1392_v17 = vsel %vm5678_vm2, %v1387_v21, %v1391_v31  ;;  %v1420_v28 = vsel %vm5678_vm2, %v1415_v44, %v6480_v20  ;;  %v1440_v32 = vsel %vm5678_vm2, %v1435_v10, %v1439_v58  ;;  %v6582_v10 = vld [vmem:[%s5537_s9 + $0x224] sm:$0xf] }
  0xe1   : > { %v6566_v48 = vsel %vm6308_vm5, %v2761_v22, %v2762_v61  ;;  %v1463_v39 = vrot.slane %v1462_v49, 4  ;;  %v1483_v59 = vrot.slane %v1482_v16, 4  ;;  %v1487_v1 = vrot.slane %v1485_v29, 5  ;;  %4774 = vmatmul.mubr.bf16.gmra.mrb[84].mxu1 %v4077_v8 }
  0xe2   : > { %v4146_v13 = vrot.slane %v5227_v6, 9  ;;  %v2775_v20 = vrot.slane %v2769_v38, 4  ;;  %v2776_v21 = vrot.slane %v5228_v18, 5  ;;  %v7474_v31 = vshrl.u32 %v5970_v15, 16  ;;  %4777 = vmatprep.mubr.bf16.mxu1 %v4080_v9  ;;  %4806 = vmatpush3.bf16.msra.mxu1 %v5197_v43 }
  0xe3   : > { %3361 = vmatmul.mubr.bf16.gmra.mrb[84].mxu0 %v4221_v55  ;;  %v7475_v41 = vshll.u32 %v5970_v15, 16  ;;  %v1815_v44 = vshrl.u32 %v6578_v42, 16  ;;  %v1840_v58 = vshrl.u32 %v6582_v10, 16  ;;  %v6585_v22 = vrot.slane %v1561_v56, 5  ;;  %v6593_v55 = vld [vmem:[%s5537_s9 + $0x164] sm:$0x1]  ;;  %4807 = vmatprep.subr.bf16.mxu1 %v5198_v33 }
  0xe4   : > { %v1554_v14 = vrot.slane %v7474_v31, 4  ;;  %3368 = vmatprep.mubr.bf16.mxu0 %v4225_v23  ;;  %v7476_v49 = vshrl.u32 %v5977_v3, 16  ;;  %v1843_v29 = vshll.u32 %v6582_v10, 16  ;;  %v4083_v8 = vcombine.low %v1372_v60, %v1392_v17 }
  0xe5   : > { %v1557_v61 = vrot.slane %v7475_v41, 5  ;;  %v4224_v15 = vcombine.low %v6499_v51, %v6527_v46  ;;  %v1609_v30 = vshll.u32 %v6007_v45, 16  ;;  %v4086_v6 = vcombine.low %v1420_v28, %v1440_v32  ;;  %v5199_v51 = vld [vmem:[%s7426_s1 + $0x220] sm:$0xff]  }
  0xe6   : > { %v1577_v16 = vrot.slane %v7476_v49, 4  ;;  %v4228_v23 = vcombine.high %v6554_v7, %v6566_v48  ;;  %v1468_v3 = vsel %vm5678_vm2, %v1463_v39, %v6513_v40  ;;  %v1488_v9 = vsel %vm5678_vm2, %v1483_v59, %v1487_v1  ;;  %4808 = vmatpush3.bf16.msra.mxu1 %v5198_v33  ;;  %v6624_v1 = vld [vmem:[%s5537_s9 + $0x188] sm:$0x1]  ;;  %v6641_v49 = vld [vmem:[%s5537_s9 + $0x1ac] sm:$0x1] }
  0xe7   : > { %v6608_v46 = vsel %vm6308_vm5, %v4146_v13, %v2769_v38  ;;  %v6612_v43 = vsel %vm6308_vm5, %v2775_v20, %v2776_v21  ;;  %v1558_v60 = vor.u32 %v1557_v61, %v1554_v14  ;;  %v1657_v40 = vshll.u32 %v6020_v53, 16  ;;  %v5231_v21 = vld [vmem:[%s5537_s9 + $0xc0] sm:$0xff]  ;;  %4809 = vmatprep.subr.bf16.mxu1 %v5199_v51  ;;  %v5200_v33 = vld [vmem:[%s7426_s1 + $0x228] sm:$0xff]  }
  0xe8   : > { %v1578_v56 = vor.u32 %v1577_v16, %v6585_v22  ;;  %v1581_v17 = vshll.u32 %v6593_v55, 16  ;;  %v7477_v28 = vshrl.u32 %v5997_v35, 16  ;;  %v7478_v39 = vshll.u32 %v5997_v35, 16 }
  0xe9   : > { %v4227_v38 = vcombine.low %v6554_v7, %v6566_v48  ;;  %v6626_v13 = vrot.slane %v1609_v30, 5  ;;  %v7479_v20 = vshrl.u32 %v6007_v45, 16  ;;  %v2783_v31 = vrot.slane %v5231_v21, 5  ;;  %4778 = vmatmul.mubr.bf16.gmra.mrb[88].mxu1 %v4083_v8 }
  0xea   : > { %v1602_v32 = vrot.slane %v7477_v28, 4  ;;  %v1605_v59 = vrot.slane %v7478_v39, 5  ;;  %v4089_v14 = vcombine.low %v1468_v3, %v1488_v9  ;;  %v4231_v41 = vcombine.high %v6608_v46, %v6612_v43  ;;  %4781 = vmatprep.mubr.bf16.mxu1 %v4086_v6  ;;  %4810 = vmatpush3.bf16.msra.mxu1 %v5199_v51  ;;  %v5201_v51 = vld [vmem:[%s7426_s1 + $0x230] sm:$0xff]  }
  0xeb   : > { %v1625_v18 = vrot.slane %v7479_v20, 4  ;;  %v7480_v35 = vshrl.u32 %v6011_v47, 16  ;;  %v7481_v7 = vshll.u32 %v6011_v47, 16  ;;  %3369 = vmatmul.mubr.bf16.gmra.mrb[88].mxu0 %v4224_v15  ;;  %v1559_v45 = vrot.slane %v1558_v60, 4  ;;  %v5232_v15 = vld [vmem:[%s5537_s9 + $0xb4] sm:$0xff]  ;;  %4811 = vmatprep.subr.bf16.mxu1 %v5200_v33 }
  0xec   : > { %v6643_v16 = vrot.slane %v1657_v40, 5  ;;  %v7482_v30 = vshrl.u32 %v6020_v53, 16  ;;  %v1705_v9 = vshll.u32 %v6049_v25, 16  ;;  %3376 = vmatprep.mubr.bf16.mxu0 %v4228_v23  ;;  %v1579_v47 = vrot.slane %v1578_v56, 4  ;;  %v5233_v40 = vld [vmem:[%s5537_s9 + $0xcc] sm:$0x11] }
  0xed   : > { %v1650_v61 = vrot.slane %v7480_v35, 4  ;;  %v1653_v48 = vrot.slane %v7481_v7, 5  ;;  %v1583_v28 = vrot.slane %v1581_v17, 5  ;;  %v1606_v39 = vor.u32 %v1605_v59, %v1602_v32 }
  0xee   : > { %v1673_v3 = vrot.slane %v7482_v30, 4  ;;  %v1629_v20 = vshll.u32 %v6624_v1, 16  ;;  %v1626_v8 = vor.u32 %v1625_v18, %v6626_v13  ;;  %v4148_v60 = vrot.slane %v5232_v15, 9  ;;  %v6673_v15 = vld [vmem:[%s5537_s9 + $0x1d0] sm:$0x1]  ;;  %4812 = vmatpush3.bf16.msra.mxu1 %v5200_v33 }
  0xef   : > { %v2789_v21 = vrot.slane %v2783_v31, 4  ;;  %v2790_v53 = vrot.slane %v5233_v40, 5  ;;  %v1654_v35 = vor.u32 %v1653_v48, %v1650_v61  ;;  %v1677_v7 = vshll.u32 %v6641_v49, 16  ;;  %v5234_v40 = vld [vmem:[%s5537_s9 + $0xe4] sm:$0xff]  ;;  %4813 = vmatprep.subr.bf16.mxu1 %v5201_v51 }
  0xf0   : > { %v7483_v6 = vshrl.u32 %v5615_v50, 16  ;;  %v7484_v56 = vshll.u32 %v6045_v5, 16  ;;  %v4230_v32 = vcombine.low %v6608_v46, %v6612_v43  ;;  %v1674_v59 = vor.u32 %v1673_v3, %v6643_v16 }
  0xf1   : > { %v6663_v18 = vrot.slane %v1705_v9, 5  ;;  %v7485_v61 = vshrl.u32 %v6049_v25, 16  ;;  %v1564_v50 = vsel %vm5678_vm2, %v1559_v45, %v6585_v22  ;;  %v1584_v5 = vsel %vm5678_vm2, %v1579_v47, %v1583_v28  ;;  %v6685_v28 = vld [vmem:[%s5537_s9 + $0x1e8] sm:$0xf]  ;;  %4782 = vmatmul.mubr.bf16.gmra.mrb[92].mxu1 %v4089_v14 }
  0xf2   : > { %v1698_v23 = vrot.slane %v7483_v6, 4  ;;  %v1701_v17 = vrot.slane %v7484_v56, 5  ;;  %v1607_v30 = vrot.slane %v1606_v39, 4  ;;  %v2797_v6 = vrot.slane %v5234_v40, 5  ;;  %4785 = vmatprep.mubr.bf16.mxu1 %v6348_v26  ;;  %4814 = vmatpush3.bf16.msra.mxu1 %v5201_v51 }
  0xf3   : > { %v1721_v48 = vrot.slane %v7485_v61, 4  ;;  %v1627_v56 = vrot.slane %v1626_v8, 4  ;;  %v1631_v3 = vrot.slane %v1629_v20, 5  ;;  %v6678_v25 = vsel %vm6308_vm5, %v4148_v60, %v2783_v31  ;;  %v5202_v20 = vld [vmem:[%s7426_s1 + $0x238] sm:$0xff]   ;;  %3377 = vmatmul.mubr.bf16.gmra.mrb[92].mxu0 %v4227_v38 }
  0xf4   : > { %v6682_v9 = vsel %vm6308_vm5, %v2789_v21, %v2790_v53  ;;  %v1655_v22 = vrot.slane %v1654_v35, 4  ;;  %v1679_v45 = vrot.slane %v1677_v7, 5  ;;  %v1702_v47 = vor.u32 %v1701_v17, %v1698_v23  ;;  %v5236_v60 = vld [vmem:[%s5537_s9 + $0xd8] sm:$0xff]  ;;  %3384 = vmatprep.mubr.bf16.mxu0 %v4231_v41  ;;  %v5237_v35 = vld [vmem:[%s5537_s9 + $0xf0] sm:$0x11]  ;;  %4815 = vmatprep.subr.bf16.mxu1 %v5202_v20 }
  0xf5   : > { %v1753_v39 = vshll.u32 %v6685_v28, 16  ;;  %v1675_v31 = vrot.slane %v1674_v59, 4  ;;  %v1722_v8 = vor.u32 %v1721_v48, %v6663_v18  ;;  %v1725_v33 = vshll.u32 %v6673_v15, 16 }
  0xf6   : > { %v4150_v21 = vrot.slane %v5236_v60, 9  ;;  %v2803_v53 = vrot.slane %v2797_v6, 4  ;;  %v2804_v7 = vrot.slane %v5237_v35, 5  ;;  %v7486_v23 = vshrl.u32 %v5637_v62, 16  ;;  %4816 = vmatpush3.bf16.msra.mxu1 %v5202_v20 }
  0xf7   : > { %v7487_v61 = vshll.u32 %v5637_v62, 16  ;;  %v4095_v14 = vcombine.low %v1564_v50, %v1584_v5  ;;  %v1612_v59 = vsel %vm5678_vm2, %v1607_v30, %v6626_v13  ;;  %v1632_v48 = vsel %vm5678_vm2, %v1627_v56, %v1631_v3  ;;  %v6718_v3 = vld [vmem:[%s5537_s9 + $0x1f4] sm:$0x1] }
  0xf8   : > { %v1746_v17 = vrot.slane %v7486_v23, 4  ;;  %v1801_v26 = vshll.u32 %v6578_v42, 16  ;;  %v4234_v41 = vcombine.high %v6678_v25, %v6682_v9  ;;  %v1660_v62 = vsel %vm5678_vm2, %v1655_v22, %v6643_v16  ;;  %v6729_v22 = vld [vmem:[%s5537_s9 + $0x218] sm:$0x1]  ;;  %v5239_v23 = vld [vmem:[%s5537_s9 + $0x108] sm:$0xff] }
  0xf9   : > { %v1749_v38 = vrot.slane %v7487_v61, 5  ;;  %v6711_v40 = vrot.slane %v1753_v39, 5  ;;  %v7488_v50 = vshrl.u32 %v5640_v63, 16  ;;  %v1680_v13 = vsel %vm5678_vm2, %v1675_v31, %v1679_v45  ;;  %4786 = vmatmul.mubr.bf16.gmra.mrb[0].mxu1 %v4095_v14  ;;  %v7491_v61 = vld [vmem:[#allocation6_spill] sm:$0xff] }
  0xfa   : > { %v1703_v51 = vrot.slane %v1702_v47, 4  ;;  %v1723_v30 = vrot.slane %v1722_v8, 4  ;;  %v1727_v56 = vrot.slane %v1725_v33, 5  ;;  %v4098_v60 = vcombine.low %v1612_v59, %v1632_v48 }
  0xfb   : > { %v1769_v5 = vrot.slane %v7488_v50, 4  ;;  %v6722_v35 = vsel %vm6308_vm5, %v4150_v21, %v2797_v6  ;;  %v6726_v16 = vsel %vm6308_vm5, %v2803_v53, %v2804_v7  ;;  %v1750_v63 = vor.u32 %v1749_v38, %v1746_v17  ;;  %v6744_v7 = vld [vmem:[%s5537_s9 + $0x230] sm:$0xf]  ;;  %3385 = vmatmul.mubr.bf16.gmra.mrb[96].mxu0 %v4230_v32 }
  0xfc   : > { %v7489_v45 = vshrl.u32 %v6083_v27, 16  ;;  %v1797_v39 = vrot.slane %v1795_v0, 5  ;;  %v6735_v31 = vrot.slane %v1801_v26, 5  ;;  %v1817_v8 = vrot.slane %v1815_v44, 4  ;;  %4789 = vmatprep.mubr.bf16.mxu1 %v4098_v60  ;;  %3392 = vmatprep.mubr.bf16.mxu0 %v4234_v41  ;;  %v7494_v50 = vld [vmem:[#allocation8_spill] sm:$0xff] }
  0xfd   : > { %v4101_v6 = vcombine.low %v1660_v62, %v1680_v13  ;;  %v4233_v33 = vcombine.low %v6678_v25, %v6682_v9  ;;  %v1770_v21 = vor.u32 %v1769_v5, %v6711_v40  ;;  %v1773_v53 = vshll.u32 %v6718_v3, 16  ;;  %v5240_v13 = vld [vmem:[%s5537_s9 + $0xfc] sm:$0xff] }
  0xfe   : > { %v1794_v47 = vrot.slane %v7489_v45, 4  ;;  %v1863_v27 = vshrl.u32 %v6744_v7, 16  ;;  %v1708_v0 = vsel %vm5678_vm2, %v1703_v51, %v6663_v18  ;;  %v1728_v44 = vsel %vm5678_vm2, %v1723_v30, %v1727_v56  ;;  %v5241_v30 = vld [vmem:[%s5537_s9 + $0x114] sm:$0x11] }
  0xff   : > { %v4237_v25 = vcombine.high %v6722_v35, %v6726_v16  ;;  %v1751_v9 = vrot.slane %v1750_v63, 4  ;;  %v1821_v20 = vshll.u32 %v6729_v22, 16  ;;  %v2811_v46 = vrot.slane %v5239_v23, 5 }
 0x100   : > { %v1849_v43 = vshll.u32 %v6744_v7, 16  ;;  %v1798_v32 = vor.u32 %v1797_v39, %v1794_v47  ;;  %v1818_v18 = vor.u32 %v1817_v8, %v6735_v31  ;;  %v7490_v17 = vrot.slane %v5948_v54, 5  ;;  %v6779_v47 = vld [vmem:[%s5537_s9 + $0x23c] sm:$0x1] }
 0x101   : > { %v7492_v38 = vrot.slane %v7491_v61, 9  ;;  %v4104_v26 = vcombine.low %v1708_v0, %v1728_v44  ;;  %v1771_v41 = vrot.slane %v1770_v21, 4  ;;  %v1775_v62 = vrot.slane %v1773_v53, 5  ;;  %4790 = vmatmul.mubr.bf16.gmra.mrb[4].mxu1 %v4101_v6 }
 0x102   : > { %v7493_v59 = vmov %v7490_v17  ;;  %v2835_v5 = vrot.slane %v7494_v50, 5  ;;  %v4152_v51 = vrot.slane %v5240_v13, 9  ;;  %v2818_v56 = vrot.slane %v5241_v30, 5  ;;  %v5246_v13 = vld [vmem:[%s5537_s9 + $0x138] sm:$0x11] }
 0x103   : > { %v6767_v14 = vsel %vm6308_vm5, %v7492_v38, %v7490_v17  ;;  %v2834_v48 = vrot.slane %v7493_v59, 4  ;;  %v1842_v60 = vrot.slane %v1840_v58, 4  ;;  %v1845_v63 = vrot.slane %v1843_v29, 5  ;;  %3393 = vmatmul.mubr.bf16.gmra.mrb[100].mxu0 %v4233_v33  ;;  %4793 = vmatprep.mubr.bf16.mxu1 %v4104_v26  ;;  %v5244_v26 = vld [vmem:[%s5537_s9 + $0x120] sm:$0xff] }
 0x104   : > { %v2817_v45 = vrot.slane %v2811_v46, 4  ;;  %v1851_v54 = vrot.slane %v1849_v43, 5  ;;  %v1865_v39 = vrot.slane %v1863_v27, 4  ;;  %v1799_v21 = vrot.slane %v1798_v32, 4  ;;  %3400 = vmatprep.mubr.bf16.mxu0 %v4237_v25  ;;  %v5242_v43 = vld [vmem:[%s5537_s9 + $0x12c] sm:$0xff] }
 0x105   : > { %v6783_v8 = vsel %vm6308_vm5, %v2834_v48, %v2835_v5  ;;  %v1819_v53 = vrot.slane %v1818_v18, 4  ;;  %v1823_v0 = vrot.slane %v1821_v20, 5  ;;  %v1756_v58 = vsel %vm5678_vm2, %v1751_v9, %v6711_v40  ;;  %v5243_v32 = vld [vmem:[%s5537_s9 + $0x14] sm:$0xf] }
 0x106   : > { %v4244_v44 = vcombine.low %v6767_v14, %v6783_v8  ;;  %v1776_v29 = vsel %vm5678_vm2, %v1771_v41, %v1775_v62  ;;  %v1846_v27 = vor.u32 %v1845_v63, %v1842_v60  ;;  %v1869_v23 = vshll.u32 %v6779_v47, 16  ;;  %v5245_v62 = vld [vmem:[%s5537_s9 + $0x8] sm:$0xf]  ;;  %v5247_v60 = vld [vmem:[%s5537_s9 + $0x38] sm:$0xf] }
 0x107   : > { %v6795_v20 = vsel %vm6308_vm5, %v4152_v51, %v2811_v46  ;;  %v6799_v6 = vsel %vm6308_vm5, %v2817_v45, %v2818_v56  ;;  %v1866_v33 = vor.u32 %v1865_v39, %v1851_v54  ;;  %v1804_v40 = vsel %vm5678_vm2, %v1799_v21, %v6735_v31  ;;  %v7495_v56 = vld [vmem:[#allocation7_spill] sm:$0xff] }
 0x108   : > { %v1824_v9 = vsel %vm5678_vm2, %v1819_v53, %v1823_v0  ;;  %v2825_v25 = vrot.slane %v5242_v43, 5  ;;  %v2717_v46 = vrot.slane %v5243_v32, 5  ;;  %v4236_v18 = vcombine.low %v6722_v35, %v6726_v16  ;;  %v5248_v0 = vld [vmem:[%s5537_s9 + $0x150] sm:$0xff] }
 0x109   : > { %v4107_v17 = vcombine.low %v1756_v58, %v1776_v29  ;;  %v4240_v61 = vcombine.high %v6795_v20, %v6799_v6  ;;  %v1847_v38 = vrot.slane %v1846_v27, 4  ;;  %v1871_v59 = vrot.slane %v1869_v23, 5  ;;  %v5249_v23 = vld [vmem:[%s5537_s9 + $0x2c] sm:$0xf] }
 0x10a   : > { %v4110_v48 = vcombine.low %v1804_v40, %v1824_v9  ;;  %v1867_v31 = vrot.slane %v1866_v33, 4  ;;  %v4154_v41 = vrot.slane %v5244_v26, 9  ;;  %v4139_v50 = vrot.slane %v5245_v62, 9 }
 0x10b   : > { %v2831_v5 = vrot.slane %v2825_v25, 4  ;;  %v2832_v51 = vrot.slane %v5246_v13, 5  ;;  %v2722_v30 = vrot.slane %v2717_v46, 4  ;;  %v2723_v35 = vrot.slane %v7495_v56, 5  ;;  %4794 = vmatmul.mubr.bf16.gmra.mrb[8].mxu1 %v4107_v17  ;;  %3401 = vmatmul.mubr.bf16.gmra.mrb[104].mxu0 %v4236_v18  ;;  %v4313_v29 = vpop.f32.mrb[0].mxu0 }
 0x10c   : > { %v1852_v16 = vsel %vm5678_vm2, %v1847_v38, %v1851_v54  ;;  %v2731_v63 = vrot.slane %v5247_v60, 5  ;;  %4797 = vmatprep.mubr.bf16.mxu1 %v4110_v48  ;;  %3408 = vmatprep.mubr.bf16.mxu0 %v4240_v61  ;;  %v1872_v45 = vsel %vm5678_vm2, %v1867_v31, %v1871_v59  ;;  %v6823_v39 = vsel %vm6308_vm5, %v4154_v41, %v2825_v25  ;;  %v4314_v40 = vpop.f32.mrb[1].mxu0  ;;  %v7496_v25 = vld [vmem:[#allocation9_spill] sm:$0xff]  ;;  %v5252_v31 = vld [vmem:[%s5537_s9 + $0x50] sm:$0xf] }
 0x10d   : > { %v2718_v21 = vsel %vm6308_vm5, %v4139_v50, %v2717_v46  ;;  %v6829_v53 = vsel %vm6308_vm5, %v2831_v5, %v2832_v51  ;;  %v2724_v54 = vsel %vm6308_vm5, %v2722_v30, %v2723_v35  ;;  %v2839_v58 = vrot.slane %v5248_v0, 5  ;;  %v5250_v46 = vld [vmem:[%s5537_s9 + $0x144] sm:$0xff]  ;;  %v4316_v61 = vpop.f32.mrb[2].mxu0  ;;  %v5251_v59 = vld [vmem:[%s5537_s9 + $0x15c] sm:$0x11] }
 0x10e   : > { %v4239_v27 = vcombine.low %v6795_v20, %v6799_v6  ;;  %v4141_v33 = vrot.slane %v5249_v23, 9  ;;  %v4113_v9 = vcombine.low %v1852_v16, %v1872_v45  ;;  %v2736_v43 = vrot.slane %v2731_v63, 4  ;;  %v4317_v20 = vpop.f32.mrb[3].mxu0  ;;  %v5255_v23 = vld [vmem:[%s5537_s9 + $0x168] sm:$0xff] }
 0x10f   : > { %v2737_v32 = vrot.slane %v7496_v25, 5  ;;  %v4156_v18 = vrot.slane %v5250_v46, 9  ;;  %v6840_v17 = vadd.f32 %v4314_v40, %v4313_v29  ;;  %v4243_v34 = vcombine.high %v6823_v39, %v6829_v53 }
 0x110   : > { %v4220_v38 = vcombine.low %v2718_v21, %v2724_v54  ;;  %v2846_v48 = vrot.slane %v5251_v59, 5  ;;  %v2845_v6 = vrot.slane %v2839_v58, 4  ;;  %v4143_v26 = vrot.slane %v5252_v31, 9  ;;  %v5254_v54 = vld [vmem:[%s5537_s9 + $0x74] sm:$0xf] }
 0x111   : > { %v2750_v41 = vrot.slane %v2745_v24, 4  ;;  %v2751_v62 = vrot.slane %v6326_v19, 5  ;;  %v6847_v50 = vadd.f32 %v4317_v20, %v4316_v61  ;;  %v2732_v5 = vsel %vm6308_vm5, %v4141_v33, %v2731_v63  ;;  %v5253_v19 = vld [vmem:[%s5537_s9 + $0x174] sm:$0xff]  ;;  %v5258_v59 = vld [vmem:[%s5537_s9 + $0xc8] sm:$0xf] }
 0x112   : > { %v2738_v13 = vsel %vm6308_vm5, %v2736_v43, %v2737_v32  ;;  %v2759_v51 = vrot.slane %v6131_v57, 5  ;;  %v6856_v30 = vsel %vm6308_vm5, %v4156_v18, %v2839_v58  ;;  %v2853_v56 = vrot.slane %v5253_v19, 5  ;;  %v5257_v32 = vld [vmem:[%s5537_s9 + $0x98] sm:$0xf] }
 0x113   : > { %4798 = vmatmul.mubr.bf16.gmra.mrb[12].mxu1 %v4113_v9  ;;  %3409 = vmatmul.mubr.bf16.gmra.mrb[108].mxu0 %v4239_v27  ;;  %v6861_v35 = vsel %vm6308_vm5, %v2845_v6, %v2846_v48  ;;  %v2746_v16 = vsel %vm6308_vm5, %v4143_v26, %v2745_v24  ;;  %v2752_v57 = vsel %vm6308_vm5, %v2750_v41, %v2751_v62  ;;  %v2773_v60 = vrot.slane %v6151_v2, 5  ;;  %v4319_v63 = vpop.f32.mrb[4].mxu0  ;;  %v5256_v24 = vld [vmem:[%s5537_s9 + $0x180] sm:$0x11]  ;;  %v5259_v26 = vld [vmem:[%s5537_s9 + $0x198] sm:$0xff] }
 0x114   : > { %3416 = vmatprep.mubr.bf16.mxu0 %v4243_v34  ;;  %4817 = vmatprep.mubr.bf16.mxu1 %v4220_v38  ;;  %v4242_v45 = vcombine.low %v6823_v39, %v6829_v53  ;;  %v4223_v21 = vcombine.low %v2732_v5, %v2738_v13  ;;  %v4145_v0 = vrot.slane %v5254_v54, 9  ;;  %v4320_v58 = vpop.f32.mrb[5].mxu0  ;;  %v2764_v29 = vrot.slane %v2759_v51, 4  ;;  %v5260_v62 = vld [vmem:[%s5537_s9 + $0xec] sm:$0xf] }
 0x115   : > { %v2765_v27 = vrot.slane %v6381_v11, 5  ;;  %v4158_v33 = vrot.slane %v5255_v23, 9  ;;  %v2860_v40 = vrot.slane %v5256_v24, 5  ;;  %v6874_v9 = vadd.f32 %v4320_v58, %v4319_v63  ;;  %v4322_v2 = vpop.f32.mrb[6].mxu0 }
 0x116   : > { %v4246_v43 = vcombine.high %v6856_v30, %v6861_v35  ;;  %v4226_v39 = vcombine.low %v2746_v16, %v2752_v57  ;;  %v2859_v53 = vrot.slane %v2853_v56, 4  ;;  %v4323_v25 = vpop.f32.mrb[7].mxu0  ;;  %v4147_v46 = vrot.slane %v5257_v32, 9  ;;  %v5261_v16 = vld [vmem:[%s5537_s9 + $0xbc] sm:$0xf] }
 0x117   : > { %v2778_v18 = vrot.slane %v2773_v60, 4  ;;  %v2779_v11 = vrot.slane %v6427_v52, 5  ;;  %v6880_v61 = vadd.f32 %v4323_v25, %v4322_v2  ;;  %v2760_v34 = vsel %vm6308_vm5, %v4145_v0, %v2759_v51  ;;  %v5266_v32 = vld [vmem:[%s5537_s9 + $0x1bc] sm:$0xff] }
 0x118   : > { %v2766_v38 = vsel %vm6308_vm5, %v2764_v29, %v2765_v27  ;;  %v2787_v48 = vrot.slane %v5258_v59, 5  ;;  %v6889_v20 = vsel %vm6308_vm5, %v4158_v33, %v2853_v56  ;;  %v6893_v52 = vsel %vm6308_vm5, %v2859_v53, %v2860_v40  ;;  %v5264_v33 = vld [vmem:[%s5537_s9 + $0xe0] sm:$0xf]  ;;  %v5265_v53 = vld [vmem:[%s5537_s9 + $0x110] sm:$0xf] }
 0x119   : > { %v2774_v6 = vsel %vm6308_vm5, %v4147_v46, %v2773_v60  ;;  %v2780_v31 = vsel %vm6308_vm5, %v2778_v18, %v2779_v11  ;;  %v2867_v41 = vrot.slane %v5259_v26, 5  ;;  %v2801_v5 = vrot.slane %v5260_v62, 5 }
 0x11a   : > { %v4245_v51 = vcombine.low %v6856_v30, %v6861_v35  ;;  %v4229_v19 = vcombine.low %v2760_v34, %v2766_v38  ;;  %v4149_v57 = vrot.slane %v5261_v16, 9  ;;  %v2792_v63 = vrot.slane %v2787_v48, 4  ;;  %v5263_v30 = vld [vmem:[%s5537_s9 + $0x1a4] sm:$0x11] }
 0x11b   : > { %3417 = vmatmul.mubr.bf16.gmra.mrb[112].mxu0 %v4242_v45  ;;  %4818 = vmatmul.mubr.bf16.vlgmr.msra.gmra.mrb[80].mxu1 %v4223_v21  ;;  %v4325_v13 = vpop.f32.mrb[8].mxu0  ;;  %v2793_v60 = vrot.slane %v6474_v36, 5  ;;  %v5262_v45 = vld [vmem:[%s5537_s9 + $0x18c] sm:$0xff]  ;;  %v4249_v58 = vcombine.high %v6889_v20, %v6893_v52  ;;  %v4232_v29 = vcombine.low %v2774_v6, %v2780_v31  ;;  %v2874_v35 = vrot.slane %v5263_v30, 5  ;;  %v5267_v6 = vld [vmem:[%s5537_s9 + $0x104] sm:$0xf] }
 0x11c   : > { %3424 = vmatprep.mubr.bf16.mxu0 %v4246_v43  ;;  %4821 = vmatprep.mubr.bf16.mxu1 %v4226_v39  ;;  %v4326_v56 = vpop.f32.mrb[9].mxu0  ;;  %v4160_v21 = vrot.slane %v5262_v45, 9  ;;  %v2873_v23 = vrot.slane %v2867_v41, 4  ;;  %v4151_v24 = vrot.slane %v5264_v33, 9  ;;  %v2806_v40 = vrot.slane %v2801_v5, 4  ;;  %v5271_v30 = vld [vmem:[%s5537_s9 + $0x1e0] sm:$0xff] }
 0x11d   : > { %v6906_v54 = vadd.f32 %v4326_v56, %v4325_v13  ;;  %v4328_v0 = vpop.f32.mrb[10].mxu0  ;;  %v2807_v36 = vrot.slane %v6490_v37, 5  ;;  %v2788_v43 = vsel %vm6308_vm5, %v4149_v57, %v2787_v48  ;;  %v2794_v39 = vsel %vm6308_vm5, %v2792_v63, %v2793_v60  ;;  %v5268_v13 = vld [vmem:[%s5537_s9 + $0x1b0] sm:$0xff]  ;;  %v5269_v56 = vld [vmem:[%s5537_s9 + $0x1c8] sm:$0x11] }
 0x11e   : > { %v4329_v27 = vpop.f32.mrb[11].mxu0  ;;  %v2815_v25 = vrot.slane %v5265_v53, 5  ;;  %v2881_v46 = vrot.slane %v5266_v32, 5  ;;  %v6923_v37 = vsel %vm6308_vm5, %v4160_v21, %v2867_v41  ;;  %v6927_v18 = vsel %vm6308_vm5, %v2873_v23, %v2874_v35  ;;  %v5274_v32 = vld [vmem:[%s5537_s9 + $0x1d4] sm:$0xff] }
 0x11f   : > { %v6913_v2 = vadd.f32 %v4329_v27, %v4328_v0  ;;  %v2802_v11 = vsel %vm6308_vm5, %v4151_v24, %v2801_v5  ;;  %v2808_v34 = vsel %vm6308_vm5, %v2806_v40, %v2807_v36  ;;  %v4248_v59 = vcombine.low %v6889_v20, %v6893_v52  ;;  %v5272_v27 = vld [vmem:[%s5537_s9 + $0x17c] sm:$0xf]  ;;  %v5273_v24 = vld [vmem:[%s5537_s9 + $0x14c] sm:$0xf] }
 0x120   : > { %v4235_v48 = vcombine.low %v2788_v43, %v2794_v39  ;;  %v4153_v31 = vrot.slane %v5267_v6, 9  ;;  %v2821_v26 = vrot.slane %v6530_v4, 5  ;;  %v2820_v62 = vrot.slane %v2815_v25, 4  ;;  %v5276_v6 = vld [vmem:[%s5537_s9 + $0x170] sm:$0xf] }
 0x121   : > { %v2888_v5 = vrot.slane %v5269_v56, 5  ;;  %v4252_v20 = vcombine.high %v6923_v37, %v6927_v18  ;;  %v4238_v52 = vcombine.low %v2802_v11, %v2808_v34  ;;  %v2895_v35 = vrot.slane %v5271_v30, 5 }
 0x122   : > { %v2816_v4 = vsel %vm6308_vm5, %v4153_v31, %v2815_v25  ;;  %v2822_v45 = vsel %vm6308_vm5, %v2820_v62, %v2821_v26  ;;  %v2857_v23 = vrot.slane %v5272_v27, 5  ;;  %v4251_v33 = vcombine.low %v6923_v37, %v6927_v18 }
 0x123   : > { %3425 = vmatmul.mubr.bf16.gmra.mrb[116].mxu0 %v4245_v51  ;;  %4822 = vmatmul.mubr.bf16.gmra.mrb[84].mxu1 %v4229_v19  ;;  %v4331_v38 = vpop.f32.mrb[12].mxu0  ;;  %v4162_v51 = vrot.slane %v5268_v13, 9  ;;  %v2887_v19 = vrot.slane %v2881_v46, 4  ;;  %v4157_v40 = vrot.slane %v5273_v24, 9  ;;  %v4241_v39 = vcombine.low %v2816_v4, %v2822_v45 }
 0x124   : > { %3432 = vmatprep.mubr.bf16.mxu0 %v4249_v58  ;;  %4825 = vmatprep.mubr.bf16.mxu1 %v4232_v29  ;;  %v4332_v41 = vpop.f32.mrb[13].mxu0  ;;  %v5270_v58 = vld [vmem:[%s5537_s9 + $0x158] sm:$0xf]  ;;  %v2849_v25 = vrot.slane %v6593_v55, 5  ;;  %v4159_v31 = vrot.slane %v5276_v6, 9  ;;  %v2863_v37 = vrot.slane %v6624_v1, 5 }
 0x125   : > { %v6939_v16 = vadd.f32 %v4332_v41, %v4331_v38  ;;  %v4334_v57 = vpop.f32.mrb[14].mxu0  ;;  %v6951_v21 = vsel %vm6308_vm5, %v4162_v51, %v2881_v46  ;;  %v6955_v0 = vsel %vm6308_vm5, %v2887_v19, %v2888_v5  ;;  %v2843_v29 = vrot.slane %v5270_v58, 5 }
 0x126   : > { %v4335_v63 = vpop.f32.mrb[15].mxu0  ;;  %v4255_v53 = vcombine.high %v6951_v21, %v6955_v0  ;;  %v4164_v46 = vrot.slane %v5274_v32, 9  ;;  %v2901_v13 = vrot.slane %v2895_v35, 4  ;;  %v2862_v55 = vrot.slane %v2857_v23, 4  ;;  %v5281_v32 = vld [vmem:[%s5537_s9 + $0x1f8] sm:$0xff] }
 0x127   : > { %v6943_v60 = vadd.f32 %v4335_v63, %v4334_v57  ;;  %v2848_v38 = vrot.slane %v2843_v29, 4  ;;  %v2844_v1 = vsel %vm6308_vm5, %v4157_v40, %v2843_v29  ;;  %v2858_v45 = vsel %vm6308_vm5, %v4159_v31, %v2857_v23  ;;  %v5278_v29 = vld [vmem:[%s5537_s9 + $0x204] sm:$0xff]  ;;  %v5283_v31 = vld [vmem:[%s5537_s9 + $0x1b8] sm:$0xf] }
 0x128   : > { %v2864_v58 = vsel %vm6308_vm5, %v2862_v55, %v2863_v37  ;;  %v2909_v30 = vrot.slane %v5278_v29, 5  ;;  %v4254_v14 = vcombine.low %v6951_v21, %v6955_v0  ;;  %v4163_v37 = vrot.slane %v5283_v31, 9 }
 0x129   : > { %v2850_v57 = vsel %vm6308_vm5, %v2848_v38, %v2849_v25 }
 0x12a   : > { %v4247_v8 = vcombine.low %v2844_v1, %v2850_v57  ;;  %v2915_v38 = vrot.slane %v2909_v30, 4  ;;  %v2899_v1 = vrot.slane %v6685_v28, 5 }
 0x12b   : > { %3433 = vmatmul.mubr.bf16.gmra.mrb[120].mxu0 %v4248_v59  ;;  %4826 = vmatmul.mubr.bf16.gmra.mrb[88].mxu1 %v4235_v48  ;;  %v4337_v36 = vpop.f32.mrb[16].mxu0  ;;  %v4449_v43 = vpop.f32.mrb[16].mxu1  ;;  %v5275_v59 = vld [vmem:[%s5537_s9 + $0x1ec] sm:$0x11] }
 0x12c   : > { %3440 = vmatprep.mubr.bf16.mxu0 %v4252_v20  ;;  %4829 = vmatprep.mubr.bf16.mxu1 %v4238_v52  ;;  %v4338_v11 = vpop.f32.mrb[17].mxu0  ;;  %v4450_v34 = vpop.f32.mrb[17].mxu1  ;;  %v2902_v48 = vrot.slane %v5275_v59, 5  ;;  %v6984_v20 = vsel %vm6308_vm5, %v4164_v46, %v2895_v35  ;;  %v5277_v52 = vld [vmem:[%s5537_s9 + $0x1a0] sm:$0xf]  ;;  %v4166_v46 = vrot.slane %v5281_v32, 9 }
 0x12d   : > { %v6970_v18 = vadd.f32 %v4338_v11, %v4337_v36  ;;  %v4340_v26 = vpop.f32.mrb[18].mxu0  ;;  %v6972_v41 = vadd.f32 %v4450_v34, %v4449_v43  ;;  %v4452_v62 = vpop.f32.mrb[18].mxu1  ;;  %v2871_v63 = vrot.slane %v5277_v52, 5  ;;  %v5279_v35 = vld [vmem:[%s5537_s9 + $0x1c4] sm:$0xf]  ;;  %v2877_v36 = vrot.slane %v6641_v49, 5 }
 0x12e   : > { %v4341_v51 = vpop.f32.mrb[19].mxu0  ;;  %v4453_v19 = vpop.f32.mrb[19].mxu1  ;;  %v6992_v4 = vsel %vm6308_vm5, %v2901_v13, %v2902_v48  ;;  %v2885_v27 = vrot.slane %v5279_v35, 5  ;;  %v5282_v59 = vld [vmem:[%s5537_s9 + $0x210] sm:$0x11]  ;;  %v5284_v52 = vld [vmem:[%s5537_s9 + $0x228] sm:$0xff] }
 0x12f   : > { %v6974_v56 = vadd.f32 %v4341_v51, %v4340_v26  ;;  %v6976_v5 = vadd.f32 %v4453_v19, %v4452_v62  ;;  %v2876_v25 = vrot.slane %v2871_v63, 4  ;;  %v2916_v48 = vrot.slane %v5282_v59, 5 }
 0x130   : > { %v2890_v26 = vrot.slane %v2885_v27, 4  ;;  %v2891_v62 = vrot.slane %v6673_v15, 5  ;;  %v7025_v15 = vsel %vm6308_vm5, %v4166_v46, %v2909_v30  ;;  %v4257_v30 = vcombine.low %v6984_v20, %v6992_v4 }
 0x131   : > { %v2878_v19 = vsel %vm6308_vm5, %v2876_v25, %v2877_v36  ;;  %v7029_v57 = vsel %vm6308_vm5, %v2915_v38, %v2916_v48  ;;  %v2904_v36 = vrot.slane %v2899_v1, 4  ;;  %v2919_v48 = vrot.slane %v6729_v22, 5 }
 0x132   : > { %v2892_v28 = vsel %vm6308_vm5, %v2890_v26, %v2891_v62  ;;  %v2927_v62 = vrot.slane %v6744_v7, 5 }
 0x133   : > { %3441 = vmatmul.mubr.bf16.gmra.mrb[124].mxu0 %v4251_v33  ;;  %4830 = vmatmul.mubr.bf16.gmra.mrb[92].mxu1 %v4241_v39  ;;  %v4343_v33 = vpop.f32.mrb[20].mxu0  ;;  %v4455_v24 = vpop.f32.mrb[20].mxu1  ;;  %v4258_v39 = vcombine.high %v6984_v20, %v6992_v4 }
 0x134   : > { %3448 = vmatprep.mubr.bf16.mxu0 %v4255_v53  ;;  %4833 = vmatprep.mubr.bf16.mxu1 %v4244_v44  ;;  %v5280_v44 = vld [vmem:[%s5537_s9 + $0x194] sm:$0xf]  ;;  %v4344_v23 = vpop.f32.mrb[21].mxu0  ;;  %v4456_v43 = vpop.f32.mrb[21].mxu1  ;;  %v4250_v53 = vcombine.low %v2858_v45, %v2864_v58  ;;  %v2923_v45 = vrot.slane %v5284_v52, 5  ;;  %v2913_v58 = vrot.slane %v6578_v42, 5 }
 0x135   : > { %v4161_v40 = vrot.slane %v5280_v44, 9  ;;  %v7007_v11 = vadd.f32 %v4344_v23, %v4343_v33  ;;  %v4346_v34 = vpop.f32.mrb[22].mxu0  ;;  %v7009_v21 = vadd.f32 %v4456_v43, %v4455_v24  ;;  %v4458_v0 = vpop.f32.mrb[22].mxu1  ;;  %v5285_v24 = vld [vmem:[%s5537_s9 + $0x1dc] sm:$0xf] }
 0x136   : > { %v4347_v49 = vpop.f32.mrb[23].mxu0  ;;  %v4459_v6 = vpop.f32.mrb[23].mxu1  ;;  %v5286_v23 = vld [vmem:[%s5537_s9 + $0x21c] sm:$0xff]  ;;  %v5287_v42 = vld [vmem:[%s5537_s9 + $0x234] sm:$0x11]  ;;  %v2929_v46 = vrot.slane %v2923_v45, 4 }
 0x137   : > { %v7014_v13 = vadd.f32 %v4347_v49, %v4346_v34  ;;  %v7016_v55 = vadd.f32 %v4459_v6, %v4458_v0  ;;  %v2872_v51 = vsel %vm6308_vm5, %v4161_v40, %v2871_v63  ;;  %v2886_v63 = vsel %vm6308_vm5, %v4163_v37, %v2885_v27  ;;  %v5288_v0 = vld [vmem:[%s5537_s9 + $0x200] sm:$0xf]  ;;  %s188_s9 = sand.u32 1, %s5351_s13  }
 0x138   : > { %v4253_v33 = vcombine.low %v2872_v51, %v2878_v19  ;;  %v4261_v27 = vcombine.high %v7025_v15, %v7029_v57  ;;  %v4168_v43 = vrot.slane %v5286_v23, 9  ;;  %v4256_v32 = vcombine.low %v2886_v63, %v2892_v28  ;;  %s3944_s28 = sshll.u32 %s188_s9, 8  ;;  %s7379_s15 = scalar_lea.sflag [#allocation4], %s188_s9 }
 0x139   : > { %v4167_v38 = vrot.slane %v5288_v0, 9  ;;  %v2918_v59 = vrot.slane %v2913_v58, 4  ;;  %v4260_v63 = vcombine.low %v7025_v15, %v7029_v57  ;;  %s7270_s4 = scalar_lea.vmem [#allocation3], %s3944_s28 }
 0x13a   : > { %v2924_v26 = vsel %vm6308_vm5, %v4168_v43, %v2923_v45  ;;  %s3857_s6 = sshll.u32 %s7270_s4, 4  ;;  %s7372_s6 = int_to_ptr.vmem [resolvable:$true] %s3857_s6 }
 0x13b   : > { %3449 = vmatmul.mubr.bf16.gmra.mrb[128].mxu0 %v4254_v14  ;;  %4834 = vmatmul.mubr.bf16.gmra.mrb[0].mxu1 %v4247_v8  ;;  %v4349_v29 = vpop.f32.mrb[24].mxu0  ;;  %v4461_v35 = vpop.f32.mrb[24].mxu1  ;;  %v4165_v14 = vrot.slane %v5285_v24, 9  ;;  %v2905_v8 = vrot.slane %v6718_v3, 5  ;;  %v2914_v51 = vsel %vm6308_vm5, %v4167_v38, %v2913_v58  ;;  %v2920_v19 = vsel %vm6308_vm5, %v2918_v59, %v2919_v48  ;;  %s5289_s11 = scalar_lea.vmem %s7372_s6, 4096  ;;  %p5296_p1 = scmp.lt.s32.totalorder %s7372_s6, %s5294_s19 }
 0x13c   : > { %3456 = vmatprep.mubr.bf16.mxu0 %v4258_v39  ;;  %4837 = vmatprep.mubr.bf16.mxu1 %v4250_v53  ;;  %v4350_v44 = vpop.f32.mrb[25].mxu0  ;;  %v4462_v40 = vpop.f32.mrb[25].mxu1  ;;  %v2930_v39 = vrot.slane %v5287_v42, 5  ;;  %p5290_p12 = scmp.ne.s32.totalorder %s7372_s6, %s5289_s11  ;;  %p5297_p2 = scmp.lt.s32.totalorder %s5295_s21, %s5289_s11 }
 0x13d   : > { %v7045_v53 = vadd.f32 %v4350_v44, %v4349_v29  ;;  %v4352_v25 = vpop.f32.mrb[26].mxu0  ;;  %v7047_v20 = vadd.f32 %v4462_v40, %v4461_v35  ;;  %v4464_v4 = vpop.f32.mrb[26].mxu1  ;;  %v2900_v31 = vsel %vm6308_vm5, %v4165_v14, %v2899_v1  ;;  %v2906_v37 = vsel %vm6308_vm5, %v2904_v36, %v2905_v8 }
 0x13e   : > { %v4353_v3 = vpop.f32.mrb[27].mxu0  ;;  %v4465_v34 = vpop.f32.mrb[27].mxu1  ;;  %v2931_v22 = vsel %vm6308_vm5, %v2929_v46, %v2930_v39  ;;  %v4259_v35 = vcombine.low %v2900_v31, %v2906_v37  ;;  %v4262_v8 = vcombine.low %v2914_v51, %v2920_v19  ;;  %v2932_v44 = vrot.slane %v2927_v62, 4  ;;  %p5291_p13 = pnand %p5290_p12, %p5432_p4  ;;  %p5298_p3 = por %p5297_p2, %p5296_p1 }
 0x13f   : > { %v7051_v49 = vadd.f32 %v4353_v3, %v4352_v25  ;;  %v7053_v6 = vadd.f32 %v4465_v34, %v4464_v4  ;;  %v4264_v45 = vcombine.high %v2924_v26, %v2931_v22  ;;  %v4263_v39 = vcombine.low %v2924_v26, %v2931_v22 }
 0x140   : > { %p5292_p0 = pneg %p5291_p13 }
 0x142   : > { %p5299_p5 = pnand %p5298_p3, %p5292_p0 }
 0x143   : > { %3457 = vmatmul.mubr.bf16.gmra.mrb[132].mxu0 %v4257_v30  ;;  %4838 = vmatmul.mubr.bf16.gmra.mrb[4].mxu1 %v4253_v33  ;;  %v4355_v1 = vpop.f32.mrb[28].mxu0  ;;  %v4467_v52 = vpop.f32.mrb[28].mxu1  ;;  %v4169_v30 = vrot.slane %v6582_v10, 9  ;;  %v2933_v33 = vrot.slane %v6779_v47, 5 }
 0x144   : > { %3464 = vmatprep.mubr.bf16.mxu0 %v4261_v27  ;;  %4841 = vmatprep.mubr.bf16.mxu1 %v4256_v32  ;;  %v4356_v28 = vpop.f32.mrb[29].mxu0  ;;  %v4468_v29 = vpop.f32.mrb[29].mxu1 }
 0x145   : > { %v7072_v7 = vadd.f32 %v4356_v28, %v4355_v1  ;;  %v4358_v24 = vpop.f32.mrb[30].mxu0  ;;  %v7074_v58 = vadd.f32 %v4468_v29, %v4467_v52  ;;  %v4470_v14 = vpop.f32.mrb[30].mxu1  ;;  %v2928_v10 = vsel %vm6308_vm5, %v4169_v30, %v2927_v62  ;;  %v2934_v47 = vsel %vm6308_vm5, %v2932_v44, %v2933_v33 }
 0x146   : > { %v4359_v40 = vpop.f32.mrb[31].mxu0  ;;  %v4471_v27 = vpop.f32.mrb[31].mxu1  ;;  %v4265_v25 = vcombine.low %v2928_v10, %v2934_v47 }
 0x147   : > { %v7076_v36 = vadd.f32 %v4359_v40, %v4358_v24  ;;  %v7078_v15 = vadd.f32 %v4471_v27, %v4470_v14 }
 0x14b   : > { %3465 = vmatmul.mubr.bf16.gmra.mrb[136].mxu0 %v4260_v63  ;;  %4842 = vmatmul.mubr.bf16.gmra.mrb[8].mxu1 %v4259_v35  ;;  %v4361_v57 = vpop.f32.mrb[32].mxu0  ;;  %v4473_v23 = vpop.f32.mrb[32].mxu1 }
 0x14c   : > { %3472 = vmatprep.mubr.bf16.mxu0 %v4264_v45  ;;  %4845 = vmatprep.mubr.bf16.mxu1 %v4262_v8  ;;  %v4362_v43 = vpop.f32.mrb[33].mxu0  ;;  %v4474_v42 = vpop.f32.mrb[33].mxu1 }
 0x14d   : > { %v4363_v4 = vadd.f32 %v4362_v43, %v4361_v57  ;;  %v4364_v32 = vpop.f32.mrb[34].mxu0  ;;  %v7084_v46 = vadd.f32 %v4474_v42, %v4473_v23  ;;  %v4476_v3 = vpop.f32.mrb[34].mxu1 }
 0x14e   : > { %v4365_v34 = vpop.f32.mrb[35].mxu0  ;;  %v4477_v0 = vpop.f32.mrb[35].mxu1 }
 0x14f   : > { %v4366_v38 = vadd.f32 %v4365_v34, %v4364_v32  ;;  %v7086_v59 = vadd.f32 %v4477_v0, %v4476_v3 }
 0x153   : > { %3473 = vmatmul.mubr.bf16.gmra.mrb[140].mxu0 %v4263_v39  ;;  %4846 = vmatmul.mubr.bf16.gmra.mrb[12].mxu1 %v4265_v25  ;;  %v4367_v12 = vpop.f32.mrb[36].mxu0  ;;  %v4479_v48 = vpop.f32.mrb[36].mxu1 }
 0x154   : > { %v4368_v31 = vpop.f32.mrb[37].mxu0  ;;  %v4480_v37 = vpop.f32.mrb[37].mxu1 }
 0x155   : > { %v4369_v62 = vadd.f32 %v4368_v31, %v4367_v12  ;;  %v4370_v51 = vpop.f32.mrb[38].mxu0  ;;  %v7088_v26 = vadd.f32 %v4480_v37, %v4479_v48  ;;  %v4482_v22 = vpop.f32.mrb[38].mxu1 }
 0x156   : > { %v4371_v19 = vpop.f32.mrb[39].mxu0  ;;  %v4483_v1 = vpop.f32.mrb[39].mxu1 }
 0x157   : > { %v4372_v52 = vadd.f32 %v4371_v19, %v4370_v51  ;;  %v7090_v63 = vadd.f32 %v4483_v1, %v4482_v22 }
 0x15b   : > { %v4373_v28 = vpop.f32.mrb[40].mxu0  ;;  %v4485_v29 = vpop.f32.mrb[40].mxu1 }
 0x15c   : > { %v4374_v35 = vpop.f32.mrb[41].mxu0  ;;  %v4486_v45 = vpop.f32.mrb[41].mxu1 }
 0x15d   : > { %v4375_v30 = vadd.f32 %v4374_v35, %v4373_v28  ;;  %v4376_v33 = vpop.f32.mrb[42].mxu0  ;;  %v7092_v24 = vadd.f32 %v4486_v45, %v4485_v29  ;;  %v4488_v14 = vpop.f32.mrb[42].mxu1 }
 0x15e   : > { %v4377_v8 = vpop.f32.mrb[43].mxu0  ;;  %v4489_v44 = vpop.f32.mrb[43].mxu1 }
 0x15f   : > { %v4378_v40 = vadd.f32 %v4377_v8, %v4376_v33  ;;  %v7094_v27 = vadd.f32 %v4489_v44, %v4488_v14 }
 0x163   : > { %v4379_v10 = vpop.f32.mrb[44].mxu0  ;;  %v4491_v47 = vpop.f32.mrb[44].mxu1 }
 0x164   : > { %v4380_v57 = vpop.f32.mrb[45].mxu0  ;;  %v4492_v23 = vpop.f32.mrb[45].mxu1 }
 0x165   : > { %v4381_v43 = vadd.f32 %v4380_v57, %v4379_v10  ;;  %v4382_v42 = vpop.f32.mrb[46].mxu0  ;;  %v7096_v39 = vadd.f32 %v4492_v23, %v4491_v47  ;;  %v4494_v25 = vpop.f32.mrb[46].mxu1 }
 0x166   : > { %v4383_v32 = vpop.f32.mrb[47].mxu0  ;;  %v4495_v3 = vpop.f32.mrb[47].mxu1 }
 0x167   : > { %v4384_v34 = vadd.f32 %v4383_v32, %v4382_v42  ;;  %v7098_v0 = vadd.f32 %v4495_v3, %v4494_v25 }
 0x16b   : > { %v4385_v12 = vpop.f32.mrb[48].mxu0  ;;  %v4497_v48 = vpop.f32.mrb[48].mxu1 }
 0x16c   : > { %v4386_v31 = vpop.f32.mrb[49].mxu0  ;;  %v4498_v37 = vpop.f32.mrb[49].mxu1 }
 0x16d   : > { %v7100_v51 = vadd.f32 %v4386_v31, %v4385_v12  ;;  %v4499_v22 = vadd.f32 %v4498_v37, %v4497_v48  ;;  %v4388_v19 = vpop.f32.mrb[50].mxu0  ;;  %v4500_v1 = vpop.f32.mrb[50].mxu1 }
 0x16e   : > { %v4389_v28 = vpop.f32.mrb[51].mxu0  ;;  %v4501_v29 = vpop.f32.mrb[51].mxu1 }
 0x16f   : > { %v7102_v35 = vadd.f32 %v4499_v22, %v4363_v4  ;;  %v7104_v45 = vadd.f32 %v4389_v28, %v4388_v19  ;;  %v4502_v33 = vadd.f32 %v4501_v29, %v4500_v1 }
 0x171   : > { %v7106_v14 = vadd.f32 %v4502_v33, %v4366_v38 }
 0x173   : > { %v4391_v8 = vpop.f32.mrb[52].mxu0  ;;  %v4503_v44 = vpop.f32.mrb[52].mxu1 }
 0x174   : > { %v4392_v10 = vpop.f32.mrb[53].mxu0  ;;  %v4504_v47 = vpop.f32.mrb[53].mxu1 }
 0x175   : > { %v7108_v57 = vadd.f32 %v4392_v10, %v4391_v8  ;;  %v4505_v23 = vadd.f32 %v4504_v47, %v4503_v44  ;;  %v4394_v42 = vpop.f32.mrb[54].mxu0  ;;  %v4506_v25 = vpop.f32.mrb[54].mxu1 }
 0x176   : > { %v4395_v32 = vpop.f32.mrb[55].mxu0  ;;  %v4507_v3 = vpop.f32.mrb[55].mxu1 }
 0x177   : > { %v7110_v12 = vadd.f32 %v4505_v23, %v4369_v62  ;;  %v7112_v4 = vadd.f32 %v4395_v32, %v4394_v42  ;;  %v4508_v48 = vadd.f32 %v4507_v3, %v4506_v25 }
 0x179   : > { %v7114_v31 = vadd.f32 %v4508_v48, %v4372_v52 }
 0x17b   : > { %7497 = vst [vmem:[#allocation6_spill] sm:$0xff] %v7114_v31  ;;  %v4397_v38 = vpop.f32.mrb[56].mxu0  ;;  %v4509_v37 = vpop.f32.mrb[56].mxu1 }
 0x17c   : > { %v4398_v22 = vpop.f32.mrb[57].mxu0  ;;  %v4510_v19 = vpop.f32.mrb[57].mxu1 }
 0x17d   : > { %v7116_v1 = vadd.f32 %v4398_v22, %v4397_v38  ;;  %v4511_v28 = vadd.f32 %v4510_v19, %v4509_v37  ;;  %v4400_v29 = vpop.f32.mrb[58].mxu0  ;;  %v4512_v33 = vpop.f32.mrb[58].mxu1 }
 0x17e   : > { %v4401_v8 = vpop.f32.mrb[59].mxu0  ;;  %v4513_v44 = vpop.f32.mrb[59].mxu1 }
 0x17f   : > { %v7118_v10 = vadd.f32 %v4511_v28, %v4375_v30  ;;  %v7120_v62 = vadd.f32 %v4401_v8, %v4400_v29  ;;  %v4514_v47 = vadd.f32 %v4513_v44, %v4512_v33 }
 0x181   : > { %v7122_v23 = vadd.f32 %v4514_v47, %v4378_v40 }
 0x183   : > { %7498 = vst [vmem:[#allocation8_spill] sm:$0xff] %v7122_v23  ;;  %v4403_v52 = vpop.f32.mrb[60].mxu0  ;;  %v4515_v42 = vpop.f32.mrb[60].mxu1 }
 0x184   : > { %v4404_v25 = vpop.f32.mrb[61].mxu0  ;;  %v4516_v32 = vpop.f32.mrb[61].mxu1 }
 0x185   : > { %v7124_v3 = vadd.f32 %v4404_v25, %v4403_v52  ;;  %v4517_v48 = vadd.f32 %v4516_v32, %v4515_v42  ;;  %v4406_v38 = vpop.f32.mrb[62].mxu0  ;;  %v4518_v37 = vpop.f32.mrb[62].mxu1 }
 0x186   : > { %v4407_v22 = vpop.f32.mrb[63].mxu0  ;;  %v4519_v19 = vpop.f32.mrb[63].mxu1 }
 0x187   : > { %v7126_v31 = vadd.f32 %v4517_v48, %v4381_v43  ;;  %v7128_v30 = vadd.f32 %v4407_v22, %v4406_v38  ;;  %v4520_v28 = vadd.f32 %v4519_v19, %v4518_v37 }
 0x189   : > { %v7130_v29 = vadd.f32 %v4520_v28, %v4384_v34 }
 0x18b   : > { %v4723_v40 = vpop.f32.mrb[64].mxu0  ;;  %v4521_v33 = vpop.f32.mrb[64].mxu1 }
 0x18c   : > { %v952_v8 = vadd.f32 %v4723_v40, %v6874_v9  ;;  %v943_v44 = vpop.f32.mrb[65].mxu0  ;;  %v4522_v47 = vpop.f32.mrb[65].mxu1 }
 0x18d   : > { %v944_v52 = vadd.f32 %v6840_v17, %v943_v44  ;;  %v4523_v42 = vadd.f32 %v4522_v47, %v4521_v33  ;;  %v4724_v25 = vpop.f32.mrb[66].mxu0  ;;  %v4524_v32 = vpop.f32.mrb[66].mxu1 }
 0x18e   : > { %v7135_v23 = vadd.f32 %v7009_v21, %v952_v8  ;;  %v955_v43 = vadd.f32 %v4724_v25, %v6880_v61  ;;  %v946_v48 = vpop.f32.mrb[67].mxu0  ;;  %v4525_v38 = vpop.f32.mrb[67].mxu1 }
 0x18f   : > { %v7139_v34 = vadd.f32 %v6972_v41, %v944_v52  ;;  %v7142_v37 = vadd.f32 %v4523_v42, %v7100_v51  ;;  %v947_v9 = vadd.f32 %v6847_v50, %v946_v48  ;;  %v4526_v22 = vadd.f32 %v4525_v38, %v4524_v32 }
 0x190   : > { %v7146_v17 = vadd.f32 %v7016_v55, %v955_v43 }
 0x191   : > { %v7149_v19 = vadd.f32 %v6976_v5, %v947_v9  ;;  %v7152_v21 = vadd.f32 %v4526_v22, %v7104_v45 }
 0x193   : > { %v4727_v61 = vpop.f32.mrb[68].mxu0  ;;  %v4527_v28 = vpop.f32.mrb[68].mxu1 }
 0x194   : > { %v968_v41 = vadd.f32 %v4727_v61, %v6939_v16  ;;  %v959_v40 = vpop.f32.mrb[69].mxu0  ;;  %v4528_v33 = vpop.f32.mrb[69].mxu1 }
 0x195   : > { %v960_v51 = vadd.f32 %v6906_v54, %v959_v40  ;;  %v4529_v8 = vadd.f32 %v4528_v33, %v4527_v28  ;;  %v4728_v50 = vpop.f32.mrb[70].mxu0  ;;  %v4530_v44 = vpop.f32.mrb[70].mxu1 }
 0x196   : > { %v7157_v55 = vadd.f32 %v7074_v58, %v968_v41  ;;  %v971_v5 = vadd.f32 %v4728_v50, %v6943_v60  ;;  %v962_v47 = vpop.f32.mrb[71].mxu0  ;;  %v4531_v52 = vpop.f32.mrb[71].mxu1 }
 0x197   : > { %v7161_v45 = vadd.f32 %v7047_v20, %v960_v51  ;;  %v7164_v42 = vadd.f32 %v4529_v8, %v7108_v57  ;;  %v963_v16 = vadd.f32 %v6913_v2, %v962_v47  ;;  %v4532_v25 = vadd.f32 %v4531_v52, %v4530_v44 }
 0x198   : > { %v7168_v54 = vadd.f32 %v7078_v15, %v971_v5 }
 0x199   : > { %v7171_v32 = vadd.f32 %v7053_v6, %v963_v16  ;;  %v7174_v58 = vadd.f32 %v4532_v25, %v7112_v4 }
 0x19b   : > { %v4731_v60 = vpop.f32.mrb[72].mxu0  ;;  %v4533_v43 = vpop.f32.mrb[72].mxu1 }
 0x19c   : > { %v984_v20 = vadd.f32 %v4731_v60, %v7007_v11  ;;  %v975_v48 = vpop.f32.mrb[73].mxu0  ;;  %v4534_v38 = vpop.f32.mrb[73].mxu1 }
 0x19d   : > { %v976_v57 = vadd.f32 %v6970_v18, %v975_v48  ;;  %v4535_v9 = vadd.f32 %v4534_v38, %v4533_v43  ;;  %v4732_v2 = vpop.f32.mrb[74].mxu0  ;;  %v4536_v22 = vpop.f32.mrb[74].mxu1 }
 0x19e   : > { %v7179_v15 = vadd.f32 %v7088_v26, %v984_v20  ;;  %v987_v6 = vadd.f32 %v4732_v2, %v7014_v13  ;;  %v978_v61 = vpop.f32.mrb[75].mxu0  ;;  %v4537_v28 = vpop.f32.mrb[75].mxu1 }
 0x19f   : > { %v7183_v4 = vadd.f32 %v7084_v46, %v976_v57  ;;  %v7186_v41 = vadd.f32 %v4535_v9, %v7116_v1  ;;  %v979_v11 = vadd.f32 %v6974_v56, %v978_v61  ;;  %v4538_v40 = vadd.f32 %v4537_v28, %v4536_v22 }
 0x1a0   : > { %v7190_v18 = vadd.f32 %v7090_v63, %v987_v6 }
 0x1a1   : > { %v4910_v33 = vadd.f32 %v7086_v59, %v979_v11  ;;  %v7194_v26 = vadd.f32 %v4538_v40, %v7120_v62 }
 0x1a4   : > { %v4735_v13 = vpop.f32.mrb[76].mxu0  ;;  %v4539_v51 = vpop.f32.mrb[76].mxu1 }
 0x1a5   : > { %v1000_v8 = vadd.f32 %v4735_v13, %v7072_v7  ;;  %v991_v46 = vpop.f32.mrb[77].mxu0  ;;  %v4540_v50 = vpop.f32.mrb[77].mxu1 }
 0x1a6   : > { %v992_v1 = vadd.f32 %v7045_v53, %v991_v46  ;;  %v4541_v44 = vadd.f32 %v4540_v50, %v4539_v51  ;;  %v4736_v5 = vpop.f32.mrb[78].mxu0  ;;  %v4542_v56 = vpop.f32.mrb[78].mxu1 }
 0x1a7   : > { %v7199_v47 = vadd.f32 %v7096_v39, %v1000_v8  ;;  %v1003_v63 = vadd.f32 %v4736_v5, %v7076_v36  ;;  %v994_v59 = vpop.f32.mrb[79].mxu0  ;;  %v4543_v52 = vpop.f32.mrb[79].mxu1 }
 0x1a8   : > { %v4918_v62 = vadd.f32 %v7092_v24, %v992_v1  ;;  %v7204_v16 = vadd.f32 %v4541_v44, %v7124_v3  ;;  %v995_v7 = vadd.f32 %v7051_v49, %v994_v59  ;;  %v4544_v25 = vadd.f32 %v4543_v52, %v4542_v56 }
 0x1a9   : > { %v7208_v53 = vadd.f32 %v7098_v0, %v1003_v63 }
 0x1aa   : > { %v4926_v60 = vadd.f32 %v7094_v27, %v995_v7  ;;  %v7212_v39 = vadd.f32 %v4544_v25, %v7128_v30 }
 0x1ae   : > { %v4585_v43 = vpop.f32.mrb[80].mxu0 }
 0x1af   : > { %v4586_v36 = vpop.f32.mrb[81].mxu0 }
 0x1b0   : > { %v4587_v20 = vadd.f32 %v4586_v36, %v4585_v43  ;;  %v4588_v48 = vpop.f32.mrb[82].mxu0 }
 0x1b1   : > { %v4589_v38 = vpop.f32.mrb[83].mxu0 }
 0x1b2   : > { %v4590_v24 = vadd.f32 %v4589_v38, %v4588_v48  ;;  %v7215_v3 = vadd.f32 %v7139_v34, %v4587_v20 }
 0x1b4   : > { %v7218_v49 = vadd.f32 %v7149_v19, %v4590_v24 }
 0x1b6   : > { %v4591_v57 = vpop.f32.mrb[84].mxu0 }
 0x1b7   : > { %v4592_v0 = vpop.f32.mrb[85].mxu0 }
 0x1b8   : > { %v4593_v9 = vadd.f32 %v4592_v0, %v4591_v57  ;;  %v4594_v2 = vpop.f32.mrb[86].mxu0 }
 0x1b9   : > { %v4595_v27 = vpop.f32.mrb[87].mxu0 }
 0x1ba   : > { %v4596_v22 = vadd.f32 %v4595_v27, %v4594_v2  ;;  %v4867_v30 = vadd.f32 %v7135_v23, %v4593_v9 }
 0x1bc   : > { %v4875_v6 = vadd.f32 %v7146_v17, %v4596_v22 }
 0x1be   : > { %v4597_v61 = vpop.f32.mrb[88].mxu0 }
 0x1bf   : > { %v4598_v28 = vpop.f32.mrb[89].mxu0 }
 0x1c0   : > { %v4599_v11 = vadd.f32 %v4598_v28, %v4597_v61  ;;  %v4600_v40 = vpop.f32.mrb[90].mxu0 }
 0x1c1   : > { %v4601_v13 = vpop.f32.mrb[91].mxu0 }
 0x1c2   : > { %v4602_v34 = vadd.f32 %v4601_v13, %v4600_v40  ;;  %v7223_v51 = vadd.f32 %v7161_v45, %v4599_v11 }
 0x1c4   : > { %v7226_v19 = vadd.f32 %v7171_v32, %v4602_v34 }
 0x1c6   : > { %v4603_v8 = vpop.f32.mrb[92].mxu0 }
 0x1c7   : > { %v4604_v46 = vpop.f32.mrb[93].mxu0 }
 0x1c8   : > { %v4605_v50 = vadd.f32 %v4604_v46, %v4603_v8  ;;  %v4606_v1 = vpop.f32.mrb[94].mxu0 }
 0x1c9   : > { %v4607_v44 = vpop.f32.mrb[95].mxu0 }
 0x1ca   : > { %v4608_v23 = vadd.f32 %v4607_v44, %v4606_v1  ;;  %v7229_v17 = vadd.f32 %v7157_v55, %v4605_v50 }
 0x1cc   : > { %v7232_v5 = vadd.f32 %v7168_v54, %v4608_v23 }
 0x1ce   : > { %v4609_v56 = vpop.f32.mrb[96].mxu0 }
 0x1cf   : > { %v4610_v63 = vpop.f32.mrb[97].mxu0 }
 0x1d0   : > { %v4611_v59 = vadd.f32 %v4610_v63, %v4609_v56  ;;  %v4612_v45 = vpop.f32.mrb[98].mxu0 }
 0x1d1   : > { %v4613_v52 = vpop.f32.mrb[99].mxu0 }
 0x1d2   : > { %v4614_v7 = vadd.f32 %v4613_v52, %v4612_v45  ;;  %v7235_v32 = vadd.f32 %v7183_v4, %v4611_v59 }
 0x1d4   : > { %v7237_v25 = vadd.f32 %v4910_v33, %v4614_v7 }
 0x1d6   : > { %v4615_v43 = vpop.f32.mrb[100].mxu0 }
 0x1d7   : > { %v4616_v36 = vpop.f32.mrb[101].mxu0 }
 0x1d8   : > { %v4617_v20 = vadd.f32 %v4616_v36, %v4615_v43  ;;  %v4618_v48 = vpop.f32.mrb[102].mxu0 }
 0x1d9   : > { %v4619_v55 = vpop.f32.mrb[103].mxu0 }
 0x1da   : > { %v4620_v38 = vadd.f32 %v4619_v55, %v4618_v48  ;;  %v7240_v54 = vadd.f32 %v7179_v15, %v4617_v20 }
 0x1dc   : > { %v7243_v24 = vadd.f32 %v7190_v18, %v4620_v38 }
 0x1de   : > { %v4621_v57 = vpop.f32.mrb[104].mxu0 }
 0x1df   : > { %v4622_v0 = vpop.f32.mrb[105].mxu0 }
 0x1e0   : > { %v4623_v4 = vadd.f32 %v4622_v0, %v4621_v57  ;;  %v4624_v9 = vpop.f32.mrb[106].mxu0 }
 0x1e1   : > { %v4625_v33 = vpop.f32.mrb[107].mxu0 }
 0x1e2   : > { %v4626_v2 = vadd.f32 %v4625_v33, %v4624_v9  ;;  %v7245_v27 = vadd.f32 %v4918_v62, %v4623_v4 }
 0x1e4   : > { %v7247_v22 = vadd.f32 %v4926_v60, %v4626_v2  ;;  %v7261_v60 = vld [vmem:[%s7427_s2] ss:$0 sm:$0xff] }
 0x1e6   : > { %v4627_v61 = vpop.f32.mrb[108].mxu0 }
 0x1e7   : > { %v4628_v28 = vpop.f32.mrb[109].mxu0 }
 0x1e8   : > { %v4629_v11 = vadd.f32 %v4628_v28, %v4627_v61  ;;  %v4630_v15 = vpop.f32.mrb[110].mxu0 }
 0x1e9   : > { %v4631_v40 = vpop.f32.mrb[111].mxu0 }
 0x1ea   : > { %v4632_v13 = vadd.f32 %v4631_v40, %v4630_v15  ;;  %v7251_v18 = vadd.f32 %v7199_v47, %v4629_v11  ;;  %v7499_v40 = vld [vmem:[#allocation6_spill] sm:$0xff] }
 0x1ec   : > { %v7254_v34 = vadd.f32 %v7208_v53, %v4632_v13 }
 0x1ee   : > { %v4633_v8 = vpop.f32.mrb[112].mxu0  ;;  %v4819_v62 = vpop.f32.mrb[80].mxu1 }
 0x1ef   : > { %v4868_v46 = vadd.f32 %v4867_v30, %v4819_v62  ;;  %v4634_v50 = vpop.f32.mrb[113].mxu0  ;;  %v3515_v1 = vpop.f32.mrb[81].mxu1 }
 0x1f0   : > { %v4635_v44 = vadd.f32 %v4634_v50, %v4633_v8  ;;  %v4872_v23 = vadd.f32 %v7215_v3, %v3515_v1  ;;  %v4636_v47 = vpop.f32.mrb[114].mxu0  ;;  %v4820_v56 = vpop.f32.mrb[82].mxu1 }
 0x1f1   : > { %v3779_v53 = vadd.f32 %v4868_v46, %v7261_v60  ;;  %v4876_v63 = vadd.f32 %v4875_v6, %v4820_v56  ;;  %v4637_v59 = vpop.f32.mrb[115].mxu0  ;;  %v3518_v45 = vpop.f32.mrb[83].mxu1 }
 0x1f2   : > { %v3777_v52 = vadd.f32 %v4872_v23, %v7261_v60  ;;  %v4638_v7 = vadd.f32 %v4637_v59, %v4636_v47  ;;  %v4880_v43 = vadd.f32 %v7218_v49, %v3518_v45  ;;  %v7268_v36 = vadd.f32 %v7102_v35, %v4635_v44 }
 0x1f3   : > { %3811 = vst [vmem:[%s7270_s4 + $0x10] sm:$0xff] %v3779_v53  ;;  %v3780_v3 = vadd.f32 %v4876_v63, %v7261_v60 }
 0x1f4   : > { %3809 = vst [vmem:[%s7270_s4] sm:$0xff] %v3777_v52  ;;  %v3778_v30 = vadd.f32 %v4880_v43, %v7261_v60  ;;  %v7277_v6 = vadd.f32 %v7106_v14, %v4638_v7  ;;  %v7500_v7 = vld [vmem:[#allocation8_spill] sm:$0xff] }
 0x1f5   : > { %3812 = vst [vmem:[%s7270_s4 + $0x18] sm:$0xff] %v3780_v3 }
 0x1f6   : > { %3810 = vst [vmem:[%s7270_s4 + $0x8] sm:$0xff] %v3778_v30  ;;  %v4639_v49 = vpop.f32.mrb[116].mxu0  ;;  %v4823_v35 = vpop.f32.mrb[84].mxu1 }
 0x1f7   : > { %v4884_v20 = vadd.f32 %v7229_v17, %v4823_v35  ;;  %v4640_v48 = vpop.f32.mrb[117].mxu0  ;;  %v3531_v55 = vpop.f32.mrb[85].mxu1 }
 0x1f8   : > { %v4641_v38 = vadd.f32 %v4640_v48, %v4639_v49  ;;  %v4888_v57 = vadd.f32 %v7223_v51, %v3531_v55  ;;  %v4642_v0 = vpop.f32.mrb[118].mxu0  ;;  %v4824_v4 = vpop.f32.mrb[86].mxu1 }
 0x1f9   : > { %v3783_v14 = vadd.f32 %v4884_v20, %v7261_v60  ;;  %v4892_v9 = vadd.f32 %v7232_v5, %v4824_v4  ;;  %v4643_v33 = vpop.f32.mrb[119].mxu0  ;;  %v3534_v2 = vpop.f32.mrb[87].mxu1 }
 0x1fa   : > { %v3781_v61 = vadd.f32 %v4888_v57, %v7261_v60  ;;  %v4644_v28 = vadd.f32 %v4643_v33, %v4642_v0  ;;  %v4896_v17 = vadd.f32 %v7226_v19, %v3534_v2  ;;  %v4930_v11 = vadd.f32 %v7110_v12, %v4641_v38 }
 0x1fb   : > { %3815 = vst [vmem:[%s7270_s4 + $0x30] sm:$0xff] %v3783_v14  ;;  %v3784_v51 = vadd.f32 %v4892_v9, %v7261_v60 }
 0x1fc   : > { %3813 = vst [vmem:[%s7270_s4 + $0x20] sm:$0xff] %v3781_v61  ;;  %v3782_v15 = vadd.f32 %v4896_v17, %v7261_v60  ;;  %v4936_v13 = vadd.f32 %v7499_v40, %v4644_v28 }
 0x1fd   : > { %3816 = vst [vmem:[%s7270_s4 + $0x38] sm:$0xff] %v3784_v51 }
 0x1fe   : > { %3814 = vst [vmem:[%s7270_s4 + $0x28] sm:$0xff] %v3782_v15  ;;  %v4645_v5 = vpop.f32.mrb[120].mxu0  ;;  %v4827_v8 = vpop.f32.mrb[88].mxu1 }
 0x1ff   : > { %v4900_v62 = vadd.f32 %v7240_v54, %v4827_v8  ;;  %v4646_v46 = vpop.f32.mrb[121].mxu0  ;;  %v3547_v19 = vpop.f32.mrb[89].mxu1 }
 0x200   : > { %v4647_v50 = vadd.f32 %v4646_v46, %v4645_v5  ;;  %v4904_v12 = vadd.f32 %v7235_v32, %v3547_v19  ;;  %v4648_v1 = vpop.f32.mrb[122].mxu0  ;;  %v4828_v44 = vpop.f32.mrb[90].mxu1 }
 0x201   : > { %v3787_v23 = vadd.f32 %v4900_v62, %v7261_v60  ;;  %v4908_v47 = vadd.f32 %v7243_v24, %v4828_v44  ;;  %v4649_v56 = vpop.f32.mrb[123].mxu0  ;;  %v3550_v53 = vpop.f32.mrb[91].mxu1 }
 0x202   : > { %v3785_v63 = vadd.f32 %v4904_v12, %v7261_v60  ;;  %v4650_v59 = vadd.f32 %v4649_v56, %v4648_v1  ;;  %v4912_v54 = vadd.f32 %v7237_v25, %v3550_v53  ;;  %v4945_v45 = vadd.f32 %v7118_v10, %v4647_v50 }
 0x203   : > { %3819 = vst [vmem:[%s7270_s4 + $0x50] sm:$0xff] %v3787_v23  ;;  %v3788_v32 = vadd.f32 %v4908_v47, %v7261_v60 }
 0x204   : > { %3817 = vst [vmem:[%s7270_s4 + $0x40] sm:$0xff] %v3785_v63  ;;  %v3786_v52 = vadd.f32 %v4912_v54, %v7261_v60  ;;  %v7307_v43 = vadd.f32 %v7500_v7, %v4650_v59 }
 0x205   : > { %3820 = vst [vmem:[%s7270_s4 + $0x58] sm:$0xff] %v3788_v32 }
 0x206   : > { %3818 = vst [vmem:[%s7270_s4 + $0x48] sm:$0xff] %v3786_v52  ;;  %v4651_v24 = vpop.f32.mrb[124].mxu0  ;;  %v4831_v3 = vpop.f32.mrb[92].mxu1 }
 0x207   : > { %v4916_v30 = vadd.f32 %v7251_v18, %v4831_v3  ;;  %v4652_v49 = vpop.f32.mrb[125].mxu0  ;;  %v3563_v25 = vpop.f32.mrb[93].mxu1 }
 0x208   : > { %v4653_v10 = vadd.f32 %v4652_v49, %v4651_v24  ;;  %v4920_v35 = vadd.f32 %v7245_v27, %v3563_v25  ;;  %v4654_v20 = vpop.f32.mrb[126].mxu0  ;;  %v4832_v48 = vpop.f32.mrb[94].mxu1 }
 0x209   : > { %v3791_v55 = vadd.f32 %v4916_v30, %v7261_v60  ;;  %v4924_v38 = vadd.f32 %v7254_v34, %v4832_v48  ;;  %v4655_v57 = vpop.f32.mrb[127].mxu0  ;;  %v3566_v0 = vpop.f32.mrb[95].mxu1 }
 0x20a   : > { %v3789_v4 = vadd.f32 %v4920_v35, %v7261_v60  ;;  %v4656_v14 = vadd.f32 %v4655_v57, %v4654_v20  ;;  %v4928_v18 = vadd.f32 %v7247_v22, %v3566_v0  ;;  %v4942_v9 = vadd.f32 %v7126_v31, %v4653_v10 }
 0x20b   : > { %3823 = vst [vmem:[%s7270_s4 + $0x70] sm:$0xff] %v3791_v55  ;;  %v3792_v27 = vadd.f32 %v4924_v38, %v7261_v60 }
 0x20c   : > { %3821 = vst [vmem:[%s7270_s4 + $0x60] sm:$0xff] %v3789_v4  ;;  %v3790_v33 = vadd.f32 %v4928_v18, %v7261_v60  ;;  %v4948_v2 = vadd.f32 %v7130_v29, %v4656_v14 }
 0x20d   : > { %3824 = vst [vmem:[%s7270_s4 + $0x78] sm:$0xff] %v3792_v27 }
 0x20e   : > { %3822 = vst [vmem:[%s7270_s4 + $0x68] sm:$0xff] %v3790_v33  ;;  %v4657_v34 = vpop.f32.mrb[128].mxu0  ;;  %v4835_v61 = vpop.f32.mrb[0].mxu1 }
 0x20f   : > { %v4931_v28 = vadd.f32 %v4930_v11, %v4835_v61  ;;  %v4658_v17 = vpop.f32.mrb[129].mxu0  ;;  %v3579_v51 = vpop.f32.mrb[1].mxu1 }
 0x210   : > { %v4659_v22 = vadd.f32 %v4658_v17, %v4657_v34  ;;  %v4934_v31 = vadd.f32 %v7268_v36, %v3579_v51  ;;  %v4660_v15 = vpop.f32.mrb[130].mxu0  ;;  %v4836_v40 = vpop.f32.mrb[2].mxu1 }
 0x211   : > { %v3795_v5 = vadd.f32 %v4931_v28, %v7261_v60  ;;  %v4937_v8 = vadd.f32 %v4936_v13, %v4836_v40  ;;  %v4661_v29 = vpop.f32.mrb[131].mxu0  ;;  %v3582_v62 = vpop.f32.mrb[3].mxu1 }
 0x212   : > { %v3793_v46 = vadd.f32 %v4934_v31, %v7261_v60  ;;  %v4662_v19 = vadd.f32 %v4661_v29, %v4660_v15  ;;  %v4940_v11 = vadd.f32 %v7277_v6, %v3582_v62  ;;  %v4957_v50 = vadd.f32 %v7142_v37, %v4659_v22 }
 0x213   : > { %3827 = vst [vmem:[%s7270_s4 + $0x90] sm:$0xff] %v3795_v5  ;;  %v3796_v12 = vadd.f32 %v4937_v8, %v7261_v60 }
 0x214   : > { %3825 = vst [vmem:[%s7270_s4 + $0x80] sm:$0xff] %v3793_v46  ;;  %v3794_v36 = vadd.f32 %v4940_v11, %v7261_v60  ;;  %v4963_v1 = vadd.f32 %v7152_v21, %v4662_v19 }
 0x215   : > { %3828 = vst [vmem:[%s7270_s4 + $0x98] sm:$0xff] %v3796_v12 }
 0x216   : > { %3826 = vst [vmem:[%s7270_s4 + $0x88] sm:$0xff] %v3794_v36  ;;  %v4663_v13 = vpop.f32.mrb[132].mxu0  ;;  %v4839_v44 = vpop.f32.mrb[4].mxu1 }
 0x217   : > { %v4943_v23 = vadd.f32 %v4942_v9, %v4839_v44  ;;  %v4664_v47 = vpop.f32.mrb[133].mxu0  ;;  %v3595_v56 = vpop.f32.mrb[5].mxu1 }
 0x218   : > { %v4665_v6 = vadd.f32 %v4664_v47, %v4663_v13  ;;  %v4946_v53 = vadd.f32 %v4945_v45, %v3595_v56  ;;  %v4666_v37 = vpop.f32.mrb[134].mxu0  ;;  %v4840_v63 = vpop.f32.mrb[6].mxu1 }
 0x219   : > { %v3799_v59 = vadd.f32 %v4943_v23, %v7261_v60  ;;  %v4949_v54 = vadd.f32 %v4948_v2, %v4840_v63  ;;  %v4667_v32 = vpop.f32.mrb[135].mxu0  ;;  %v3598_v21 = vpop.f32.mrb[7].mxu1 }
 0x21a   : > { %v3797_v52 = vadd.f32 %v4946_v53, %v7261_v60  ;;  %v4668_v7 = vadd.f32 %v4667_v32, %v4666_v37  ;;  %v4952_v24 = vadd.f32 %v7307_v43, %v3598_v21  ;;  %v4954_v3 = vadd.f32 %v7164_v42, %v4665_v6 }
 0x21b   : > { %3831 = vst [vmem:[%s7270_s4 + $0xb0] sm:$0xff] %v3799_v59  ;;  %v3800_v30 = vadd.f32 %v4949_v54, %v7261_v60 }
 0x21c   : > { %3829 = vst [vmem:[%s7270_s4 + $0xa0] sm:$0xff] %v3797_v52  ;;  %v3798_v45 = vadd.f32 %v4952_v24, %v7261_v60  ;;  %v4960_v49 = vadd.f32 %v7174_v58, %v4668_v7 }
 0x21d   : > { %3832 = vst [vmem:[%s7270_s4 + $0xb8] sm:$0xff] %v3800_v30 }
 0x21e   : > { %3830 = vst [vmem:[%s7270_s4 + $0xa8] sm:$0xff] %v3798_v45  ;;  %v4669_v25 = vpop.f32.mrb[136].mxu0  ;;  %v4843_v10 = vpop.f32.mrb[8].mxu1 }
 0x21f   : > { %v4955_v35 = vadd.f32 %v4954_v3, %v4843_v10  ;;  %v4670_v20 = vpop.f32.mrb[137].mxu0  ;;  %v3611_v48 = vpop.f32.mrb[9].mxu1 }
 0x220   : > { %v4671_v43 = vadd.f32 %v4670_v20, %v4669_v25  ;;  %v4958_v55 = vadd.f32 %v4957_v50, %v3611_v48  ;;  %v4672_v42 = vpop.f32.mrb[138].mxu0  ;;  %v4844_v38 = vpop.f32.mrb[10].mxu1 }
 0x221   : > { %v3803_v57 = vadd.f32 %v4955_v35, %v7261_v60  ;;  %v4961_v0 = vadd.f32 %v4960_v49, %v4844_v38  ;;  %v4673_v4 = vpop.f32.mrb[139].mxu0  ;;  %v3614_v58 = vpop.f32.mrb[11].mxu1 }
 0x222   : > { %v3801_v14 = vadd.f32 %v4958_v55, %v7261_v60  ;;  %v4674_v18 = vadd.f32 %v4673_v4, %v4672_v42  ;;  %v4964_v9 = vadd.f32 %v4963_v1, %v3614_v58  ;;  %v4969_v27 = vadd.f32 %v7186_v41, %v4671_v43 }
 0x223   : > { %3835 = vst [vmem:[%s7270_s4 + $0xd0] sm:$0xff] %v3803_v57  ;;  %v3804_v33 = vadd.f32 %v4961_v0, %v7261_v60 }
 0x224   : > { %3833 = vst [vmem:[%s7270_s4 + $0xc0] sm:$0xff] %v3801_v14  ;;  %v3802_v2 = vadd.f32 %v4964_v9, %v7261_v60  ;;  %v4975_v34 = vadd.f32 %v7194_v26, %v4674_v18 }
 0x225   : > { %3836 = vst [vmem:[%s7270_s4 + $0xd8] sm:$0xff] %v3804_v33 }
 0x226   : > { %3834 = vst [vmem:[%s7270_s4 + $0xc8] sm:$0xff] %v3802_v2  ;;  %v4675_v61 = vpop.f32.mrb[140].mxu0  ;;  %v4847_v28 = vpop.f32.mrb[12].mxu1 }
 0x227   : > { %v4676_v17 = vpop.f32.mrb[141].mxu0  ;;  %v3627_v51 = vpop.f32.mrb[13].mxu1 }
 0x228   : > { %v4677_v22 = vadd.f32 %v4676_v17, %v4675_v61  ;;  %v4970_v31 = vadd.f32 %v4969_v27, %v3627_v51  ;;  %v4678_v41 = vpop.f32.mrb[142].mxu0  ;;  %v4848_v15 = vpop.f32.mrb[14].mxu1 }
 0x229   : > { %v4679_v40 = vpop.f32.mrb[143].mxu0  ;;  %v3630_v5 = vpop.f32.mrb[15].mxu1 }
 0x22a   : > { %v4966_v8 = vadd.f32 %v7204_v16, %v4677_v22  ;;  %v3805_v26 = vadd.f32 %v4970_v31, %v7261_v60  ;;  %v4680_v29 = vadd.f32 %v4679_v40, %v4678_v41  ;;  %v4976_v62 = vadd.f32 %v4975_v34, %v3630_v5 }
 0x22c   : > { %v4967_v46 = vadd.f32 %v4966_v8, %v4847_v28  ;;  %3837 = vst [vmem:[%s7270_s4 + $0xe0] sm:$0xff] %v3805_v26  ;;  %v4972_v19 = vadd.f32 %v7212_v39, %v4680_v29  ;;  %v3806_v11 = vadd.f32 %v4976_v62, %v7261_v60 }
 0x22e   : > { %v3807_v50 = vadd.f32 %v4967_v46, %v7261_v60  ;;  %v4973_v12 = vadd.f32 %v4972_v19, %v4848_v15  ;;  %3838 = vst [vmem:[%s7270_s4 + $0xe8] sm:$0xff] %v3806_v11 }
 0x230   : > { %3839 = vst [vmem:[%s7270_s4 + $0xf0] sm:$0xff] %v3807_v50  ;;  %v3808_v16 = vadd.f32 %v4973_v12, %v7261_v60 }
 0x232   : > { %3840 = vst [vmem:[%s7270_s4 + $0xf8] sm:$0xff] %v3808_v16 }
 0x233   : > { %5302 = shalt.err (!%p5299_p5)
}
 0x234   : > { %s5303_s23 = scalar_lea.hbm %s7370_s10, 4096  ;;  %s5307_s9 = scalar_lea.hbm %s7428_s3, 8192 }
 0x235   : > { %p5304_p6 = scmp.ne.s32.totalorder %s7370_s10, %s5303_s23  ;;  %p5308_p10 = scmp.lt.u32.totalorder %s7370_s10, %s7428_s3 }
 0x236   : > { %p5309_p11 = scmp.lt.u32.totalorder %s5307_s9, %s5303_s23  ;;  %p5311_p13 = scmp.lt.u32.totalorder %s5303_s23, %s7370_s10 }
 0x237   : > { %p5305_p7 = pnand %p5304_p6, %p5432_p4 }
 0x238   : > { %p5310_p12 = por %p5309_p11, %p5308_p10 }
 0x239   : > { %p5306_p9 = pneg %p5305_p7 }
 0x23a   : > { %p5312_p0 = por %p5311_p13, %p5310_p12 }
 0x23c   : > { %p5313_p1 = pnand %p5312_p0, %p5306_p9 }
 0x23e   : > { %5316 = shalt.err (!%p5313_p1)
}
 0x23f   : > { %s5370_s30 = smov 128   ;;  %s5371_s4 = smov 8  }
 0x240   : > { %5026 = dma.vmem_to_hbm [thread:$0]  (%p5432_p4), %s7372_s6, 4096, %s7370_s10, %s7379_s15, %s5370_s30, %s5370_s30, %s5371_s4  }
 0x241 PF: > { %p5032_p2 = scmp.ge.s32.totalorder %s5367_s17, 2  ;;  %s3872_s5 = sand.u32 1, %s5347_s12  }
 0x242   : > { %s3873_s7 = scalar_lea.sflag [#allocation4], %s3872_s5 }
 0x243   : > { %p5029_p3 = pnand %p5032_p2, %p5439_p8 }
 0x245   : > { %5342 = dma.done.wait (!%p5029_p3), %s3873_s7, 4096  }
 0x246   : > { %5344 = vsyncadd (!%p5029_p3), %s3873_s7, 4294963200  ;;  %s16_s17 = sadd.s32 1, %s5367_s17   ;;  %s7501_s12 = smov %s5351_s13 }
 0x247   : > { %p13_p5 = scmp.ge.s32.totalorder %s16_s17, 4   ;;  %s7502_s13 = smov %s5355_s14 }
 0x248   : > { %s7503_s14 = smov %s5445_s25  ;;  %s7504_s15 = smov %s5363_s16 }
 0x249   : > { %s7505_s16 = smov %s7507_s20  ;;  %15 = sbr.rel (!%p13_p5) target bundleno = 4 (0x4), region = 69 }
 0x250   :  { %3878 = vsyncpa [#allocation4], 1 }
 0x251   :  { %3880 = vsyncpa [#allocation4 + $0x1], 1 }

</bundles_post_ra>
